<compile_context>
chip_gen: v7x
topology: tpu7x:2x2x1
jax: 0.10.0
libtpu: 0.0.40
codegen_flags: <defaults>
</compile_context>

<pallas_src>
import functools

import jax
import jax.numpy as jnp
from jax.experimental import pallas as pl
from jax.experimental.pallas import tpu as pltpu

LANES = 128                      # output-channel / gate padding target
VMEM_LIMIT = 32 * 1024 * 1024    # fits every generation's scoped-VMEM budget


# ----------------------------- small helpers --------------------------------

def _round_up(x, m):
    return ((x + m - 1) // m) * m


def _cdiv(a, b):
    return (a + b - 1) // b


def _tile_m(m, max_tm=512):
    """M tile: multiple of 8, <= ~max_tm, and >=2 grid blocks when possible so
    the 'parallel' grid axis can actually be sharded across TensorCores."""
    n_blocks = max(_cdiv(m, max_tm), 2) if m > 8 else 1
    tm = _round_up(_cdiv(m, n_blocks), 8)
    grid = _cdiv(m, tm)
    return tm, grid, tm * grid


# ----------------------------- Pallas kernels -------------------------------

def _conv_mm_kernel(a_ref, w_ref, s_ref, b_ref, o_ref):
    # o = relu((A @ W) * scale + bias); A/W are bf16, accumulate + epilogue f32.
    acc = jnp.dot(a_ref[...], w_ref[...], preferred_element_type=jnp.float32)
    o_ref[...] = jnp.maximum(acc * s_ref[...] + b_ref[...], 0.0)


def _conv_mm_pool_kernel(a_ref, w_ref, s_ref, b_ref, o_ref):
    # Fused conv-matmul + BN + ReLU + 2x2 max-pool.  a_ref is (4, TM, K): the
    # four 2x2-window offsets of the same TM pooled output rows.
    w = w_ref[...]
    s = s_ref[...]
    b = b_ref[...]

    def f(j):
        acc = jnp.dot(a_ref[j], w, preferred_element_type=jnp.float32)
        return jnp.maximum(acc * s + b, 0.0)

    o_ref[...] = jnp.maximum(jnp.maximum(f(0), f(1)), jnp.maximum(f(2), f(3)))


def _cfc_kernel(x_ref, wx_ref, wh_ref, b_ref, o_ref, *, T, HP):
    # Dense CfC cell, whole recurrence in one kernel.  The input projection is
    # hoisted out of the time loop as a single (N*T, D) @ (D, 4*HP) matmul; the
    # unrolled T-step loop only does the small recurrent matmul.  Each gate is
    # padded to HP=128 lanes so every gate slice is lane-aligned.
    NT = x_ref.shape[0]
    N = NT // T
    wh = wh_ref[...]
    zx = jnp.dot(x_ref[...], wx_ref[...], preferred_element_type=jnp.float32)
    zx = (zx + b_ref[...]).reshape(N, T, 4 * HP)       # rows ordered (n, t)
    h = jnp.zeros((N, HP), jnp.float32)
    for t in range(T):                                 # T small & static
        z = zx[:, t] + jnp.dot(h.astype(jnp.bfloat16), wh,
                               preferred_element_type=jnp.float32)
        ff1 = jnp.tanh(z[:, 0:HP])
        ff2 = jnp.tanh(z[:, HP:2 * HP])
        t_interp = jax.nn.sigmoid(z[:, 2 * HP:3 * HP] + z[:, 3 * HP:4 * HP])
        h = ff1 + t_interp * (ff2 - ff1)               # ff1*(1-ti) + ti*ff2
    o_ref[...] = h                                     # lane-dense (N, 128)


# ------------------------------ conv glue ------------------------------------

def _im2col(x_nhwc, k, stride, pad):
    # TODO(synk): im2col inflates HBM traffic by k^2; a kernel-position
    # decomposition (K-grid of shifted matmuls) would avoid that at large batch.
    N, H, W, C = x_nhwc.shape
    xp = jnp.pad(x_nhwc, ((0, 0), (pad, pad), (pad, pad), (0, 0)))
    ho = (H + 2 * pad - k) // stride + 1
    wo = (W + 2 * pad - k) // stride + 1
    cols = []
    for ki in range(k):
        for kj in range(k):
            cols.append(xp[:, ki:ki + stride * ho:stride,
                           kj:kj + stride * wo:stride, :])
    a = jnp.stack(cols, axis=3)                        # (N, ho, wo, k*k, C)
    return a.reshape(N, ho, wo, k * k * C), ho, wo


def _fold_conv(w_oihw, b, bn, cin_store):
    # Fold conv bias + (eval-mode) BatchNorm into per-channel scale/bias and
    # zero-pad input channels (to the stored channel count) and output channels
    # (to 128 lanes) so matmul operands and stores are lane-aligned/dense.
    cout, cin, kh, kw = w_oihw.shape
    w = jnp.transpose(w_oihw, (2, 3, 1, 0))            # (kh, kw, cin, cout)
    w = jnp.pad(w, ((0, 0), (0, 0), (0, cin_store - cin), (0, LANES - cout)))
    w_mat = w.reshape(kh * kw * cin_store, LANES).astype(jnp.bfloat16)
    if bn is None:
        scale = jnp.ones((cout,), jnp.float32)
        bias = b
    else:
        gamma, beta, mean, var, eps = bn
        scale = gamma * jax.lax.rsqrt(var + eps)
        bias = (b - mean) * scale + beta
    scale = jnp.pad(scale, (0, LANES - cout)).reshape(1, LANES)
    bias = jnp.pad(bias, (0, LANES - cout)).reshape(1, LANES)
    return w_mat, scale, bias


def _conv_matmul(a2d, w_mat, scale, bias, max_tm=512):
    m, k = a2d.shape
    k_pad = _round_up(k, LANES)                        # only conv1 (K=9) pads
    if k_pad != k:
        a2d = jnp.pad(a2d, ((0, 0), (0, k_pad - k)))
        w_mat = jnp.pad(w_mat, ((0, k_pad - k), (0, 0)))
    tm, grid, m_pad = _tile_m(m, max_tm)
    a2d = jnp.pad(a2d, ((0, m_pad - m), (0, 0)))
    out = pl.pallas_call(
        _conv_mm_kernel,
        out_shape=jax.ShapeDtypeStruct((m_pad, LANES), jnp.float32),
        grid_spec=pltpu.PrefetchScalarGridSpec(
            num_scalar_prefetch=0,
            grid=(grid,),
            in_specs=[
                pl.BlockSpec((tm, k_pad), lambda i: (i, 0)),
                pl.BlockSpec((k_pad, LANES), lambda i: (0, 0)),
                pl.BlockSpec((1, LANES), lambda i: (0, 0)),
                pl.BlockSpec((1, LANES), lambda i: (0, 0)),
            ],
            out_specs=pl.BlockSpec((tm, LANES), lambda i: (i, 0)),
        ),
        compiler_params=pltpu.CompilerParams(
            dimension_semantics=("parallel",),
            vmem_limit_bytes=VMEM_LIMIT),
    )(a2d, w_mat, scale, bias)
    return out[:m]


def conv_bn_relu(x_nhwc, w_oihw, b, k, stride, pad, bn=None):
    N = x_nhwc.shape[0]
    cin_store = x_nhwc.shape[-1]
    w_mat, scale, bias = _fold_conv(w_oihw, b, bn, cin_store)
    a, ho, wo = _im2col(x_nhwc.astype(jnp.bfloat16), k, stride, pad)
    out = _conv_matmul(a.reshape(N * ho * wo, -1), w_mat, scale, bias)
    return out.reshape(N, ho, wo, LANES)


def conv_bn_relu_pool2(x_nhwc, w_oihw, b, k, stride, pad, bn=None):
    # conv + BN + ReLU with a fused 2x2 max-pool epilogue (conv4 path).
    N = x_nhwc.shape[0]
    cin_store = x_nhwc.shape[-1]
    w_mat, scale, bias = _fold_conv(w_oihw, b, bn, cin_store)
    a, ho, wo = _im2col(x_nhwc.astype(jnp.bfloat16), k, stride, pad)
    kdim = a.shape[-1]                                 # multiple of 128 here
    h2, w2 = ho // 2, wo // 2
    a = a[:, :2 * h2, :2 * w2, :]
    a = a.reshape(N, h2, 2, w2, 2, kdim)
    a = jnp.transpose(a, (2, 4, 0, 1, 3, 5)).reshape(4, N * h2 * w2, kdim)
    m4 = N * h2 * w2
    tm, grid, m_pad = _tile_m(m4, 128)
    a = jnp.pad(a, ((0, 0), (0, m_pad - m4), (0, 0)))
    out = pl.pallas_call(
        _conv_mm_pool_kernel,
        out_shape=jax.ShapeDtypeStruct((m_pad, LANES), jnp.float32),
        grid_spec=pltpu.PrefetchScalarGridSpec(
            num_scalar_prefetch=0,
            grid=(grid,),
            in_specs=[
                pl.BlockSpec((4, tm, kdim), lambda i: (0, i, 0)),
                pl.BlockSpec((kdim, LANES), lambda i: (0, 0)),
                pl.BlockSpec((1, LANES), lambda i: (0, 0)),
                pl.BlockSpec((1, LANES), lambda i: (0, 0)),
            ],
            out_specs=pl.BlockSpec((tm, LANES), lambda i: (i, 0)),
        ),
        compiler_params=pltpu.CompilerParams(
            dimension_semantics=("parallel",),
            vmem_limit_bytes=VMEM_LIMIT),
    )(a, w_mat, scale, bias)
    return out[:m4].reshape(N, h2, w2, LANES)


# ------------------------------ CfC glue -------------------------------------

def cfc_forward(x_seq, wx, wh, b, hidden_size, num_classes):
    # x_seq: (B, T, D)  ->  (B, num_classes) output of the last timestep.
    B, T, D = x_seq.shape
    H = hidden_size
    HP = LANES

    def pad_gates(m, lead_pad=None):
        r = m.shape[0]
        m = m.reshape(r, 4, H)
        m = jnp.pad(m, ((0, 0), (0, 0), (0, HP - H)))   # 128-lane aligned gates
        m = m.reshape(r, 4 * HP)
        if lead_pad is not None:
            m = jnp.pad(m, ((0, lead_pad - r), (0, 0)))
        return m

    wx_p = pad_gates(wx).astype(jnp.bfloat16)               # (D, 4*HP)
    wh_p = pad_gates(wh, lead_pad=HP).astype(jnp.bfloat16)  # (HP, 4*HP)
    b_p = pad_gates(b)                                      # (1, 4*HP) f32
    x2 = x_seq.reshape(B * T, D).astype(jnp.bfloat16)       # rows ordered (b,t)

    kernel = functools.partial(_cfc_kernel, T=T, HP=HP)
    h_last = pl.pallas_call(
        kernel,
        out_shape=jax.ShapeDtypeStruct((B, HP), jnp.float32),
        compiler_params=pltpu.CompilerParams(vmem_limit_bytes=VMEM_LIMIT),
    )(x2, wx_p, wh_p, b_p)
    # TODO(synk): dense-CfC approximation of AutoNCP; motor neurons = last
    # `num_classes` units of the state.
    return h_last[:, H - num_classes:H]


# ------------------------------ full forward ---------------------------------

def lnn_forward(x_nchw, params, *, sequence_length, ncp_input_size,
                hidden_size, num_classes):
    eps = 1e-5
    x = jnp.transpose(x_nchw, (0, 2, 3, 1))                 # NCHW -> NHWC
    # TODO(synk): conv1 (K=9, Cout=16) underfills the MXU; a direct/VPU conv or
    # folding it into conv2 would be better at scale.
    x = conv_bn_relu(x, params['conv1_w'], params['conv1_b'], 3, 1, 0)
    x = conv_bn_relu(x, params['conv2_w'], params['conv2_b'], 3, 2, 2,
                     bn=(params['bn2_gamma'], params['bn2_beta'],
                         params['bn2_mean'], params['bn2_var'], eps))
    x = conv_bn_relu(x, params['conv3_w'], params['conv3_b'], 5, 2, 2)
    x = conv_bn_relu_pool2(x, params['conv4_w'], params['conv4_b'], 5, 2, 2,
                           bn=(params['bn4_gamma'], params['bn4_beta'],
                               params['bn4_mean'], params['bn4_var'], eps))
    # Match PyTorch x.view(-1, seq, ncp) on an NCHW tensor (conv4 has exactly
    # 128 output channels, so no padded channels to strip here).
    x = jnp.transpose(x, (0, 3, 1, 2))                      # NHWC -> NCHW
    x_seq = x.reshape(-1, sequence_length, ncp_input_size)  # (B, T, D)
    return cfc_forward(x_seq, params['cfc_wx'], params['cfc_wh'],
                       params['cfc_b'], hidden_size, num_classes)


def init_params(key, hidden_size, ncp_input_size):
    ks = jax.random.split(key, 18)
    n = jax.random.normal
    return {
        'conv1_w': 0.1 * n(ks[0], (16, 1, 3, 3), jnp.float32),
        'conv1_b': 0.1 * n(ks[1], (16,), jnp.float32),
        'conv2_w': 0.1 * n(ks[2], (32, 16, 3, 3), jnp.float32),
        'conv2_b': 0.1 * n(ks[3], (32,), jnp.float32),
        'bn2_gamma': 1.0 + 0.1 * n(ks[4], (32,), jnp.float32),
        'bn2_beta': 0.1 * n(ks[5], (32,), jnp.float32),
        'bn2_mean': 0.05 * n(ks[6], (32,), jnp.float32),
        'bn2_var': 1.0 + 0.1 * jnp.abs(n(ks[7], (32,), jnp.float32)),
        'conv3_w': 0.05 * n(ks[8], (64, 32, 5, 5), jnp.float32),
        'conv3_b': 0.1 * n(ks[9], (64,), jnp.float32),
        'conv4_w': 0.05 * n(ks[10], (128, 64, 5, 5), jnp.float32),
        'conv4_b': 0.1 * n(ks[11], (128,), jnp.float32),
        'bn4_gamma': 1.0 + 0.1 * n(ks[12], (128,), jnp.float32),
        'bn4_beta': 0.1 * n(ks[13], (128,), jnp.float32),
        'bn4_mean': 0.05 * n(ks[14], (128,), jnp.float32),
        'bn4_var': 1.0 + 0.1 * jnp.abs(n(ks[15], (128,), jnp.float32)),
        # CfC cell: concatenated [ff1 | ff2 | time_a | time_b] projections.
        'cfc_wx': 0.1 * n(ks[16], (ncp_input_size, 4 * hidden_size), jnp.float32),
        'cfc_wh': 0.1 * n(ks[17], (hidden_size, 4 * hidden_size), jnp.float32),
        'cfc_b': jnp.zeros((1, 4 * hidden_size), jnp.float32),
    }


if __name__ == "__main__":
    # Module hyper-parameters (consistent with the PyTorch forward):
    # 28x28 input -> conv stack -> (N, 128, 2, 2) -> view(-1, 8, 64)
    ncp_input_size = 64
    hidden_size = 32
    num_classes = 10
    sequence_length = 8

    key = jax.random.PRNGKey(0)
    pkey, xkey = jax.random.split(key)
    params = init_params(pkey, hidden_size, ncp_input_size)
    x = jax.random.normal(xkey, (2, 1, 28, 28), jnp.float32)   # NCHW like PyTorch

    fwd = jax.jit(functools.partial(
        lnn_forward,
        sequence_length=sequence_length,
        ncp_input_size=ncp_input_size,
        hidden_size=hidden_size,
        num_classes=num_classes))

    out = fwd(x, params)
    jax.block_until_ready(out)
    assert out.shape == (2, num_classes), out.shape
    print("KERNEL_OK")
</pallas_src>

<mosaic_0001>
module attributes {stable_mosaic.version = 11 : i64} {
  func.func @_conv_mm_kernel(%arg0: i32, %arg1: memref<456x128xbf16, #tpu.memory_space<vmem>>, %arg2: memref<128x128xbf16, #tpu.memory_space<vmem>>, %arg3: memref<1x128xf32, #tpu.memory_space<vmem>>, %arg4: memref<1x128xf32, #tpu.memory_space<vmem>>, %arg5: memref<456x128xf32, #tpu.memory_space<vmem>>) attributes {dimension_semantics = [#tpu.dimension_semantics<parallel>], iteration_bounds = array<i64: 3>, scalar_prefetch = 0 : i64, scratch_operands = 0 : i64, tpu.core_type = #tpu.core_type<tc>, window_params = [{transform_indices = @transform_0, window_bounds = array<i64: 456, 128>}, {pipeline_mode = #tpu.pipeline_mode<synchronous>, transform_indices = @transform_1, window_bounds = array<i64: 128, 128>}, {pipeline_mode = #tpu.pipeline_mode<synchronous>, transform_indices = @transform_2, window_bounds = array<i64: 1, 128>}, {pipeline_mode = #tpu.pipeline_mode<synchronous>, transform_indices = @transform_3, window_bounds = array<i64: 1, 128>}, {transform_indices = @transform_4, window_bounds = array<i64: 456, 128>}]} {
    %c0 = arith.constant 0 : index
    %c0_0 = arith.constant 0 : index
    %0 = vector.load %arg1[%c0, %c0_0] : memref<456x128xbf16, #tpu.memory_space<vmem>>, vector<456x128xbf16>
    %c0_1 = arith.constant 0 : index
    %c0_2 = arith.constant 0 : index
    %1 = vector.load %arg2[%c0_1, %c0_2] : memref<128x128xbf16, #tpu.memory_space<vmem>>, vector<128x128xbf16>
    %cst = arith.constant dense<0.000000e+00> : vector<456x128xf32>
    %2 = tpu.matmul %0, %1, %cst {dimension_numbers = #tpu.dot_dimension_numbers<[1], [0], [0], [1], [0, 0, 1, 1], [], []>} : vector<456x128xbf16>, vector<128x128xbf16>, vector<456x128xf32> -> vector<456x128xf32>
    %c0_3 = arith.constant 0 : index
    %c0_4 = arith.constant 0 : index
    %3 = vector.load %arg3[%c0_3, %c0_4] : memref<1x128xf32, #tpu.memory_space<vmem>>, vector<1x128xf32>
    %4 = vector.broadcast %3 : vector<1x128xf32> to vector<456x128xf32>
    %5 = arith.mulf %2, %4 : vector<456x128xf32>
    %c0_5 = arith.constant 0 : index
    %c0_6 = arith.constant 0 : index
    %6 = vector.load %arg4[%c0_5, %c0_6] : memref<1x128xf32, #tpu.memory_space<vmem>>, vector<1x128xf32>
    %7 = vector.broadcast %6 : vector<1x128xf32> to vector<456x128xf32>
    %8 = arith.addf %5, %7 : vector<456x128xf32>
    %cst_7 = arith.constant 0.000000e+00 : f32
    %9 = vector.broadcast %cst_7 : f32 to vector<456x128xf32>
    %10 = arith.maximumf %8, %9 : vector<456x128xf32>
    %c0_8 = arith.constant 0 : index
    %c0_9 = arith.constant 0 : index
    %11 = vector.load %arg5[%c0_8, %c0_9] : memref<456x128xf32, #tpu.memory_space<vmem>>, vector<456x128xf32>
    tpu.vector_store %arg5[%c0_8, %c0_9], %10 {strides = array<i32>} : memref<456x128xf32, #tpu.memory_space<vmem>>, vector<456x128xf32>,
    return
  }
  func.func @transform_0(%arg0: i32) -> (i32, i32) {
    %c0_i32 = arith.constant 0 : i32
    %c0_i32_0 = arith.constant 0 : i32
    return %arg0, %c0_i32 : i32, i32
  }
  func.func @transform_1(%arg0: i32) -> (i32, i32) {
    %c0_i32 = arith.constant 0 : i32
    %c0_i32_0 = arith.constant 0 : i32
    %c0_i32_1 = arith.constant 0 : i32
    return %c0_i32, %c0_i32_0 : i32, i32
  }
  func.func @transform_2(%arg0: i32) -> (i32, i32) {
    %c0_i32 = arith.constant 0 : i32
    %c0_i32_0 = arith.constant 0 : i32
    %c0_i32_1 = arith.constant 0 : i32
    return %c0_i32, %c0_i32_0 : i32, i32
  }
  func.func @transform_3(%arg0: i32) -> (i32, i32) {
    %c0_i32 = arith.constant 0 : i32
    %c0_i32_0 = arith.constant 0 : i32
    %c0_i32_1 = arith.constant 0 : i32
    return %c0_i32, %c0_i32_0 : i32, i32
  }
  func.func @transform_4(%arg0: i32) -> (i32, i32) {
    %c0_i32 = arith.constant 0 : i32
    %c0_i32_0 = arith.constant 0 : i32
    return %arg0, %c0_i32 : i32, i32
  }
}

module attributes {stable_mosaic.version = 11 : i64} {
  func.func @_conv_mm_kernel(%arg0: i32, %arg1: memref<200x1152xbf16, #tpu.memory_space<vmem>>, %arg2: memref<1152x128xbf16, #tpu.memory_space<vmem>>, %arg3: memref<1x128xf32, #tpu.memory_space<vmem>>, %arg4: memref<1x128xf32, #tpu.memory_space<vmem>>, %arg5: memref<200x128xf32, #tpu.memory_space<vmem>>) attributes {dimension_semantics = [#tpu.dimension_semantics<parallel>], iteration_bounds = array<i64: 2>, scalar_prefetch = 0 : i64, scratch_operands = 0 : i64, tpu.core_type = #tpu.core_type<tc>, window_params = [{transform_indices = @transform_0, window_bounds = array<i64: 200, 1152>}, {pipeline_mode = #tpu.pipeline_mode<synchronous>, transform_indices = @transform_1, window_bounds = array<i64: 1152, 128>}, {pipeline_mode = #tpu.pipeline_mode<synchronous>, transform_indices = @transform_2, window_bounds = array<i64: 1, 128>}, {pipeline_mode = #tpu.pipeline_mode<synchronous>, transform_indices = @transform_3, window_bounds = array<i64: 1, 128>}, {transform_indices = @transform_4, window_bounds = array<i64: 200, 128>}]} {
    %c0 = arith.constant 0 : index
    %c0_0 = arith.constant 0 : index
    %0 = vector.load %arg1[%c0, %c0_0] : memref<200x1152xbf16, #tpu.memory_space<vmem>>, vector<200x1152xbf16>
    %c0_1 = arith.constant 0 : index
    %c0_2 = arith.constant 0 : index
    %1 = vector.load %arg2[%c0_1, %c0_2] : memref<1152x128xbf16, #tpu.memory_space<vmem>>, vector<1152x128xbf16>
    %cst = arith.constant dense<0.000000e+00> : vector<200x128xf32>
    %2 = tpu.matmul %0, %1, %cst {dimension_numbers = #tpu.dot_dimension_numbers<[1], [0], [0], [1], [0, 0, 1, 1], [], []>} : vector<200x1152xbf16>, vector<1152x128xbf16>, vector<200x128xf32> -> vector<200x128xf32>
    %c0_3 = arith.constant 0 : index
    %c0_4 = arith.constant 0 : index
    %3 = vector.load %arg3[%c0_3, %c0_4] : memref<1x128xf32, #tpu.memory_space<vmem>>, vector<1x128xf32>
    %4 = vector.broadcast %3 : vector<1x128xf32> to vector<200x128xf32>
    %5 = arith.mulf %2, %4 : vector<200x128xf32>
    %c0_5 = arith.constant 0 : index
    %c0_6 = arith.constant 0 : index
    %6 = vector.load %arg4[%c0_5, %c0_6] : memref<1x128xf32, #tpu.memory_space<vmem>>, vector<1x128xf32>
    %7 = vector.broadcast %6 : vector<1x128xf32> to vector<200x128xf32>
    %8 = arith.addf %5, %7 : vector<200x128xf32>
    %cst_7 = arith.constant 0.000000e+00 : f32
    %9 = vector.broadcast %cst_7 : f32 to vector<200x128xf32>
    %10 = arith.maximumf %8, %9 : vector<200x128xf32>
    %c0_8 = arith.constant 0 : index
    %c0_9 = arith.constant 0 : index
    %11 = vector.load %arg5[%c0_8, %c0_9] : memref<200x128xf32, #tpu.memory_space<vmem>>, vector<200x128xf32>
    tpu.vector_store %arg5[%c0_8, %c0_9], %10 {strides = array<i32>} : memref<200x128xf32, #tpu.memory_space<vmem>>, vector<200x128xf32>,
    return
  }
  func.func @transform_0(%arg0: i32) -> (i32, i32) {
    %c0_i32 = arith.constant 0 : i32
    %c0_i32_0 = arith.constant 0 : i32
    return %arg0, %c0_i32 : i32, i32
  }
  func.func @transform_1(%arg0: i32) -> (i32, i32) {
    %c0_i32 = arith.constant 0 : i32
    %c0_i32_0 = arith.constant 0 : i32
    %c0_i32_1 = arith.constant 0 : i32
    return %c0_i32, %c0_i32_0 : i32, i32
  }
  func.func @transform_2(%arg0: i32) -> (i32, i32) {
    %c0_i32 = arith.constant 0 : i32
    %c0_i32_0 = arith.constant 0 : i32
    %c0_i32_1 = arith.constant 0 : i32
    return %c0_i32, %c0_i32_0 : i32, i32
  }
  func.func @transform_3(%arg0: i32) -> (i32, i32) {
    %c0_i32 = arith.constant 0 : i32
    %c0_i32_0 = arith.constant 0 : i32
    %c0_i32_1 = arith.constant 0 : i32
    return %c0_i32, %c0_i32_0 : i32, i32
  }
  func.func @transform_4(%arg0: i32) -> (i32, i32) {
    %c0_i32 = arith.constant 0 : i32
    %c0_i32_0 = arith.constant 0 : i32
    return %arg0, %c0_i32 : i32, i32
  }
}

module attributes {stable_mosaic.version = 11 : i64} {
  func.func @_conv_mm_kernel(%arg0: i32, %arg1: memref<56x3200xbf16, #tpu.memory_space<vmem>>, %arg2: memref<3200x128xbf16, #tpu.memory_space<vmem>>, %arg3: memref<1x128xf32, #tpu.memory_space<vmem>>, %arg4: memref<1x128xf32, #tpu.memory_space<vmem>>, %arg5: memref<56x128xf32, #tpu.memory_space<vmem>>) attributes {dimension_semantics = [#tpu.dimension_semantics<parallel>], iteration_bounds = array<i64: 2>, scalar_prefetch = 0 : i64, scratch_operands = 0 : i64, tpu.core_type = #tpu.core_type<tc>, window_params = [{transform_indices = @transform_0, window_bounds = array<i64: 56, 3200>}, {pipeline_mode = #tpu.pipeline_mode<synchronous>, transform_indices = @transform_1, window_bounds = array<i64: 3200, 128>}, {pipeline_mode = #tpu.pipeline_mode<synchronous>, transform_indices = @transform_2, window_bounds = array<i64: 1, 128>}, {pipeline_mode = #tpu.pipeline_mode<synchronous>, transform_indices = @transform_3, window_bounds = array<i64: 1, 128>}, {transform_indices = @transform_4, window_bounds = array<i64: 56, 128>}]} {
    %c0 = arith.constant 0 : index
    %c0_0 = arith.constant 0 : index
    %0 = vector.load %arg1[%c0, %c0_0] : memref<56x3200xbf16, #tpu.memory_space<vmem>>, vector<56x3200xbf16>
    %c0_1 = arith.constant 0 : index
    %c0_2 = arith.constant 0 : index
    %1 = vector.load %arg2[%c0_1, %c0_2] : memref<3200x128xbf16, #tpu.memory_space<vmem>>, vector<3200x128xbf16>
    %cst = arith.constant dense<0.000000e+00> : vector<56x128xf32>
    %2 = tpu.matmul %0, %1, %cst {dimension_numbers = #tpu.dot_dimension_numbers<[1], [0], [0], [1], [0, 0, 1, 1], [], []>} : vector<56x3200xbf16>, vector<3200x128xbf16>, vector<56x128xf32> -> vector<56x128xf32>
    %c0_3 = arith.constant 0 : index
    %c0_4 = arith.constant 0 : index
    %3 = vector.load %arg3[%c0_3, %c0_4] : memref<1x128xf32, #tpu.memory_space<vmem>>, vector<1x128xf32>
    %4 = vector.broadcast %3 : vector<1x128xf32> to vector<56x128xf32>
    %5 = arith.mulf %2, %4 : vector<56x128xf32>
    %c0_5 = arith.constant 0 : index
    %c0_6 = arith.constant 0 : index
    %6 = vector.load %arg4[%c0_5, %c0_6] : memref<1x128xf32, #tpu.memory_space<vmem>>, vector<1x128xf32>
    %7 = vector.broadcast %6 : vector<1x128xf32> to vector<56x128xf32>
    %8 = arith.addf %5, %7 : vector<56x128xf32>
    %cst_7 = arith.constant 0.000000e+00 : f32
    %9 = vector.broadcast %cst_7 : f32 to vector<56x128xf32>
    %10 = arith.maximumf %8, %9 : vector<56x128xf32>
    %c0_8 = arith.constant 0 : index
    %c0_9 = arith.constant 0 : index
    %11 = vector.load %arg5[%c0_8, %c0_9] : memref<56x128xf32, #tpu.memory_space<vmem>>, vector<56x128xf32>
    tpu.vector_store %arg5[%c0_8, %c0_9], %10 {strides = array<i32>} : memref<56x128xf32, #tpu.memory_space<vmem>>, vector<56x128xf32>,
    return
  }
  func.func @transform_0(%arg0: i32) -> (i32, i32) {
    %c0_i32 = arith.constant 0 : i32
    %c0_i32_0 = arith.constant 0 : i32
    return %arg0, %c0_i32 : i32, i32
  }
  func.func @transform_1(%arg0: i32) -> (i32, i32) {
    %c0_i32 = arith.constant 0 : i32
    %c0_i32_0 = arith.constant 0 : i32
    %c0_i32_1 = arith.constant 0 : i32
    return %c0_i32, %c0_i32_0 : i32, i32
  }
  func.func @transform_2(%arg0: i32) -> (i32, i32) {
    %c0_i32 = arith.constant 0 : i32
    %c0_i32_0 = arith.constant 0 : i32
    %c0_i32_1 = arith.constant 0 : i32
    return %c0_i32, %c0_i32_0 : i32, i32
  }
  func.func @transform_3(%arg0: i32) -> (i32, i32) {
    %c0_i32 = arith.constant 0 : i32
    %c0_i32_0 = arith.constant 0 : i32
    %c0_i32_1 = arith.constant 0 : i32
    return %c0_i32, %c0_i32_0 : i32, i32
  }
  func.func @transform_4(%arg0: i32) -> (i32, i32) {
    %c0_i32 = arith.constant 0 : i32
    %c0_i32_0 = arith.constant 0 : i32
    return %arg0, %c0_i32 : i32, i32
  }
}

module attributes {stable_mosaic.version = 11 : i64} {
  func.func @_conv_mm_pool_kernel(%arg0: i32, %arg1: memref<4x8x3200xbf16, #tpu.memory_space<vmem>>, %arg2: memref<3200x128xbf16, #tpu.memory_space<vmem>>, %arg3: memref<1x128xf32, #tpu.memory_space<vmem>>, %arg4: memref<1x128xf32, #tpu.memory_space<vmem>>, %arg5: memref<8x128xf32, #tpu.memory_space<vmem>>) attributes {dimension_semantics = [#tpu.dimension_semantics<parallel>], iteration_bounds = array<i64: 1>, scalar_prefetch = 0 : i64, scratch_operands = 0 : i64, tpu.core_type = #tpu.core_type<tc>, window_params = [{transform_indices = @transform_0, window_bounds = array<i64: 4, 8, 3200>}, {pipeline_mode = #tpu.pipeline_mode<synchronous>, transform_indices = @transform_1, window_bounds = array<i64: 3200, 128>}, {pipeline_mode = #tpu.pipeline_mode<synchronous>, transform_indices = @transform_2, window_bounds = array<i64: 1, 128>}, {pipeline_mode = #tpu.pipeline_mode<synchronous>, transform_indices = @transform_3, window_bounds = array<i64: 1, 128>}, {transform_indices = @transform_4, window_bounds = array<i64: 8, 128>}]} {
    %c0 = arith.constant 0 : index
    %c0_0 = arith.constant 0 : index
    %0 = vector.load %arg2[%c0, %c0_0] : memref<3200x128xbf16, #tpu.memory_space<vmem>>, vector<3200x128xbf16>
    %c0_1 = arith.constant 0 : index
    %c0_2 = arith.constant 0 : index
    %1 = vector.load %arg3[%c0_1, %c0_2] : memref<1x128xf32, #tpu.memory_space<vmem>>, vector<1x128xf32>
    %c0_3 = arith.constant 0 : index
    %c0_4 = arith.constant 0 : index
    %2 = vector.load %arg4[%c0_3, %c0_4] : memref<1x128xf32, #tpu.memory_space<vmem>>, vector<1x128xf32>
    %c0_5 = arith.constant 0 : index
    %c0_6 = arith.constant 0 : index
    %c0_7 = arith.constant 0 : index
    %3 = vector.load %arg1[%c0_5, %c0_6, %c0_7] : memref<4x8x3200xbf16, #tpu.memory_space<vmem>>, vector<1x8x3200xbf16>
    %4 = vector.shape_cast %3 : vector<1x8x3200xbf16> to vector<8x3200xbf16>
    %cst = arith.constant dense<0.000000e+00> : vector<8x128xf32>
    %5 = tpu.matmul %4, %0, %cst {dimension_numbers = #tpu.dot_dimension_numbers<[1], [0], [0], [1], [0, 0, 1, 1], [], []>} : vector<8x3200xbf16>, vector<3200x128xbf16>, vector<8x128xf32> -> vector<8x128xf32>
    %6 = vector.broadcast %1 : vector<1x128xf32> to vector<8x128xf32>
    %7 = arith.mulf %5, %6 : vector<8x128xf32>
    %8 = vector.broadcast %2 : vector<1x128xf32> to vector<8x128xf32>
    %9 = arith.addf %7, %8 : vector<8x128xf32>
    %cst_8 = arith.constant 0.000000e+00 : f32
    %10 = vector.broadcast %cst_8 : f32 to vector<8x128xf32>
    %11 = arith.maximumf %9, %10 : vector<8x128xf32>
    %c1 = arith.constant 1 : index
    %c0_9 = arith.constant 0 : index
    %c0_10 = arith.constant 0 : index
    %12 = vector.load %arg1[%c1, %c0_9, %c0_10] : memref<4x8x3200xbf16, #tpu.memory_space<vmem>>, vector<1x8x3200xbf16>
    %13 = vector.shape_cast %12 : vector<1x8x3200xbf16> to vector<8x3200xbf16>
    %cst_11 = arith.constant dense<0.000000e+00> : vector<8x128xf32>
    %14 = tpu.matmul %13, %0, %cst_11 {dimension_numbers = #tpu.dot_dimension_numbers<[1], [0], [0], [1], [0, 0, 1, 1], [], []>} : vector<8x3200xbf16>, vector<3200x128xbf16>, vector<8x128xf32> -> vector<8x128xf32>
    %15 = vector.broadcast %1 : vector<1x128xf32> to vector<8x128xf32>
    %16 = arith.mulf %14, %15 : vector<8x128xf32>
    %17 = vector.broadcast %2 : vector<1x128xf32> to vector<8x128xf32>
    %18 = arith.addf %16, %17 : vector<8x128xf32>
    %cst_12 = arith.constant 0.000000e+00 : f32
    %19 = vector.broadcast %cst_12 : f32 to vector<8x128xf32>
    %20 = arith.maximumf %18, %19 : vector<8x128xf32>
    %21 = arith.maximumf %11, %20 : vector<8x128xf32>
    %c2 = arith.constant 2 : index
    %c0_13 = arith.constant 0 : index
    %c0_14 = arith.constant 0 : index
    %22 = vector.load %arg1[%c2, %c0_13, %c0_14] : memref<4x8x3200xbf16, #tpu.memory_space<vmem>>, vector<1x8x3200xbf16>
    %23 = vector.shape_cast %22 : vector<1x8x3200xbf16> to vector<8x3200xbf16>
    %cst_15 = arith.constant dense<0.000000e+00> : vector<8x128xf32>
    %24 = tpu.matmul %23, %0, %cst_15 {dimension_numbers = #tpu.dot_dimension_numbers<[1], [0], [0], [1], [0, 0, 1, 1], [], []>} : vector<8x3200xbf16>, vector<3200x128xbf16>, vector<8x128xf32> -> vector<8x128xf32>
    %25 = vector.broadcast %1 : vector<1x128xf32> to vector<8x128xf32>
    %26 = arith.mulf %24, %25 : vector<8x128xf32>
    %27 = vector.broadcast %2 : vector<1x128xf32> to vector<8x128xf32>
    %28 = arith.addf %26, %27 : vector<8x128xf32>
    %cst_16 = arith.constant 0.000000e+00 : f32
    %29 = vector.broadcast %cst_16 : f32 to vector<8x128xf32>
    %30 = arith.maximumf %28, %29 : vector<8x128xf32>
    %c3 = arith.constant 3 : index
    %c0_17 = arith.constant 0 : index
    %c0_18 = arith.constant 0 : index
    %31 = vector.load %arg1[%c3, %c0_17, %c0_18] : memref<4x8x3200xbf16, #tpu.memory_space<vmem>>, vector<1x8x3200xbf16>
    %32 = vector.shape_cast %31 : vector<1x8x3200xbf16> to vector<8x3200xbf16>
    %cst_19 = arith.constant dense<0.000000e+00> : vector<8x128xf32>
    %33 = tpu.matmul %32, %0, %cst_19 {dimension_numbers = #tpu.dot_dimension_numbers<[1], [0], [0], [1], [0, 0, 1, 1], [], []>} : vector<8x3200xbf16>, vector<3200x128xbf16>, vector<8x128xf32> -> vector<8x128xf32>
    %34 = vector.broadcast %1 : vector<1x128xf32> to vector<8x128xf32>
    %35 = arith.mulf %33, %34 : vector<8x128xf32>
    %36 = vector.broadcast %2 : vector<1x128xf32> to vector<8x128xf32>
    %37 = arith.addf %35, %36 : vector<8x128xf32>
    %cst_20 = arith.constant 0.000000e+00 : f32
    %38 = vector.broadcast %cst_20 : f32 to vector<8x128xf32>
    %39 = arith.maximumf %37, %38 : vector<8x128xf32>
    %40 = arith.maximumf %30, %39 : vector<8x128xf32>
    %41 = arith.maximumf %21, %40 : vector<8x128xf32>
    %c0_21 = arith.constant 0 : index
    %c0_22 = arith.constant 0 : index
    %42 = vector.load %arg5[%c0_21, %c0_22] : memref<8x128xf32, #tpu.memory_space<vmem>>, vector<8x128xf32>
    tpu.vector_store %arg5[%c0_21, %c0_22], %41 {strides = array<i32>} : memref<8x128xf32, #tpu.memory_space<vmem>>, vector<8x128xf32>,
    return
  }
  func.func @transform_0(%arg0: i32) -> (i32, i32, i32) {
    %c0_i32 = arith.constant 0 : i32
    %c0_i32_0 = arith.constant 0 : i32
    %c0_i32_1 = arith.constant 0 : i32
    return %c0_i32, %arg0, %c0_i32_0 : i32, i32, i32
  }
  func.func @transform_1(%arg0: i32) -> (i32, i32) {
    %c0_i32 = arith.constant 0 : i32
    %c0_i32_0 = arith.constant 0 : i32
    %c0_i32_1 = arith.constant 0 : i32
    return %c0_i32, %c0_i32_0 : i32, i32
  }
  func.func @transform_2(%arg0: i32) -> (i32, i32) {
    %c0_i32 = arith.constant 0 : i32
    %c0_i32_0 = arith.constant 0 : i32
    %c0_i32_1 = arith.constant 0 : i32
    return %c0_i32, %c0_i32_0 : i32, i32
  }
  func.func @transform_3(%arg0: i32) -> (i32, i32) {
    %c0_i32 = arith.constant 0 : i32
    %c0_i32_0 = arith.constant 0 : i32
    %c0_i32_1 = arith.constant 0 : i32
    return %c0_i32, %c0_i32_0 : i32, i32
  }
  func.func @transform_4(%arg0: i32) -> (i32, i32) {
    %c0_i32 = arith.constant 0 : i32
    %c0_i32_0 = arith.constant 0 : i32
    return %arg0, %c0_i32 : i32, i32
  }
}

module attributes {stable_mosaic.version = 11 : i64} {
  func.func @_cfc_kernel(%arg0: memref<16x64xbf16, #tpu.memory_space<vmem>>, %arg1: memref<64x512xbf16, #tpu.memory_space<vmem>>, %arg2: memref<128x512xbf16, #tpu.memory_space<vmem>>, %arg3: memref<1x512xf32, #tpu.memory_space<vmem>>, %arg4: memref<2x128xf32, #tpu.memory_space<vmem>>) attributes {dimension_semantics = [], scalar_prefetch = 0 : i64, scratch_operands = 0 : i64, tpu.core_type = #tpu.core_type<tc>} {
    %c0 = arith.constant 0 : index
    %c0_0 = arith.constant 0 : index
    %0 = vector.load %arg2[%c0, %c0_0] : memref<128x512xbf16, #tpu.memory_space<vmem>>, vector<128x512xbf16>
    %c0_1 = arith.constant 0 : index
    %c0_2 = arith.constant 0 : index
    %1 = vector.load %arg0[%c0_1, %c0_2] : memref<16x64xbf16, #tpu.memory_space<vmem>>, vector<16x64xbf16>
    %c0_3 = arith.constant 0 : index
    %c0_4 = arith.constant 0 : index
    %2 = vector.load %arg1[%c0_3, %c0_4] : memref<64x512xbf16, #tpu.memory_space<vmem>>, vector<64x512xbf16>
    %cst = arith.constant dense<0.000000e+00> : vector<16x512xf32>
    %3 = tpu.matmul %1, %2, %cst {dimension_numbers = #tpu.dot_dimension_numbers<[1], [0], [0], [1], [0, 0, 1, 1], [], []>} : vector<16x64xbf16>, vector<64x512xbf16>, vector<16x512xf32> -> vector<16x512xf32>
    %c0_5 = arith.constant 0 : index
    %c0_6 = arith.constant 0 : index
    %4 = vector.load %arg3[%c0_5, %c0_6] : memref<1x512xf32, #tpu.memory_space<vmem>>, vector<1x512xf32>
    %5 = vector.broadcast %4 : vector<1x512xf32> to vector<16x512xf32>
    %6 = arith.addf %3, %5 : vector<16x512xf32>
    %7 = vector.shape_cast %6 : vector<16x512xf32> to vector<2x8x512xf32>
    %cst_7 = arith.constant 0.000000e+00 : f32
    %8 = vector.broadcast %cst_7 : f32 to vector<2x128xf32>
    %9 = vector.extract_strided_slice %7 {offsets = [0, 0, 0], sizes = [2, 1, 512], strides = [1, 1, 1]} : vector<2x8x512xf32> to vector<2x1x512xf32>
    %10 = vector.shape_cast %9 : vector<2x1x512xf32> to vector<2x512xf32>
    %11 = arith.truncf %8 : vector<2x128xf32> to vector<2x128xbf16>
    %cst_8 = arith.constant dense<0.000000e+00> : vector<2x512xf32>
    %12 = tpu.matmul %11, %0, %cst_8 {dimension_numbers = #tpu.dot_dimension_numbers<[1], [0], [0], [1], [0, 0, 1, 1], [], []>} : vector<2x128xbf16>, vector<128x512xbf16>, vector<2x512xf32> -> vector<2x512xf32>
    %13 = arith.addf %10, %12 : vector<2x512xf32>
    %14 = vector.extract_strided_slice %13 {offsets = [0, 0], sizes = [2, 128], strides = [1, 1]} : vector<2x512xf32> to vector<2x128xf32>
    %15 = math.tanh %14 : vector<2x128xf32>
    %16 = vector.extract_strided_slice %13 {offsets = [0, 128], sizes = [2, 128], strides = [1, 1]} : vector<2x512xf32> to vector<2x128xf32>
    %17 = math.tanh %16 : vector<2x128xf32>
    %18 = vector.extract_strided_slice %13 {offsets = [0, 256], sizes = [2, 128], strides = [1, 1]} : vector<2x512xf32> to vector<2x128xf32>
    %19 = vector.extract_strided_slice %13 {offsets = [0, 384], sizes = [2, 128], strides = [1, 1]} : vector<2x512xf32> to vector<2x128xf32>
    %20 = arith.addf %18, %19 : vector<2x128xf32>
    %21 = arith.negf %20 : vector<2x128xf32>
    %22 = math.exp %21 : vector<2x128xf32>
    %cst_9 = arith.constant 1.000000e+00 : f32
    %23 = vector.broadcast %cst_9 : f32 to vector<2x128xf32>
    %24 = arith.addf %23, %22 : vector<2x128xf32>
    %25 = arith.divf %23, %24 : vector<2x128xf32>
    %26 = arith.subf %17, %15 : vector<2x128xf32>
    %27 = arith.mulf %25, %26 : vector<2x128xf32>
    %28 = arith.addf %15, %27 : vector<2x128xf32>
    %29 = vector.extract_strided_slice %7 {offsets = [0, 1, 0], sizes = [2, 1, 512], strides = [1, 1, 1]} : vector<2x8x512xf32> to vector<2x1x512xf32>
    %30 = vector.shape_cast %29 : vector<2x1x512xf32> to vector<2x512xf32>
    %31 = arith.truncf %28 : vector<2x128xf32> to vector<2x128xbf16>
    %cst_10 = arith.constant dense<0.000000e+00> : vector<2x512xf32>
    %32 = tpu.matmul %31, %0, %cst_10 {dimension_numbers = #tpu.dot_dimension_numbers<[1], [0], [0], [1], [0, 0, 1, 1], [], []>} : vector<2x128xbf16>, vector<128x512xbf16>, vector<2x512xf32> -> vector<2x512xf32>
    %33 = arith.addf %30, %32 : vector<2x512xf32>
    %34 = vector.extract_strided_slice %33 {offsets = [0, 0], sizes = [2, 128], strides = [1, 1]} : vector<2x512xf32> to vector<2x128xf32>
    %35 = math.tanh %34 : vector<2x128xf32>
    %36 = vector.extract_strided_slice %33 {offsets = [0, 128], sizes = [2, 128], strides = [1, 1]} : vector<2x512xf32> to vector<2x128xf32>
    %37 = math.tanh %36 : vector<2x128xf32>
    %38 = vector.extract_strided_slice %33 {offsets = [0, 256], sizes = [2, 128], strides = [1, 1]} : vector<2x512xf32> to vector<2x128xf32>
    %39 = vector.extract_strided_slice %33 {offsets = [0, 384], sizes = [2, 128], strides = [1, 1]} : vector<2x512xf32> to vector<2x128xf32>
    %40 = arith.addf %38, %39 : vector<2x128xf32>
    %41 = arith.negf %40 : vector<2x128xf32>
    %42 = math.exp %41 : vector<2x128xf32>
    %cst_11 = arith.constant 1.000000e+00 : f32
    %43 = vector.broadcast %cst_11 : f32 to vector<2x128xf32>
    %44 = arith.addf %43, %42 : vector<2x128xf32>
    %45 = arith.divf %43, %44 : vector<2x128xf32>
    %46 = arith.subf %37, %35 : vector<2x128xf32>
    %47 = arith.mulf %45, %46 : vector<2x128xf32>
    %48 = arith.addf %35, %47 : vector<2x128xf32>
    %49 = vector.extract_strided_slice %7 {offsets = [0, 2, 0], sizes = [2, 1, 512], strides = [1, 1, 1]} : vector<2x8x512xf32> to vector<2x1x512xf32>
    %50 = vector.shape_cast %49 : vector<2x1x512xf32> to vector<2x512xf32>
    %51 = arith.truncf %48 : vector<2x128xf32> to vector<2x128xbf16>
    %cst_12 = arith.constant dense<0.000000e+00> : vector<2x512xf32>
    %52 = tpu.matmul %51, %0, %cst_12 {dimension_numbers = #tpu.dot_dimension_numbers<[1], [0], [0], [1], [0, 0, 1, 1], [], []>} : vector<2x128xbf16>, vector<128x512xbf16>, vector<2x512xf32> -> vector<2x512xf32>
    %53 = arith.addf %50, %52 : vector<2x512xf32>
    %54 = vector.extract_strided_slice %53 {offsets = [0, 0], sizes = [2, 128], strides = [1, 1]} : vector<2x512xf32> to vector<2x128xf32>
    %55 = math.tanh %54 : vector<2x128xf32>
    %56 = vector.extract_strided_slice %53 {offsets = [0, 128], sizes = [2, 128], strides = [1, 1]} : vector<2x512xf32> to vector<2x128xf32>
    %57 = math.tanh %56 : vector<2x128xf32>
    %58 = vector.extract_strided_slice %53 {offsets = [0, 256], sizes = [2, 128], strides = [1, 1]} : vector<2x512xf32> to vector<2x128xf32>
    %59 = vector.extract_strided_slice %53 {offsets = [0, 384], sizes = [2, 128], strides = [1, 1]} : vector<2x512xf32> to vector<2x128xf32>
    %60 = arith.addf %58, %59 : vector<2x128xf32>
    %61 = arith.negf %60 : vector<2x128xf32>
    %62 = math.exp %61 : vector<2x128xf32>
    %cst_13 = arith.constant 1.000000e+00 : f32
    %63 = vector.broadcast %cst_13 : f32 to vector<2x128xf32>
    %64 = arith.addf %63, %62 : vector<2x128xf32>
    %65 = arith.divf %63, %64 : vector<2x128xf32>
    %66 = arith.subf %57, %55 : vector<2x128xf32>
    %67 = arith.mulf %65, %66 : vector<2x128xf32>
    %68 = arith.addf %55, %67 : vector<2x128xf32>
    %69 = vector.extract_strided_slice %7 {offsets = [0, 3, 0], sizes = [2, 1, 512], strides = [1, 1, 1]} : vector<2x8x512xf32> to vector<2x1x512xf32>
    %70 = vector.shape_cast %69 : vector<2x1x512xf32> to vector<2x512xf32>
    %71 = arith.truncf %68 : vector<2x128xf32> to vector<2x128xbf16>
    %cst_14 = arith.constant dense<0.000000e+00> : vector<2x512xf32>
    %72 = tpu.matmul %71, %0, %cst_14 {dimension_numbers = #tpu.dot_dimension_numbers<[1], [0], [0], [1], [0, 0, 1, 1], [], []>} : vector<2x128xbf16>, vector<128x512xbf16>, vector<2x512xf32> -> vector<2x512xf32>
    %73 = arith.addf %70, %72 : vector<2x512xf32>
    %74 = vector.extract_strided_slice %73 {offsets = [0, 0], sizes = [2, 128], strides = [1, 1]} : vector<2x512xf32> to vector<2x128xf32>
    %75 = math.tanh %74 : vector<2x128xf32>
    %76 = vector.extract_strided_slice %73 {offsets = [0, 128], sizes = [2, 128], strides = [1, 1]} : vector<2x512xf32> to vector<2x128xf32>
    %77 = math.tanh %76 : vector<2x128xf32>
    %78 = vector.extract_strided_slice %73 {offsets = [0, 256], sizes = [2, 128], strides = [1, 1]} : vector<2x512xf32> to vector<2x128xf32>
    %79 = vector.extract_strided_slice %73 {offsets = [0, 384], sizes = [2, 128], strides = [1, 1]} : vector<2x512xf32> to vector<2x128xf32>
    %80 = arith.addf %78, %79 : vector<2x128xf32>
    %81 = arith.negf %80 : vector<2x128xf32>
    %82 = math.exp %81 : vector<2x128xf32>
    %cst_15 = arith.constant 1.000000e+00 : f32
    %83 = vector.broadcast %cst_15 : f32 to vector<2x128xf32>
    %84 = arith.addf %83, %82 : vector<2x128xf32>
    %85 = arith.divf %83, %84 : vector<2x128xf32>
    %86 = arith.subf %77, %75 : vector<2x128xf32>
    %87 = arith.mulf %85, %86 : vector<2x128xf32>
    %88 = arith.addf %75, %87 : vector<2x128xf32>
    %89 = vector.extract_strided_slice %7 {offsets = [0, 4, 0], sizes = [2, 1, 512], strides = [1, 1, 1]} : vector<2x8x512xf32> to vector<2x1x512xf32>
    %90 = vector.shape_cast %89 : vector<2x1x512xf32> to vector<2x512xf32>
    %91 = arith.truncf %88 : vector<2x128xf32> to vector<2x128xbf16>
    %cst_16 = arith.constant dense<0.000000e+00> : vector<2x512xf32>
    %92 = tpu.matmul %91, %0, %cst_16 {dimension_numbers = #tpu.dot_dimension_numbers<[1], [0], [0], [1], [0, 0, 1, 1], [], []>} : vector<2x128xbf16>, vector<128x512xbf16>, vector<2x512xf32> -> vector<2x512xf32>
    %93 = arith.addf %90, %92 : vector<2x512xf32>
    %94 = vector.extract_strided_slice %93 {offsets = [0, 0], sizes = [2, 128], strides = [1, 1]} : vector<2x512xf32> to vector<2x128xf32>
    %95 = math.tanh %94 : vector<2x128xf32>
    %96 = vector.extract_strided_slice %93 {offsets = [0, 128], sizes = [2, 128], strides = [1, 1]} : vector<2x512xf32> to vector<2x128xf32>
    %97 = math.tanh %96 : vector<2x128xf32>
    %98 = vector.extract_strided_slice %93 {offsets = [0, 256], sizes = [2, 128], strides = [1, 1]} : vector<2x512xf32> to vector<2x128xf32>
    %99 = vector.extract_strided_slice %93 {offsets = [0, 384], sizes = [2, 128], strides = [1, 1]} : vector<2x512xf32> to vector<2x128xf32>
    %100 = arith.addf %98, %99 : vector<2x128xf32>
    %101 = arith.negf %100 : vector<2x128xf32>
    %102 = math.exp %101 : vector<2x128xf32>
    %cst_17 = arith.constant 1.000000e+00 : f32
    %103 = vector.broadcast %cst_17 : f32 to vector<2x128xf32>
    %104 = arith.addf %103, %102 : vector<2x128xf32>
    %105 = arith.divf %103, %104 : vector<2x128xf32>
    %106 = arith.subf %97, %95 : vector<2x128xf32>
    %107 = arith.mulf %105, %106 : vector<2x128xf32>
    %108 = arith.addf %95, %107 : vector<2x128xf32>
    %109 = vector.extract_strided_slice %7 {offsets = [0, 5, 0], sizes = [2, 1, 512], strides = [1, 1, 1]} : vector<2x8x512xf32> to vector<2x1x512xf32>
    %110 = vector.shape_cast %109 : vector<2x1x512xf32> to vector<2x512xf32>
    %111 = arith.truncf %108 : vector<2x128xf32> to vector<2x128xbf16>
    %cst_18 = arith.constant dense<0.000000e+00> : vector<2x512xf32>
    %112 = tpu.matmul %111, %0, %cst_18 {dimension_numbers = #tpu.dot_dimension_numbers<[1], [0], [0], [1], [0, 0, 1, 1], [], []>} : vector<2x128xbf16>, vector<128x512xbf16>, vector<2x512xf32> -> vector<2x512xf32>
    %113 = arith.addf %110, %112 : vector<2x512xf32>
    %114 = vector.extract_strided_slice %113 {offsets = [0, 0], sizes = [2, 128], strides = [1, 1]} : vector<2x512xf32> to vector<2x128xf32>
    %115 = math.tanh %114 : vector<2x128xf32>
    %116 = vector.extract_strided_slice %113 {offsets = [0, 128], sizes = [2, 128], strides = [1, 1]} : vector<2x512xf32> to vector<2x128xf32>
    %117 = math.tanh %116 : vector<2x128xf32>
    %118 = vector.extract_strided_slice %113 {offsets = [0, 256], sizes = [2, 128], strides = [1, 1]} : vector<2x512xf32> to vector<2x128xf32>
    %119 = vector.extract_strided_slice %113 {offsets = [0, 384], sizes = [2, 128], strides = [1, 1]} : vector<2x512xf32> to vector<2x128xf32>
    %120 = arith.addf %118, %119 : vector<2x128xf32>
    %121 = arith.negf %120 : vector<2x128xf32>
    %122 = math.exp %121 : vector<2x128xf32>
    %cst_19 = arith.constant 1.000000e+00 : f32
    %123 = vector.broadcast %cst_19 : f32 to vector<2x128xf32>
    %124 = arith.addf %123, %122 : vector<2x128xf32>
    %125 = arith.divf %123, %124 : vector<2x128xf32>
    %126 = arith.subf %117, %115 : vector<2x128xf32>
    %127 = arith.mulf %125, %126 : vector<2x128xf32>
    %128 = arith.addf %115, %127 : vector<2x128xf32>
    %129 = vector.extract_strided_slice %7 {offsets = [0, 6, 0], sizes = [2, 1, 512], strides = [1, 1, 1]} : vector<2x8x512xf32> to vector<2x1x512xf32>
    %130 = vector.shape_cast %129 : vector<2x1x512xf32> to vector<2x512xf32>
    %131 = arith.truncf %128 : vector<2x128xf32> to vector<2x128xbf16>
    %cst_20 = arith.constant dense<0.000000e+00> : vector<2x512xf32>
    %132 = tpu.matmul %131, %0, %cst_20 {dimension_numbers = #tpu.dot_dimension_numbers<[1], [0], [0], [1], [0, 0, 1, 1], [], []>} : vector<2x128xbf16>, vector<128x512xbf16>, vector<2x512xf32> -> vector<2x512xf32>
    %133 = arith.addf %130, %132 : vector<2x512xf32>
    %134 = vector.extract_strided_slice %133 {offsets = [0, 0], sizes = [2, 128], strides = [1, 1]} : vector<2x512xf32> to vector<2x128xf32>
    %135 = math.tanh %134 : vector<2x128xf32>
    %136 = vector.extract_strided_slice %133 {offsets = [0, 128], sizes = [2, 128], strides = [1, 1]} : vector<2x512xf32> to vector<2x128xf32>
    %137 = math.tanh %136 : vector<2x128xf32>
    %138 = vector.extract_strided_slice %133 {offsets = [0, 256], sizes = [2, 128], strides = [1, 1]} : vector<2x512xf32> to vector<2x128xf32>
    %139 = vector.extract_strided_slice %133 {offsets = [0, 384], sizes = [2, 128], strides = [1, 1]} : vector<2x512xf32> to vector<2x128xf32>
    %140 = arith.addf %138, %139 : vector<2x128xf32>
    %141 = arith.negf %140 : vector<2x128xf32>
    %142 = math.exp %141 : vector<2x128xf32>
    %cst_21 = arith.constant 1.000000e+00 : f32
    %143 = vector.broadcast %cst_21 : f32 to vector<2x128xf32>
    %144 = arith.addf %143, %142 : vector<2x128xf32>
    %145 = arith.divf %143, %144 : vector<2x128xf32>
    %146 = arith.subf %137, %135 : vector<2x128xf32>
    %147 = arith.mulf %145, %146 : vector<2x128xf32>
    %148 = arith.addf %135, %147 : vector<2x128xf32>
    %149 = vector.extract_strided_slice %7 {offsets = [0, 7, 0], sizes = [2, 1, 512], strides = [1, 1, 1]} : vector<2x8x512xf32> to vector<2x1x512xf32>
    %150 = vector.shape_cast %149 : vector<2x1x512xf32> to vector<2x512xf32>
    %151 = arith.truncf %148 : vector<2x128xf32> to vector<2x128xbf16>
    %cst_22 = arith.constant dense<0.000000e+00> : vector<2x512xf32>
    %152 = tpu.matmul %151, %0, %cst_22 {dimension_numbers = #tpu.dot_dimension_numbers<[1], [0], [0], [1], [0, 0, 1, 1], [], []>} : vector<2x128xbf16>, vector<128x512xbf16>, vector<2x512xf32> -> vector<2x512xf32>
    %153 = arith.addf %150, %152 : vector<2x512xf32>
    %154 = vector.extract_strided_slice %153 {offsets = [0, 0], sizes = [2, 128], strides = [1, 1]} : vector<2x512xf32> to vector<2x128xf32>
    %155 = math.tanh %154 : vector<2x128xf32>
    %156 = vector.extract_strided_slice %153 {offsets = [0, 128], sizes = [2, 128], strides = [1, 1]} : vector<2x512xf32> to vector<2x128xf32>
    %157 = math.tanh %156 : vector<2x128xf32>
    %158 = vector.extract_strided_slice %153 {offsets = [0, 256], sizes = [2, 128], strides = [1, 1]} : vector<2x512xf32> to vector<2x128xf32>
    %159 = vector.extract_strided_slice %153 {offsets = [0, 384], sizes = [2, 128], strides = [1, 1]} : vector<2x512xf32> to vector<2x128xf32>
    %160 = arith.addf %158, %159 : vector<2x128xf32>
    %161 = arith.negf %160 : vector<2x128xf32>
    %162 = math.exp %161 : vector<2x128xf32>
    %cst_23 = arith.constant 1.000000e+00 : f32
    %163 = vector.broadcast %cst_23 : f32 to vector<2x128xf32>
    %164 = arith.addf %163, %162 : vector<2x128xf32>
    %165 = arith.divf %163, %164 : vector<2x128xf32>
    %166 = arith.subf %157, %155 : vector<2x128xf32>
    %167 = arith.mulf %165, %166 : vector<2x128xf32>
    %168 = arith.addf %155, %167 : vector<2x128xf32>
    %c0_24 = arith.constant 0 : index
    %c0_25 = arith.constant 0 : index
    %169 = vector.load %arg4[%c0_24, %c0_25] : memref<2x128xf32, #tpu.memory_space<vmem>>, vector<2x128xf32>
    tpu.vector_store %arg4[%c0_24, %c0_25], %168 {strides = array<i32>} : memref<2x128xf32, #tpu.memory_space<vmem>>, vector<2x128xf32>,
    return
  }
}

</mosaic_0001>

<bundles_post_ra>
// kernel: lnn_forward.5
= control target key start
LH: loop header
LB: loop body
LE: loop exit
PB: predicated region body
PF: predicated region fallthrough
CT: control target
= control target key end

     0   :  { %s1372_s15 = smov 0   ;;  %s1705_s0 = inlined_call_operand.vmem [shape: bf16[1368,128], index: 0, kind: input, shape index: {}]   ;;  %s1706_s1 = inlined_call_operand.vmem [shape: bf16[128,128], index: 1, kind: input, shape index: {}]   ;;  %s1707_s2 = inlined_call_operand.vmem [shape: f32[1,128], index: 2, kind: input, shape index: {}]   ;;  %s1708_s3 = inlined_call_operand.vmem [shape: f32[1,128], index: 3, kind: input, shape index: {}]   ;;  %s1709_s4 = inlined_call_operand.vmem [shape: f32[1368,128], index: 4, kind: output, shape index: {}]  }
   0x1 LB: > { %s1057_s16 = sadd.s32 4294967295, %s1343_s15   ;;  %p1061_p0 = scmp.ge.s32.totalorder %s1343_s15, 1  ;;  %s1343_s15 = sphi %s1372_s15, %s14_s15  }
   0x2   : > { %p163_p1 = scmp.lt.s32.totalorder %s1343_s15, 4 }
   0x4   : > { %p164_p2 = pnand %p1061_p0, %p163_p1 }
   0x5   : > { %v1300_v0 = vld [vmem:[%s1706_s1] sm:$0xff] (!%p164_p2)   ;;  %v1345_v1 = vmov (!%p164_p2), 0.0   ;;  %v1301_v2 = vld [vmem:[%s1706_s1 + $0x8] sm:$0xff] (!%p164_p2)   ;;  %s189_s21 = smul.u32 (!%p164_p2), 57, %s1057_s16  ;;  %vm1346_vm0 = vmmov (!%p164_p2), 0   ;;  %v1302_v3 = vld [vmem:[%s1706_s1 + $0x10] sm:$0xff] (!%p164_p2)  }
   0x6   : > { %167 = sbr.rel (%p164_p2) target bundleno = 371 (0x173), region = 36  ;;  %1142 = vmatprep.subr.bf16.mxu0 (!%p164_p2), %v1345_v1  ;;  %1274 = vmatprep.subr.bf16.mxu1 (!%p164_p2), %v1345_v1  ;;  %v1303_v4 = vld [vmem:[%s1706_s1 + $0x18] sm:$0xff] (!%p164_p2)   ;;  %v1304_v5 = vld [vmem:[%s1706_s1 + $0x20] sm:$0xff] (!%p164_p2)   ;;  %v1305_v6 = vld [vmem:[%s1706_s1 + $0x28] sm:$0xff] (!%p164_p2)  }
   0x7   : > { %1143 = vmatpush3.bf16.msra.mxu0 (!%p164_p2), %v1300_v0  ;;  %1282 = vmatpush3.bf16.msra.mxu1 (!%p164_p2), %v1300_v0  ;;  %p190_p3 = scmp.lt.s32.totalorder (!%p164_p2), %s189_s21, 170  ;;  %v1306_v7 = vld [vmem:[%s1706_s1 + $0x30] sm:$0xff] (!%p164_p2)   ;;  %v1307_v8 = vld [vmem:[%s1706_s1 + $0x38] sm:$0xff] (!%p164_p2)   ;;  %v1518_v38 = vld [vmem:[%s1707_s2] ss:$0 sm:$0xff] (!%p164_p2) }
   0x8   : > { %1144 = vmatprep.subr.bf16.mxu0 (!%p164_p2), %v1345_v1  ;;  %1275 = vmatprep.subr.bf16.mxu1 (!%p164_p2), %v1345_v1  ;;  %v1523_v40 = vld [vmem:[%s1708_s3] ss:$0 sm:$0xff] (!%p164_p2) }
   0x9   : > { %1158 = vmatprep.mubr.msk.bf16.mxu0 (!%p164_p2), %vm1346_vm0, %v1345_v1  ;;  %1218 = vmatprep.mubr.msk.bf16.mxu1 (!%p164_p2), %vm1346_vm0, %v1345_v1 }
   0xb   : > { %1145 = vmatpush3.bf16.msra.mxu0 (!%p164_p2), %v1301_v2  ;;  %1283 = vmatpush3.bf16.msra.mxu1 (!%p164_p2), %v1301_v2 }
   0xc   : > { %1146 = vmatprep.subr.bf16.mxu0 (!%p164_p2), %v1345_v1  ;;  %1276 = vmatprep.subr.bf16.mxu1 (!%p164_p2), %v1345_v1 }
   0xd   : > { %s1711_s21 = smov (!%p190_p3, %s189_s21), 170 }
   0xe   : > { %s1062_s24 = sshll.u32 %s1711_s21, 2  ;;  %s1063_s17 = sshll.u32 %s1711_s21, 3 }
   0xf   : > { %s1405_s27 = scalar_lea.vmem %s1705_s0, %s1062_s24  ;;  %1147 = vmatpush3.bf16.msra.mxu0 %v1302_v3  ;;  %1284 = vmatpush3.bf16.msra.mxu1 %v1302_v3  ;;  %s1535_s20 = scalar_lea.vmem %s1709_s4, %s1063_s17 }
  0x10   : > { %1148 = vmatprep.subr.bf16.mxu0 %v1345_v1  ;;  %1277 = vmatprep.subr.bf16.mxu1 %v1345_v1  ;;  %v1308_v9 = vld [vmem:[%s1405_s27] sm:$0xff]   ;;  %v1309_v10 = vld [vmem:[%s1405_s27 + $0x78] sm:$0xff]   ;;  %v1310_v11 = vld [vmem:[%s1405_s27 + $0x8] sm:$0xff]  }
  0x11   : > { %v1311_v12 = vld [vmem:[%s1405_s27 + $0x80] sm:$0xff]   ;;  %v1312_v13 = vld [vmem:[%s1405_s27 + $0x10] sm:$0xff]   ;;  %v1313_v14 = vld [vmem:[%s1405_s27 + $0x88] sm:$0xff]  }
  0x12   : > { %v1314_v15 = vld [vmem:[%s1405_s27 + $0x18] sm:$0xff]   ;;  %v1315_v16 = vld [vmem:[%s1405_s27 + $0x90] sm:$0xff]   ;;  %v1316_v17 = vld [vmem:[%s1405_s27 + $0x20] sm:$0xff]  }
  0x13   : > { %1149 = vmatpush3.bf16.msra.mxu0 %v1303_v4  ;;  %1285 = vmatpush3.bf16.msra.mxu1 %v1303_v4  ;;  %v1317_v18 = vld [vmem:[%s1405_s27 + $0x98] sm:$0xff]   ;;  %v1318_v19 = vld [vmem:[%s1405_s27 + $0x28] sm:$0xff]   ;;  %v1319_v20 = vld [vmem:[%s1405_s27 + $0xa0] sm:$0xff]  }
  0x14   : > { %1150 = vmatprep.subr.bf16.mxu0 %v1345_v1  ;;  %1278 = vmatprep.subr.bf16.mxu1 %v1345_v1  ;;  %v1320_v21 = vld [vmem:[%s1405_s27 + $0x30] sm:$0xff]   ;;  %v1321_v22 = vld [vmem:[%s1405_s27 + $0xa8] sm:$0xff]   ;;  %v1322_v23 = vld [vmem:[%s1405_s27 + $0x38] sm:$0xff]  }
  0x15   : > { %v1323_v24 = vld [vmem:[%s1405_s27 + $0xb0] sm:$0xff]   ;;  %v1324_v25 = vld [vmem:[%s1405_s27 + $0x40] sm:$0xff]   ;;  %v1325_v26 = vld [vmem:[%s1405_s27 + $0xb8] sm:$0xff]  }
  0x16   : > { %v1326_v27 = vld [vmem:[%s1405_s27 + $0x48] sm:$0xff]   ;;  %v1327_v28 = vld [vmem:[%s1405_s27 + $0xc0] sm:$0xff]   ;;  %v1328_v29 = vld [vmem:[%s1405_s27 + $0x50] sm:$0xff]  }
  0x17   : > { %1151 = vmatpush3.bf16.msra.mxu0 %v1304_v5  ;;  %1286 = vmatpush3.bf16.msra.mxu1 %v1304_v5  ;;  %v1329_v30 = vld [vmem:[%s1405_s27 + $0xc8] sm:$0xff]   ;;  %v1330_v31 = vld [vmem:[%s1405_s27 + $0x58] sm:$0xff]   ;;  %v1331_v32 = vld [vmem:[%s1405_s27 + $0xd0] sm:$0xff]  }
  0x18   : > { %1152 = vmatprep.subr.bf16.mxu0 %v1345_v1  ;;  %1279 = vmatprep.subr.bf16.mxu1 %v1345_v1  ;;  %v1332_v33 = vld [vmem:[%s1405_s27 + $0x60] sm:$0xff]   ;;  %v1333_v34 = vld [vmem:[%s1405_s27 + $0xd8] sm:$0xff]   ;;  %v1334_v35 = vld [vmem:[%s1405_s27 + $0x68] sm:$0xff]  }
  0x19   : > { %v1335_v36 = vld [vmem:[%s1405_s27 + $0xe0] ss:$0 sps:$4 sm:$0xff]   ;;  %v1336_v37 = vld [vmem:[%s1405_s27 + $0x70] sm:$0xff]  }
  0x1b   : > { %1153 = vmatpush3.bf16.msra.mxu0 %v1305_v6  ;;  %1287 = vmatpush3.bf16.msra.mxu1 %v1305_v6 }
  0x1c   : > { %1154 = vmatprep.subr.bf16.mxu0 %v1345_v1  ;;  %1280 = vmatprep.subr.bf16.mxu1 %v1345_v1 }
  0x1f   : > { %1155 = vmatpush3.bf16.msra.mxu0 %v1306_v7  ;;  %1288 = vmatpush3.bf16.msra.mxu1 %v1306_v7 }
  0x20   : > { %1156 = vmatprep.subr.bf16.mxu0 %v1345_v1  ;;  %1281 = vmatprep.subr.bf16.mxu1 %v1345_v1 }
  0x23   : > { %1157 = vmatpush3.bf16.msra.mxu0 %v1307_v8  ;;  %1289 = vmatpush3.bf16.msra.mxu1 %v1307_v8 }
  0x26   : > { %1159 = vmatmul.mubr.bf16.vlgmr.msra.gmra.mrb[0].mxu0 %v1308_v9  ;;  %1219 = vmatmul.mubr.bf16.vlgmr.msra.gmra.mrb[0].mxu1 %v1309_v10 }
  0x27   : > { %1162 = vmatprep.mubr.msk.bf16.mxu0 %vm1346_vm0, %v1345_v1  ;;  %1222 = vmatprep.mubr.msk.bf16.mxu1 %vm1346_vm0, %v1345_v1 }
  0x2e   : > { %1163 = vmatmul.mubr.bf16.gmra.mrb[4].mxu0 %v1310_v11  ;;  %1223 = vmatmul.mubr.bf16.gmra.mrb[4].mxu1 %v1311_v12 }
  0x2f   : > { %1166 = vmatprep.mubr.msk.bf16.mxu0 %vm1346_vm0, %v1345_v1  ;;  %1226 = vmatprep.mubr.msk.bf16.mxu1 %vm1346_vm0, %v1345_v1 }
  0x36   : > { %1167 = vmatmul.mubr.bf16.gmra.mrb[8].mxu0 %v1312_v13  ;;  %1227 = vmatmul.mubr.bf16.gmra.mrb[8].mxu1 %v1313_v14 }
  0x37   : > { %1170 = vmatprep.mubr.msk.bf16.mxu0 %vm1346_vm0, %v1345_v1  ;;  %1230 = vmatprep.mubr.msk.bf16.mxu1 %vm1346_vm0, %v1345_v1 }
  0x3e   : > { %1171 = vmatmul.mubr.bf16.gmra.mrb[12].mxu0 %v1314_v15  ;;  %1231 = vmatmul.mubr.bf16.gmra.mrb[12].mxu1 %v1315_v16 }
  0x3f   : > { %1174 = vmatprep.mubr.msk.bf16.mxu0 %vm1346_vm0, %v1345_v1  ;;  %1234 = vmatprep.mubr.msk.bf16.mxu1 %vm1346_vm0, %v1345_v1 }
  0x46   : > { %1175 = vmatmul.mubr.bf16.gmra.mrb[16].mxu0 %v1316_v17  ;;  %1235 = vmatmul.mubr.bf16.gmra.mrb[16].mxu1 %v1317_v18 }
  0x47   : > { %1178 = vmatprep.mubr.msk.bf16.mxu0 %vm1346_vm0, %v1345_v1  ;;  %1238 = vmatprep.mubr.msk.bf16.mxu1 %vm1346_vm0, %v1345_v1 }
  0x4e   : > { %1179 = vmatmul.mubr.bf16.gmra.mrb[20].mxu0 %v1318_v19  ;;  %1239 = vmatmul.mubr.bf16.gmra.mrb[20].mxu1 %v1319_v20 }
  0x4f   : > { %1182 = vmatprep.mubr.msk.bf16.mxu0 %vm1346_vm0, %v1345_v1  ;;  %1242 = vmatprep.mubr.msk.bf16.mxu1 %vm1346_vm0, %v1345_v1 }
  0x56   : > { %1183 = vmatmul.mubr.bf16.gmra.mrb[24].mxu0 %v1320_v21  ;;  %1243 = vmatmul.mubr.bf16.gmra.mrb[24].mxu1 %v1321_v22 }
  0x57   : > { %1186 = vmatprep.mubr.msk.bf16.mxu0 %vm1346_vm0, %v1345_v1  ;;  %1246 = vmatprep.mubr.msk.bf16.mxu1 %vm1346_vm0, %v1345_v1 }
  0x5e   : > { %1187 = vmatmul.mubr.bf16.gmra.mrb[28].mxu0 %v1322_v23  ;;  %1247 = vmatmul.mubr.bf16.gmra.mrb[28].mxu1 %v1323_v24 }
  0x5f   : > { %1190 = vmatprep.mubr.msk.bf16.mxu0 %vm1346_vm0, %v1345_v1  ;;  %1250 = vmatprep.mubr.msk.bf16.mxu1 %vm1346_vm0, %v1345_v1 }
  0x66   : > { %1191 = vmatmul.mubr.bf16.gmra.mrb[32].mxu0 %v1324_v25  ;;  %1251 = vmatmul.mubr.bf16.gmra.mrb[32].mxu1 %v1325_v26 }
  0x67   : > { %1194 = vmatprep.mubr.msk.bf16.mxu0 %vm1346_vm0, %v1345_v1  ;;  %1254 = vmatprep.mubr.msk.bf16.mxu1 %vm1346_vm0, %v1345_v1 }
  0x6e   : > { %1195 = vmatmul.mubr.bf16.gmra.mrb[36].mxu0 %v1326_v27  ;;  %1255 = vmatmul.mubr.bf16.gmra.mrb[36].mxu1 %v1327_v28 }
  0x6f   : > { %1198 = vmatprep.mubr.msk.bf16.mxu0 %vm1346_vm0, %v1345_v1  ;;  %1258 = vmatprep.mubr.msk.bf16.mxu1 %vm1346_vm0, %v1345_v1 }
  0x76   : > { %1199 = vmatmul.mubr.bf16.gmra.mrb[40].mxu0 %v1328_v29  ;;  %1259 = vmatmul.mubr.bf16.gmra.mrb[40].mxu1 %v1329_v30 }
  0x77   : > { %1202 = vmatprep.mubr.msk.bf16.mxu0 %vm1346_vm0, %v1345_v1  ;;  %1262 = vmatprep.mubr.msk.bf16.mxu1 %vm1346_vm0, %v1345_v1 }
  0x7e   : > { %1203 = vmatmul.mubr.bf16.gmra.mrb[44].mxu0 %v1330_v31  ;;  %1263 = vmatmul.mubr.bf16.gmra.mrb[44].mxu1 %v1331_v32 }
  0x7f   : > { %1206 = vmatprep.mubr.msk.bf16.mxu0 %vm1346_vm0, %v1345_v1  ;;  %1266 = vmatprep.mubr.msk.bf16.mxu1 %vm1346_vm0, %v1345_v1 }
  0x86   : > { %1207 = vmatmul.mubr.bf16.gmra.mrb[48].mxu0 %v1332_v33  ;;  %1267 = vmatmul.mubr.bf16.gmra.mrb[48].mxu1 %v1333_v34 }
  0x87   : > { %1210 = vmatprep.mubr.msk.bf16.mxu0 %vm1346_vm0, %v1345_v1  ;;  %1270 = vmatprep.mubr.msk.bf16.mxu1 %vm1346_vm0, %v1345_v1 }
  0x8e   : > { %1211 = vmatmul.mubr.bf16.gmra.mrb[52].mxu0 %v1334_v35  ;;  %1271 = vmatmul.mubr.bf16.gmra.mrb[52].mxu1 %v1335_v36 }
  0x8f   : > { %1214 = vmatprep.mubr.msk.bf16.mxu0 %vm1346_vm0, %v1345_v1 }
  0x96   : > { %1215 = vmatmul.mubr.bf16.gmra.mrb[56].mxu0 %v1336_v37 }
  0xf9   : > { %v529_v39 = vpop.f32.mrb[0].mxu0  ;;  %v649_v41 = vpop.f32.mrb[0].mxu1 }
  0xfa   : > { %v766_v42 = vmul.f32 %v1518_v38, %v529_v39  ;;  %v1160_v43 = vpop.f32.mrb[1].mxu0  ;;  %v796_v44 = vmul.f32 %v1518_v38, %v649_v41  ;;  %v1220_v45 = vpop.f32.mrb[1].mxu1 }
  0xfb   : > { %v532_v46 = vpop.f32.mrb[2].mxu0  ;;  %v652_v47 = vpop.f32.mrb[2].mxu1 }
  0xfc   : > { %v830_v48 = vadd.f32 %v1523_v40, %v766_v42  ;;  %v767_v49 = vmul.f32 %v1518_v38, %v532_v46  ;;  %v1161_v50 = vpop.f32.mrb[3].mxu0  ;;  %v860_v51 = vadd.f32 %v1523_v40, %v796_v44  ;;  %v797_v52 = vmul.f32 %v1518_v38, %v652_v47  ;;  %v1221_v53 = vpop.f32.mrb[3].mxu1 }
  0xfe   : > { %v887_v54 = vmax.f32 %v830_v48, 0.0  ;;  %v831_v55 = vadd.f32 %v1523_v40, %v767_v49  ;;  %v917_v56 = vmax.f32 %v860_v51, 0.0  ;;  %v861_v57 = vadd.f32 %v1523_v40, %v797_v52 }
 0x100   : > { %944 = vst [vmem:[%s1535_s20] sm:$0xff] %v887_v54  ;;  %v888_v58 = vmax.f32 %v831_v55, 0.0  ;;  %974 = vst [vmem:[%s1535_s20 + $0xf0] sm:$0xff] %v917_v56  ;;  %v918_v59 = vmax.f32 %v861_v57, 0.0 }
 0x101   : > { %v537_v60 = vpop.f32.mrb[4].mxu0  ;;  %v657_v61 = vpop.f32.mrb[4].mxu1 }
 0x102   : > { %945 = vst [vmem:[%s1535_s20 + $0x8] sm:$0xff] %v888_v58  ;;  %v768_v62 = vmul.f32 %v1518_v38, %v537_v60  ;;  %v1164_v63 = vpop.f32.mrb[5].mxu0  ;;  %975 = vst [vmem:[%s1535_s20 + $0xf8] sm:$0xff] %v918_v59  ;;  %v798_v0 = vmul.f32 %v1518_v38, %v657_v61  ;;  %v1224_v1 = vpop.f32.mrb[5].mxu1 }
 0x103   : > { %v540_v2 = vpop.f32.mrb[6].mxu0  ;;  %v660_v3 = vpop.f32.mrb[6].mxu1 }
 0x104   : > { %v832_v4 = vadd.f32 %v1523_v40, %v768_v62  ;;  %v769_v5 = vmul.f32 %v1518_v38, %v540_v2  ;;  %v1165_v6 = vpop.f32.mrb[7].mxu0  ;;  %v862_v7 = vadd.f32 %v1523_v40, %v798_v0  ;;  %v799_v8 = vmul.f32 %v1518_v38, %v660_v3  ;;  %v1225_v9 = vpop.f32.mrb[7].mxu1 }
 0x106   : > { %v889_v10 = vmax.f32 %v832_v4, 0.0  ;;  %v833_v11 = vadd.f32 %v1523_v40, %v769_v5  ;;  %v919_v12 = vmax.f32 %v862_v7, 0.0  ;;  %v863_v13 = vadd.f32 %v1523_v40, %v799_v8 }
 0x108   : > { %946 = vst [vmem:[%s1535_s20 + $0x10] sm:$0xff] %v889_v10  ;;  %v890_v14 = vmax.f32 %v833_v11, 0.0  ;;  %976 = vst [vmem:[%s1535_s20 + $0x100] sm:$0xff] %v919_v12  ;;  %v920_v15 = vmax.f32 %v863_v13, 0.0 }
 0x109   : > { %v545_v16 = vpop.f32.mrb[8].mxu0  ;;  %v665_v17 = vpop.f32.mrb[8].mxu1 }
 0x10a   : > { %947 = vst [vmem:[%s1535_s20 + $0x18] sm:$0xff] %v890_v14  ;;  %v770_v18 = vmul.f32 %v1518_v38, %v545_v16  ;;  %v1168_v19 = vpop.f32.mrb[9].mxu0  ;;  %977 = vst [vmem:[%s1535_s20 + $0x108] sm:$0xff] %v920_v15  ;;  %v800_v20 = vmul.f32 %v1518_v38, %v665_v17  ;;  %v1228_v21 = vpop.f32.mrb[9].mxu1 }
 0x10b   : > { %v548_v22 = vpop.f32.mrb[10].mxu0  ;;  %v668_v23 = vpop.f32.mrb[10].mxu1 }
 0x10c   : > { %v834_v24 = vadd.f32 %v1523_v40, %v770_v18  ;;  %v771_v25 = vmul.f32 %v1518_v38, %v548_v22  ;;  %v1169_v26 = vpop.f32.mrb[11].mxu0  ;;  %v864_v27 = vadd.f32 %v1523_v40, %v800_v20  ;;  %v801_v28 = vmul.f32 %v1518_v38, %v668_v23  ;;  %v1229_v29 = vpop.f32.mrb[11].mxu1 }
 0x10e   : > { %v891_v30 = vmax.f32 %v834_v24, 0.0  ;;  %v835_v31 = vadd.f32 %v1523_v40, %v771_v25  ;;  %v921_v32 = vmax.f32 %v864_v27, 0.0  ;;  %v865_v33 = vadd.f32 %v1523_v40, %v801_v28 }
 0x110   : > { %948 = vst [vmem:[%s1535_s20 + $0x20] sm:$0xff] %v891_v30  ;;  %v892_v34 = vmax.f32 %v835_v31, 0.0  ;;  %978 = vst [vmem:[%s1535_s20 + $0x110] sm:$0xff] %v921_v32  ;;  %v922_v35 = vmax.f32 %v865_v33, 0.0 }
 0x111   : > { %v553_v36 = vpop.f32.mrb[12].mxu0  ;;  %v673_v37 = vpop.f32.mrb[12].mxu1 }
 0x112   : > { %949 = vst [vmem:[%s1535_s20 + $0x28] sm:$0xff] %v892_v34  ;;  %v772_v39 = vmul.f32 %v1518_v38, %v553_v36  ;;  %v1172_v41 = vpop.f32.mrb[13].mxu0  ;;  %979 = vst [vmem:[%s1535_s20 + $0x118] sm:$0xff] %v922_v35  ;;  %v802_v42 = vmul.f32 %v1518_v38, %v673_v37  ;;  %v1232_v43 = vpop.f32.mrb[13].mxu1 }
 0x113   : > { %v556_v44 = vpop.f32.mrb[14].mxu0  ;;  %v676_v45 = vpop.f32.mrb[14].mxu1 }
 0x114   : > { %v836_v46 = vadd.f32 %v1523_v40, %v772_v39  ;;  %v773_v47 = vmul.f32 %v1518_v38, %v556_v44  ;;  %v1173_v48 = vpop.f32.mrb[15].mxu0  ;;  %v866_v49 = vadd.f32 %v1523_v40, %v802_v42  ;;  %v803_v50 = vmul.f32 %v1518_v38, %v676_v45  ;;  %v1233_v51 = vpop.f32.mrb[15].mxu1 }
 0x116   : > { %v893_v52 = vmax.f32 %v836_v46, 0.0  ;;  %v837_v53 = vadd.f32 %v1523_v40, %v773_v47  ;;  %v923_v54 = vmax.f32 %v866_v49, 0.0  ;;  %v867_v55 = vadd.f32 %v1523_v40, %v803_v50 }
 0x118   : > { %950 = vst [vmem:[%s1535_s20 + $0x30] sm:$0xff] %v893_v52  ;;  %v894_v56 = vmax.f32 %v837_v53, 0.0  ;;  %980 = vst [vmem:[%s1535_s20 + $0x120] sm:$0xff] %v923_v54  ;;  %v924_v57 = vmax.f32 %v867_v55, 0.0 }
 0x119   : > { %v561_v58 = vpop.f32.mrb[16].mxu0  ;;  %v681_v59 = vpop.f32.mrb[16].mxu1 }
 0x11a   : > { %951 = vst [vmem:[%s1535_s20 + $0x38] sm:$0xff] %v894_v56  ;;  %v774_v60 = vmul.f32 %v1518_v38, %v561_v58  ;;  %v1176_v61 = vpop.f32.mrb[17].mxu0  ;;  %981 = vst [vmem:[%s1535_s20 + $0x128] sm:$0xff] %v924_v57  ;;  %v804_v62 = vmul.f32 %v1518_v38, %v681_v59  ;;  %v1236_v63 = vpop.f32.mrb[17].mxu1 }
 0x11b   : > { %v564_v0 = vpop.f32.mrb[18].mxu0  ;;  %v684_v1 = vpop.f32.mrb[18].mxu1 }
 0x11c   : > { %v838_v2 = vadd.f32 %v1523_v40, %v774_v60  ;;  %v775_v3 = vmul.f32 %v1518_v38, %v564_v0  ;;  %v1177_v4 = vpop.f32.mrb[19].mxu0  ;;  %v868_v5 = vadd.f32 %v1523_v40, %v804_v62  ;;  %v805_v6 = vmul.f32 %v1518_v38, %v684_v1  ;;  %v1237_v7 = vpop.f32.mrb[19].mxu1 }
 0x11e   : > { %v895_v8 = vmax.f32 %v838_v2, 0.0  ;;  %v839_v9 = vadd.f32 %v1523_v40, %v775_v3  ;;  %v925_v10 = vmax.f32 %v868_v5, 0.0  ;;  %v869_v11 = vadd.f32 %v1523_v40, %v805_v6 }
 0x120   : > { %952 = vst [vmem:[%s1535_s20 + $0x40] sm:$0xff] %v895_v8  ;;  %v896_v12 = vmax.f32 %v839_v9, 0.0  ;;  %982 = vst [vmem:[%s1535_s20 + $0x130] sm:$0xff] %v925_v10  ;;  %v926_v13 = vmax.f32 %v869_v11, 0.0 }
 0x121   : > { %v569_v14 = vpop.f32.mrb[20].mxu0  ;;  %v689_v15 = vpop.f32.mrb[20].mxu1 }
 0x122   : > { %953 = vst [vmem:[%s1535_s20 + $0x48] sm:$0xff] %v896_v12  ;;  %v776_v16 = vmul.f32 %v1518_v38, %v569_v14  ;;  %v1180_v17 = vpop.f32.mrb[21].mxu0  ;;  %983 = vst [vmem:[%s1535_s20 + $0x138] sm:$0xff] %v926_v13  ;;  %v806_v18 = vmul.f32 %v1518_v38, %v689_v15  ;;  %v1240_v19 = vpop.f32.mrb[21].mxu1 }
 0x123   : > { %v572_v20 = vpop.f32.mrb[22].mxu0  ;;  %v692_v21 = vpop.f32.mrb[22].mxu1 }
 0x124   : > { %v840_v22 = vadd.f32 %v1523_v40, %v776_v16  ;;  %v777_v23 = vmul.f32 %v1518_v38, %v572_v20  ;;  %v1181_v24 = vpop.f32.mrb[23].mxu0  ;;  %v870_v25 = vadd.f32 %v1523_v40, %v806_v18  ;;  %v807_v26 = vmul.f32 %v1518_v38, %v692_v21  ;;  %v1241_v27 = vpop.f32.mrb[23].mxu1 }
 0x126   : > { %v897_v28 = vmax.f32 %v840_v22, 0.0  ;;  %v841_v29 = vadd.f32 %v1523_v40, %v777_v23  ;;  %v927_v30 = vmax.f32 %v870_v25, 0.0  ;;  %v871_v31 = vadd.f32 %v1523_v40, %v807_v26 }
 0x128   : > { %954 = vst [vmem:[%s1535_s20 + $0x50] sm:$0xff] %v897_v28  ;;  %v898_v32 = vmax.f32 %v841_v29, 0.0  ;;  %984 = vst [vmem:[%s1535_s20 + $0x140] sm:$0xff] %v927_v30  ;;  %v928_v33 = vmax.f32 %v871_v31, 0.0 }
 0x129   : > { %v577_v34 = vpop.f32.mrb[24].mxu0  ;;  %v697_v35 = vpop.f32.mrb[24].mxu1 }
 0x12a   : > { %955 = vst [vmem:[%s1535_s20 + $0x58] sm:$0xff] %v898_v32  ;;  %v778_v36 = vmul.f32 %v1518_v38, %v577_v34  ;;  %v1184_v37 = vpop.f32.mrb[25].mxu0  ;;  %985 = vst [vmem:[%s1535_s20 + $0x148] sm:$0xff] %v928_v33  ;;  %v808_v39 = vmul.f32 %v1518_v38, %v697_v35  ;;  %v1244_v41 = vpop.f32.mrb[25].mxu1 }
 0x12b   : > { %v580_v42 = vpop.f32.mrb[26].mxu0  ;;  %v700_v43 = vpop.f32.mrb[26].mxu1 }
 0x12c   : > { %v842_v44 = vadd.f32 %v1523_v40, %v778_v36  ;;  %v779_v45 = vmul.f32 %v1518_v38, %v580_v42  ;;  %v1185_v46 = vpop.f32.mrb[27].mxu0  ;;  %v872_v47 = vadd.f32 %v1523_v40, %v808_v39  ;;  %v809_v48 = vmul.f32 %v1518_v38, %v700_v43  ;;  %v1245_v49 = vpop.f32.mrb[27].mxu1 }
 0x12e   : > { %v899_v50 = vmax.f32 %v842_v44, 0.0  ;;  %v843_v51 = vadd.f32 %v1523_v40, %v779_v45  ;;  %v929_v52 = vmax.f32 %v872_v47, 0.0  ;;  %v873_v53 = vadd.f32 %v1523_v40, %v809_v48 }
 0x130   : > { %956 = vst [vmem:[%s1535_s20 + $0x60] sm:$0xff] %v899_v50  ;;  %v900_v54 = vmax.f32 %v843_v51, 0.0  ;;  %986 = vst [vmem:[%s1535_s20 + $0x150] sm:$0xff] %v929_v52  ;;  %v930_v55 = vmax.f32 %v873_v53, 0.0 }
 0x131   : > { %v585_v56 = vpop.f32.mrb[28].mxu0  ;;  %v705_v57 = vpop.f32.mrb[28].mxu1 }
 0x132   : > { %957 = vst [vmem:[%s1535_s20 + $0x68] sm:$0xff] %v900_v54  ;;  %v780_v58 = vmul.f32 %v1518_v38, %v585_v56  ;;  %v1188_v59 = vpop.f32.mrb[29].mxu0  ;;  %987 = vst [vmem:[%s1535_s20 + $0x158] sm:$0xff] %v930_v55  ;;  %v810_v60 = vmul.f32 %v1518_v38, %v705_v57  ;;  %v1248_v61 = vpop.f32.mrb[29].mxu1 }
 0x133   : > { %v588_v62 = vpop.f32.mrb[30].mxu0  ;;  %v708_v63 = vpop.f32.mrb[30].mxu1 }
 0x134   : > { %v844_v0 = vadd.f32 %v1523_v40, %v780_v58  ;;  %v781_v1 = vmul.f32 %v1518_v38, %v588_v62  ;;  %v1189_v2 = vpop.f32.mrb[31].mxu0  ;;  %v874_v3 = vadd.f32 %v1523_v40, %v810_v60  ;;  %v811_v4 = vmul.f32 %v1518_v38, %v708_v63  ;;  %v1249_v5 = vpop.f32.mrb[31].mxu1 }
 0x136   : > { %v901_v6 = vmax.f32 %v844_v0, 0.0  ;;  %v845_v7 = vadd.f32 %v1523_v40, %v781_v1  ;;  %v931_v8 = vmax.f32 %v874_v3, 0.0  ;;  %v875_v9 = vadd.f32 %v1523_v40, %v811_v4 }
 0x138   : > { %958 = vst [vmem:[%s1535_s20 + $0x70] sm:$0xff] %v901_v6  ;;  %v902_v10 = vmax.f32 %v845_v7, 0.0  ;;  %988 = vst [vmem:[%s1535_s20 + $0x160] sm:$0xff] %v931_v8  ;;  %v932_v11 = vmax.f32 %v875_v9, 0.0 }
 0x139   : > { %v593_v12 = vpop.f32.mrb[32].mxu0  ;;  %v713_v13 = vpop.f32.mrb[32].mxu1 }
 0x13a   : > { %959 = vst [vmem:[%s1535_s20 + $0x78] sm:$0xff] %v902_v10  ;;  %v782_v14 = vmul.f32 %v1518_v38, %v593_v12  ;;  %v1192_v15 = vpop.f32.mrb[33].mxu0  ;;  %989 = vst [vmem:[%s1535_s20 + $0x168] sm:$0xff] %v932_v11  ;;  %v812_v16 = vmul.f32 %v1518_v38, %v713_v13  ;;  %v1252_v17 = vpop.f32.mrb[33].mxu1 }
 0x13b   : > { %v596_v18 = vpop.f32.mrb[34].mxu0  ;;  %v716_v19 = vpop.f32.mrb[34].mxu1 }
 0x13c   : > { %v846_v20 = vadd.f32 %v1523_v40, %v782_v14  ;;  %v783_v21 = vmul.f32 %v1518_v38, %v596_v18  ;;  %v1193_v22 = vpop.f32.mrb[35].mxu0  ;;  %v876_v23 = vadd.f32 %v1523_v40, %v812_v16  ;;  %v813_v24 = vmul.f32 %v1518_v38, %v716_v19  ;;  %v1253_v25 = vpop.f32.mrb[35].mxu1 }
 0x13e   : > { %v903_v26 = vmax.f32 %v846_v20, 0.0  ;;  %v847_v27 = vadd.f32 %v1523_v40, %v783_v21  ;;  %v933_v28 = vmax.f32 %v876_v23, 0.0  ;;  %v877_v29 = vadd.f32 %v1523_v40, %v813_v24 }
 0x140   : > { %960 = vst [vmem:[%s1535_s20 + $0x80] sm:$0xff] %v903_v26  ;;  %v904_v30 = vmax.f32 %v847_v27, 0.0  ;;  %990 = vst [vmem:[%s1535_s20 + $0x170] sm:$0xff] %v933_v28  ;;  %v934_v31 = vmax.f32 %v877_v29, 0.0 }
 0x141   : > { %v601_v32 = vpop.f32.mrb[36].mxu0  ;;  %v721_v33 = vpop.f32.mrb[36].mxu1 }
 0x142   : > { %961 = vst [vmem:[%s1535_s20 + $0x88] sm:$0xff] %v904_v30  ;;  %v784_v34 = vmul.f32 %v1518_v38, %v601_v32  ;;  %v1196_v35 = vpop.f32.mrb[37].mxu0  ;;  %991 = vst [vmem:[%s1535_s20 + $0x178] sm:$0xff] %v934_v31  ;;  %v814_v36 = vmul.f32 %v1518_v38, %v721_v33  ;;  %v1256_v37 = vpop.f32.mrb[37].mxu1 }
 0x143   : > { %v604_v39 = vpop.f32.mrb[38].mxu0  ;;  %v724_v41 = vpop.f32.mrb[38].mxu1 }
 0x144   : > { %v848_v42 = vadd.f32 %v1523_v40, %v784_v34  ;;  %v785_v43 = vmul.f32 %v1518_v38, %v604_v39  ;;  %v1197_v44 = vpop.f32.mrb[39].mxu0  ;;  %v878_v45 = vadd.f32 %v1523_v40, %v814_v36  ;;  %v815_v46 = vmul.f32 %v1518_v38, %v724_v41  ;;  %v1257_v47 = vpop.f32.mrb[39].mxu1 }
 0x146   : > { %v905_v48 = vmax.f32 %v848_v42, 0.0  ;;  %v849_v49 = vadd.f32 %v1523_v40, %v785_v43  ;;  %v935_v50 = vmax.f32 %v878_v45, 0.0  ;;  %v879_v51 = vadd.f32 %v1523_v40, %v815_v46 }
 0x148   : > { %962 = vst [vmem:[%s1535_s20 + $0x90] sm:$0xff] %v905_v48  ;;  %v906_v52 = vmax.f32 %v849_v49, 0.0  ;;  %992 = vst [vmem:[%s1535_s20 + $0x180] sm:$0xff] %v935_v50  ;;  %v936_v53 = vmax.f32 %v879_v51, 0.0 }
 0x149   : > { %v609_v54 = vpop.f32.mrb[40].mxu0  ;;  %v729_v55 = vpop.f32.mrb[40].mxu1 }
 0x14a   : > { %963 = vst [vmem:[%s1535_s20 + $0x98] sm:$0xff] %v906_v52  ;;  %v786_v56 = vmul.f32 %v1518_v38, %v609_v54  ;;  %v1200_v57 = vpop.f32.mrb[41].mxu0  ;;  %993 = vst [vmem:[%s1535_s20 + $0x188] sm:$0xff] %v936_v53  ;;  %v816_v58 = vmul.f32 %v1518_v38, %v729_v55  ;;  %v1260_v59 = vpop.f32.mrb[41].mxu1 }
 0x14b   : > { %v612_v60 = vpop.f32.mrb[42].mxu0  ;;  %v732_v61 = vpop.f32.mrb[42].mxu1 }
 0x14c   : > { %v850_v62 = vadd.f32 %v1523_v40, %v786_v56  ;;  %v787_v63 = vmul.f32 %v1518_v38, %v612_v60  ;;  %v1201_v0 = vpop.f32.mrb[43].mxu0  ;;  %v880_v1 = vadd.f32 %v1523_v40, %v816_v58  ;;  %v817_v2 = vmul.f32 %v1518_v38, %v732_v61  ;;  %v1261_v3 = vpop.f32.mrb[43].mxu1 }
 0x14e   : > { %v907_v4 = vmax.f32 %v850_v62, 0.0  ;;  %v851_v5 = vadd.f32 %v1523_v40, %v787_v63  ;;  %v937_v6 = vmax.f32 %v880_v1, 0.0  ;;  %v881_v7 = vadd.f32 %v1523_v40, %v817_v2 }
 0x150   : > { %964 = vst [vmem:[%s1535_s20 + $0xa0] sm:$0xff] %v907_v4  ;;  %v908_v8 = vmax.f32 %v851_v5, 0.0  ;;  %994 = vst [vmem:[%s1535_s20 + $0x190] sm:$0xff] %v937_v6  ;;  %v938_v9 = vmax.f32 %v881_v7, 0.0 }
 0x151   : > { %v617_v10 = vpop.f32.mrb[44].mxu0  ;;  %v737_v11 = vpop.f32.mrb[44].mxu1 }
 0x152   : > { %965 = vst [vmem:[%s1535_s20 + $0xa8] sm:$0xff] %v908_v8  ;;  %v788_v12 = vmul.f32 %v1518_v38, %v617_v10  ;;  %v1204_v13 = vpop.f32.mrb[45].mxu0  ;;  %995 = vst [vmem:[%s1535_s20 + $0x198] sm:$0xff] %v938_v9  ;;  %v818_v14 = vmul.f32 %v1518_v38, %v737_v11  ;;  %v1264_v15 = vpop.f32.mrb[45].mxu1 }
 0x153   : > { %v620_v16 = vpop.f32.mrb[46].mxu0  ;;  %v740_v17 = vpop.f32.mrb[46].mxu1 }
 0x154   : > { %v852_v18 = vadd.f32 %v1523_v40, %v788_v12  ;;  %v789_v19 = vmul.f32 %v1518_v38, %v620_v16  ;;  %v1205_v20 = vpop.f32.mrb[47].mxu0  ;;  %v882_v21 = vadd.f32 %v1523_v40, %v818_v14  ;;  %v819_v22 = vmul.f32 %v1518_v38, %v740_v17  ;;  %v1265_v23 = vpop.f32.mrb[47].mxu1 }
 0x156   : > { %v909_v24 = vmax.f32 %v852_v18, 0.0  ;;  %v853_v25 = vadd.f32 %v1523_v40, %v789_v19  ;;  %v939_v26 = vmax.f32 %v882_v21, 0.0  ;;  %v883_v27 = vadd.f32 %v1523_v40, %v819_v22 }
 0x158   : > { %966 = vst [vmem:[%s1535_s20 + $0xb0] sm:$0xff] %v909_v24  ;;  %v910_v28 = vmax.f32 %v853_v25, 0.0  ;;  %996 = vst [vmem:[%s1535_s20 + $0x1a0] sm:$0xff] %v939_v26  ;;  %v940_v29 = vmax.f32 %v883_v27, 0.0 }
 0x159   : > { %v625_v30 = vpop.f32.mrb[48].mxu0  ;;  %v745_v31 = vpop.f32.mrb[48].mxu1 }
 0x15a   : > { %967 = vst [vmem:[%s1535_s20 + $0xb8] sm:$0xff] %v910_v28  ;;  %v790_v32 = vmul.f32 %v1518_v38, %v625_v30  ;;  %v1208_v33 = vpop.f32.mrb[49].mxu0  ;;  %997 = vst [vmem:[%s1535_s20 + $0x1a8] sm:$0xff] %v940_v29  ;;  %v820_v34 = vmul.f32 %v1518_v38, %v745_v31  ;;  %v1268_v35 = vpop.f32.mrb[49].mxu1 }
 0x15b   : > { %v628_v36 = vpop.f32.mrb[50].mxu0  ;;  %v748_v37 = vpop.f32.mrb[50].mxu1 }
 0x15c   : > { %v854_v39 = vadd.f32 %v1523_v40, %v790_v32  ;;  %v791_v41 = vmul.f32 %v1518_v38, %v628_v36  ;;  %v1209_v42 = vpop.f32.mrb[51].mxu0  ;;  %v884_v43 = vadd.f32 %v1523_v40, %v820_v34  ;;  %v821_v44 = vmul.f32 %v1518_v38, %v748_v37  ;;  %v1269_v45 = vpop.f32.mrb[51].mxu1 }
 0x15e   : > { %v911_v46 = vmax.f32 %v854_v39, 0.0  ;;  %v855_v47 = vadd.f32 %v1523_v40, %v791_v41  ;;  %v941_v48 = vmax.f32 %v884_v43, 0.0  ;;  %v885_v49 = vadd.f32 %v1523_v40, %v821_v44 }
 0x160   : > { %968 = vst [vmem:[%s1535_s20 + $0xc0] sm:$0xff] %v911_v46  ;;  %v912_v50 = vmax.f32 %v855_v47, 0.0  ;;  %998 = vst [vmem:[%s1535_s20 + $0x1b0] sm:$0xff] %v941_v48  ;;  %v942_v51 = vmax.f32 %v885_v49, 0.0 }
 0x161   : > { %v633_v52 = vpop.f32.mrb[52].mxu0  ;;  %v753_v53 = vpop.f32.mrb[52].mxu1 }
 0x162   : > { %969 = vst [vmem:[%s1535_s20 + $0xc8] sm:$0xff] %v912_v50  ;;  %v792_v54 = vmul.f32 %v1518_v38, %v633_v52  ;;  %v1212_v55 = vpop.f32.mrb[53].mxu0  ;;  %999 = vst [vmem:[%s1535_s20 + $0x1b8] sm:$0xff] %v942_v51  ;;  %v822_v56 = vmul.f32 %v1518_v38, %v753_v53  ;;  %v1272_v57 = vpop.f32.mrb[53].mxu1 }
 0x163   : > { %v636_v58 = vpop.f32.mrb[54].mxu0  ;;  %v756_v59 = vpop.f32.mrb[54].mxu1 }
 0x164   : > { %v856_v60 = vadd.f32 %v1523_v40, %v792_v54  ;;  %v793_v61 = vmul.f32 %v1518_v38, %v636_v58  ;;  %v1213_v62 = vpop.f32.mrb[55].mxu0  ;;  %v886_v63 = vadd.f32 %v1523_v40, %v822_v56  ;;  %v1273_v0 = vpop.f32.mrb[55].mxu1 }
 0x166   : > { %v913_v1 = vmax.f32 %v856_v60, 0.0  ;;  %v857_v2 = vadd.f32 %v1523_v40, %v793_v61  ;;  %v943_v3 = vmax.f32 %v886_v63, 0.0 }
 0x168   : > { %970 = vst [vmem:[%s1535_s20 + $0xd0] sm:$0xff] %v913_v1  ;;  %v914_v4 = vmax.f32 %v857_v2, 0.0  ;;  %1000 = vst [vmem:[%s1535_s20 + $0x1c0] sm:$0xff] %v943_v3 }
 0x169   : > { %v641_v5 = vpop.f32.mrb[56].mxu0 }
 0x16a   : > { %971 = vst [vmem:[%s1535_s20 + $0xd8] sm:$0xff] %v914_v4  ;;  %v794_v6 = vmul.f32 %v1518_v38, %v641_v5  ;;  %v1216_v7 = vpop.f32.mrb[57].mxu0 }
 0x16b   : > { %v644_v8 = vpop.f32.mrb[58].mxu0 }
 0x16c   : > { %v858_v9 = vadd.f32 %v1523_v40, %v794_v6  ;;  %v795_v10 = vmul.f32 %v1518_v38, %v644_v8  ;;  %v1217_v11 = vpop.f32.mrb[59].mxu0 }
 0x16e   : > { %v915_v12 = vmax.f32 %v858_v9, 0.0  ;;  %v859_v13 = vadd.f32 %v1523_v40, %v795_v10 }
 0x170   : > { %972 = vst [vmem:[%s1535_s20 + $0xe0] sm:$0xff] %v915_v12  ;;  %v916_v14 = vmax.f32 %v859_v13, 0.0 }
 0x172   : > { %973 = vst [vmem:[%s1535_s20 + $0xe8] sm:$0xff] %v916_v14 }
 0x173 PF: > { %s14_s15 = sadd.s32 1, %s1343_s15  }
 0x174   : > { %p11_p4 = scmp.ge.s32.totalorder %s14_s15, 5  }
 0x176   :  { %13 = sbr.rel (!%p11_p4) target bundleno = 1 (0x1), region = 66 }

// kernel: lnn_forward.6
= control target key start
LH: loop header
LB: loop body
LE: loop exit
PB: predicated region body
PF: predicated region fallthrough
CT: control target
= control target key end

     0   :  { %s3304_s15 = smov 0   ;;  %s3927_s0 = inlined_call_operand.vmem [shape: bf16[400,1152], index: 0, kind: input, shape index: {}]   ;;  %s3928_s1 = inlined_call_operand.vmem [shape: bf16[1152,128], index: 1, kind: input, shape index: {}]   ;;  %s3929_s2 = inlined_call_operand.vmem [shape: f32[1,128], index: 2, kind: input, shape index: {}]   ;;  %s3930_s3 = inlined_call_operand.vmem [shape: f32[1,128], index: 3, kind: input, shape index: {}]   ;;  %s3931_s4 = inlined_call_operand.vmem [shape: f32[400,128], index: 4, kind: output, shape index: {}]  }
   0x1 LB: > { %s2340_s16 = sadd.s32 4294967295, %s3275_s15   ;;  %p2344_p0 = scmp.ge.s32.totalorder %s3275_s15, 1  ;;  %s3275_s15 = sphi %s3304_s15, %s14_s15  }
   0x2   : > { %p164_p1 = scmp.lt.s32.totalorder %s3275_s15, 3 }
   0x4   : > { %p165_p2 = pnand %p2344_p0, %p164_p1 }
   0x5   : > { %v3032_v0 = vld [vmem:[%s3928_s1 + $0x40] sm:$0xff] (!%p165_p2)   ;;  %s191_s19 = smul.u32 (!%p165_p2), 25, %s2340_s16  ;;  %v3034_v2 = vld [vmem:[%s3928_s1 + $0x48] sm:$0xff] (!%p165_p2)   ;;  %v3036_v4 = vld [vmem:[%s3928_s1 + $0x50] sm:$0xff] (!%p165_p2)   ;;  %vm3278_vm0 = vmmov (!%p165_p2), 0  }
   0x6   : > { %168 = sbr.rel (%p165_p2) target bundleno = 515 (0x203), region = 36  ;;  %v3033_v1 = vld [vmem:[%s3928_s1] sm:$0xff] (!%p165_p2)   ;;  %2540 = vmatprep.subr.bf16.mxu0 (!%p165_p2), %v3032_v0  ;;  %3005 = vmatprep.subr.bf16.mxu1 (!%p165_p2), %v3032_v0  ;;  %v3035_v3 = vld [vmem:[%s3928_s1 + $0x8] sm:$0xff] (!%p165_p2)   ;;  %v3037_v5 = vld [vmem:[%s3928_s1 + $0x10] sm:$0xff] (!%p165_p2)  }
   0x7   : > { %p192_p3 = scmp.lt.s32.totalorder (!%p165_p2), %s191_s19, 49  ;;  %2541 = vmatpush3.bf16.msra.mxu0 (!%p165_p2), %v3033_v1  ;;  %3013 = vmatpush3.bf16.msra.mxu1 (!%p165_p2), %v3033_v1  ;;  %v3038_v6 = vld [vmem:[%s3928_s1 + $0x58] sm:$0xff] (!%p165_p2)   ;;  %v3040_v8 = vld [vmem:[%s3928_s1 + $0x60] sm:$0xff] (!%p165_p2)   ;;  %v3042_v10 = vld [vmem:[%s3928_s1 + $0x68] sm:$0xff] (!%p165_p2)  }
   0x8   : > { %2542 = vmatprep.subr.bf16.mxu0 (!%p165_p2), %v3034_v2  ;;  %3006 = vmatprep.subr.bf16.mxu1 (!%p165_p2), %v3034_v2  ;;  %v3039_v7 = vld [vmem:[%s3928_s1 + $0x18] sm:$0xff] (!%p165_p2)   ;;  %v3041_v9 = vld [vmem:[%s3928_s1 + $0x20] sm:$0xff] (!%p165_p2)   ;;  %v3043_v13 = vld [vmem:[%s3928_s1 + $0x28] sm:$0xff] (!%p165_p2)  }
   0x9   : > { %v3044_v14 = vld [vmem:[%s3928_s1 + $0x70] sm:$0xff] (!%p165_p2)   ;;  %v3046_v16 = vld [vmem:[%s3928_s1 + $0x78] sm:$0xff] (!%p165_p2)   ;;  %v3054_v18 = vld [vmem:[%s3928_s1 + $0x140] sm:$0xff] (!%p165_p2)  }
   0xa   : > { %v3045_v15 = vld [vmem:[%s3928_s1 + $0x30] sm:$0xff] (!%p165_p2)   ;;  %v3047_v17 = vld [vmem:[%s3928_s1 + $0x38] sm:$0xff] (!%p165_p2)   ;;  %v3056_v21 = vld [vmem:[%s3928_s1 + $0xc0] sm:$0xff] (!%p165_p2)  }
   0xb   : > { %2543 = vmatpush3.bf16.msra.mxu0 (!%p165_p2), %v3035_v3  ;;  %3014 = vmatpush3.bf16.msra.mxu1 (!%p165_p2), %v3035_v3  ;;  %v3055_v22 = vld [vmem:[%s3928_s1 + $0x100] sm:$0xff] (!%p165_p2)   ;;  %v3062_v26 = vld [vmem:[%s3928_s1 + $0x148] sm:$0xff] (!%p165_p2)   ;;  %v3068_v30 = vld [vmem:[%s3928_s1 + $0x150] sm:$0xff] (!%p165_p2)  }
   0xc   : > { %2544 = vmatprep.subr.bf16.mxu0 (!%p165_p2), %v3036_v4  ;;  %3007 = vmatprep.subr.bf16.mxu1 (!%p165_p2), %v3036_v4  ;;  %v3057_v23 = vld [vmem:[%s3928_s1 + $0x80] sm:$0xff] (!%p165_p2)   ;;  %v3066_v27 = vld [vmem:[%s3928_s1 + $0xc8] sm:$0xff] (!%p165_p2)   ;;  %v3073_v33 = vld [vmem:[%s3928_s1 + $0xd0] sm:$0xff] (!%p165_p2)  }
   0xd   : > { %s3933_s19 = smov (!%p192_p3, %s191_s19), 49  ;;  %v3065_v28 = vld [vmem:[%s3928_s1 + $0x108] sm:$0xff]   ;;  %v3074_v36 = vld [vmem:[%s3928_s1 + $0x110] sm:$0xff]   ;;  %v3078_v38 = vld [vmem:[%s3928_s1 + $0xd8] sm:$0xff]  }
   0xe   : > { %s3021_s6 = smul.u32 36, %s3933_s19  ;;  %v3067_v29 = vld [vmem:[%s3928_s1 + $0x88] sm:$0xff]   ;;  %v3077_v37 = vld [vmem:[%s3928_s1 + $0x90] sm:$0xff]   ;;  %v3079_v39 = vld [vmem:[%s3928_s1 + $0x158] sm:$0xff]   ;;  %s2346_s30 = sshll.u32 %s3933_s19, 3 }
   0xf   : > { %2545 = vmatpush3.bf16.msra.mxu0 %v3037_v5  ;;  %3015 = vmatpush3.bf16.msra.mxu1 %v3037_v5  ;;  %v3080_v40 = vld [vmem:[%s3928_s1 + $0x98] sm:$0xff]   ;;  %v3088_v44 = vld [vmem:[%s3928_s1 + $0xe0] sm:$0xff]   ;;  %v3098_v50 = vld [vmem:[%s3928_s1 + $0xe8] sm:$0xff]   ;;  %s3828_s7 = scalar_lea.vmem %s3931_s4, %s2346_s30 }
  0x10   : > { %2546 = vmatprep.subr.bf16.mxu0 %v3038_v6  ;;  %3008 = vmatprep.subr.bf16.mxu1 %v3038_v6  ;;  %s3345_s13 = scalar_lea.vmem %s3927_s0, %s3021_s6  ;;  %v3081_v41 = vld [vmem:[%s3928_s1 + $0x118] sm:$0xff]   ;;  %v3090_v45 = vld [vmem:[%s3928_s1 + $0x160] sm:$0xff]   ;;  %v3099_v51 = vld [vmem:[%s3928_s1 + $0xa8] sm:$0xff]  }
  0x11   : > { %v3050_v11 = vld [vmem:[%s3345_s13 + $0x4] ss:$36 sps:$4 sm:$0xff]   ;;  %v3053_v12 = vld [vmem:[%s3345_s13 + $0x1fc] ss:$36 sps:$4 sm:$0xff]   ;;  %v3058_v24 = vld [vmem:[%s3345_s13 + $0x4c] ss:$36 sps:$4 sm:$0xff]  }
  0x12   : > { %1522 = vmatprep.mubr.bf16.mxu0 %v3050_v11  ;;  %1578 = vmatprep.mubr.bf16.mxu1 %v3053_v12  ;;  %v3048_v19 = vld [vmem:[%s3345_s13] ss:$36 sps:$4 sm:$0xff]   ;;  %v3051_v20 = vld [vmem:[%s3345_s13 + $0x1f8] ss:$36 sps:$4 sm:$0xff]   ;;  %v3063_v31 = vld [vmem:[%s3345_s13 + $0x48] ss:$36 sps:$4 sm:$0xff]  }
  0x13   : > { %2547 = vmatpush3.bf16.msra.mxu0 %v3039_v7  ;;  %3016 = vmatpush3.bf16.msra.mxu1 %v3039_v7  ;;  %v3060_v25 = vld [vmem:[%s3345_s13 + $0x244] ss:$36 sps:$4 sm:$0xff]   ;;  %v3069_v34 = vld [vmem:[%s3345_s13 + $0x94] ss:$36 sps:$4 sm:$0xff]   ;;  %v3071_v35 = vld [vmem:[%s3345_s13 + $0x28c] ss:$36 sps:$4 sm:$0xff]  }
  0x14   : > { %2548 = vmatprep.subr.bf16.mxu0 %v3040_v8  ;;  %3009 = vmatprep.subr.bf16.mxu1 %v3040_v8  ;;  %v3064_v32 = vld [vmem:[%s3345_s13 + $0x240] ss:$36 sps:$4 sm:$0xff]   ;;  %v3075_v42 = vld [vmem:[%s3345_s13 + $0x90] ss:$36 sps:$4 sm:$0xff]   ;;  %v3076_v43 = vld [vmem:[%s3345_s13 + $0x288] ss:$36 sps:$4 sm:$0xff]  }
  0x15   : > { %v3082_v46 = vld [vmem:[%s3345_s13 + $0xdc] ss:$36 sps:$4 sm:$0xff]   ;;  %v3084_v47 = vld [vmem:[%s3345_s13 + $0x2d4] ss:$36 sps:$4 sm:$0xff]   ;;  %v3100_v53 = vld [vmem:[%s3928_s1 + $0x168] sm:$0xff]   ;;  %v3277_v11 = vmov 0.0  }
  0x16   : > { %v3089_v48 = vld [vmem:[%s3928_s1 + $0xa0] sm:$0xff]   ;;  %v3086_v52 = vld [vmem:[%s3345_s13 + $0xd8] ss:$36 sps:$4 sm:$0xff]   ;;  %v3101_v54 = vld [vmem:[%s3928_s1 + $0x128] sm:$0xff]  }
  0x17   : > { %2549 = vmatpush3.bf16.msra.mxu0 %v3041_v9  ;;  %3017 = vmatpush3.bf16.msra.mxu1 %v3041_v9  ;;  %v3091_v49 = vld [vmem:[%s3928_s1 + $0x120] sm:$0xff]   ;;  %v3087_v55 = vld [vmem:[%s3345_s13 + $0x2d0] ss:$36 sps:$4 sm:$0xff]   ;;  %v3111_v63 = vld [vmem:[%s3928_s1 + $0xf8] sm:$0xff]  }
  0x18   : > { %2550 = vmatprep.subr.bf16.mxu0 %v3042_v10  ;;  %3010 = vmatprep.subr.bf16.mxu1 %v3042_v10  ;;  %v3092_v56 = vld [vmem:[%s3345_s13 + $0x124] ss:$36 sps:$4 sm:$0xff]   ;;  %v3094_v57 = vld [vmem:[%s3345_s13 + $0x31c] ss:$36 sps:$4 sm:$0xff]   ;;  %v3105_v58 = vld [vmem:[%s3928_s1 + $0xf0] sm:$0xff]  }
  0x19   : > { %v3108_v59 = vld [vmem:[%s3928_s1 + $0xb0] sm:$0xff]   ;;  %v325_v61 = vld [vmem:[%s3345_s13 + $0x360] sm:$0xff]  ;;  %v3112_v0 = vld [vmem:[%s3928_s1 + $0xb8] sm:$0xff]  }
  0x1a   : > { %v3109_v60 = vld [vmem:[%s3928_s1 + $0x170] sm:$0xff]   ;;  %v3096_v1 = vld [vmem:[%s3345_s13 + $0x120] ss:$36 sps:$4 sm:$0xff]   ;;  %v3097_v2 = vld [vmem:[%s3345_s13 + $0x318] ss:$36 sps:$4 sm:$0xff]   ;;  %v2456_v4 = vcombine.high %v325_v61, %v325_v61  ;;  %v2455_v9 = vcombine.low %v325_v61, %v325_v61 }
  0x1b   : > { %2551 = vmatpush3.bf16.msra.mxu0 %v3043_v13  ;;  %3018 = vmatpush3.bf16.msra.mxu1 %v3043_v13  ;;  %v3110_v62 = vld [vmem:[%s3928_s1 + $0x130] sm:$0xff]   ;;  %v3119_v5 = vld [vmem:[%s3928_s1 + $0x178] sm:$0xff]   ;;  %v3121_v7 = vld [vmem:[%s3928_s1 + $0x1c0] sm:$0xff]  }
  0x1c   : > { %2552 = vmatprep.subr.bf16.mxu0 %v3044_v14  ;;  %3011 = vmatprep.subr.bf16.mxu1 %v3044_v14  ;;  %v3102_v3 = vld [vmem:[%s3345_s13 + $0x16c] ss:$36 sps:$4 sm:$0xff]   ;;  %v3120_v6 = vld [vmem:[%s3928_s1 + $0x138] sm:$0xff]  }
  0x1d   : > { %v3106_v8 = vld [vmem:[%s3345_s13 + $0x168] ss:$36 sps:$4 sm:$0xff]   ;;  %v3113_v10 = vld [vmem:[%s3345_s13 + $0x1b4] ss:$36 sps:$4 sm:$0xff]  }
  0x1e   : > { %v3117_v12 = vld [vmem:[%s3345_s13 + $0xc] ss:$36 sps:$4 sm:$0xff]   ;;  %v3167_v61 = vld [vmem:[%s3345_s13 + $0x178] ss:$36 sps:$4 sm:$0xff]  }
  0x1f   : > { %2553 = vmatpush3.bf16.msra.mxu0 %v3045_v15  ;;  %3019 = vmatpush3.bf16.msra.mxu1 %v3045_v15  ;;  %v3115_v13 = vld [vmem:[%s3345_s13 + $0x8] ss:$36 sps:$4 sm:$0xff]   ;;  %v3118_v14 = vld [vmem:[%s3345_s13 + $0x1b0] ss:$36 sps:$4 sm:$0xff]   ;;  %v3122_v15 = vld [vmem:[%s3928_s1 + $0x180] sm:$0xff]  }
  0x20   : > { %2554 = vmatprep.subr.bf16.mxu0 %v3046_v16  ;;  %3012 = vmatprep.subr.bf16.mxu1 %v3046_v16  ;;  %v3123_v16 = vld [vmem:[%s3345_s13 + $0x54] ss:$36 sps:$4 sm:$0xff]  }
  0x23   : > { %2555 = vmatpush3.bf16.msra.mxu0 %v3047_v17  ;;  %3020 = vmatpush3.bf16.msra.mxu1 %v3047_v17  ;;  %v3127_v17 = vld [vmem:[%s3345_s13 + $0x14] ss:$36 sps:$4 sm:$0xff]  }
  0x24   : > { %2728 = vmatprep.subr.bf16.mxu0 %v3054_v18  ;;  %2634 = vmatprep.subr.bf16.mxu1 %v3056_v21  ;;  %v3136_v18 = vld [vmem:[%s3928_s1 + $0x1c8] sm:$0xff]   ;;  %v3125_v21 = vld [vmem:[%s3345_s13 + $0x10] ss:$36 sps:$4 sm:$0xff]  }
  0x26   : > { %1523 = vmatmul.mubr.bf16.vlgmr.msra.gmra.mrb[0].mxu0 %v3048_v19  ;;  %1579 = vmatmul.mubr.bf16.vlgmr.msra.gmra.mrb[0].mxu1 %v3051_v20  ;;  %v3137_v19 = vld [vmem:[%s3928_s1 + $0x188] sm:$0xff]   ;;  %v3145_v20 = vld [vmem:[%s3928_s1 + $0x1d0] sm:$0xff]  }
  0x27   : > { %2729 = vmatpush3.bf16.msra.mxu0 %v3055_v22  ;;  %2635 = vmatpush3.bf16.msra.mxu1 %v3057_v23  ;;  %v3128_v22 = vld [vmem:[%s3345_s13 + $0x50] ss:$36 sps:$4 sm:$0xff]   ;;  %v3129_v23 = vld [vmem:[%s3928_s1 + $0x200] sm:$0xff]  }
  0x28   : > { %1530 = vmatprep.mubr.bf16.mxu0 %v3058_v24  ;;  %1586 = vmatprep.mubr.bf16.mxu1 %v3060_v25  ;;  %v3130_v24 = vld [vmem:[%s3345_s13 + $0x9c] ss:$36 sps:$4 sm:$0xff]  }
  0x29   : > { %2730 = vmatprep.subr.bf16.mxu0 %v3062_v26  ;;  %2636 = vmatprep.subr.bf16.mxu1 %v3066_v27  ;;  %v3132_v25 = vld [vmem:[%s3345_s13 + $0x5c] ss:$36 sps:$4 sm:$0xff]   ;;  %v3146_v26 = vld [vmem:[%s3928_s1 + $0x190] sm:$0xff]  }
  0x2a   : > { %v3160_v27 = vld [vmem:[%s3928_s1 + $0x1d8] sm:$0xff]  }
  0x2b   : > { %2731 = vmatpush3.bf16.msra.mxu0 %v3065_v28  ;;  %2637 = vmatpush3.bf16.msra.mxu1 %v3067_v29  ;;  %v3138_v28 = vld [vmem:[%s3928_s1 + $0x208] sm:$0xff]   ;;  %v3134_v29 = vld [vmem:[%s3345_s13 + $0x98] ss:$36 sps:$4 sm:$0xff]  }
  0x2c   : > { %2732 = vmatprep.subr.bf16.mxu0 %v3068_v30  ;;  %2638 = vmatprep.subr.bf16.mxu1 %v3073_v33  ;;  %v3135_v30 = vld [vmem:[%s3345_s13 + $0x58] ss:$36 sps:$4 sm:$0xff]   ;;  %v3141_v33 = vld [vmem:[%s3345_s13 + $0xa4] ss:$36 sps:$4 sm:$0xff]  }
  0x2e   : > { %1531 = vmatmul.mubr.bf16.gmra.mrb[4].mxu0 %v3063_v31  ;;  %1587 = vmatmul.mubr.bf16.gmra.mrb[4].mxu1 %v3064_v32  ;;  %v3161_v31 = vld [vmem:[%s3928_s1 + $0x198] sm:$0xff]   ;;  %v3139_v32 = vld [vmem:[%s3345_s13 + $0xe4] ss:$36 sps:$4 sm:$0xff]  }
  0x2f   : > { %1538 = vmatprep.mubr.bf16.mxu0 %v3069_v34  ;;  %1594 = vmatprep.mubr.bf16.mxu1 %v3071_v35  ;;  %v3153_v34 = vld [vmem:[%s3928_s1 + $0x210] sm:$0xff]   ;;  %v3173_v35 = vld [vmem:[%s3928_s1 + $0x1e0] sm:$0xff]  }
  0x30   : > { %2733 = vmatpush3.bf16.msra.mxu0 %v3074_v36  ;;  %2639 = vmatpush3.bf16.msra.mxu1 %v3077_v37  ;;  %v3176_v36 = vld [vmem:[%s3928_s1 + $0x1a0] sm:$0xff]  }
  0x31   : > { %2640 = vmatprep.subr.bf16.mxu1 %v3078_v38  ;;  %2734 = vmatprep.subr.bf16.mxu0 %v3079_v39  ;;  %v3143_v37 = vld [vmem:[%s3345_s13 + $0xe0] ss:$36 sps:$4 sm:$0xff]   ;;  %v3168_v38 = vld [vmem:[%s3928_s1 + $0x218] sm:$0xff]  }
  0x32   : > { %v3144_v39 = vld [vmem:[%s3345_s13 + $0xa0] ss:$36 sps:$4 sm:$0xff]  }
  0x34   : > { %2641 = vmatpush3.bf16.msra.mxu1 %v3080_v40  ;;  %2735 = vmatpush3.bf16.msra.mxu0 %v3081_v41  ;;  %v3147_v40 = vld [vmem:[%s3345_s13 + $0x12c] ss:$36 sps:$4 sm:$0xff]  }
  0x35   : > { %2642 = vmatprep.subr.bf16.mxu1 %v3088_v44  ;;  %2736 = vmatprep.subr.bf16.mxu0 %v3090_v45  ;;  %v3149_v41 = vld [vmem:[%s3345_s13 + $0xec] ss:$36 sps:$4 sm:$0xff]   ;;  %v3177_v44 = vld [vmem:[%s3928_s1 + $0x220] sm:$0xff]  }
  0x36   : > { %1539 = vmatmul.mubr.bf16.gmra.mrb[8].mxu0 %v3075_v42  ;;  %1595 = vmatmul.mubr.bf16.gmra.mrb[8].mxu1 %v3076_v43  ;;  %v3184_v42 = vld [vmem:[%s3928_s1 + $0x1e8] sm:$0xff]  }
  0x37   : > { %1546 = vmatprep.mubr.bf16.mxu0 %v3082_v46  ;;  %1602 = vmatprep.mubr.bf16.mxu1 %v3084_v47  ;;  %v3185_v43 = vld [vmem:[%s3928_s1 + $0x1a8] sm:$0xff]  }
  0x38   : > { %2643 = vmatpush3.bf16.msra.mxu1 %v3089_v48  ;;  %2737 = vmatpush3.bf16.msra.mxu0 %v3091_v49  ;;  %v3151_v45 = vld [vmem:[%s3345_s13 + $0x128] ss:$36 sps:$4 sm:$0xff]   ;;  %v3154_v48 = vld [vmem:[%s3345_s13 + $0x174] ss:$36 sps:$4 sm:$0xff]  }
  0x39   : > { %2644 = vmatprep.subr.bf16.mxu1 %v3098_v50  ;;  %2738 = vmatprep.subr.bf16.mxu0 %v3100_v53  ;;  %v3192_v46 = vld [vmem:[%s3928_s1 + $0x228] sm:$0xff]   ;;  %v3156_v49 = vld [vmem:[%s3345_s13 + $0x134] ss:$36 sps:$4 sm:$0xff]  }
  0x3a   : > { %v3152_v47 = vld [vmem:[%s3345_s13 + $0xe8] ss:$36 sps:$4 sm:$0xff]   ;;  %v3199_v50 = vld [vmem:[%s3928_s1 + $0x1f0] sm:$0xff]  }
  0x3b   : > { %v3158_v53 = vld [vmem:[%s3345_s13 + $0x170] ss:$36 sps:$4 sm:$0xff]  }
  0x3c   : > { %2645 = vmatpush3.bf16.msra.mxu1 %v3099_v51  ;;  %2739 = vmatpush3.bf16.msra.mxu0 %v3101_v54  ;;  %v3200_v51 = vld [vmem:[%s3928_s1 + $0x1b0] sm:$0xff]   ;;  %v3208_v54 = vld [vmem:[%s3928_s1 + $0x1f8] sm:$0xff]  }
  0x3d   : > { %2646 = vmatprep.subr.bf16.mxu1 %v3105_v58  ;;  %2740 = vmatprep.subr.bf16.mxu0 %v3109_v60  ;;  %v3212_v58 = vld [vmem:[%s3928_s1 + $0x1b8] sm:$0xff]  }
  0x3e   : > { %1547 = vmatmul.mubr.bf16.gmra.mrb[12].mxu0 %v3086_v52  ;;  %1603 = vmatmul.mubr.bf16.gmra.mrb[12].mxu1 %v3087_v55  ;;  %v3205_v52 = vld [vmem:[%s3928_s1 + $0x230] sm:$0xff]   ;;  %v3166_v60 = vld [vmem:[%s3345_s13 + $0x1b8] ss:$36 sps:$4 sm:$0xff]  }
  0x3f   : > { %1554 = vmatprep.mubr.bf16.mxu0 %v3092_v56  ;;  %1610 = vmatprep.mubr.bf16.mxu1 %v3094_v57  ;;  %v3159_v55 = vld [vmem:[%s3345_s13 + $0x130] ss:$36 sps:$4 sm:$0xff]   ;;  %v3162_v56 = vld [vmem:[%s3345_s13 + $0x1bc] ss:$36 sps:$4 sm:$0xff]  }
  0x40   : > { %2647 = vmatpush3.bf16.msra.mxu1 %v3108_v59  ;;  %2741 = vmatpush3.bf16.msra.mxu0 %v3110_v62  ;;  %v3164_v57 = vld [vmem:[%s3345_s13 + $0x17c] ss:$36 sps:$4 sm:$0xff]   ;;  %v3169_v62 = vld [vmem:[%s3345_s13 + $0x204] ss:$36 sps:$4 sm:$0xff]  }
  0x41   : > { %2648 = vmatprep.subr.bf16.mxu1 %v3111_v63  ;;  %2742 = vmatprep.subr.bf16.mxu0 %v3119_v5  ;;  %v3215_v59 = vld [vmem:[%s3928_s1 + $0x238] sm:$0xff]   ;;  %v3171_v63 = vld [vmem:[%s3345_s13 + $0x1c4] ss:$36 sps:$4 sm:$0xff]  }
  0x42   : > { %v3183_v5 = vld [vmem:[%s3345_s13 + $0x208] ss:$36 sps:$4 sm:$0xff]  }
  0x44   : > { %2649 = vmatpush3.bf16.msra.mxu1 %v3112_v0  ;;  %2743 = vmatpush3.bf16.msra.mxu0 %v3120_v6  ;;  %v3174_v0 = vld [vmem:[%s3345_s13 + $0x200] ss:$36 sps:$4 sm:$0xff]   ;;  %v3186_v6 = vld [vmem:[%s3345_s13 + $0x294] ss:$36 sps:$4 sm:$0xff]  }
  0x45   : > { %2822 = vmatprep.subr.bf16.mxu1 %v3121_v7  ;;  %2937 = vmatprep.subr.bf16.mxu0 %v3277_v11  ;;  %v3188_v7 = vld [vmem:[%s3345_s13 + $0x254] ss:$36 sps:$4 sm:$0xff]  }
  0x46   : > { %1555 = vmatmul.mubr.bf16.gmra.mrb[16].mxu0 %v3096_v1  ;;  %1611 = vmatmul.mubr.bf16.gmra.mrb[16].mxu1 %v3097_v2  ;;  %v3175_v1 = vld [vmem:[%s3345_s13 + $0x1c0] ss:$36 sps:$4 sm:$0xff]   ;;  %v3178_v2 = vld [vmem:[%s3345_s13 + $0x24c] ss:$36 sps:$4 sm:$0xff]  }
  0x47   : > { %1562 = vmatprep.mubr.bf16.mxu0 %v3102_v3  ;;  %1618 = vmatprep.mubr.bf16.mxu1 %v2456_v4  ;;  %v3180_v3 = vld [vmem:[%s3345_s13 + $0x20c] ss:$36 sps:$4 sm:$0xff]  }
  0x48   : > { %v3182_v4 = vld [vmem:[%s3345_s13 + $0x248] ss:$36 sps:$4 sm:$0xff]  }
  0x4e   : > { %1563 = vmatmul.mubr.bf16.gmra.mrb[20].mxu0 %v3106_v8  ;;  %1619 = vmatmul.mubr.bf16.gmra.mrb[20].mxu1 %v2455_v9  ;;  %v3190_v8 = vld [vmem:[%s3345_s13 + $0x290] ss:$36 sps:$4 sm:$0xff]  }
  0x4f   : > { %1570 = vmatprep.mubr.bf16.mxu0 %v3113_v10  ;;  %1658 = vmatprep.mubr.bf16.mxu1 %v3117_v12  ;;  %v3191_v9 = vld [vmem:[%s3345_s13 + $0x250] ss:$36 sps:$4 sm:$0xff]   ;;  %v3193_v10 = vld [vmem:[%s3345_s13 + $0x2dc] ss:$36 sps:$4 sm:$0xff]  }
  0x50   : > { %v3195_v12 = vld [vmem:[%s3345_s13 + $0x29c] ss:$36 sps:$4 sm:$0xff]  }
  0x56   : > { %1571 = vmatmul.mubr.bf16.gmra.mrb[24].mxu0 %v3118_v14  ;;  %1659 = vmatmul.mubr.bf16.vlgmr.msra.gmra.mrb[24].mxu1 %v3115_v13  ;;  %v3197_v13 = vld [vmem:[%s3345_s13 + $0x2d8] ss:$36 sps:$4 sm:$0xff]  }
  0x57   : > { %2823 = vmatpush3.bf16.msra.mxu1 %v3122_v15  ;;  %1666 = vmatprep.mubr.bf16.mxu1 %v3123_v16  ;;  %v3198_v14 = vld [vmem:[%s3345_s13 + $0x298] ss:$36 sps:$4 sm:$0xff]   ;;  %v3201_v15 = vld [vmem:[%s3345_s13 + $0x324] ss:$36 sps:$4 sm:$0xff]  }
  0x58   : > { %1794 = vmatprep.mubr.bf16.mxu0 %v3127_v17  ;;  %2824 = vmatprep.subr.bf16.mxu1 %v3136_v18  ;;  %v3203_v16 = vld [vmem:[%s3345_s13 + $0x2e4] ss:$36 sps:$4 sm:$0xff]  }
  0x59   : > { %v326_v17 = vld [vmem:[%s3345_s13 + $0x368] sm:$0xff]  ;;  %v3206_v18 = vld [vmem:[%s3345_s13 + $0x320] ss:$36 sps:$4 sm:$0xff]  }
  0x5b   : > { %2825 = vmatpush3.bf16.msra.mxu1 %v3137_v19  ;;  %v3207_v19 = vld [vmem:[%s3345_s13 + $0x2e0] ss:$36 sps:$4 sm:$0xff]  }
  0x5c   : > { %2826 = vmatprep.subr.bf16.mxu1 %v3145_v20  ;;  %v2458_v20 = vcombine.high %v326_v17, %v326_v17 }
  0x5e   : > { %1667 = vmatmul.mubr.bf16.gmra.mrb[28].mxu1 %v3128_v22  ;;  %1795 = vmatmul.mubr.bf16.vlgmr.msra.gmra.mrb[28].mxu0 %v3125_v21  ;;  %v3210_v21 = vld [vmem:[%s3345_s13 + $0x32c] ss:$36 sps:$4 sm:$0xff]  }
  0x5f   : > { %2938 = vmatpush3.bf16.msra.mxu0 %v3129_v23  ;;  %1674 = vmatprep.mubr.bf16.mxu1 %v3130_v24  ;;  %v327_v22 = vld [vmem:[%s3345_s13 + $0x370] sm:$0xff]  ;;  %v2457_v23 = vcombine.low %v326_v17, %v326_v17  ;;  %v3214_v24 = vld [vmem:[%s3345_s13 + $0x328] ss:$36 sps:$4 sm:$0xff]  }
  0x60   : > { %1802 = vmatprep.mubr.bf16.mxu0 %v3132_v25  ;;  %2939 = vmatprep.subr.bf16.mxu0 %v3277_v11  ;;  %v2460_v25 = vcombine.high %v327_v22, %v327_v22 }
  0x61   : > { %2827 = vmatpush3.bf16.msra.mxu1 %v3146_v26  ;;  %v3219_v26 = vld [vmem:[%s3345_s13 + $0x1c] ss:$36 sps:$4 sm:$0xff]  }
  0x62   : > { %2828 = vmatprep.subr.bf16.mxu1 %v3160_v27  ;;  %v3217_v27 = vld [vmem:[%s3345_s13 + $0x18] ss:$36 sps:$4 sm:$0xff]  }
  0x63   : > { %2940 = vmatpush3.bf16.msra.mxu0 %v3138_v28  ;;  %v2459_v28 = vcombine.low %v327_v22, %v327_v22  ;;  %v3259_v22 = vld [vmem:[%s3345_s13 + $0x2e8] ss:$36 sps:$4 sm:$0xff]  }
  0x64   : > { %2941 = vmatprep.subr.bf16.mxu0 %v3277_v11 }
  0x65   : > { %2829 = vmatpush3.bf16.msra.mxu1 %v3161_v31  ;;  %v3224_v31 = vld [vmem:[%s3345_s13 + $0x20] ss:$36 sps:$4 sm:$0xff]  }
  0x66   : > { %1675 = vmatmul.mubr.bf16.gmra.mrb[32].mxu1 %v3134_v29  ;;  %1803 = vmatmul.mubr.bf16.gmra.mrb[32].mxu0 %v3135_v30  ;;  %v3221_v29 = vld [vmem:[%s3345_s13 + $0x64] ss:$36 sps:$4 sm:$0xff]  }
  0x67   : > { %1682 = vmatprep.mubr.bf16.mxu1 %v3139_v32  ;;  %1810 = vmatprep.mubr.bf16.mxu0 %v3141_v33  ;;  %v3223_v30 = vld [vmem:[%s3345_s13 + $0x60] ss:$36 sps:$4 sm:$0xff]   ;;  %v3225_v32 = vld [vmem:[%s3345_s13 + $0xac] ss:$36 sps:$4 sm:$0xff]  }
  0x68   : > { %2942 = vmatpush3.bf16.msra.mxu0 %v3153_v34  ;;  %2830 = vmatprep.subr.bf16.mxu1 %v3173_v35  ;;  %v3227_v33 = vld [vmem:[%s3345_s13 + $0xa8] ss:$36 sps:$4 sm:$0xff]   ;;  %v3229_v35 = vld [vmem:[%s3345_s13 + $0xf4] ss:$36 sps:$4 sm:$0xff]  }
  0x69   : > { %2943 = vmatprep.subr.bf16.mxu0 %v3277_v11  ;;  %2831 = vmatpush3.bf16.msra.mxu1 %v3176_v36  ;;  %v3228_v34 = vld [vmem:[%s3345_s13 + $0x68] ss:$36 sps:$4 sm:$0xff]   ;;  %v3231_v36 = vld [vmem:[%s3345_s13 + $0xf0] ss:$36 sps:$4 sm:$0xff]  }
  0x6a   : > { %2832 = vmatprep.subr.bf16.mxu1 %v3184_v42  ;;  %v3239_v42 = vld [vmem:[%s3345_s13 + $0x180] ss:$36 sps:$4 sm:$0xff]  }
  0x6c   : > { %2944 = vmatpush3.bf16.msra.mxu0 %v3168_v38  ;;  %v3233_v38 = vld [vmem:[%s3345_s13 + $0x13c] ss:$36 sps:$4 sm:$0xff]  }
  0x6d   : > { %2945 = vmatprep.subr.bf16.mxu0 %v3277_v11  ;;  %2833 = vmatpush3.bf16.msra.mxu1 %v3185_v43  ;;  %v3240_v43 = vld [vmem:[%s3345_s13 + $0x140] ss:$36 sps:$4 sm:$0xff]  }
  0x6e   : > { %1683 = vmatmul.mubr.bf16.gmra.mrb[36].mxu1 %v3143_v37  ;;  %1811 = vmatmul.mubr.bf16.gmra.mrb[36].mxu0 %v3144_v39  ;;  %v3232_v37 = vld [vmem:[%s3345_s13 + $0xb0] ss:$36 sps:$4 sm:$0xff]   ;;  %v3235_v39 = vld [vmem:[%s3345_s13 + $0x138] ss:$36 sps:$4 sm:$0xff]  }
  0x6f   : > { %1690 = vmatprep.mubr.bf16.mxu1 %v3147_v40  ;;  %1818 = vmatprep.mubr.bf16.mxu0 %v3149_v41  ;;  %v3236_v40 = vld [vmem:[%s3345_s13 + $0xf8] ss:$36 sps:$4 sm:$0xff]   ;;  %v3237_v41 = vld [vmem:[%s3345_s13 + $0x184] ss:$36 sps:$4 sm:$0xff]  }
  0x70   : > { %2946 = vmatpush3.bf16.msra.mxu0 %v3177_v44  ;;  %2834 = vmatprep.subr.bf16.mxu1 %v3199_v50  ;;  %v3241_v44 = vld [vmem:[%s3345_s13 + $0x1cc] ss:$36 sps:$4 sm:$0xff]   ;;  %v3249_v50 = vld [vmem:[%s3345_s13 + $0x25c] ss:$36 sps:$4 sm:$0xff]  }
  0x71   : > { %2947 = vmatprep.subr.bf16.mxu0 %v3277_v11  ;;  %2835 = vmatpush3.bf16.msra.mxu1 %v3200_v51 }
  0x72   : > { %2836 = vmatprep.subr.bf16.mxu1 %v3208_v54 }
  0x74   : > { %2948 = vmatpush3.bf16.msra.mxu0 %v3192_v46  ;;  %v3244_v46 = vld [vmem:[%s3345_s13 + $0x188] ss:$36 sps:$4 sm:$0xff]  }
  0x75   : > { %2949 = vmatprep.subr.bf16.mxu0 %v3277_v11  ;;  %2837 = vmatpush3.bf16.msra.mxu1 %v3212_v58 }
  0x76   : > { %1691 = vmatmul.mubr.bf16.gmra.mrb[40].mxu1 %v3151_v45  ;;  %1819 = vmatmul.mubr.bf16.gmra.mrb[40].mxu0 %v3152_v47  ;;  %v3243_v45 = vld [vmem:[%s3345_s13 + $0x1c8] ss:$36 sps:$4 sm:$0xff]   ;;  %v3245_v47 = vld [vmem:[%s3345_s13 + $0x214] ss:$36 sps:$4 sm:$0xff]  }
  0x77   : > { %1698 = vmatprep.mubr.bf16.mxu1 %v3154_v48  ;;  %1826 = vmatprep.mubr.bf16.mxu0 %v3156_v49  ;;  %v3247_v48 = vld [vmem:[%s3345_s13 + $0x210] ss:$36 sps:$4 sm:$0xff]  }
  0x78   : > { %2950 = vmatpush3.bf16.msra.mxu0 %v3205_v52  ;;  %v3248_v49 = vld [vmem:[%s3345_s13 + $0x1d0] ss:$36 sps:$4 sm:$0xff]  }
  0x79   : > { %2951 = vmatprep.subr.bf16.mxu0 %v3277_v11 }
  0x7c   : > { %2952 = vmatpush3.bf16.msra.mxu0 %v3215_v59 }
  0x7e   : > { %1699 = vmatmul.mubr.bf16.gmra.mrb[44].mxu1 %v3158_v53  ;;  %1827 = vmatmul.mubr.bf16.gmra.mrb[44].mxu0 %v3159_v55  ;;  %v3251_v55 = vld [vmem:[%s3345_s13 + $0x258] ss:$36 sps:$4 sm:$0xff]  }
  0x7f   : > { %1706 = vmatprep.mubr.bf16.mxu1 %v3162_v56  ;;  %1834 = vmatprep.mubr.bf16.mxu0 %v3164_v57  ;;  %v3252_v56 = vld [vmem:[%s3345_s13 + $0x218] ss:$36 sps:$4 sm:$0xff]  }
  0x86   : > { %1707 = vmatmul.mubr.bf16.gmra.mrb[48].mxu1 %v3166_v60  ;;  %1835 = vmatmul.mubr.bf16.gmra.mrb[48].mxu0 %v3167_v61  ;;  %v3253_v61 = vld [vmem:[%s3345_s13 + $0x2a4] ss:$36 sps:$4 sm:$0xff]  }
  0x87   : > { %1714 = vmatprep.mubr.bf16.mxu1 %v3169_v62  ;;  %1842 = vmatprep.mubr.bf16.mxu0 %v3171_v63 }
  0x8e   : > { %1715 = vmatmul.mubr.bf16.gmra.mrb[52].mxu1 %v3174_v0  ;;  %1843 = vmatmul.mubr.bf16.gmra.mrb[52].mxu0 %v3175_v1 }
  0x8f   : > { %1722 = vmatprep.mubr.bf16.mxu1 %v3178_v2  ;;  %1850 = vmatprep.mubr.bf16.mxu0 %v3180_v3 }
  0x96   : > { %1723 = vmatmul.mubr.bf16.gmra.mrb[56].mxu1 %v3182_v4  ;;  %1851 = vmatmul.mubr.bf16.gmra.mrb[56].mxu0 %v3183_v5 }
  0x97   : > { %1730 = vmatprep.mubr.bf16.mxu1 %v3186_v6  ;;  %1858 = vmatprep.mubr.bf16.mxu0 %v3188_v7  ;;  %v3255_v6 = vld [vmem:[%s3345_s13 + $0x2a0] ss:$36 sps:$4 sm:$0xff]  }
  0x98   : > { %v3256_v7 = vld [vmem:[%s3345_s13 + $0x260] ss:$36 sps:$4 sm:$0xff]  }
  0x9e   : > { %1731 = vmatmul.mubr.bf16.gmra.mrb[60].mxu1 %v3190_v8  ;;  %1859 = vmatmul.mubr.bf16.gmra.mrb[60].mxu0 %v3191_v9 }
  0x9f   : > { %1738 = vmatprep.mubr.bf16.mxu1 %v3193_v10  ;;  %1866 = vmatprep.mubr.bf16.mxu0 %v3195_v12 }
  0xa6   : > { %1739 = vmatmul.mubr.bf16.gmra.mrb[64].mxu1 %v3197_v13  ;;  %1867 = vmatmul.mubr.bf16.gmra.mrb[64].mxu0 %v3198_v14  ;;  %v3257_v13 = vld [vmem:[%s3345_s13 + $0x2ec] ss:$36 sps:$4 sm:$0xff]  }
  0xa7   : > { %1746 = vmatprep.mubr.bf16.mxu1 %v3201_v15  ;;  %1874 = vmatprep.mubr.bf16.mxu0 %v3203_v16 }
  0xae   : > { %1747 = vmatmul.mubr.bf16.gmra.mrb[68].mxu1 %v3206_v18  ;;  %1875 = vmatmul.mubr.bf16.gmra.mrb[68].mxu0 %v3207_v19 }
  0xaf   : > { %1754 = vmatprep.mubr.bf16.mxu1 %v2458_v20  ;;  %1882 = vmatprep.mubr.bf16.mxu0 %v3210_v21 }
  0xb6   : > { %1755 = vmatmul.mubr.bf16.gmra.mrb[72].mxu1 %v2457_v23  ;;  %1883 = vmatmul.mubr.bf16.gmra.mrb[72].mxu0 %v3214_v24  ;;  %v3260_v23 = vld [vmem:[%s3345_s13 + $0x2a8] ss:$36 sps:$4 sm:$0xff]  }
  0xb7   : > { %1890 = vmatprep.mubr.bf16.mxu0 %v2460_v25  ;;  %1930 = vmatprep.mubr.bf16.mxu1 %v3219_v26 }
  0xbe   : > { %1891 = vmatmul.mubr.bf16.gmra.mrb[76].mxu0 %v2459_v28  ;;  %1931 = vmatmul.mubr.bf16.vlgmr.msra.gmra.mrb[76].mxu1 %v3217_v27  ;;  %v3261_v28 = vld [vmem:[%s3345_s13 + $0x334] ss:$36 sps:$4 sm:$0xff]  }
  0xbf   : > { %1938 = vmatprep.mubr.bf16.mxu1 %v3221_v29  ;;  %2953 = vmatprep.mubr.msk.bf16.mxu0 %vm3278_vm0, %v3277_v11 }
  0xc6   : > { %1939 = vmatmul.mubr.bf16.gmra.mrb[80].mxu1 %v3223_v30  ;;  %2954 = vmatmul.mubr.bf16.vlgmr.msra.gmra.mrb[80].mxu0 %v3224_v31 }
  0xc7   : > { %1946 = vmatprep.mubr.bf16.mxu1 %v3225_v32  ;;  %2957 = vmatprep.mubr.msk.bf16.mxu0 %vm3278_vm0, %v3277_v11 }
  0xce   : > { %1947 = vmatmul.mubr.bf16.gmra.mrb[84].mxu1 %v3227_v33  ;;  %2958 = vmatmul.mubr.bf16.gmra.mrb[84].mxu0 %v3228_v34  ;;  %v328_v33 = vld [vmem:[%s3345_s13 + $0x378] sm:$0xff] }
  0xcf   : > { %1954 = vmatprep.mubr.bf16.mxu1 %v3229_v35  ;;  %2961 = vmatprep.mubr.msk.bf16.mxu0 %vm3278_vm0, %v3277_v11 }
  0xd6   : > { %1955 = vmatmul.mubr.bf16.gmra.mrb[88].mxu1 %v3231_v36  ;;  %2962 = vmatmul.mubr.bf16.gmra.mrb[88].mxu0 %v3232_v37 }
  0xd7   : > { %1962 = vmatprep.mubr.bf16.mxu1 %v3233_v38  ;;  %2965 = vmatprep.mubr.msk.bf16.mxu0 %vm3278_vm0, %v3277_v11  ;;  %v3263_v38 = vld [vmem:[%s3345_s13 + $0x330] ss:$36 sps:$4 sm:$0xff]  }
  0xde   : > { %1963 = vmatmul.mubr.bf16.gmra.mrb[92].mxu1 %v3235_v39  ;;  %2966 = vmatmul.mubr.bf16.gmra.mrb[92].mxu0 %v3236_v40  ;;  %v3264_v39 = vld [vmem:[%s3345_s13 + $0x2f0] ss:$36 sps:$4 sm:$0xff]  }
  0xdf   : > { %1970 = vmatprep.mubr.bf16.mxu1 %v3237_v41  ;;  %2969 = vmatprep.mubr.msk.bf16.mxu0 %vm3278_vm0, %v3277_v11 }
  0xe6   : > { %1971 = vmatmul.mubr.bf16.gmra.mrb[96].mxu1 %v3239_v42  ;;  %2970 = vmatmul.mubr.bf16.gmra.mrb[96].mxu0 %v3240_v43 }
  0xe7   : > { %1978 = vmatprep.mubr.bf16.mxu1 %v3241_v44  ;;  %2973 = vmatprep.mubr.msk.bf16.mxu0 %vm3278_vm0, %v3277_v11  ;;  %v2462_v44 = vcombine.high %v328_v33, %v328_v33 }
  0xee   : > { %1979 = vmatmul.mubr.bf16.gmra.mrb[100].mxu1 %v3243_v45  ;;  %2974 = vmatmul.mubr.bf16.gmra.mrb[100].mxu0 %v3244_v46 }
  0xef   : > { %1986 = vmatprep.mubr.bf16.mxu1 %v3245_v47  ;;  %2977 = vmatprep.mubr.msk.bf16.mxu0 %vm3278_vm0, %v3277_v11 }
  0xf6   : > { %1987 = vmatmul.mubr.bf16.gmra.mrb[104].mxu1 %v3247_v48  ;;  %2978 = vmatmul.mubr.bf16.gmra.mrb[104].mxu0 %v3248_v49 }
  0xf7   : > { %1994 = vmatprep.mubr.bf16.mxu1 %v3249_v50  ;;  %2981 = vmatprep.mubr.msk.bf16.mxu0 %vm3278_vm0, %v3277_v11 }
  0xf9   : > { %v2556_v51 = vpop.f32.mrb[0].mxu0  ;;  %v2598_v52 = vpop.f32.mrb[0].mxu1 }
  0xfa   : > { %v2557_v53 = vpop.f32.mrb[1].mxu0  ;;  %v2599_v54 = vpop.f32.mrb[1].mxu1 }
  0xfb   : > { %v3661_v57 = vadd.f32 %v2557_v53, %v2556_v51  ;;  %v2559_v58 = vpop.f32.mrb[2].mxu0  ;;  %v3663_v59 = vadd.f32 %v2599_v54, %v2598_v52  ;;  %v2601_v60 = vpop.f32.mrb[2].mxu1  ;;  %v2461_v53 = vcombine.low %v328_v33, %v328_v33  ;;  %v3267_v54 = vld [vmem:[%s3345_s13 + $0x338] ss:$36 sps:$4 sm:$0xff]  }
  0xfc   : > { %v2560_v62 = vpop.f32.mrb[3].mxu0  ;;  %v2602_v63 = vpop.f32.mrb[3].mxu1 }
  0xfd   : > { %v3666_v0 = vadd.f32 %v2560_v62, %v2559_v58  ;;  %v3668_v1 = vadd.f32 %v2602_v63, %v2601_v60 }
  0xfe   : > { %1995 = vmatmul.mubr.bf16.gmra.mrb[108].mxu1 %v3251_v55  ;;  %2982 = vmatmul.mubr.bf16.gmra.mrb[108].mxu0 %v3252_v56 }
  0xff   : > { %2002 = vmatprep.mubr.bf16.mxu1 %v3253_v61  ;;  %2985 = vmatprep.mubr.msk.bf16.mxu0 %vm3278_vm0, %v3277_v11 }
 0x101   : > { %v2562_v2 = vpop.f32.mrb[4].mxu0  ;;  %v2604_v3 = vpop.f32.mrb[4].mxu1 }
 0x102   : > { %v2563_v4 = vpop.f32.mrb[5].mxu0  ;;  %v2605_v5 = vpop.f32.mrb[5].mxu1 }
 0x103   : > { %v3674_v8 = vadd.f32 %v2563_v4, %v2562_v2  ;;  %v2565_v9 = vpop.f32.mrb[6].mxu0  ;;  %v3676_v10 = vadd.f32 %v2605_v5, %v2604_v3  ;;  %v2607_v12 = vpop.f32.mrb[6].mxu1 }
 0x104   : > { %v2566_v14 = vpop.f32.mrb[7].mxu0  ;;  %v2608_v15 = vpop.f32.mrb[7].mxu1 }
 0x105   : > { %v3679_v16 = vadd.f32 %v2566_v14, %v2565_v9  ;;  %v3681_v17 = vadd.f32 %v2608_v15, %v2607_v12 }
 0x106   : > { %2003 = vmatmul.mubr.bf16.gmra.mrb[112].mxu1 %v3255_v6  ;;  %2986 = vmatmul.mubr.bf16.gmra.mrb[112].mxu0 %v3256_v7  ;;  %v3268_v7 = vld [vmem:[%s3345_s13 + $0x380] ss:$0 sps:$4 sm:$0xff]  }
 0x107   : > { %2010 = vmatprep.mubr.bf16.mxu1 %v3257_v13  ;;  %2989 = vmatprep.mubr.msk.bf16.mxu0 %vm3278_vm0, %v3277_v11 }
 0x109   : > { %v2568_v18 = vpop.f32.mrb[8].mxu0  ;;  %v2610_v19 = vpop.f32.mrb[8].mxu1 }
 0x10a   : > { %v2569_v20 = vpop.f32.mrb[9].mxu0  ;;  %v2611_v21 = vpop.f32.mrb[9].mxu1 }
 0x10b   : > { %v3687_v24 = vadd.f32 %v2569_v20, %v2568_v18  ;;  %v2571_v25 = vpop.f32.mrb[10].mxu0  ;;  %v3689_v26 = vadd.f32 %v2611_v21, %v2610_v19  ;;  %v2613_v27 = vpop.f32.mrb[10].mxu1 }
 0x10c   : > { %v2572_v29 = vpop.f32.mrb[11].mxu0  ;;  %v2614_v30 = vpop.f32.mrb[11].mxu1 }
 0x10d   : > { %v3692_v31 = vadd.f32 %v2572_v29, %v2571_v25  ;;  %v3694_v32 = vadd.f32 %v2614_v30, %v2613_v27 }
 0x10e   : > { %2011 = vmatmul.mubr.bf16.gmra.mrb[116].mxu1 %v3259_v22  ;;  %2990 = vmatmul.mubr.bf16.gmra.mrb[116].mxu0 %v3260_v23 }
 0x10f   : > { %2018 = vmatprep.mubr.bf16.mxu1 %v3261_v28  ;;  %2993 = vmatprep.mubr.msk.bf16.mxu0 %vm3278_vm0, %v3277_v11 }
 0x111   : > { %v2574_v34 = vpop.f32.mrb[12].mxu0  ;;  %v2616_v35 = vpop.f32.mrb[12].mxu1 }
 0x112   : > { %v2575_v36 = vpop.f32.mrb[13].mxu0  ;;  %v2617_v37 = vpop.f32.mrb[13].mxu1 }
 0x113   : > { %v3701_v40 = vadd.f32 %v2575_v36, %v2574_v34  ;;  %v2577_v41 = vpop.f32.mrb[14].mxu0  ;;  %v3703_v42 = vadd.f32 %v2617_v37, %v2616_v35  ;;  %v2619_v43 = vpop.f32.mrb[14].mxu1 }
 0x114   : > { %v2578_v45 = vpop.f32.mrb[15].mxu0  ;;  %v2620_v46 = vpop.f32.mrb[15].mxu1 }
 0x115   : > { %v3705_v47 = vadd.f32 %v2578_v45, %v2577_v41  ;;  %v3707_v48 = vadd.f32 %v2620_v46, %v2619_v43 }
 0x116   : > { %2019 = vmatmul.mubr.bf16.gmra.mrb[120].mxu1 %v3263_v38  ;;  %2994 = vmatmul.mubr.bf16.gmra.mrb[120].mxu0 %v3264_v39 }
 0x117   : > { %2026 = vmatprep.mubr.bf16.mxu1 %v2462_v44  ;;  %2997 = vmatprep.mubr.msk.bf16.mxu0 %vm3278_vm0, %v3277_v11 }
 0x119   : > { %v2580_v49 = vpop.f32.mrb[16].mxu0  ;;  %v2622_v50 = vpop.f32.mrb[16].mxu1 }
 0x11a   : > { %v2581_v51 = vpop.f32.mrb[17].mxu0  ;;  %v2623_v52 = vpop.f32.mrb[17].mxu1 }
 0x11b   : > { %v3712_v55 = vadd.f32 %v2581_v51, %v2580_v49  ;;  %v2583_v56 = vpop.f32.mrb[18].mxu0  ;;  %v3714_v58 = vadd.f32 %v2623_v52, %v2622_v50  ;;  %v2625_v60 = vpop.f32.mrb[18].mxu1 }
 0x11c   : > { %v2584_v61 = vpop.f32.mrb[19].mxu0  ;;  %v2626_v62 = vpop.f32.mrb[19].mxu1 }
 0x11d   : > { %v3716_v63 = vadd.f32 %v2584_v61, %v2583_v56  ;;  %v3718_v2 = vadd.f32 %v2626_v62, %v2625_v60 }
 0x11e   : > { %2027 = vmatmul.mubr.bf16.gmra.mrb[124].mxu1 %v2461_v53  ;;  %2998 = vmatmul.mubr.bf16.gmra.mrb[124].mxu0 %v3267_v54 }
 0x11f   : > { %3001 = vmatprep.mubr.msk.bf16.mxu0 %vm3278_vm0, %v3277_v11 }
 0x121   : > { %v2586_v3 = vpop.f32.mrb[20].mxu0  ;;  %v2628_v4 = vpop.f32.mrb[20].mxu1 }
 0x122   : > { %v2587_v5 = vpop.f32.mrb[21].mxu0  ;;  %v2629_v6 = vpop.f32.mrb[21].mxu1 }
 0x123   : > { %v3723_v9 = vadd.f32 %v2587_v5, %v2586_v3  ;;  %v2589_v12 = vpop.f32.mrb[22].mxu0  ;;  %v3725_v13 = vadd.f32 %v2629_v6, %v2628_v4  ;;  %v2631_v14 = vpop.f32.mrb[22].mxu1 }
 0x124   : > { %v2590_v15 = vpop.f32.mrb[23].mxu0  ;;  %v2632_v18 = vpop.f32.mrb[23].mxu1 }
 0x125   : > { %v3727_v19 = vadd.f32 %v2590_v15, %v2589_v12 }
 0x126   : > { %3002 = vmatmul.mubr.bf16.gmra.mrb[128].mxu0 %v3268_v7 }
 0x129   : > { %v2592_v20 = vpop.f32.mrb[24].mxu0  ;;  %v2650_v21 = vpop.f32.mrb[24].mxu1 }
 0x12a   : > { %v2593_v22 = vpop.f32.mrb[25].mxu0  ;;  %v2651_v11 = vpop.f32.mrb[25].mxu1 }
 0x12b   : > { %v3729_v23 = vadd.f32 %v2593_v22, %v2592_v20  ;;  %v2652_v25 = vadd.f32 %v2651_v11, %v2650_v21  ;;  %v2595_v27 = vpop.f32.mrb[26].mxu0  ;;  %v2653_v28 = vpop.f32.mrb[26].mxu1 }
 0x12c   : > { %v2596_v29 = vpop.f32.mrb[27].mxu0  ;;  %v2654_v30 = vpop.f32.mrb[27].mxu1 }
 0x12d   : > { %v1661_v33 = vadd.f32 %v2652_v25, %v3661_v57  ;;  %v3732_v34 = vadd.f32 %v2596_v29, %v2595_v27  ;;  %v2655_v35 = vadd.f32 %v2654_v30, %v2653_v28 }
 0x12f   : > { %v1664_v36 = vadd.f32 %v2655_v35, %v3666_v0 }
 0x131   : > { %v2656_v37 = vpop.f32.mrb[28].mxu1  ;;  %v2744_v38 = vpop.f32.mrb[28].mxu0 }
 0x132   : > { %v2657_v39 = vpop.f32.mrb[29].mxu1  ;;  %v2745_v41 = vpop.f32.mrb[29].mxu0 }
 0x133   : > { %v2658_v43 = vadd.f32 %v2657_v39, %v2656_v37  ;;  %v2746_v44 = vadd.f32 %v2745_v41, %v2744_v38  ;;  %v2659_v45 = vpop.f32.mrb[30].mxu1  ;;  %v2747_v46 = vpop.f32.mrb[30].mxu0 }
 0x134   : > { %v2660_v49 = vpop.f32.mrb[31].mxu1  ;;  %v2748_v50 = vpop.f32.mrb[31].mxu0 }
 0x135   : > { %v1669_v51 = vadd.f32 %v2658_v43, %v3674_v8  ;;  %v3736_v52 = vadd.f32 %v2746_v44, %v1661_v33  ;;  %v2661_v57 = vadd.f32 %v2660_v49, %v2659_v45  ;;  %v2749_v53 = vadd.f32 %v2748_v50, %v2747_v46 }
 0x137   : > { %v1672_v54 = vadd.f32 %v2661_v57, %v3679_v16  ;;  %v3739_v56 = vadd.f32 %v2749_v53, %v1664_v36 }
 0x139   : > { %v2662_v0 = vpop.f32.mrb[32].mxu1  ;;  %v2750_v60 = vpop.f32.mrb[32].mxu0 }
 0x13a   : > { %v2663_v61 = vpop.f32.mrb[33].mxu1  ;;  %v2751_v62 = vpop.f32.mrb[33].mxu0 }
 0x13b   : > { %v2664_v3 = vadd.f32 %v2663_v61, %v2662_v0  ;;  %v2752_v4 = vadd.f32 %v2751_v62, %v2750_v60  ;;  %v2665_v5 = vpop.f32.mrb[34].mxu1  ;;  %v2753_v6 = vpop.f32.mrb[34].mxu0 }
 0x13c   : > { %v2666_v7 = vpop.f32.mrb[35].mxu1  ;;  %v2754_v12 = vpop.f32.mrb[35].mxu0 }
 0x13d   : > { %v1677_v8 = vadd.f32 %v2664_v3, %v3687_v24  ;;  %v3742_v14 = vadd.f32 %v2752_v4, %v1669_v51  ;;  %v2667_v15 = vadd.f32 %v2666_v7, %v2665_v5  ;;  %v2755_v18 = vadd.f32 %v2754_v12, %v2753_v6 }
 0x13f   : > { %v1680_v16 = vadd.f32 %v2667_v15, %v3692_v31  ;;  %v3745_v20 = vadd.f32 %v2755_v18, %v1672_v54 }
 0x141   : > { %v2668_v21 = vpop.f32.mrb[36].mxu1  ;;  %v2756_v22 = vpop.f32.mrb[36].mxu0 }
 0x142   : > { %v2669_v11 = vpop.f32.mrb[37].mxu1  ;;  %v2757_v25 = vpop.f32.mrb[37].mxu0 }
 0x143   : > { %v2670_v27 = vadd.f32 %v2669_v11, %v2668_v21  ;;  %v2758_v28 = vadd.f32 %v2757_v25, %v2756_v22  ;;  %v2671_v29 = vpop.f32.mrb[38].mxu1  ;;  %v2759_v30 = vpop.f32.mrb[38].mxu0 }
 0x144   : > { %v2672_v33 = vpop.f32.mrb[39].mxu1  ;;  %v2760_v35 = vpop.f32.mrb[39].mxu0 }
 0x145   : > { %v1685_v24 = vadd.f32 %v2670_v27, %v3701_v40  ;;  %v3748_v36 = vadd.f32 %v2758_v28, %v1677_v8  ;;  %v2673_v37 = vadd.f32 %v2672_v33, %v2671_v29  ;;  %v2761_v38 = vadd.f32 %v2760_v35, %v2759_v30 }
 0x147   : > { %v1688_v31 = vadd.f32 %v2673_v37, %v3705_v47  ;;  %v3751_v39 = vadd.f32 %v2761_v38, %v1680_v16 }
 0x149   : > { %v2674_v41 = vpop.f32.mrb[40].mxu1  ;;  %v2762_v43 = vpop.f32.mrb[40].mxu0 }
 0x14a   : > { %v2675_v44 = vpop.f32.mrb[41].mxu1  ;;  %v2763_v45 = vpop.f32.mrb[41].mxu0 }
 0x14b   : > { %v2676_v46 = vadd.f32 %v2675_v44, %v2674_v41  ;;  %v2764_v49 = vadd.f32 %v2763_v45, %v2762_v43  ;;  %v2677_v50 = vpop.f32.mrb[42].mxu1  ;;  %v2765_v51 = vpop.f32.mrb[42].mxu0 }
 0x14c   : > { %v2678_v57 = vpop.f32.mrb[43].mxu1  ;;  %v2766_v53 = vpop.f32.mrb[43].mxu0 }
 0x14d   : > { %v1693_v40 = vadd.f32 %v2676_v46, %v3712_v55  ;;  %v3754_v54 = vadd.f32 %v2764_v49, %v1685_v24  ;;  %v2679_v0 = vadd.f32 %v2678_v57, %v2677_v50  ;;  %v2767_v60 = vadd.f32 %v2766_v53, %v2765_v51 }
 0x14f   : > { %v1696_v47 = vadd.f32 %v2679_v0, %v3716_v63  ;;  %v3757_v61 = vadd.f32 %v2767_v60, %v1688_v31 }
 0x151   : > { %v2680_v62 = vpop.f32.mrb[44].mxu1  ;;  %v2768_v3 = vpop.f32.mrb[44].mxu0 }
 0x152   : > { %v2681_v4 = vpop.f32.mrb[45].mxu1  ;;  %v2769_v5 = vpop.f32.mrb[45].mxu0 }
 0x153   : > { %v2682_v6 = vadd.f32 %v2681_v4, %v2680_v62  ;;  %v2770_v7 = vadd.f32 %v2769_v5, %v2768_v3  ;;  %v2683_v12 = vpop.f32.mrb[46].mxu1  ;;  %v2771_v8 = vpop.f32.mrb[46].mxu0 }
 0x154   : > { %v2684_v15 = vpop.f32.mrb[47].mxu1  ;;  %v2772_v18 = vpop.f32.mrb[47].mxu0 }
 0x155   : > { %v1701_v55 = vadd.f32 %v2682_v6, %v3723_v9  ;;  %v3760_v16 = vadd.f32 %v2770_v7, %v1693_v40  ;;  %v2685_v21 = vadd.f32 %v2684_v15, %v2683_v12  ;;  %v2773_v22 = vadd.f32 %v2772_v18, %v2771_v8 }
 0x157   : > { %v1704_v63 = vadd.f32 %v2685_v21, %v3727_v19  ;;  %v3763_v11 = vadd.f32 %v2773_v22, %v1696_v47 }
 0x159   : > { %v2686_v25 = vpop.f32.mrb[48].mxu1  ;;  %v2774_v27 = vpop.f32.mrb[48].mxu0 }
 0x15a   : > { %v2687_v28 = vpop.f32.mrb[49].mxu1  ;;  %v2775_v29 = vpop.f32.mrb[49].mxu0 }
 0x15b   : > { %v2688_v30 = vadd.f32 %v2687_v28, %v2686_v25  ;;  %v2776_v33 = vadd.f32 %v2775_v29, %v2774_v27  ;;  %v2689_v35 = vpop.f32.mrb[50].mxu1  ;;  %v2777_v24 = vpop.f32.mrb[50].mxu0 }
 0x15c   : > { %v2690_v37 = vpop.f32.mrb[51].mxu1  ;;  %v2778_v38 = vpop.f32.mrb[51].mxu0 }
 0x15d   : > { %v1709_v9 = vadd.f32 %v2688_v30, %v3729_v23  ;;  %v3766_v31 = vadd.f32 %v2776_v33, %v1701_v55  ;;  %v2691_v41 = vadd.f32 %v2690_v37, %v2689_v35  ;;  %v2779_v43 = vadd.f32 %v2778_v38, %v2777_v24 }
 0x15f   : > { %v1712_v19 = vadd.f32 %v2691_v41, %v3732_v34  ;;  %v3769_v44 = vadd.f32 %v2779_v43, %v1704_v63 }
 0x161   : > { %v2692_v45 = vpop.f32.mrb[52].mxu1  ;;  %v2780_v46 = vpop.f32.mrb[52].mxu0 }
 0x162   : > { %v2693_v49 = vpop.f32.mrb[53].mxu1  ;;  %v2781_v50 = vpop.f32.mrb[53].mxu0 }
 0x163   : > { %v2694_v51 = vadd.f32 %v2693_v49, %v2692_v45  ;;  %v2782_v57 = vadd.f32 %v2781_v50, %v2780_v46  ;;  %v2695_v53 = vpop.f32.mrb[54].mxu1  ;;  %v2783_v40 = vpop.f32.mrb[54].mxu0 }
 0x164   : > { %v2696_v0 = vpop.f32.mrb[55].mxu1  ;;  %v2784_v60 = vpop.f32.mrb[55].mxu0 }
 0x165   : > { %v1717_v23 = vadd.f32 %v2694_v51, %v3663_v59  ;;  %v3772_v47 = vadd.f32 %v2782_v57, %v1709_v9  ;;  %v2697_v62 = vadd.f32 %v2696_v0, %v2695_v53  ;;  %v2785_v3 = vadd.f32 %v2784_v60, %v2783_v40 }
 0x167   : > { %v1720_v34 = vadd.f32 %v2697_v62, %v3668_v1  ;;  %v3775_v4 = vadd.f32 %v2785_v3, %v1712_v19 }
 0x169   : > { %v2698_v5 = vpop.f32.mrb[56].mxu1  ;;  %v2786_v6 = vpop.f32.mrb[56].mxu0 }
 0x16a   : > { %v2699_v7 = vpop.f32.mrb[57].mxu1  ;;  %v2787_v12 = vpop.f32.mrb[57].mxu0 }
 0x16b   : > { %v2700_v8 = vadd.f32 %v2699_v7, %v2698_v5  ;;  %v2788_v15 = vadd.f32 %v2787_v12, %v2786_v6  ;;  %v2701_v18 = vpop.f32.mrb[58].mxu1  ;;  %v2789_v55 = vpop.f32.mrb[58].mxu0 }
 0x16c   : > { %v2702_v21 = vpop.f32.mrb[59].mxu1  ;;  %v2790_v22 = vpop.f32.mrb[59].mxu0 }
 0x16d   : > { %v1725_v59 = vadd.f32 %v2700_v8, %v3676_v10  ;;  %v3778_v63 = vadd.f32 %v2788_v15, %v1717_v23  ;;  %v2703_v25 = vadd.f32 %v2702_v21, %v2701_v18  ;;  %v2791_v27 = vadd.f32 %v2790_v22, %v2789_v55 }
 0x16f   : > { %v1728_v1 = vadd.f32 %v2703_v25, %v3681_v17  ;;  %v3781_v28 = vadd.f32 %v2791_v27, %v1720_v34 }
 0x171   : > { %v2704_v29 = vpop.f32.mrb[60].mxu1  ;;  %v2792_v30 = vpop.f32.mrb[60].mxu0 }
 0x172   : > { %v2705_v33 = vpop.f32.mrb[61].mxu1  ;;  %v2793_v35 = vpop.f32.mrb[61].mxu0 }
 0x173   : > { %v2706_v24 = vadd.f32 %v2705_v33, %v2704_v29  ;;  %v2794_v37 = vadd.f32 %v2793_v35, %v2792_v30  ;;  %v2707_v38 = vpop.f32.mrb[62].mxu1  ;;  %v2795_v9 = vpop.f32.mrb[62].mxu0 }
 0x174   : > { %v2708_v41 = vpop.f32.mrb[63].mxu1  ;;  %v2796_v43 = vpop.f32.mrb[63].mxu0 }
 0x175   : > { %v1733_v10 = vadd.f32 %v2706_v24, %v3689_v26  ;;  %v3784_v19 = vadd.f32 %v2794_v37, %v1725_v59  ;;  %v2709_v45 = vadd.f32 %v2708_v41, %v2707_v38  ;;  %v2797_v46 = vadd.f32 %v2796_v43, %v2795_v9 }
 0x177   : > { %v1736_v17 = vadd.f32 %v2709_v45, %v3694_v32  ;;  %v3787_v49 = vadd.f32 %v2797_v46, %v1728_v1 }
 0x179   : > { %v2710_v50 = vpop.f32.mrb[64].mxu1  ;;  %v2798_v51 = vpop.f32.mrb[64].mxu0 }
 0x17a   : > { %v2711_v57 = vpop.f32.mrb[65].mxu1  ;;  %v2799_v53 = vpop.f32.mrb[65].mxu0 }
 0x17b   : > { %v2712_v40 = vadd.f32 %v2711_v57, %v2710_v50  ;;  %v2800_v0 = vadd.f32 %v2799_v53, %v2798_v51  ;;  %v2713_v60 = vpop.f32.mrb[66].mxu1  ;;  %v2801_v23 = vpop.f32.mrb[66].mxu0 }
 0x17c   : > { %v2714_v62 = vpop.f32.mrb[67].mxu1  ;;  %v2802_v3 = vpop.f32.mrb[67].mxu0 }
 0x17d   : > { %v1741_v26 = vadd.f32 %v2712_v40, %v3703_v42  ;;  %v3790_v34 = vadd.f32 %v2800_v0, %v1733_v10  ;;  %v2715_v5 = vadd.f32 %v2714_v62, %v2713_v60  ;;  %v2803_v6 = vadd.f32 %v2802_v3, %v2801_v23 }
 0x17f   : > { %v1744_v32 = vadd.f32 %v2715_v5, %v3707_v48  ;;  %v3793_v7 = vadd.f32 %v2803_v6, %v1736_v17 }
 0x181   : > { %v2716_v12 = vpop.f32.mrb[68].mxu1  ;;  %v2804_v8 = vpop.f32.mrb[68].mxu0 }
 0x182   : > { %v2717_v15 = vpop.f32.mrb[69].mxu1  ;;  %v2805_v18 = vpop.f32.mrb[69].mxu0 }
 0x183   : > { %v2718_v55 = vadd.f32 %v2717_v15, %v2716_v12  ;;  %v2806_v21 = vadd.f32 %v2805_v18, %v2804_v8  ;;  %v2719_v22 = vpop.f32.mrb[70].mxu1  ;;  %v2807_v59 = vpop.f32.mrb[70].mxu0  ;;  %v3813_v15 = vld [vmem:[%s3929_s2] ss:$0 sm:$0xff] }
 0x184   : > { %v2720_v25 = vpop.f32.mrb[71].mxu1  ;;  %v2808_v27 = vpop.f32.mrb[71].mxu0 }
 0x185   : > { %v1749_v42 = vadd.f32 %v2718_v55, %v3714_v58  ;;  %v3796_v1 = vadd.f32 %v2806_v21, %v1741_v26  ;;  %v2721_v29 = vadd.f32 %v2720_v25, %v2719_v22  ;;  %v2809_v30 = vadd.f32 %v2808_v27, %v2807_v59  ;;  %v3818_v22 = vld [vmem:[%s3930_s3] ss:$0 sm:$0xff] }
 0x187   : > { %v1752_v48 = vadd.f32 %v2721_v29, %v3718_v2  ;;  %v3799_v33 = vadd.f32 %v2809_v30, %v1744_v32 }
 0x189   : > { %v2722_v35 = vpop.f32.mrb[72].mxu1  ;;  %v2810_v24 = vpop.f32.mrb[72].mxu0 }
 0x18a   : > { %v2723_v37 = vpop.f32.mrb[73].mxu1  ;;  %v2811_v38 = vpop.f32.mrb[73].mxu0 }
 0x18b   : > { %v2724_v9 = vadd.f32 %v2723_v37, %v2722_v35  ;;  %v2812_v41 = vadd.f32 %v2811_v38, %v2810_v24  ;;  %v2813_v43 = vpop.f32.mrb[74].mxu0  ;;  %v2725_v10 = vpop.f32.mrb[74].mxu1 }
 0x18c   : > { %v2814_v45 = vpop.f32.mrb[75].mxu0  ;;  %v2726_v46 = vpop.f32.mrb[75].mxu1 }
 0x18d   : > { %v1757_v58 = vadd.f32 %v2724_v9, %v3725_v13  ;;  %v3802_v17 = vadd.f32 %v2812_v41, %v1749_v42  ;;  %v2815_v50 = vadd.f32 %v2814_v45, %v2813_v43 }
 0x18f   : > { %v3804_v51 = vadd.f32 %v2815_v50, %v1752_v48 }
 0x191   : > { %v2816_v2 = vpop.f32.mrb[76].mxu0  ;;  %v2838_v57 = vpop.f32.mrb[76].mxu1 }
 0x192   : > { %v2817_v53 = vpop.f32.mrb[77].mxu0  ;;  %v2839_v40 = vpop.f32.mrb[77].mxu1 }
 0x193   : > { %v2818_v0 = vadd.f32 %v2817_v53, %v2816_v2  ;;  %v2840_v60 = vadd.f32 %v2839_v40, %v2838_v57  ;;  %v2819_v23 = vpop.f32.mrb[78].mxu0  ;;  %v2841_v62 = vpop.f32.mrb[78].mxu1 }
 0x194   : > { %v2820_v3 = vpop.f32.mrb[79].mxu0  ;;  %v2842_v26 = vpop.f32.mrb[79].mxu1 }
 0x195   : > { %v3806_v5 = vadd.f32 %v2818_v0, %v1757_v58  ;;  %v2843_v6 = vadd.f32 %v2842_v26, %v2841_v62  ;;  %v1933_v13 = vadd.f32 %v2840_v60, %v3736_v52 }
 0x197   : > { %v1936_v32 = vadd.f32 %v2843_v6, %v3739_v56 }
 0x199   : > { %v2844_v12 = vpop.f32.mrb[80].mxu1  ;;  %v2068_v8 = vpop.f32.mrb[80].mxu0 }
 0x19a   : > { %v2069_v18 = vadd.f32 %v2068_v8, %v1933_v13  ;;  %v2845_v55 = vpop.f32.mrb[81].mxu1  ;;  %v2955_v21 = vpop.f32.mrb[81].mxu0 }
 0x19b   : > { %v2846_v59 = vadd.f32 %v2845_v55, %v2844_v12  ;;  %v2847_v25 = vpop.f32.mrb[82].mxu1  ;;  %v2071_v52 = vpop.f32.mrb[82].mxu0 }
 0x19c   : > { %v2177_v56 = vmul.f32 %v3813_v15, %v2069_v18  ;;  %v2072_v27 = vadd.f32 %v2071_v52, %v1936_v32  ;;  %v2848_v42 = vpop.f32.mrb[83].mxu1  ;;  %v2956_v29 = vpop.f32.mrb[83].mxu0 }
 0x19d   : > { %v2849_v30 = vadd.f32 %v2848_v42, %v2847_v25  ;;  %v1941_v48 = vadd.f32 %v2846_v59, %v3742_v14 }
 0x19e   : > { %v2209_v35 = vadd.f32 %v3818_v22, %v2177_v56  ;;  %v2178_v24 = vmul.f32 %v3813_v15, %v2072_v27 }
 0x19f   : > { %v1944_v37 = vadd.f32 %v2849_v30, %v3745_v20 }
 0x1a0   : > { %v2234_v38 = vmax.f32 %v2209_v35, 0.0  ;;  %v2210_v9 = vadd.f32 %v3818_v22, %v2178_v24 }
 0x1a1   : > { %v2850_v41 = vpop.f32.mrb[84].mxu1  ;;  %v2076_v43 = vpop.f32.mrb[84].mxu0 }
 0x1a2   : > { %2259 = vst [vmem:[%s3828_s7] sm:$0xff] %v2234_v38  ;;  %v2235_v14 = vmax.f32 %v2210_v9, 0.0  ;;  %v2077_v10 = vadd.f32 %v2076_v43, %v1941_v48  ;;  %v2851_v45 = vpop.f32.mrb[85].mxu1  ;;  %v2959_v46 = vpop.f32.mrb[85].mxu0 }
 0x1a3   : > { %v2852_v58 = vadd.f32 %v2851_v45, %v2850_v41  ;;  %v2853_v50 = vpop.f32.mrb[86].mxu1  ;;  %v2079_v2 = vpop.f32.mrb[86].mxu0 }
 0x1a4   : > { %2260 = vst [vmem:[%s3828_s7 + $0x8] sm:$0xff] %v2235_v14  ;;  %v2179_v57 = vmul.f32 %v3813_v15, %v2077_v10  ;;  %v2080_v53 = vadd.f32 %v2079_v2, %v1944_v37  ;;  %v2854_v40 = vpop.f32.mrb[87].mxu1  ;;  %v2960_v20 = vpop.f32.mrb[87].mxu0 }
 0x1a5   : > { %v2855_v0 = vadd.f32 %v2854_v40, %v2853_v50  ;;  %v1949_v60 = vadd.f32 %v2852_v58, %v3748_v36 }
 0x1a6   : > { %v2211_v23 = vadd.f32 %v3818_v22, %v2179_v57  ;;  %v2180_v62 = vmul.f32 %v3813_v15, %v2080_v53 }
 0x1a7   : > { %v1952_v3 = vadd.f32 %v2855_v0, %v3751_v39 }
 0x1a8   : > { %v2236_v26 = vmax.f32 %v2211_v23, 0.0  ;;  %v2212_v6 = vadd.f32 %v3818_v22, %v2180_v62 }
 0x1a9   : > { %v2856_v13 = vpop.f32.mrb[88].mxu1  ;;  %v2084_v32 = vpop.f32.mrb[88].mxu0 }
 0x1aa   : > { %2261 = vst [vmem:[%s3828_s7 + $0x10] sm:$0xff] %v2236_v26  ;;  %v2237_v12 = vmax.f32 %v2212_v6, 0.0  ;;  %v2085_v8 = vadd.f32 %v2084_v32, %v1949_v60  ;;  %v2857_v18 = vpop.f32.mrb[89].mxu1  ;;  %v2963_v55 = vpop.f32.mrb[89].mxu0 }
 0x1ab   : > { %v2858_v21 = vadd.f32 %v2857_v18, %v2856_v13  ;;  %v2859_v59 = vpop.f32.mrb[90].mxu1  ;;  %v2087_v36 = vpop.f32.mrb[90].mxu0 }
 0x1ac   : > { %2262 = vst [vmem:[%s3828_s7 + $0x18] sm:$0xff] %v2237_v12  ;;  %v2181_v25 = vmul.f32 %v3813_v15, %v2085_v8  ;;  %v2088_v52 = vadd.f32 %v2087_v36, %v1952_v3  ;;  %v2860_v56 = vpop.f32.mrb[91].mxu1  ;;  %v2964_v39 = vpop.f32.mrb[91].mxu0 }
 0x1ad   : > { %v2861_v27 = vadd.f32 %v2860_v56, %v2859_v59  ;;  %v1957_v42 = vadd.f32 %v2858_v21, %v3754_v54 }
 0x1ae   : > { %v2213_v29 = vadd.f32 %v3818_v22, %v2181_v25  ;;  %v2182_v30 = vmul.f32 %v3813_v15, %v2088_v52 }
 0x1af   : > { %v1960_v48 = vadd.f32 %v2861_v27, %v3757_v61 }
 0x1b0   : > { %v2238_v35 = vmax.f32 %v2213_v29, 0.0  ;;  %v2214_v24 = vadd.f32 %v3818_v22, %v2182_v30 }
 0x1b1   : > { %v2862_v37 = vpop.f32.mrb[92].mxu1  ;;  %v2092_v38 = vpop.f32.mrb[92].mxu0 }
 0x1b2   : > { %2263 = vst [vmem:[%s3828_s7 + $0x20] sm:$0xff] %v2238_v35  ;;  %v2239_v9 = vmax.f32 %v2214_v24, 0.0  ;;  %v2093_v41 = vadd.f32 %v2092_v38, %v1957_v42  ;;  %v2863_v43 = vpop.f32.mrb[93].mxu1  ;;  %v2967_v14 = vpop.f32.mrb[93].mxu0 }
 0x1b3   : > { %v2864_v10 = vadd.f32 %v2863_v43, %v2862_v37  ;;  %v2865_v45 = vpop.f32.mrb[94].mxu1  ;;  %v2095_v54 = vpop.f32.mrb[94].mxu0 }
 0x1b4   : > { %2264 = vst [vmem:[%s3828_s7 + $0x28] sm:$0xff] %v2239_v9  ;;  %v2183_v46 = vmul.f32 %v3813_v15, %v2093_v41  ;;  %v2096_v58 = vadd.f32 %v2095_v54, %v1960_v48  ;;  %v2866_v50 = vpop.f32.mrb[95].mxu1  ;;  %v2968_v61 = vpop.f32.mrb[95].mxu0 }
 0x1b5   : > { %v2867_v2 = vadd.f32 %v2866_v50, %v2865_v45  ;;  %v1965_v57 = vadd.f32 %v2864_v10, %v3760_v16 }
 0x1b6   : > { %v2215_v53 = vadd.f32 %v3818_v22, %v2183_v46  ;;  %v2184_v40 = vmul.f32 %v3813_v15, %v2096_v58 }
 0x1b7   : > { %v1968_v20 = vadd.f32 %v2867_v2, %v3763_v11 }
 0x1b8   : > { %v2240_v0 = vmax.f32 %v2215_v53, 0.0  ;;  %v2216_v60 = vadd.f32 %v3818_v22, %v2184_v40 }
 0x1b9   : > { %v2868_v23 = vpop.f32.mrb[96].mxu1  ;;  %v2100_v62 = vpop.f32.mrb[96].mxu0 }
 0x1ba   : > { %2265 = vst [vmem:[%s3828_s7 + $0x30] sm:$0xff] %v2240_v0  ;;  %v2241_v3 = vmax.f32 %v2216_v60, 0.0  ;;  %v2101_v26 = vadd.f32 %v2100_v62, %v1965_v57  ;;  %v2869_v6 = vpop.f32.mrb[97].mxu1  ;;  %v2971_v13 = vpop.f32.mrb[97].mxu0 }
 0x1bb   : > { %v2870_v32 = vadd.f32 %v2869_v6, %v2868_v23  ;;  %v2871_v12 = vpop.f32.mrb[98].mxu1  ;;  %v2103_v16 = vpop.f32.mrb[98].mxu0 }
 0x1bc   : > { %2266 = vst [vmem:[%s3828_s7 + $0x38] sm:$0xff] %v2241_v3  ;;  %v2185_v8 = vmul.f32 %v3813_v15, %v2101_v26  ;;  %v2104_v18 = vadd.f32 %v2103_v16, %v1968_v20  ;;  %v2872_v55 = vpop.f32.mrb[99].mxu1  ;;  %v2972_v11 = vpop.f32.mrb[99].mxu0 }
 0x1bd   : > { %v2873_v21 = vadd.f32 %v2872_v55, %v2871_v12  ;;  %v1973_v59 = vadd.f32 %v2870_v32, %v3766_v31 }
 0x1be   : > { %v2217_v36 = vadd.f32 %v3818_v22, %v2185_v8  ;;  %v2186_v25 = vmul.f32 %v3813_v15, %v2104_v18 }
 0x1bf   : > { %v1976_v52 = vadd.f32 %v2873_v21, %v3769_v44 }
 0x1c0   : > { %v2242_v56 = vmax.f32 %v2217_v36, 0.0  ;;  %v2218_v39 = vadd.f32 %v3818_v22, %v2186_v25 }
 0x1c1   : > { %v2874_v27 = vpop.f32.mrb[100].mxu1  ;;  %v2108_v42 = vpop.f32.mrb[100].mxu0 }
 0x1c2   : > { %2267 = vst [vmem:[%s3828_s7 + $0x40] sm:$0xff] %v2242_v56  ;;  %v2243_v29 = vmax.f32 %v2218_v39, 0.0  ;;  %v2109_v30 = vadd.f32 %v2108_v42, %v1973_v59  ;;  %v2875_v48 = vpop.f32.mrb[101].mxu1  ;;  %v2975_v35 = vpop.f32.mrb[101].mxu0 }
 0x1c3   : > { %v2876_v24 = vadd.f32 %v2875_v48, %v2874_v27  ;;  %v2877_v37 = vpop.f32.mrb[102].mxu1  ;;  %v2111_v31 = vpop.f32.mrb[102].mxu0 }
 0x1c4   : > { %2268 = vst [vmem:[%s3828_s7 + $0x48] sm:$0xff] %v2243_v29  ;;  %v2187_v38 = vmul.f32 %v3813_v15, %v2109_v30  ;;  %v2112_v9 = vadd.f32 %v2111_v31, %v1976_v52  ;;  %v2878_v41 = vpop.f32.mrb[103].mxu1  ;;  %v2976_v44 = vpop.f32.mrb[103].mxu0 }
 0x1c5   : > { %v2879_v43 = vadd.f32 %v2878_v41, %v2877_v37  ;;  %v1981_v14 = vadd.f32 %v2876_v24, %v3772_v47 }
 0x1c6   : > { %v2219_v10 = vadd.f32 %v3818_v22, %v2187_v38  ;;  %v2188_v45 = vmul.f32 %v3813_v15, %v2112_v9 }
 0x1c7   : > { %v1984_v54 = vadd.f32 %v2879_v43, %v3775_v4 }
 0x1c8   : > { %v2244_v46 = vmax.f32 %v2219_v10, 0.0  ;;  %v2220_v58 = vadd.f32 %v3818_v22, %v2188_v45 }
 0x1c9   : > { %v2880_v50 = vpop.f32.mrb[104].mxu1  ;;  %v2116_v61 = vpop.f32.mrb[104].mxu0 }
 0x1ca   : > { %2269 = vst [vmem:[%s3828_s7 + $0x50] sm:$0xff] %v2244_v46  ;;  %v2245_v2 = vmax.f32 %v2220_v58, 0.0  ;;  %v2117_v57 = vadd.f32 %v2116_v61, %v1981_v14  ;;  %v2881_v53 = vpop.f32.mrb[105].mxu1  ;;  %v2979_v40 = vpop.f32.mrb[105].mxu0 }
 0x1cb   : > { %v2882_v20 = vadd.f32 %v2881_v53, %v2880_v50  ;;  %v2883_v0 = vpop.f32.mrb[106].mxu1  ;;  %v2119_v47 = vpop.f32.mrb[106].mxu0 }
 0x1cc   : > { %2270 = vst [vmem:[%s3828_s7 + $0x58] sm:$0xff] %v2245_v2  ;;  %v2189_v60 = vmul.f32 %v3813_v15, %v2117_v57  ;;  %v2120_v23 = vadd.f32 %v2119_v47, %v1984_v54  ;;  %v2884_v62 = vpop.f32.mrb[107].mxu1  ;;  %v2980_v4 = vpop.f32.mrb[107].mxu0 }
 0x1cd   : > { %v2885_v3 = vadd.f32 %v2884_v62, %v2883_v0  ;;  %v1989_v26 = vadd.f32 %v2882_v20, %v3778_v63 }
 0x1ce   : > { %v2221_v6 = vadd.f32 %v3818_v22, %v2189_v60  ;;  %v2190_v13 = vmul.f32 %v3813_v15, %v2120_v23 }
 0x1cf   : > { %v1992_v32 = vadd.f32 %v2885_v3, %v3781_v28 }
 0x1d0   : > { %v2246_v12 = vmax.f32 %v2221_v6, 0.0  ;;  %v2222_v16 = vadd.f32 %v3818_v22, %v2190_v13 }
 0x1d1   : > { %v2886_v8 = vpop.f32.mrb[108].mxu1  ;;  %v2124_v18 = vpop.f32.mrb[108].mxu0 }
 0x1d2   : > { %2271 = vst [vmem:[%s3828_s7 + $0x60] sm:$0xff] %v2246_v12  ;;  %v2247_v55 = vmax.f32 %v2222_v16, 0.0  ;;  %v2125_v11 = vadd.f32 %v2124_v18, %v1989_v26  ;;  %v2887_v21 = vpop.f32.mrb[109].mxu1  ;;  %v2983_v59 = vpop.f32.mrb[109].mxu0 }
 0x1d3   : > { %v2888_v36 = vadd.f32 %v2887_v21, %v2886_v8  ;;  %v2889_v25 = vpop.f32.mrb[110].mxu1  ;;  %v2127_v63 = vpop.f32.mrb[110].mxu0 }
 0x1d4   : > { %2272 = vst [vmem:[%s3828_s7 + $0x68] sm:$0xff] %v2247_v55  ;;  %v2191_v52 = vmul.f32 %v3813_v15, %v2125_v11  ;;  %v2128_v56 = vadd.f32 %v2127_v63, %v1992_v32  ;;  %v2890_v39 = vpop.f32.mrb[111].mxu1  ;;  %v2984_v28 = vpop.f32.mrb[111].mxu0 }
 0x1d5   : > { %v2891_v27 = vadd.f32 %v2890_v39, %v2889_v25  ;;  %v1997_v42 = vadd.f32 %v2888_v36, %v3784_v19 }
 0x1d6   : > { %v2223_v29 = vadd.f32 %v3818_v22, %v2191_v52  ;;  %v2192_v30 = vmul.f32 %v3813_v15, %v2128_v56 }
 0x1d7   : > { %v2000_v48 = vadd.f32 %v2891_v27, %v3787_v49 }
 0x1d8   : > { %v2248_v35 = vmax.f32 %v2223_v29, 0.0  ;;  %v2224_v24 = vadd.f32 %v3818_v22, %v2192_v30 }
 0x1d9   : > { %v2892_v37 = vpop.f32.mrb[112].mxu1  ;;  %v2132_v31 = vpop.f32.mrb[112].mxu0 }
 0x1da   : > { %2273 = vst [vmem:[%s3828_s7 + $0x70] sm:$0xff] %v2248_v35  ;;  %v2249_v38 = vmax.f32 %v2224_v24, 0.0  ;;  %v2133_v9 = vadd.f32 %v2132_v31, %v1997_v42  ;;  %v2893_v41 = vpop.f32.mrb[113].mxu1  ;;  %v2987_v44 = vpop.f32.mrb[113].mxu0 }
 0x1db   : > { %v2894_v43 = vadd.f32 %v2893_v41, %v2892_v37  ;;  %v2895_v14 = vpop.f32.mrb[114].mxu1  ;;  %v2135_v19 = vpop.f32.mrb[114].mxu0 }
 0x1dc   : > { %2274 = vst [vmem:[%s3828_s7 + $0x78] sm:$0xff] %v2249_v38  ;;  %v2193_v10 = vmul.f32 %v3813_v15, %v2133_v9  ;;  %v2136_v45 = vadd.f32 %v2135_v19, %v2000_v48  ;;  %v2896_v54 = vpop.f32.mrb[115].mxu1  ;;  %v2988_v49 = vpop.f32.mrb[115].mxu0 }
 0x1dd   : > { %v2897_v46 = vadd.f32 %v2896_v54, %v2895_v14  ;;  %v2005_v58 = vadd.f32 %v2894_v43, %v3790_v34 }
 0x1de   : > { %v2225_v50 = vadd.f32 %v3818_v22, %v2193_v10  ;;  %v2194_v61 = vmul.f32 %v3813_v15, %v2136_v45 }
 0x1df   : > { %v2008_v2 = vadd.f32 %v2897_v46, %v3793_v7 }
 0x1e0   : > { %v2250_v57 = vmax.f32 %v2225_v50, 0.0  ;;  %v2226_v53 = vadd.f32 %v3818_v22, %v2194_v61 }
 0x1e1   : > { %v2898_v40 = vpop.f32.mrb[116].mxu1  ;;  %v2140_v20 = vpop.f32.mrb[116].mxu0 }
 0x1e2   : > { %2275 = vst [vmem:[%s3828_s7 + $0x80] sm:$0xff] %v2250_v57  ;;  %v2251_v0 = vmax.f32 %v2226_v53, 0.0  ;;  %v2141_v47 = vadd.f32 %v2140_v20, %v2005_v58  ;;  %v2899_v60 = vpop.f32.mrb[117].mxu1  ;;  %v2991_v23 = vpop.f32.mrb[117].mxu0 }
 0x1e3   : > { %v2900_v62 = vadd.f32 %v2899_v60, %v2898_v40  ;;  %v2901_v4 = vpop.f32.mrb[118].mxu1  ;;  %v2143_v34 = vpop.f32.mrb[118].mxu0 }
 0x1e4   : > { %2276 = vst [vmem:[%s3828_s7 + $0x88] sm:$0xff] %v2251_v0  ;;  %v2195_v3 = vmul.f32 %v3813_v15, %v2141_v47  ;;  %v2144_v26 = vadd.f32 %v2143_v34, %v2008_v2  ;;  %v2902_v6 = vpop.f32.mrb[119].mxu1  ;;  %v2992_v7 = vpop.f32.mrb[119].mxu0 }
 0x1e5   : > { %v2903_v13 = vadd.f32 %v2902_v6, %v2901_v4  ;;  %v2013_v32 = vadd.f32 %v2900_v62, %v3796_v1 }
 0x1e6   : > { %v2227_v12 = vadd.f32 %v3818_v22, %v2195_v3  ;;  %v2196_v16 = vmul.f32 %v3813_v15, %v2144_v26 }
 0x1e7   : > { %v2016_v8 = vadd.f32 %v2903_v13, %v3799_v33 }
 0x1e8   : > { %v2252_v18 = vmax.f32 %v2227_v12, 0.0  ;;  %v2228_v55 = vadd.f32 %v3818_v22, %v2196_v16 }
 0x1e9   : > { %v2904_v11 = vpop.f32.mrb[120].mxu1  ;;  %v2148_v21 = vpop.f32.mrb[120].mxu0 }
 0x1ea   : > { %2277 = vst [vmem:[%s3828_s7 + $0x90] sm:$0xff] %v2252_v18  ;;  %v2253_v59 = vmax.f32 %v2228_v55, 0.0  ;;  %v2149_v36 = vadd.f32 %v2148_v21, %v2013_v32  ;;  %v2905_v25 = vpop.f32.mrb[121].mxu1  ;;  %v2995_v63 = vpop.f32.mrb[121].mxu0 }
 0x1eb   : > { %v2906_v52 = vadd.f32 %v2905_v25, %v2904_v11  ;;  %v2907_v56 = vpop.f32.mrb[122].mxu1  ;;  %v2151_v1 = vpop.f32.mrb[122].mxu0 }
 0x1ec   : > { %2278 = vst [vmem:[%s3828_s7 + $0x98] sm:$0xff] %v2253_v59  ;;  %v2197_v39 = vmul.f32 %v3813_v15, %v2149_v36  ;;  %v2152_v28 = vadd.f32 %v2151_v1, %v2016_v8  ;;  %v2908_v27 = vpop.f32.mrb[123].mxu1  ;;  %v2996_v33 = vpop.f32.mrb[123].mxu0 }
 0x1ed   : > { %v2909_v42 = vadd.f32 %v2908_v27, %v2907_v56  ;;  %v2021_v29 = vadd.f32 %v2906_v52, %v3802_v17 }
 0x1ee   : > { %v2229_v30 = vadd.f32 %v3818_v22, %v2197_v39  ;;  %v2198_v48 = vmul.f32 %v3813_v15, %v2152_v28 }
 0x1ef   : > { %v2024_v35 = vadd.f32 %v2909_v42, %v3804_v51 }
 0x1f0   : > { %v2254_v24 = vmax.f32 %v2229_v30, 0.0  ;;  %v2230_v37 = vadd.f32 %v3818_v22, %v2198_v48 }
 0x1f1   : > { %v2910_v31 = vpop.f32.mrb[124].mxu1  ;;  %v2156_v38 = vpop.f32.mrb[124].mxu0 }
 0x1f2   : > { %2279 = vst [vmem:[%s3828_s7 + $0xa0] sm:$0xff] %v2254_v24  ;;  %v2255_v9 = vmax.f32 %v2230_v37, 0.0  ;;  %v2157_v41 = vadd.f32 %v2156_v38, %v2021_v29  ;;  %v2911_v44 = vpop.f32.mrb[125].mxu1  ;;  %v2999_v43 = vpop.f32.mrb[125].mxu0 }
 0x1f3   : > { %v2912_v14 = vadd.f32 %v2911_v44, %v2910_v31  ;;  %v2159_v17 = vpop.f32.mrb[126].mxu0  ;;  %v2913_v19 = vpop.f32.mrb[126].mxu1 }
 0x1f4   : > { %2280 = vst [vmem:[%s3828_s7 + $0xa8] sm:$0xff] %v2255_v9  ;;  %v2199_v10 = vmul.f32 %v3813_v15, %v2157_v41  ;;  %v2160_v45 = vadd.f32 %v2159_v17, %v2024_v35  ;;  %v3000_v51 = vpop.f32.mrb[127].mxu0  ;;  %v2914_v54 = vpop.f32.mrb[127].mxu1 }
 0x1f5   : > { %v2029_v49 = vadd.f32 %v2912_v14, %v3806_v5 }
 0x1f6   : > { %v2231_v46 = vadd.f32 %v3818_v22, %v2199_v10  ;;  %v2200_v58 = vmul.f32 %v3813_v15, %v2160_v45 }
 0x1f8   : > { %v2256_v50 = vmax.f32 %v2231_v46, 0.0  ;;  %v2232_v61 = vadd.f32 %v3818_v22, %v2200_v58 }
 0x1f9   : > { %v2164_v2 = vpop.f32.mrb[128].mxu0 }
 0x1fa   : > { %2281 = vst [vmem:[%s3828_s7 + $0xb0] sm:$0xff] %v2256_v50  ;;  %v2257_v57 = vmax.f32 %v2232_v61, 0.0  ;;  %v2165_v53 = vadd.f32 %v2164_v2, %v2029_v49  ;;  %v3003_v40 = vpop.f32.mrb[129].mxu0 }
 0x1fb   : > { %v2167_v20 = vpop.f32.mrb[130].mxu0 }
 0x1fc   : > { %2282 = vst [vmem:[%s3828_s7 + $0xb8] sm:$0xff] %v2257_v57  ;;  %v2201_v0 = vmul.f32 %v3813_v15, %v2165_v53  ;;  %v3004_v47 = vpop.f32.mrb[131].mxu0 }
 0x1fe   : > { %v2233_v5 = vadd.f32 %v3818_v22, %v2201_v0 }
 0x200   : > { %v2258_v60 = vmax.f32 %v2233_v5, 0.0 }
 0x202   : > { %2283 = vst [vmem:[%s3828_s7 + $0xc0] sm:$0xff] %v2258_v60 }
 0x203 PF: > { %s14_s15 = sadd.s32 1, %s3275_s15  }
 0x204   : > { %p11_p4 = scmp.ge.s32.totalorder %s14_s15, 4  }
 0x206   :  { %13 = sbr.rel (!%p11_p4) target bundleno = 1 (0x1), region = 66 }

// kernel: lnn_forward.7
= control target key start
LH: loop header
LB: loop body
LE: loop exit
PB: predicated region body
PF: predicated region fallthrough
CT: control target
= control target key end

     0   :  { %s4513_s15 = smov 0   ;;  %s5244_s0 = inlined_call_operand.vmem [shape: bf16[112,3200], index: 0, kind: input, shape index: {}]   ;;  %s5245_s1 = inlined_call_operand.vmem [shape: bf16[3200,128], index: 1, kind: input, shape index: {}]   ;;  %s5246_s2 = inlined_call_operand.vmem [shape: f32[1,128], index: 2, kind: input, shape index: {}]   ;;  %s5247_s3 = inlined_call_operand.vmem [shape: f32[1,128], index: 3, kind: input, shape index: {}]   ;;  %s5248_s4 = inlined_call_operand.vmem [shape: f32[112,128], index: 4, kind: output, shape index: {}]  }
   0x1 LB: > { %s3292_s16 = sadd.s32 4294967295, %s4486_s15   ;;  %p3296_p0 = scmp.ge.s32.totalorder %s4486_s15, 1  ;;  %s4486_s15 = sphi %s4513_s15, %s14_s15  }
   0x2   : > { %p164_p1 = scmp.lt.s32.totalorder %s4486_s15, 3 }
   0x4   : > { %p165_p2 = pnand %p3296_p0, %p164_p1 }
   0x5   : > { %v4144_v0 = vld [vmem:[%s5245_s1 + $0x40] sm:$0xff] (!%p165_p2)   ;;  %v4148_v4 = vld [vmem:[%s5245_s1 + $0x48] sm:$0xff] (!%p165_p2)   ;;  %v4152_v8 = vld [vmem:[%s5245_s1 + $0x50] sm:$0xff] (!%p165_p2)   ;;  %s191_s21 = smul.u32 (!%p165_p2), 7, %s3292_s16 }
   0x6   : > { %168 = sbr.rel (%p165_p2) target bundleno = 457 (0x1c9), region = 36  ;;  %v4145_v1 = vld [vmem:[%s5245_s1 + $0xc0] sm:$0xff] (!%p165_p2)   ;;  %3603 = vmatprep.subr.bf16.mxu0 (!%p165_p2), %v4144_v0  ;;  %v4149_v5 = vld [vmem:[%s5245_s1 + $0xc8] sm:$0xff] (!%p165_p2)   ;;  %v4153_v9 = vld [vmem:[%s5245_s1 + $0xd0] sm:$0xff] (!%p165_p2)  }
   0x7   : > { %v4146_v2 = vld [vmem:[%s5245_s1] sm:$0xff] (!%p165_p2)   ;;  %3643 = vmatprep.subr.bf16.mxu1 (!%p165_p2), %v4145_v1  ;;  %v4150_v6 = vld [vmem:[%s5245_s1 + $0x8] sm:$0xff] (!%p165_p2)   ;;  %v4154_v10 = vld [vmem:[%s5245_s1 + $0x10] sm:$0xff] (!%p165_p2)   ;;  %p192_p3 = scmp.lt.s32.totalorder (!%p165_p2), %s191_s21, 13 }
   0x8   : > { %v4147_v3 = vld [vmem:[%s5245_s1 + $0x80] sm:$0xff] (!%p165_p2)   ;;  %3604 = vmatpush3.bf16.msra.mxu0 (!%p165_p2), %v4146_v2  ;;  %v4151_v7 = vld [vmem:[%s5245_s1 + $0x88] sm:$0xff] (!%p165_p2)   ;;  %v4155_v11 = vld [vmem:[%s5245_s1 + $0x90] sm:$0xff] (!%p165_p2)  }
   0x9   : > { %3644 = vmatpush3.bf16.msra.mxu1 (!%p165_p2), %v4147_v3  ;;  %3605 = vmatprep.subr.bf16.mxu0 (!%p165_p2), %v4148_v4  ;;  %v4156_v12 = vld [vmem:[%s5245_s1 + $0x58] sm:$0xff] (!%p165_p2)   ;;  %v4160_v16 = vld [vmem:[%s5245_s1 + $0x60] sm:$0xff] (!%p165_p2)   ;;  %v4164_v20 = vld [vmem:[%s5245_s1 + $0x68] sm:$0xff] (!%p165_p2)  }
   0xa   : > { %3645 = vmatprep.subr.bf16.mxu1 (!%p165_p2), %v4149_v5  ;;  %v4157_v13 = vld [vmem:[%s5245_s1 + $0xd8] sm:$0xff] (!%p165_p2)   ;;  %v4161_v17 = vld [vmem:[%s5245_s1 + $0xe0] sm:$0xff] (!%p165_p2)   ;;  %v4165_v21 = vld [vmem:[%s5245_s1 + $0xe8] sm:$0xff] (!%p165_p2)  }
   0xb   : > { %v4158_v14 = vld [vmem:[%s5245_s1 + $0x18] sm:$0xff] (!%p165_p2)   ;;  %v4162_v18 = vld [vmem:[%s5245_s1 + $0x20] sm:$0xff] (!%p165_p2)   ;;  %v4166_v22 = vld [vmem:[%s5245_s1 + $0x28] sm:$0xff] (!%p165_p2)  }
   0xc   : > { %3606 = vmatpush3.bf16.msra.mxu0 (!%p165_p2), %v4150_v6  ;;  %v4159_v15 = vld [vmem:[%s5245_s1 + $0x98] sm:$0xff] (!%p165_p2)   ;;  %v4163_v19 = vld [vmem:[%s5245_s1 + $0xa0] sm:$0xff] (!%p165_p2)   ;;  %v4167_v23 = vld [vmem:[%s5245_s1 + $0xa8] sm:$0xff] (!%p165_p2)  }
   0xd   : > { %3646 = vmatpush3.bf16.msra.mxu1 %v4151_v7  ;;  %3607 = vmatprep.subr.bf16.mxu0 %v4152_v8  ;;  %s5250_s21 = smov (!%p192_p3, %s191_s21), 13  ;;  %v4168_v24 = vld [vmem:[%s5245_s1 + $0x70] sm:$0xff]   ;;  %v4172_v28 = vld [vmem:[%s5245_s1 + $0x78] sm:$0xff]   ;;  %v4182_v36 = vld [vmem:[%s5245_s1 + $0x140] sm:$0xff]  }
   0xe   : > { %3647 = vmatprep.subr.bf16.mxu1 %v4153_v9  ;;  %v4169_v25 = vld [vmem:[%s5245_s1 + $0xf0] sm:$0xff]   ;;  %s4135_s22 = smul.u32 100, %s5250_s21  ;;  %v4173_v29 = vld [vmem:[%s5245_s1 + $0xf8] sm:$0xff]   ;;  %v4183_v37 = vld [vmem:[%s5245_s1 + $0x1c0] sm:$0xff]   ;;  %s3298_s30 = sshll.u32 %s5250_s21, 3 }
   0xf   : > { %v4170_v26 = vld [vmem:[%s5245_s1 + $0x30] sm:$0xff]   ;;  %v4174_v30 = vld [vmem:[%s5245_s1 + $0x38] sm:$0xff]   ;;  %v4184_v38 = vld [vmem:[%s5245_s1 + $0x100] sm:$0xff]   ;;  %s202_s8 = scalar_lea.vmem %s5248_s4, %s3298_s30 }
  0x10   : > { %3608 = vmatpush3.bf16.msra.mxu0 %v4154_v10  ;;  %v4171_v27 = vld [vmem:[%s5245_s1 + $0xb0] sm:$0xff]   ;;  %s4619_s6 = scalar_lea.vmem %s5244_s0, %s4135_s22  ;;  %v4175_v31 = vld [vmem:[%s5245_s1 + $0xb8] sm:$0xff]   ;;  %v4185_v39 = vld [vmem:[%s5245_s1 + $0x180] sm:$0xff]  }
  0x11   : > { %3648 = vmatpush3.bf16.msra.mxu1 %v4155_v11  ;;  %3609 = vmatprep.subr.bf16.mxu0 %v4156_v12  ;;  %v4176_v32 = vld [vmem:[%s4619_s6] ss:$100 sps:$4 sm:$0xff]   ;;  %v4179_v34 = vld [vmem:[%s4619_s6 + $0x8] ss:$100 sps:$4 sm:$0xff]   ;;  %v4192_v45 = vld [vmem:[%s4619_s6 + $0xd4] ss:$100 sps:$4 sm:$0xff]  }
  0x12   : > { %3649 = vmatprep.subr.bf16.mxu1 %v4157_v13  ;;  %v4178_v33 = vld [vmem:[%s4619_s6 + $0x4] ss:$100 sps:$4 sm:$0xff]   ;;  %v4181_v35 = vld [vmem:[%s4619_s6 + $0xc] ss:$100 sps:$4 sm:$0xff]   ;;  %v4200_v52 = vld [vmem:[%s5245_s1 + $0x158] sm:$0xff]  }
  0x13   : > { %2394 = vmatprep.mubr.bf16.mxu0 %v4178_v33  ;;  %2458 = vmatprep.mubr.bf16.mxu1 %v4181_v35  ;;  %v4186_v40 = vld [vmem:[%s5245_s1 + $0x148] sm:$0xff]   ;;  %v4195_v47 = vld [vmem:[%s4619_s6 + $0xd0] ss:$100 sps:$4 sm:$0xff]   ;;  %v4201_v53 = vld [vmem:[%s5245_s1 + $0x1d8] sm:$0xff]  }
  0x14   : > { %3610 = vmatpush3.bf16.msra.mxu0 %v4158_v14  ;;  %v4187_v41 = vld [vmem:[%s5245_s1 + $0x1c8] sm:$0xff]   ;;  %v4196_v48 = vld [vmem:[%s5245_s1 + $0x150] sm:$0xff]   ;;  %v4202_v54 = vld [vmem:[%s5245_s1 + $0x118] sm:$0xff]  }
  0x15   : > { %3650 = vmatpush3.bf16.msra.mxu1 %v4159_v15  ;;  %3611 = vmatprep.subr.bf16.mxu0 %v4160_v16  ;;  %v4188_v42 = vld [vmem:[%s5245_s1 + $0x108] sm:$0xff]   ;;  %v4197_v49 = vld [vmem:[%s5245_s1 + $0x1d0] sm:$0xff]   ;;  %v4203_v55 = vld [vmem:[%s5245_s1 + $0x198] sm:$0xff]  }
  0x16   : > { %3651 = vmatprep.subr.bf16.mxu1 %v4161_v17  ;;  %v4189_v43 = vld [vmem:[%s5245_s1 + $0x188] sm:$0xff]   ;;  %v4198_v50 = vld [vmem:[%s5245_s1 + $0x110] sm:$0xff]   ;;  %v4206_v57 = vld [vmem:[%s4619_s6 + $0x19c] ss:$100 sps:$4 sm:$0xff]  }
  0x17   : > { %v4190_v44 = vld [vmem:[%s4619_s6 + $0xcc] ss:$100 sps:$4 sm:$0xff]   ;;  %v4204_v56 = vld [vmem:[%s4619_s6 + $0x194] ss:$100 sps:$4 sm:$0xff]   ;;  %v4210_v60 = vld [vmem:[%s5245_s1 + $0x160] sm:$0xff]  }
  0x18   : > { %3612 = vmatpush3.bf16.msra.mxu0 %v4162_v18  ;;  %v4194_v46 = vld [vmem:[%s4619_s6 + $0xc8] ss:$100 sps:$4 sm:$0xff]   ;;  %v4199_v51 = vld [vmem:[%s5245_s1 + $0x190] sm:$0xff]   ;;  %v4209_v59 = vld [vmem:[%s4619_s6 + $0x198] ss:$100 sps:$4 sm:$0xff]  }
  0x19   : > { %3652 = vmatpush3.bf16.msra.mxu1 %v4163_v19  ;;  %3613 = vmatprep.subr.bf16.mxu0 %v4164_v20  ;;  %v4208_v58 = vld [vmem:[%s4619_s6 + $0x190] ss:$100 sps:$4 sm:$0xff]   ;;  %v4211_v61 = vld [vmem:[%s5245_s1 + $0x1e0] sm:$0xff]   ;;  %v4214_v0 = vld [vmem:[%s5245_s1 + $0x168] sm:$0xff]  }
  0x1a   : > { %3653 = vmatprep.subr.bf16.mxu1 %v4165_v21  ;;  %v4212_v62 = vld [vmem:[%s5245_s1 + $0x120] sm:$0xff]   ;;  %v4215_v1 = vld [vmem:[%s5245_s1 + $0x1e8] sm:$0xff]   ;;  %v283_v4 = vld [vmem:[%s4619_s6 + $0x258] sm:$0xff] }
  0x1b   : > { %v4213_v63 = vld [vmem:[%s5245_s1 + $0x1a0] sm:$0xff]   ;;  %v4216_v2 = vld [vmem:[%s5245_s1 + $0x128] sm:$0xff]   ;;  %v3375_v6 = vcombine.high %v283_v4, %v283_v4  ;;  %v3374_v8 = vcombine.low %v283_v4, %v283_v4  ;;  %v4222_v10 = vld [vmem:[%s5245_s1 + $0x170] sm:$0xff]  }
  0x1c   : > { %3614 = vmatpush3.bf16.msra.mxu0 %v4166_v22  ;;  %v4217_v3 = vld [vmem:[%s5245_s1 + $0x1a8] sm:$0xff]   ;;  %v284_v5 = vld [vmem:[%s4619_s6 + $0x260] sm:$0xff]  ;;  %v4223_v11 = vld [vmem:[%s5245_s1 + $0x1f0] sm:$0xff]  }
  0x1d   : > { %3654 = vmatpush3.bf16.msra.mxu1 %v4167_v23  ;;  %3615 = vmatprep.subr.bf16.mxu0 %v4168_v24  ;;  %v3377_v7 = vcombine.high %v284_v5, %v284_v5  ;;  %v3376_v9 = vcombine.low %v284_v5, %v284_v5  ;;  %v4224_v12 = vld [vmem:[%s5245_s1 + $0x130] sm:$0xff]   ;;  %v4226_v14 = vld [vmem:[%s5245_s1 + $0x178] sm:$0xff]   ;;  %v4236_v22 = vld [vmem:[%s5245_s1 + $0x240] sm:$0xff]  }
  0x1e   : > { %3655 = vmatprep.subr.bf16.mxu1 %v4169_v25  ;;  %v4225_v13 = vld [vmem:[%s5245_s1 + $0x1b0] sm:$0xff]   ;;  %v4227_v15 = vld [vmem:[%s5245_s1 + $0x1f8] sm:$0xff]   ;;  %v4237_v23 = vld [vmem:[%s5245_s1 + $0x2c0] sm:$0xff]  }
  0x1f   : > { %v4228_v16 = vld [vmem:[%s5245_s1 + $0x138] sm:$0xff]   ;;  %v4230_v18 = vld [vmem:[%s4619_s6 + $0x10] ss:$100 sps:$4 sm:$0xff]   ;;  %v4238_v24 = vld [vmem:[%s5245_s1 + $0x200] sm:$0xff]  }
  0x20   : > { %3616 = vmatpush3.bf16.msra.mxu0 %v4170_v26  ;;  %v4229_v17 = vld [vmem:[%s5245_s1 + $0x1b8] sm:$0xff]   ;;  %v4239_v25 = vld [vmem:[%s5245_s1 + $0x280] sm:$0xff]   ;;  %v4240_v26 = vld [vmem:[%s5245_s1 + $0x248] sm:$0xff]  }
  0x21   : > { %3656 = vmatpush3.bf16.msra.mxu1 %v4171_v27  ;;  %3617 = vmatprep.subr.bf16.mxu0 %v4172_v28  ;;  %v4232_v19 = vld [vmem:[%s4619_s6 + $0x14] ss:$100 sps:$4 sm:$0xff]   ;;  %v4235_v21 = vld [vmem:[%s4619_s6 + $0x1c] ss:$100 sps:$4 sm:$0xff]   ;;  %v4241_v27 = vld [vmem:[%s5245_s1 + $0x2c8] sm:$0xff]  }
  0x22   : > { %3657 = vmatprep.subr.bf16.mxu1 %v4173_v29  ;;  %v4233_v20 = vld [vmem:[%s4619_s6 + $0x18] ss:$100 sps:$4 sm:$0xff]   ;;  %v4242_v28 = vld [vmem:[%s5245_s1 + $0x208] sm:$0xff]   ;;  %v4249_v33 = vld [vmem:[%s4619_s6 + $0xe0] ss:$100 sps:$4 sm:$0xff]  }
  0x23   : > { %v4243_v29 = vld [vmem:[%s5245_s1 + $0x288] sm:$0xff]   ;;  %v4251_v35 = vld [vmem:[%s5245_s1 + $0x2d0] sm:$0xff]   ;;  %v4284_v4 = vld [vmem:[%s4619_s6 + $0x20] ss:$100 sps:$4 sm:$0xff]  }
  0x24   : > { %3618 = vmatpush3.bf16.msra.mxu0 %v4174_v30  ;;  %v4244_v30 = vld [vmem:[%s4619_s6 + $0xdc] ss:$100 sps:$4 sm:$0xff]   ;;  %v4286_v5 = vld [vmem:[%s4619_s6 + $0x24] ss:$100 sps:$4 sm:$0xff]  }
  0x25   : > { %3658 = vmatpush3.bf16.msra.mxu1 %v4175_v31  ;;  %3683 = vmatprep.subr.bf16.mxu0 %v4182_v36  ;;  %v4246_v31 = vld [vmem:[%s4619_s6 + $0xe4] ss:$100 sps:$4 sm:$0xff]   ;;  %v4252_v36 = vld [vmem:[%s5245_s1 + $0x210] sm:$0xff]  }
  0x26   : > { %3723 = vmatprep.subr.bf16.mxu1 %v4183_v37  ;;  %v4253_v37 = vld [vmem:[%s5245_s1 + $0x290] sm:$0xff]  }
  0x27   : > { %2395 = vmatmul.mubr.bf16.vlgmr.msra.gmra.mrb[0].mxu0 %v4176_v32  ;;  %v4248_v32 = vld [vmem:[%s4619_s6 + $0xd8] ss:$100 sps:$4 sm:$0xff]  }
  0x28   : > { %2459 = vmatmul.mubr.bf16.vlgmr.msra.gmra.mrb[0].mxu1 %v4179_v34  ;;  %3684 = vmatpush3.bf16.msra.mxu0 %v4184_v38  ;;  %v4250_v34 = vld [vmem:[%s5245_s1 + $0x250] sm:$0xff]   ;;  %v4254_v38 = vld [vmem:[%s5245_s1 + $0x258] sm:$0xff]  }
  0x29   : > { %3724 = vmatpush3.bf16.msra.mxu1 %v4185_v39  ;;  %3685 = vmatprep.subr.bf16.mxu0 %v4186_v40  ;;  %v4255_v39 = vld [vmem:[%s5245_s1 + $0x2d8] sm:$0xff]  }
  0x2a   : > { %3725 = vmatprep.subr.bf16.mxu1 %v4187_v41  ;;  %2402 = vmatprep.mubr.bf16.mxu0 %v4190_v44  ;;  %v4256_v40 = vld [vmem:[%s5245_s1 + $0x218] sm:$0xff]   ;;  %v4262_v44 = vld [vmem:[%s4619_s6 + $0x1a0] ss:$100 sps:$4 sm:$0xff]  }
  0x2b   : > { %2466 = vmatprep.mubr.bf16.mxu1 %v4192_v45  ;;  %v4257_v41 = vld [vmem:[%s5245_s1 + $0x298] sm:$0xff]   ;;  %v4263_v45 = vld [vmem:[%s4619_s6 + $0x1a8] ss:$100 sps:$4 sm:$0xff]  }
  0x2c   : > { %3686 = vmatpush3.bf16.msra.mxu0 %v4188_v42  ;;  %v4258_v42 = vld [vmem:[%s4619_s6 + $0x1a4] ss:$100 sps:$4 sm:$0xff]  }
  0x2d   : > { %3726 = vmatpush3.bf16.msra.mxu1 %v4189_v43  ;;  %3687 = vmatprep.subr.bf16.mxu0 %v4196_v48  ;;  %v4260_v43 = vld [vmem:[%s4619_s6 + $0x1ac] ss:$100 sps:$4 sm:$0xff]   ;;  %v4266_v48 = vld [vmem:[%s5245_s1 + $0x220] sm:$0xff]  }
  0x2e   : > { %3727 = vmatprep.subr.bf16.mxu1 %v4197_v49  ;;  %v4267_v49 = vld [vmem:[%s5245_s1 + $0x2a0] sm:$0xff]  }
  0x2f   : > { %2403 = vmatmul.mubr.bf16.gmra.mrb[4].mxu0 %v4194_v46  ;;  %v4264_v46 = vld [vmem:[%s5245_s1 + $0x260] sm:$0xff]  }
  0x30   : > { %2467 = vmatmul.mubr.bf16.gmra.mrb[4].mxu1 %v4195_v47  ;;  %3688 = vmatpush3.bf16.msra.mxu0 %v4198_v50  ;;  %v4265_v47 = vld [vmem:[%s5245_s1 + $0x2e0] sm:$0xff]   ;;  %v4268_v50 = vld [vmem:[%s5245_s1 + $0x268] sm:$0xff]  }
  0x31   : > { %3728 = vmatpush3.bf16.msra.mxu1 %v4199_v51  ;;  %3689 = vmatprep.subr.bf16.mxu0 %v4200_v52  ;;  %v4269_v51 = vld [vmem:[%s5245_s1 + $0x2e8] sm:$0xff]  }
  0x32   : > { %3729 = vmatprep.subr.bf16.mxu1 %v4201_v53  ;;  %2410 = vmatprep.mubr.bf16.mxu0 %v4204_v56  ;;  %v4270_v52 = vld [vmem:[%s5245_s1 + $0x228] sm:$0xff]   ;;  %v286_v56 = vld [vmem:[%s4619_s6 + $0x270] sm:$0xff] }
  0x33   : > { %2474 = vmatprep.mubr.bf16.mxu1 %v4206_v57  ;;  %v4271_v53 = vld [vmem:[%s5245_s1 + $0x2a8] sm:$0xff]  }
  0x34   : > { %3690 = vmatpush3.bf16.msra.mxu0 %v4202_v54  ;;  %v285_v54 = vld [vmem:[%s4619_s6 + $0x268] sm:$0xff] }
  0x35   : > { %3730 = vmatpush3.bf16.msra.mxu1 %v4203_v55  ;;  %3691 = vmatprep.subr.bf16.mxu0 %v4210_v60  ;;  %v3379_v55 = vcombine.high %v285_v54, %v285_v54  ;;  %v3378_v57 = vcombine.low %v285_v54, %v285_v54  ;;  %v4276_v60 = vld [vmem:[%s5245_s1 + $0x270] sm:$0xff]  }
  0x36   : > { %3731 = vmatprep.subr.bf16.mxu1 %v4211_v61  ;;  %v4277_v61 = vld [vmem:[%s5245_s1 + $0x2f0] sm:$0xff]  }
  0x37   : > { %2411 = vmatmul.mubr.bf16.gmra.mrb[8].mxu0 %v4208_v58  ;;  %v3381_v58 = vcombine.high %v286_v56, %v286_v56  ;;  %v4338_v54 = vld [vmem:[%s4619_s6 + $0x30] ss:$100 sps:$4 sm:$0xff]  }
  0x38   : > { %2475 = vmatmul.mubr.bf16.gmra.mrb[8].mxu1 %v4209_v59  ;;  %3692 = vmatpush3.bf16.msra.mxu0 %v4212_v62  ;;  %v3380_v59 = vcombine.low %v286_v56, %v286_v56  ;;  %v4278_v62 = vld [vmem:[%s5245_s1 + $0x230] sm:$0xff]   ;;  %v4341_v56 = vld [vmem:[%s4619_s6 + $0x38] ss:$100 sps:$4 sm:$0xff]  }
  0x39   : > { %3732 = vmatpush3.bf16.msra.mxu1 %v4213_v63  ;;  %3693 = vmatprep.subr.bf16.mxu0 %v4214_v0  ;;  %v4279_v63 = vld [vmem:[%s5245_s1 + $0x2b0] sm:$0xff]   ;;  %v4280_v0 = vld [vmem:[%s5245_s1 + $0x278] sm:$0xff]  }
  0x3a   : > { %3733 = vmatprep.subr.bf16.mxu1 %v4215_v1  ;;  %2418 = vmatprep.mubr.bf16.mxu0 %v3375_v6  ;;  %v4281_v1 = vld [vmem:[%s5245_s1 + $0x2f8] sm:$0xff]   ;;  %v4287_v6 = vld [vmem:[%s4619_s6 + $0x28] ss:$100 sps:$4 sm:$0xff]  }
  0x3b   : > { %2482 = vmatprep.mubr.bf16.mxu1 %v3377_v7  ;;  %v4289_v7 = vld [vmem:[%s4619_s6 + $0x2c] ss:$100 sps:$4 sm:$0xff]  }
  0x3c   : > { %3694 = vmatpush3.bf16.msra.mxu0 %v4216_v2  ;;  %v4282_v2 = vld [vmem:[%s5245_s1 + $0x238] sm:$0xff]  }
  0x3d   : > { %3734 = vmatpush3.bf16.msra.mxu1 %v4217_v3  ;;  %3695 = vmatprep.subr.bf16.mxu0 %v4222_v10  ;;  %v4283_v3 = vld [vmem:[%s5245_s1 + $0x2b8] sm:$0xff]   ;;  %v4292_v10 = vld [vmem:[%s5245_s1 + $0x300] sm:$0xff]  }
  0x3e   : > { %3735 = vmatprep.subr.bf16.mxu1 %v4223_v11  ;;  %v4293_v11 = vld [vmem:[%s5245_s1 + $0x380] sm:$0xff]  }
  0x3f   : > { %2419 = vmatmul.mubr.bf16.gmra.mrb[12].mxu0 %v3374_v8  ;;  %v4290_v8 = vld [vmem:[%s5245_s1 + $0x340] sm:$0xff]  }
  0x40   : > { %2483 = vmatmul.mubr.bf16.gmra.mrb[12].mxu1 %v3376_v9  ;;  %3696 = vmatpush3.bf16.msra.mxu0 %v4224_v12  ;;  %v4291_v9 = vld [vmem:[%s5245_s1 + $0x3c0] sm:$0xff]   ;;  %v4294_v12 = vld [vmem:[%s5245_s1 + $0x348] sm:$0xff]  }
  0x41   : > { %3736 = vmatpush3.bf16.msra.mxu1 %v4225_v13  ;;  %3697 = vmatprep.subr.bf16.mxu0 %v4226_v14  ;;  %v4295_v13 = vld [vmem:[%s5245_s1 + $0x3c8] sm:$0xff]  }
  0x42   : > { %3737 = vmatprep.subr.bf16.mxu1 %v4227_v15  ;;  %2522 = vmatprep.mubr.bf16.mxu0 %v4232_v19  ;;  %v4296_v14 = vld [vmem:[%s5245_s1 + $0x308] sm:$0xff]   ;;  %v4303_v19 = vld [vmem:[%s4619_s6 + $0xf0] ss:$100 sps:$4 sm:$0xff]  }
  0x43   : > { %2586 = vmatprep.mubr.bf16.mxu1 %v4235_v21  ;;  %v4297_v15 = vld [vmem:[%s5245_s1 + $0x388] sm:$0xff]   ;;  %v4305_v21 = vld [vmem:[%s5245_s1 + $0x3d0] sm:$0xff]  }
  0x44   : > { %3698 = vmatpush3.bf16.msra.mxu0 %v4228_v16  ;;  %v4298_v16 = vld [vmem:[%s4619_s6 + $0xec] ss:$100 sps:$4 sm:$0xff]  }
  0x45   : > { %3738 = vmatpush3.bf16.msra.mxu1 %v4229_v17  ;;  %3763 = vmatprep.subr.bf16.mxu0 %v4236_v22  ;;  %v4300_v17 = vld [vmem:[%s4619_s6 + $0xf4] ss:$100 sps:$4 sm:$0xff]  }
  0x46   : > { %3803 = vmatprep.subr.bf16.mxu1 %v4237_v23  ;;  %v4306_v22 = vld [vmem:[%s5245_s1 + $0x310] sm:$0xff]  }
  0x47   : > { %2523 = vmatmul.mubr.bf16.vlgmr.msra.gmra.mrb[16].mxu0 %v4230_v18  ;;  %v4302_v18 = vld [vmem:[%s4619_s6 + $0xe8] ss:$100 sps:$4 sm:$0xff]   ;;  %v4307_v23 = vld [vmem:[%s5245_s1 + $0x390] sm:$0xff]  }
  0x48   : > { %2587 = vmatmul.mubr.bf16.vlgmr.msra.gmra.mrb[16].mxu1 %v4233_v20  ;;  %3764 = vmatpush3.bf16.msra.mxu0 %v4238_v24  ;;  %v4304_v20 = vld [vmem:[%s5245_s1 + $0x350] sm:$0xff]   ;;  %v4308_v24 = vld [vmem:[%s5245_s1 + $0x358] sm:$0xff]  }
  0x49   : > { %3804 = vmatpush3.bf16.msra.mxu1 %v4239_v25  ;;  %3765 = vmatprep.subr.bf16.mxu0 %v4240_v26  ;;  %v4309_v25 = vld [vmem:[%s5245_s1 + $0x3d8] sm:$0xff]  }
  0x4a   : > { %3805 = vmatprep.subr.bf16.mxu1 %v4241_v27  ;;  %2530 = vmatprep.mubr.bf16.mxu0 %v4244_v30  ;;  %v4310_v26 = vld [vmem:[%s5245_s1 + $0x318] sm:$0xff]   ;;  %v4316_v30 = vld [vmem:[%s4619_s6 + $0x1b0] ss:$100 sps:$4 sm:$0xff]  }
  0x4b   : > { %2594 = vmatprep.mubr.bf16.mxu1 %v4246_v31  ;;  %v4311_v27 = vld [vmem:[%s5245_s1 + $0x398] sm:$0xff]  }
  0x4c   : > { %3766 = vmatpush3.bf16.msra.mxu0 %v4242_v28  ;;  %v4312_v28 = vld [vmem:[%s4619_s6 + $0x1b4] ss:$100 sps:$4 sm:$0xff]  }
  0x4d   : > { %3806 = vmatpush3.bf16.msra.mxu1 %v4243_v29  ;;  %3767 = vmatprep.subr.bf16.mxu0 %v4250_v34  ;;  %v4314_v29 = vld [vmem:[%s4619_s6 + $0x1bc] ss:$100 sps:$4 sm:$0xff]  }
  0x4e   : > { %3807 = vmatprep.subr.bf16.mxu1 %v4251_v35  ;;  %v4317_v31 = vld [vmem:[%s4619_s6 + $0x1b8] ss:$100 sps:$4 sm:$0xff]   ;;  %v4320_v34 = vld [vmem:[%s5245_s1 + $0x320] sm:$0xff]  }
  0x4f   : > { %2531 = vmatmul.mubr.bf16.gmra.mrb[20].mxu0 %v4248_v32  ;;  %v4318_v32 = vld [vmem:[%s5245_s1 + $0x360] sm:$0xff]  }
  0x50   : > { %2595 = vmatmul.mubr.bf16.gmra.mrb[20].mxu1 %v4249_v33  ;;  %3768 = vmatpush3.bf16.msra.mxu0 %v4252_v36  ;;  %v4319_v33 = vld [vmem:[%s5245_s1 + $0x3e0] sm:$0xff]   ;;  %v4322_v36 = vld [vmem:[%s5245_s1 + $0x368] sm:$0xff]  }
  0x51   : > { %3808 = vmatpush3.bf16.msra.mxu1 %v4253_v37  ;;  %3769 = vmatprep.subr.bf16.mxu0 %v4254_v38  ;;  %v4321_v35 = vld [vmem:[%s5245_s1 + $0x3a0] sm:$0xff]   ;;  %v4323_v37 = vld [vmem:[%s5245_s1 + $0x3e8] sm:$0xff]  }
  0x52   : > { %3809 = vmatprep.subr.bf16.mxu1 %v4255_v39  ;;  %2538 = vmatprep.mubr.bf16.mxu0 %v4258_v42  ;;  %v4324_v38 = vld [vmem:[%s5245_s1 + $0x328] sm:$0xff]  }
  0x53   : > { %2602 = vmatprep.mubr.bf16.mxu1 %v4260_v43  ;;  %v4325_v39 = vld [vmem:[%s5245_s1 + $0x3a8] sm:$0xff]  }
  0x54   : > { %3770 = vmatpush3.bf16.msra.mxu0 %v4256_v40  ;;  %v287_v40 = vld [vmem:[%s4619_s6 + $0x278] sm:$0xff] }
  0x55   : > { %3810 = vmatpush3.bf16.msra.mxu1 %v4257_v41  ;;  %3771 = vmatprep.subr.bf16.mxu0 %v4264_v46  ;;  %v288_v41 = vld [vmem:[%s4619_s6 + $0x280] sm:$0xff]  ;;  %v3383_v42 = vcombine.high %v287_v40, %v287_v40  ;;  %v4330_v46 = vld [vmem:[%s5245_s1 + $0x370] sm:$0xff]  }
  0x56   : > { %3811 = vmatprep.subr.bf16.mxu1 %v4265_v47  ;;  %v3385_v43 = vcombine.high %v288_v41, %v288_v41  ;;  %v4331_v47 = vld [vmem:[%s5245_s1 + $0x3f0] sm:$0xff]  }
  0x57   : > { %2539 = vmatmul.mubr.bf16.gmra.mrb[24].mxu0 %v4262_v44  ;;  %v3382_v44 = vcombine.low %v287_v40, %v287_v40  ;;  %v4392_v40 = vld [vmem:[%s4619_s6 + $0x40] ss:$100 sps:$4 sm:$0xff]  }
  0x58   : > { %2603 = vmatmul.mubr.bf16.gmra.mrb[24].mxu1 %v4263_v45  ;;  %3772 = vmatpush3.bf16.msra.mxu0 %v4266_v48  ;;  %v3384_v45 = vcombine.low %v288_v41, %v288_v41  ;;  %v4332_v48 = vld [vmem:[%s5245_s1 + $0x330] sm:$0xff]   ;;  %v4394_v41 = vld [vmem:[%s4619_s6 + $0x44] ss:$100 sps:$4 sm:$0xff]  }
  0x59   : > { %3812 = vmatpush3.bf16.msra.mxu1 %v4267_v49  ;;  %3773 = vmatprep.subr.bf16.mxu0 %v4268_v50  ;;  %v4333_v49 = vld [vmem:[%s5245_s1 + $0x3b0] sm:$0xff]   ;;  %v4334_v50 = vld [vmem:[%s5245_s1 + $0x378] sm:$0xff]  }
  0x5a   : > { %3813 = vmatprep.subr.bf16.mxu1 %v4269_v51  ;;  %2546 = vmatprep.mubr.bf16.mxu0 %v3379_v55  ;;  %v4335_v51 = vld [vmem:[%s5245_s1 + $0x3f8] sm:$0xff]  }
  0x5b   : > { %2610 = vmatprep.mubr.bf16.mxu1 %v3381_v58  ;;  %v4340_v55 = vld [vmem:[%s4619_s6 + $0x34] ss:$100 sps:$4 sm:$0xff]   ;;  %v4344_v58 = vld [vmem:[%s5245_s1 + $0x440] sm:$0xff]  }
  0x5c   : > { %3774 = vmatpush3.bf16.msra.mxu0 %v4270_v52  ;;  %v4336_v52 = vld [vmem:[%s5245_s1 + $0x338] sm:$0xff]  }
  0x5d   : > { %3814 = vmatpush3.bf16.msra.mxu1 %v4271_v53  ;;  %3775 = vmatprep.subr.bf16.mxu0 %v4276_v60  ;;  %v4337_v53 = vld [vmem:[%s5245_s1 + $0x3b8] sm:$0xff]   ;;  %v4346_v60 = vld [vmem:[%s5245_s1 + $0x400] sm:$0xff]  }
  0x5e   : > { %3815 = vmatprep.subr.bf16.mxu1 %v4277_v61  ;;  %v4347_v61 = vld [vmem:[%s5245_s1 + $0x480] sm:$0xff]  }
  0x5f   : > { %2547 = vmatmul.mubr.bf16.gmra.mrb[28].mxu0 %v3378_v57  ;;  %v4343_v57 = vld [vmem:[%s4619_s6 + $0x3c] ss:$100 sps:$4 sm:$0xff]  }
  0x60   : > { %2611 = vmatmul.mubr.bf16.gmra.mrb[28].mxu1 %v3380_v59  ;;  %3776 = vmatpush3.bf16.msra.mxu0 %v4278_v62  ;;  %v4345_v59 = vld [vmem:[%s5245_s1 + $0x4c0] sm:$0xff]   ;;  %v4348_v62 = vld [vmem:[%s5245_s1 + $0x448] sm:$0xff]  }
  0x61   : > { %3816 = vmatpush3.bf16.msra.mxu1 %v4279_v63  ;;  %3777 = vmatprep.subr.bf16.mxu0 %v4280_v0  ;;  %v4349_v63 = vld [vmem:[%s5245_s1 + $0x4c8] sm:$0xff]  }
  0x62   : > { %3817 = vmatprep.subr.bf16.mxu1 %v4281_v1  ;;  %2650 = vmatprep.mubr.bf16.mxu0 %v4286_v5  ;;  %v4350_v0 = vld [vmem:[%s5245_s1 + $0x408] sm:$0xff]   ;;  %v4357_v5 = vld [vmem:[%s4619_s6 + $0x100] ss:$100 sps:$4 sm:$0xff]  }
  0x63   : > { %2714 = vmatprep.mubr.bf16.mxu1 %v4289_v7  ;;  %v4351_v1 = vld [vmem:[%s5245_s1 + $0x488] sm:$0xff]   ;;  %v4359_v7 = vld [vmem:[%s5245_s1 + $0x4d0] sm:$0xff]  }
  0x64   : > { %3778 = vmatpush3.bf16.msra.mxu0 %v4282_v2  ;;  %v4352_v2 = vld [vmem:[%s4619_s6 + $0xfc] ss:$100 sps:$4 sm:$0xff]  }
  0x65   : > { %3818 = vmatpush3.bf16.msra.mxu1 %v4283_v3  ;;  %3843 = vmatprep.subr.bf16.mxu0 %v4290_v8  ;;  %v4354_v3 = vld [vmem:[%s4619_s6 + $0x104] ss:$100 sps:$4 sm:$0xff]   ;;  %v4360_v8 = vld [vmem:[%s5245_s1 + $0x410] sm:$0xff]  }
  0x66   : > { %3883 = vmatprep.subr.bf16.mxu1 %v4291_v9  ;;  %v4361_v9 = vld [vmem:[%s5245_s1 + $0x490] sm:$0xff]  }
  0x67   : > { %2651 = vmatmul.mubr.bf16.vlgmr.msra.gmra.mrb[32].mxu0 %v4284_v4  ;;  %v4356_v4 = vld [vmem:[%s4619_s6 + $0xf8] ss:$100 sps:$4 sm:$0xff]  }
  0x68   : > { %2715 = vmatmul.mubr.bf16.vlgmr.msra.gmra.mrb[32].mxu1 %v4287_v6  ;;  %3844 = vmatpush3.bf16.msra.mxu0 %v4292_v10  ;;  %v4358_v6 = vld [vmem:[%s5245_s1 + $0x450] sm:$0xff]   ;;  %v4362_v10 = vld [vmem:[%s5245_s1 + $0x458] sm:$0xff]  }
  0x69   : > { %3884 = vmatpush3.bf16.msra.mxu1 %v4293_v11  ;;  %3845 = vmatprep.subr.bf16.mxu0 %v4294_v12  ;;  %v4363_v11 = vld [vmem:[%s5245_s1 + $0x4d8] sm:$0xff]  }
  0x6a   : > { %3885 = vmatprep.subr.bf16.mxu1 %v4295_v13  ;;  %2658 = vmatprep.mubr.bf16.mxu0 %v4298_v16  ;;  %v4364_v12 = vld [vmem:[%s5245_s1 + $0x418] sm:$0xff]   ;;  %v4370_v16 = vld [vmem:[%s4619_s6 + $0x1c0] ss:$100 sps:$4 sm:$0xff]  }
  0x6b   : > { %2722 = vmatprep.mubr.bf16.mxu1 %v4300_v17  ;;  %v4365_v13 = vld [vmem:[%s5245_s1 + $0x498] sm:$0xff]   ;;  %v4371_v17 = vld [vmem:[%s4619_s6 + $0x1c8] ss:$100 sps:$4 sm:$0xff]  }
  0x6c   : > { %3846 = vmatpush3.bf16.msra.mxu0 %v4296_v14  ;;  %v4366_v14 = vld [vmem:[%s4619_s6 + $0x1c4] ss:$100 sps:$4 sm:$0xff]  }
  0x6d   : > { %3886 = vmatpush3.bf16.msra.mxu1 %v4297_v15  ;;  %3847 = vmatprep.subr.bf16.mxu0 %v4304_v20  ;;  %v4368_v15 = vld [vmem:[%s4619_s6 + $0x1cc] ss:$100 sps:$4 sm:$0xff]   ;;  %v4374_v20 = vld [vmem:[%s5245_s1 + $0x420] sm:$0xff]  }
  0x6e   : > { %3887 = vmatprep.subr.bf16.mxu1 %v4305_v21  ;;  %v4375_v21 = vld [vmem:[%s5245_s1 + $0x4a0] sm:$0xff]  }
  0x6f   : > { %2659 = vmatmul.mubr.bf16.gmra.mrb[36].mxu0 %v4302_v18  ;;  %v4372_v18 = vld [vmem:[%s5245_s1 + $0x460] sm:$0xff]  }
  0x70   : > { %2723 = vmatmul.mubr.bf16.gmra.mrb[36].mxu1 %v4303_v19  ;;  %3848 = vmatpush3.bf16.msra.mxu0 %v4306_v22  ;;  %v4373_v19 = vld [vmem:[%s5245_s1 + $0x4e0] sm:$0xff]   ;;  %v4376_v22 = vld [vmem:[%s5245_s1 + $0x468] sm:$0xff]  }
  0x71   : > { %3888 = vmatpush3.bf16.msra.mxu1 %v4307_v23  ;;  %3849 = vmatprep.subr.bf16.mxu0 %v4308_v24  ;;  %v4377_v23 = vld [vmem:[%s5245_s1 + $0x4e8] sm:$0xff]  }
  0x72   : > { %3889 = vmatprep.subr.bf16.mxu1 %v4309_v25  ;;  %2666 = vmatprep.mubr.bf16.mxu0 %v4312_v28  ;;  %v4378_v24 = vld [vmem:[%s5245_s1 + $0x428] sm:$0xff]  }
  0x73   : > { %2730 = vmatprep.mubr.bf16.mxu1 %v4314_v29  ;;  %v4379_v25 = vld [vmem:[%s5245_s1 + $0x4a8] sm:$0xff]  }
  0x74   : > { %3850 = vmatpush3.bf16.msra.mxu0 %v4310_v26  ;;  %v289_v26 = vld [vmem:[%s4619_s6 + $0x288] sm:$0xff] }
  0x75   : > { %3890 = vmatpush3.bf16.msra.mxu1 %v4311_v27  ;;  %3851 = vmatprep.subr.bf16.mxu0 %v4318_v32  ;;  %v290_v27 = vld [vmem:[%s4619_s6 + $0x290] sm:$0xff]  ;;  %v3387_v28 = vcombine.high %v289_v26, %v289_v26 }
  0x76   : > { %3891 = vmatprep.subr.bf16.mxu1 %v4319_v33  ;;  %v3389_v29 = vcombine.high %v290_v27, %v290_v27  ;;  %v4384_v32 = vld [vmem:[%s5245_s1 + $0x470] sm:$0xff]  }
  0x77   : > { %2667 = vmatmul.mubr.bf16.gmra.mrb[40].mxu0 %v4316_v30  ;;  %v3386_v30 = vcombine.low %v289_v26, %v289_v26  ;;  %v4385_v33 = vld [vmem:[%s5245_s1 + $0x4f0] sm:$0xff]  }
  0x78   : > { %2731 = vmatmul.mubr.bf16.gmra.mrb[40].mxu1 %v4317_v31  ;;  %3852 = vmatpush3.bf16.msra.mxu0 %v4320_v34  ;;  %v3388_v31 = vcombine.low %v290_v27, %v290_v27  ;;  %v4386_v34 = vld [vmem:[%s5245_s1 + $0x430] sm:$0xff]  }
  0x79   : > { %3892 = vmatpush3.bf16.msra.mxu1 %v4321_v35  ;;  %3853 = vmatprep.subr.bf16.mxu0 %v4322_v36  ;;  %v4387_v35 = vld [vmem:[%s5245_s1 + $0x4b0] sm:$0xff]   ;;  %v4388_v36 = vld [vmem:[%s5245_s1 + $0x478] sm:$0xff]  }
  0x7a   : > { %3893 = vmatprep.subr.bf16.mxu1 %v4323_v37  ;;  %2674 = vmatprep.mubr.bf16.mxu0 %v3383_v42  ;;  %v4389_v37 = vld [vmem:[%s5245_s1 + $0x4f8] sm:$0xff]   ;;  %v4395_v42 = vld [vmem:[%s4619_s6 + $0x48] ss:$100 sps:$4 sm:$0xff]   ;;  %v4446_v26 = vld [vmem:[%s4619_s6 + $0x50] ss:$100 sps:$4 sm:$0xff]  }
  0x7b   : > { %2738 = vmatprep.mubr.bf16.mxu1 %v3385_v43  ;;  %v4397_v43 = vld [vmem:[%s4619_s6 + $0x4c] ss:$100 sps:$4 sm:$0xff]   ;;  %v4448_v27 = vld [vmem:[%s4619_s6 + $0x54] ss:$100 sps:$4 sm:$0xff]  }
  0x7c   : > { %3854 = vmatpush3.bf16.msra.mxu0 %v4324_v38  ;;  %v4390_v38 = vld [vmem:[%s5245_s1 + $0x438] sm:$0xff]  }
  0x7d   : > { %3894 = vmatpush3.bf16.msra.mxu1 %v4325_v39  ;;  %3855 = vmatprep.subr.bf16.mxu0 %v4330_v46  ;;  %v4391_v39 = vld [vmem:[%s5245_s1 + $0x4b8] sm:$0xff]   ;;  %v4400_v46 = vld [vmem:[%s5245_s1 + $0x500] sm:$0xff]  }
  0x7e   : > { %3895 = vmatprep.subr.bf16.mxu1 %v4331_v47  ;;  %v4401_v47 = vld [vmem:[%s5245_s1 + $0x580] sm:$0xff]  }
  0x7f   : > { %2675 = vmatmul.mubr.bf16.gmra.mrb[44].mxu0 %v3382_v44  ;;  %v4398_v44 = vld [vmem:[%s5245_s1 + $0x540] sm:$0xff]  }
  0x80   : > { %2739 = vmatmul.mubr.bf16.gmra.mrb[44].mxu1 %v3384_v45  ;;  %3856 = vmatpush3.bf16.msra.mxu0 %v4332_v48  ;;  %v4399_v45 = vld [vmem:[%s5245_s1 + $0x5c0] sm:$0xff]   ;;  %v4402_v48 = vld [vmem:[%s5245_s1 + $0x548] sm:$0xff]  }
  0x81   : > { %3896 = vmatpush3.bf16.msra.mxu1 %v4333_v49  ;;  %3857 = vmatprep.subr.bf16.mxu0 %v4334_v50  ;;  %v4403_v49 = vld [vmem:[%s5245_s1 + $0x5c8] sm:$0xff]  }
  0x82   : > { %3897 = vmatprep.subr.bf16.mxu1 %v4335_v51  ;;  %2778 = vmatprep.mubr.bf16.mxu0 %v4340_v55  ;;  %v4404_v50 = vld [vmem:[%s5245_s1 + $0x508] sm:$0xff]   ;;  %v4411_v55 = vld [vmem:[%s4619_s6 + $0x110] ss:$100 sps:$4 sm:$0xff]  }
  0x83   : > { %2842 = vmatprep.mubr.bf16.mxu1 %v4343_v57  ;;  %v4405_v51 = vld [vmem:[%s5245_s1 + $0x588] sm:$0xff]   ;;  %v4413_v57 = vld [vmem:[%s5245_s1 + $0x5d0] sm:$0xff]  }
  0x84   : > { %3858 = vmatpush3.bf16.msra.mxu0 %v4336_v52  ;;  %v4406_v52 = vld [vmem:[%s4619_s6 + $0x10c] ss:$100 sps:$4 sm:$0xff]  }
  0x85   : > { %3898 = vmatpush3.bf16.msra.mxu1 %v4337_v53  ;;  %3923 = vmatprep.subr.bf16.mxu0 %v4344_v58  ;;  %v4408_v53 = vld [vmem:[%s4619_s6 + $0x114] ss:$100 sps:$4 sm:$0xff]  }
  0x86   : > { %3963 = vmatprep.subr.bf16.mxu1 %v4345_v59  ;;  %v4414_v58 = vld [vmem:[%s5245_s1 + $0x510] sm:$0xff]  }
  0x87   : > { %2779 = vmatmul.mubr.bf16.vlgmr.msra.gmra.mrb[48].mxu0 %v4338_v54  ;;  %v4410_v54 = vld [vmem:[%s4619_s6 + $0x108] ss:$100 sps:$4 sm:$0xff]   ;;  %v4415_v59 = vld [vmem:[%s5245_s1 + $0x590] sm:$0xff]  }
  0x88   : > { %2843 = vmatmul.mubr.bf16.vlgmr.msra.gmra.mrb[48].mxu1 %v4341_v56  ;;  %3924 = vmatpush3.bf16.msra.mxu0 %v4346_v60  ;;  %v4412_v56 = vld [vmem:[%s5245_s1 + $0x550] sm:$0xff]   ;;  %v4416_v60 = vld [vmem:[%s5245_s1 + $0x558] sm:$0xff]  }
  0x89   : > { %3964 = vmatpush3.bf16.msra.mxu1 %v4347_v61  ;;  %3925 = vmatprep.subr.bf16.mxu0 %v4348_v62  ;;  %v4417_v61 = vld [vmem:[%s5245_s1 + $0x5d8] sm:$0xff]  }
  0x8a   : > { %3965 = vmatprep.subr.bf16.mxu1 %v4349_v63  ;;  %2786 = vmatprep.mubr.bf16.mxu0 %v4352_v2  ;;  %v4418_v62 = vld [vmem:[%s5245_s1 + $0x518] sm:$0xff]   ;;  %v4424_v2 = vld [vmem:[%s4619_s6 + $0x1d0] ss:$100 sps:$4 sm:$0xff]  }
  0x8b   : > { %2850 = vmatprep.mubr.bf16.mxu1 %v4354_v3  ;;  %v4419_v63 = vld [vmem:[%s5245_s1 + $0x598] sm:$0xff]  }
  0x8c   : > { %3926 = vmatpush3.bf16.msra.mxu0 %v4350_v0  ;;  %v4420_v0 = vld [vmem:[%s4619_s6 + $0x1d4] ss:$100 sps:$4 sm:$0xff]  }
  0x8d   : > { %3966 = vmatpush3.bf16.msra.mxu1 %v4351_v1  ;;  %3927 = vmatprep.subr.bf16.mxu0 %v4358_v6  ;;  %v4422_v1 = vld [vmem:[%s4619_s6 + $0x1dc] ss:$100 sps:$4 sm:$0xff]  }
  0x8e   : > { %3967 = vmatprep.subr.bf16.mxu1 %v4359_v7  ;;  %v4425_v3 = vld [vmem:[%s4619_s6 + $0x1d8] ss:$100 sps:$4 sm:$0xff]   ;;  %v4428_v6 = vld [vmem:[%s5245_s1 + $0x520] sm:$0xff]  }
  0x8f   : > { %2787 = vmatmul.mubr.bf16.gmra.mrb[52].mxu0 %v4356_v4  ;;  %v4426_v4 = vld [vmem:[%s5245_s1 + $0x560] sm:$0xff]  }
  0x90   : > { %2851 = vmatmul.mubr.bf16.gmra.mrb[52].mxu1 %v4357_v5  ;;  %3928 = vmatpush3.bf16.msra.mxu0 %v4360_v8  ;;  %v4427_v5 = vld [vmem:[%s5245_s1 + $0x5e0] sm:$0xff]   ;;  %v4430_v8 = vld [vmem:[%s5245_s1 + $0x568] sm:$0xff]  }
  0x91   : > { %3968 = vmatpush3.bf16.msra.mxu1 %v4361_v9  ;;  %3929 = vmatprep.subr.bf16.mxu0 %v4362_v10  ;;  %v4429_v7 = vld [vmem:[%s5245_s1 + $0x5a0] sm:$0xff]   ;;  %v4431_v9 = vld [vmem:[%s5245_s1 + $0x5e8] sm:$0xff]  }
  0x92   : > { %3969 = vmatprep.subr.bf16.mxu1 %v4363_v11  ;;  %2794 = vmatprep.mubr.bf16.mxu0 %v4366_v14  ;;  %v4432_v10 = vld [vmem:[%s5245_s1 + $0x528] sm:$0xff]   ;;  %v292_v14 = vld [vmem:[%s4619_s6 + $0x2a0] sm:$0xff] }
  0x93   : > { %2858 = vmatprep.mubr.bf16.mxu1 %v4368_v15  ;;  %v4433_v11 = vld [vmem:[%s5245_s1 + $0x5a8] sm:$0xff]  }
  0x94   : > { %3930 = vmatpush3.bf16.msra.mxu0 %v4364_v12  ;;  %v291_v12 = vld [vmem:[%s4619_s6 + $0x298] sm:$0xff] }
  0x95   : > { %3970 = vmatpush3.bf16.msra.mxu1 %v4365_v13  ;;  %3931 = vmatprep.subr.bf16.mxu0 %v4372_v18  ;;  %v3391_v13 = vcombine.high %v291_v12, %v291_v12  ;;  %v3390_v15 = vcombine.low %v291_v12, %v291_v12  ;;  %v4438_v18 = vld [vmem:[%s5245_s1 + $0x570] sm:$0xff]  }
  0x96   : > { %3971 = vmatprep.subr.bf16.mxu1 %v4373_v19  ;;  %v4439_v19 = vld [vmem:[%s5245_s1 + $0x5f0] sm:$0xff]  }
  0x97   : > { %2795 = vmatmul.mubr.bf16.gmra.mrb[56].mxu0 %v4370_v16  ;;  %v3393_v16 = vcombine.high %v292_v14, %v292_v14 }
  0x98   : > { %2859 = vmatmul.mubr.bf16.gmra.mrb[56].mxu1 %v4371_v17  ;;  %3932 = vmatpush3.bf16.msra.mxu0 %v4374_v20  ;;  %v3392_v17 = vcombine.low %v292_v14, %v292_v14  ;;  %v4440_v20 = vld [vmem:[%s5245_s1 + $0x530] sm:$0xff]   ;;  %v4475_v14 = vld [vmem:[%s5245_s1 + $0x638] sm:$0xff]  }
  0x99   : > { %3972 = vmatpush3.bf16.msra.mxu1 %v4375_v21  ;;  %3933 = vmatprep.subr.bf16.mxu0 %v4376_v22  ;;  %v4441_v21 = vld [vmem:[%s5245_s1 + $0x5b0] sm:$0xff]   ;;  %v4442_v22 = vld [vmem:[%s5245_s1 + $0x578] sm:$0xff]  }
  0x9a   : > { %3973 = vmatprep.subr.bf16.mxu1 %v4377_v23  ;;  %2802 = vmatprep.mubr.bf16.mxu0 %v3387_v28  ;;  %v4443_v23 = vld [vmem:[%s5245_s1 + $0x5f8] sm:$0xff]  }
  0x9b   : > { %2866 = vmatprep.mubr.bf16.mxu1 %v3389_v29  ;;  %v4449_v28 = vld [vmem:[%s4619_s6 + $0x58] ss:$100 sps:$4 sm:$0xff]  }
  0x9c   : > { %3934 = vmatpush3.bf16.msra.mxu0 %v4378_v24  ;;  %v4444_v24 = vld [vmem:[%s5245_s1 + $0x538] sm:$0xff]  }
  0x9d   : > { %3974 = vmatpush3.bf16.msra.mxu1 %v4379_v25  ;;  %3935 = vmatprep.subr.bf16.mxu0 %v4384_v32  ;;  %v4445_v25 = vld [vmem:[%s5245_s1 + $0x5b8] sm:$0xff]  }
  0x9e   : > { %3975 = vmatprep.subr.bf16.mxu1 %v4385_v33  ;;  %v4451_v29 = vld [vmem:[%s4619_s6 + $0x5c] ss:$100 sps:$4 sm:$0xff]   ;;  %v4456_v33 = vld [vmem:[%s4619_s6 + $0x124] ss:$100 sps:$4 sm:$0xff]  }
  0x9f   : > { %2803 = vmatmul.mubr.bf16.gmra.mrb[60].mxu0 %v3386_v30  ;;  %v4452_v30 = vld [vmem:[%s5245_s1 + $0x600] sm:$0xff]  }
  0xa0   : > { %2867 = vmatmul.mubr.bf16.gmra.mrb[60].mxu1 %v3388_v31  ;;  %3936 = vmatpush3.bf16.msra.mxu0 %v4386_v34  ;;  %v4453_v31 = vld [vmem:[%s5245_s1 + $0x608] sm:$0xff]   ;;  %v4454_v32 = vld [vmem:[%s4619_s6 + $0x11c] ss:$100 sps:$4 sm:$0xff]  }
  0xa1   : > { %3976 = vmatpush3.bf16.msra.mxu1 %v4387_v35  ;;  %3937 = vmatprep.subr.bf16.mxu0 %v4388_v36  ;;  %v4458_v34 = vld [vmem:[%s4619_s6 + $0x118] ss:$100 sps:$4 sm:$0xff]   ;;  %v4460_v35 = vld [vmem:[%s5245_s1 + $0x610] sm:$0xff]   ;;  %v4459_v36 = vld [vmem:[%s4619_s6 + $0x120] ss:$100 sps:$4 sm:$0xff]  }
  0xa2   : > { %3977 = vmatprep.subr.bf16.mxu1 %v4389_v37  ;;  %2906 = vmatprep.mubr.bf16.mxu0 %v4394_v41  ;;  %v4462_v37 = vld [vmem:[%s4619_s6 + $0x1e4] ss:$100 sps:$4 sm:$0xff]  }
  0xa3   : > { %2970 = vmatprep.mubr.bf16.mxu1 %v4397_v43  ;;  %v4466_v41 = vld [vmem:[%s4619_s6 + $0x1e0] ss:$100 sps:$4 sm:$0xff]   ;;  %v293_v43 = vld [vmem:[%s4619_s6 + $0x2a8] sm:$0xff] }
  0xa4   : > { %3938 = vmatpush3.bf16.msra.mxu0 %v4390_v38  ;;  %v4461_v38 = vld [vmem:[%s5245_s1 + $0x618] sm:$0xff]  }
  0xa5   : > { %3978 = vmatpush3.bf16.msra.mxu1 %v4391_v39  ;;  %4003 = vmatprep.subr.bf16.mxu0 %v4398_v44  ;;  %v4464_v39 = vld [vmem:[%s4619_s6 + $0x1ec] ss:$100 sps:$4 sm:$0xff]  }
  0xa6   : > { %4043 = vmatprep.subr.bf16.mxu1 %v4399_v45 }
  0xa7   : > { %2907 = vmatmul.mubr.bf16.vlgmr.msra.gmra.mrb[64].mxu0 %v4392_v40 }
  0xa8   : > { %2971 = vmatmul.mubr.bf16.vlgmr.msra.gmra.mrb[64].mxu1 %v4395_v42  ;;  %4004 = vmatpush3.bf16.msra.mxu0 %v4400_v46  ;;  %v4468_v42 = vld [vmem:[%s5245_s1 + $0x620] sm:$0xff]   ;;  %v294_v46 = vld [vmem:[%s4619_s6 + $0x2b0] sm:$0xff] }
  0xa9   : > { %4044 = vmatpush3.bf16.msra.mxu1 %v4401_v47  ;;  %4005 = vmatprep.subr.bf16.mxu0 %v4402_v48 }
  0xaa   : > { %4045 = vmatprep.subr.bf16.mxu1 %v4403_v49  ;;  %2914 = vmatprep.mubr.bf16.mxu0 %v4406_v52  ;;  %v3395_v52 = vcombine.high %v293_v43, %v293_v43 }
  0xab   : > { %2978 = vmatprep.mubr.bf16.mxu1 %v4408_v53  ;;  %v3397_v53 = vcombine.high %v294_v46, %v294_v46 }
  0xac   : > { %4006 = vmatpush3.bf16.msra.mxu0 %v4404_v50 }
  0xad   : > { %4046 = vmatpush3.bf16.msra.mxu1 %v4405_v51  ;;  %4007 = vmatprep.subr.bf16.mxu0 %v4412_v56  ;;  %v4467_v51 = vld [vmem:[%s4619_s6 + $0x1e8] ss:$100 sps:$4 sm:$0xff]  }
  0xae   : > { %4047 = vmatprep.subr.bf16.mxu1 %v4413_v57 }
  0xaf   : > { %2915 = vmatmul.mubr.bf16.gmra.mrb[68].mxu0 %v4410_v54 }
  0xb0   : > { %2979 = vmatmul.mubr.bf16.gmra.mrb[68].mxu1 %v4411_v55  ;;  %4008 = vmatpush3.bf16.msra.mxu0 %v4414_v58  ;;  %v4469_v55 = vld [vmem:[%s5245_s1 + $0x628] sm:$0xff]  }
  0xb1   : > { %4048 = vmatpush3.bf16.msra.mxu1 %v4415_v59  ;;  %4009 = vmatprep.subr.bf16.mxu0 %v4416_v60 }
  0xb2   : > { %4049 = vmatprep.subr.bf16.mxu1 %v4417_v61  ;;  %2922 = vmatprep.mubr.bf16.mxu0 %v4420_v0 }
  0xb3   : > { %2986 = vmatprep.mubr.bf16.mxu1 %v4422_v1  ;;  %v3394_v1 = vcombine.low %v293_v43, %v293_v43 }
  0xb4   : > { %4010 = vmatpush3.bf16.msra.mxu0 %v4418_v62  ;;  %v4474_v62 = vld [vmem:[%s5245_s1 + $0x630] sm:$0xff]  }
  0xb5   : > { %4050 = vmatpush3.bf16.msra.mxu1 %v4419_v63  ;;  %4011 = vmatprep.subr.bf16.mxu0 %v4426_v4 }
  0xb6   : > { %4051 = vmatprep.subr.bf16.mxu1 %v4427_v5 }
  0xb7   : > { %2923 = vmatmul.mubr.bf16.gmra.mrb[72].mxu0 %v4424_v2 }
  0xb8   : > { %2987 = vmatmul.mubr.bf16.gmra.mrb[72].mxu1 %v4425_v3  ;;  %4012 = vmatpush3.bf16.msra.mxu0 %v4428_v6  ;;  %v3396_v6 = vcombine.low %v294_v46, %v294_v46 }
  0xb9   : > { %4052 = vmatpush3.bf16.msra.mxu1 %v4429_v7  ;;  %4013 = vmatprep.subr.bf16.mxu0 %v4430_v8  ;;  %v4476_v7 = vld [vmem:[%s4619_s6 + $0x60] ss:$100 sps:$4 sm:$0xff]  }
  0xba   : > { %4053 = vmatprep.subr.bf16.mxu1 %v4431_v9  ;;  %2930 = vmatprep.mubr.bf16.mxu0 %v3391_v13 }
  0xbb   : > { %2994 = vmatprep.mubr.bf16.mxu1 %v3393_v16 }
  0xbc   : > { %4014 = vmatpush3.bf16.msra.mxu0 %v4432_v10 }
  0xbd   : > { %4054 = vmatpush3.bf16.msra.mxu1 %v4433_v11  ;;  %4015 = vmatprep.subr.bf16.mxu0 %v4438_v18  ;;  %v4477_v11 = vld [vmem:[%s4619_s6 + $0x1f0] ss:$100 sps:$4 sm:$0xff]   ;;  %v4478_v18 = vld [vmem:[%s4619_s6 + $0x128] ss:$100 sps:$4 sm:$0xff]  }
  0xbe   : > { %4055 = vmatprep.subr.bf16.mxu1 %v4439_v19 }
  0xbf   : > { %2931 = vmatmul.mubr.bf16.gmra.mrb[76].mxu0 %v3390_v15 }
  0xc0   : > { %2995 = vmatmul.mubr.bf16.gmra.mrb[76].mxu1 %v3392_v17  ;;  %4016 = vmatpush3.bf16.msra.mxu0 %v4440_v20  ;;  %v4479_v20 = vld [vmem:[%s4619_s6 + $0x2b8] ss:$0 sps:$4 sm:$0xff]  }
  0xc1   : > { %4056 = vmatpush3.bf16.msra.mxu1 %v4441_v21  ;;  %4017 = vmatprep.subr.bf16.mxu0 %v4442_v22 }
  0xc2   : > { %4057 = vmatprep.subr.bf16.mxu1 %v4443_v23  ;;  %3034 = vmatprep.mubr.bf16.mxu0 %v4448_v27 }
  0xc3   : > { %3098 = vmatprep.mubr.bf16.mxu1 %v4451_v29 }
  0xc4   : > { %4018 = vmatpush3.bf16.msra.mxu0 %v4444_v24 }
  0xc5   : > { %4058 = vmatpush3.bf16.msra.mxu1 %v4445_v25  ;;  %4095 = vmatprep.subr.bf16.mxu0 %v4452_v30 }
  0xc6   : > { %4119 = vmatprep.subr.bf16.mxu1 %v4452_v30 }
  0xc7   : > { %3035 = vmatmul.mubr.bf16.vlgmr.msra.gmra.mrb[80].mxu0 %v4446_v26 }
  0xc8   : > { %3099 = vmatmul.mubr.bf16.vlgmr.msra.gmra.mrb[80].mxu1 %v4449_v28  ;;  %4096 = vmatpush3.bf16.msra.mxu0 %v4452_v30 }
  0xc9   : > { %4127 = vmatpush3.bf16.msra.mxu1 %v4452_v30  ;;  %4097 = vmatprep.subr.bf16.mxu0 %v4453_v31 }
  0xca   : > { %4120 = vmatprep.subr.bf16.mxu1 %v4453_v31  ;;  %3042 = vmatprep.mubr.bf16.mxu0 %v4454_v32 }
  0xcb   : > { %3106 = vmatprep.mubr.bf16.mxu1 %v4456_v33 }
  0xcc   : > { %4098 = vmatpush3.bf16.msra.mxu0 %v4453_v31 }
  0xcd   : > { %4128 = vmatpush3.bf16.msra.mxu1 %v4453_v31  ;;  %4099 = vmatprep.subr.bf16.mxu0 %v4460_v35 }
  0xce   : > { %4121 = vmatprep.subr.bf16.mxu1 %v4460_v35 }
  0xcf   : > { %3043 = vmatmul.mubr.bf16.gmra.mrb[84].mxu0 %v4458_v34 }
  0xd0   : > { %3107 = vmatmul.mubr.bf16.gmra.mrb[84].mxu1 %v4459_v36  ;;  %3050 = vmatprep.mubr.bf16.mxu0 %v4462_v37 }
  0xd1   : > { %4100 = vmatpush3.bf16.msra.mxu0 %v4460_v35  ;;  %3114 = vmatprep.mubr.bf16.mxu1 %v4464_v39 }
  0xd2   : > { %4129 = vmatpush3.bf16.msra.mxu1 %v4460_v35  ;;  %4101 = vmatprep.subr.bf16.mxu0 %v4461_v38 }
  0xd3   : > { %4122 = vmatprep.subr.bf16.mxu1 %v4461_v38 }
  0xd5   : > { %4102 = vmatpush3.bf16.msra.mxu0 %v4461_v38 }
  0xd6   : > { %4130 = vmatpush3.bf16.msra.mxu1 %v4461_v38  ;;  %4103 = vmatprep.subr.bf16.mxu0 %v4468_v42 }
  0xd7   : > { %3051 = vmatmul.mubr.bf16.gmra.mrb[88].mxu0 %v4466_v41  ;;  %4123 = vmatprep.subr.bf16.mxu1 %v4468_v42 }
  0xd8   : > { %3115 = vmatmul.mubr.bf16.gmra.mrb[88].mxu1 %v4467_v51  ;;  %3058 = vmatprep.mubr.bf16.mxu0 %v3395_v52 }
  0xd9   : > { %4104 = vmatpush3.bf16.msra.mxu0 %v4468_v42  ;;  %3122 = vmatprep.mubr.bf16.mxu1 %v3397_v53 }
  0xda   : > { %4131 = vmatpush3.bf16.msra.mxu1 %v4468_v42  ;;  %4105 = vmatprep.subr.bf16.mxu0 %v4469_v55 }
  0xdb   : > { %4124 = vmatprep.subr.bf16.mxu1 %v4469_v55 }
  0xdd   : > { %4106 = vmatpush3.bf16.msra.mxu0 %v4469_v55 }
  0xde   : > { %4132 = vmatpush3.bf16.msra.mxu1 %v4469_v55  ;;  %4107 = vmatprep.subr.bf16.mxu0 %v4474_v62 }
  0xdf   : > { %3059 = vmatmul.mubr.bf16.gmra.mrb[92].mxu0 %v3394_v1  ;;  %4125 = vmatprep.subr.bf16.mxu1 %v4474_v62 }
  0xe0   : > { %3123 = vmatmul.mubr.bf16.gmra.mrb[92].mxu1 %v3396_v6  ;;  %4111 = vmatprep.mubr.bf16.mxu0 %v4476_v7 }
  0xe1   : > { %4108 = vmatpush3.bf16.msra.mxu0 %v4474_v62  ;;  %4115 = vmatprep.mubr.bf16.mxu1 %v4477_v11 }
  0xe2   : > { %4133 = vmatpush3.bf16.msra.mxu1 %v4474_v62  ;;  %4109 = vmatprep.subr.bf16.mxu0 %v4475_v14 }
  0xe3   : > { %4126 = vmatprep.subr.bf16.mxu1 %v4475_v14 }
  0xe5   : > { %4110 = vmatpush3.bf16.msra.mxu0 %v4475_v14 }
  0xe6   : > { %4134 = vmatpush3.bf16.msra.mxu1 %v4475_v14 }
  0xe8   : > { %4112 = vmatmul.mubr.bf16.vlgmr.msra.gmra.mrb[96].mxu0 %v4478_v18 }
  0xe9   : > { %4116 = vmatmul.mubr.bf16.vlgmr.msra.gmra.mrb[96].mxu1 %v4479_v20 }
  0xfa   : > { %v3619_v40 = vpop.f32.mrb[0].mxu0 }
  0xfb   : > { %v3659_v44 = vpop.f32.mrb[0].mxu1  ;;  %v3620_v45 = vpop.f32.mrb[1].mxu0 }
  0xfc   : > { %v3660_v47 = vpop.f32.mrb[1].mxu1  ;;  %v3621_v48 = vadd.f32 %v3620_v45, %v3619_v40  ;;  %v3622_v50 = vpop.f32.mrb[2].mxu0 }
  0xfd   : > { %v3661_v49 = vadd.f32 %v3660_v47, %v3659_v44  ;;  %v3662_v56 = vpop.f32.mrb[2].mxu1  ;;  %v3623_v57 = vpop.f32.mrb[3].mxu0 }
  0xfe   : > { %v3624_v58 = vadd.f32 %v3623_v57, %v3622_v50  ;;  %v3663_v59 = vpop.f32.mrb[3].mxu1 }
  0xff   : > { %v5206_v54 = vadd.f32 %v3661_v49, %v3621_v48  ;;  %v3664_v60 = vadd.f32 %v3663_v59, %v3662_v56 }
 0x101   : > { %v5214_v2 = vadd.f32 %v3664_v60, %v3624_v58 }
 0x102   : > { %v3625_v61 = vpop.f32.mrb[4].mxu0 }
 0x103   : > { %v3665_v63 = vpop.f32.mrb[4].mxu1  ;;  %v3626_v0 = vpop.f32.mrb[5].mxu0 }
 0x104   : > { %v3627_v3 = vadd.f32 %v3626_v0, %v3625_v61  ;;  %v3666_v4 = vpop.f32.mrb[5].mxu1  ;;  %v3628_v5 = vpop.f32.mrb[6].mxu0 }
 0x105   : > { %v3667_v8 = vadd.f32 %v3666_v4, %v3665_v63  ;;  %v3668_v9 = vpop.f32.mrb[6].mxu1  ;;  %v3629_v10 = vpop.f32.mrb[7].mxu0 }
 0x106   : > { %v3630_v12 = vadd.f32 %v3629_v10, %v3628_v5  ;;  %v3669_v13 = vpop.f32.mrb[7].mxu1 }
 0x107   : > { %v5221_v15 = vadd.f32 %v3667_v8, %v3627_v3  ;;  %v3670_v16 = vadd.f32 %v3669_v13, %v3668_v9 }
 0x109   : > { %v5223_v17 = vadd.f32 %v3670_v16, %v3630_v12 }
 0x10a   : > { %v3631_v19 = vpop.f32.mrb[8].mxu0 }
 0x10b   : > { %v3671_v21 = vpop.f32.mrb[8].mxu1  ;;  %v3632_v22 = vpop.f32.mrb[9].mxu0 }
 0x10c   : > { %v3633_v23 = vadd.f32 %v3632_v22, %v3631_v19  ;;  %v3672_v24 = vpop.f32.mrb[9].mxu1  ;;  %v3634_v25 = vpop.f32.mrb[10].mxu0 }
 0x10d   : > { %v3673_v26 = vadd.f32 %v3672_v24, %v3671_v21  ;;  %v3674_v27 = vpop.f32.mrb[10].mxu1  ;;  %v3635_v28 = vpop.f32.mrb[11].mxu0 }
 0x10e   : > { %v3636_v29 = vadd.f32 %v3635_v28, %v3634_v25  ;;  %v3675_v30 = vpop.f32.mrb[11].mxu1 }
 0x10f   : > { %v2477_v31 = vadd.f32 %v3673_v26, %v3633_v23  ;;  %v3676_v32 = vadd.f32 %v3675_v30, %v3674_v27 }
 0x111   : > { %v2480_v33 = vadd.f32 %v3676_v32, %v3636_v29 }
 0x112   : > { %v3637_v34 = vpop.f32.mrb[12].mxu0 }
 0x113   : > { %v3677_v35 = vpop.f32.mrb[12].mxu1  ;;  %v3638_v36 = vpop.f32.mrb[13].mxu0 }
 0x114   : > { %v3678_v37 = vpop.f32.mrb[13].mxu1  ;;  %v3639_v38 = vadd.f32 %v3638_v36, %v3637_v34  ;;  %v3640_v40 = vpop.f32.mrb[14].mxu0 }
 0x115   : > { %v3679_v39 = vadd.f32 %v3678_v37, %v3677_v35  ;;  %v3680_v41 = vpop.f32.mrb[14].mxu1  ;;  %v3641_v42 = vpop.f32.mrb[15].mxu0 }
 0x116   : > { %v3681_v43 = vpop.f32.mrb[15].mxu1 }
 0x117   : > { %v2485_v44 = vadd.f32 %v3679_v39, %v3639_v38 }
 0x11a   : > { %v3699_v45 = vpop.f32.mrb[16].mxu0 }
 0x11b   : > { %v3739_v46 = vpop.f32.mrb[16].mxu1  ;;  %v3700_v47 = vpop.f32.mrb[17].mxu0 }
 0x11c   : > { %v3701_v48 = vadd.f32 %v3700_v47, %v3699_v45  ;;  %v3740_v49 = vpop.f32.mrb[17].mxu1  ;;  %v3702_v50 = vpop.f32.mrb[18].mxu0 }
 0x11d   : > { %v3741_v51 = vadd.f32 %v3740_v49, %v3739_v46  ;;  %v3742_v52 = vpop.f32.mrb[18].mxu1  ;;  %v3703_v53 = vpop.f32.mrb[19].mxu0 }
 0x11e   : > { %v2525_v55 = vadd.f32 %v3701_v48, %v5206_v54  ;;  %v3704_v56 = vadd.f32 %v3703_v53, %v3702_v50  ;;  %v3743_v57 = vpop.f32.mrb[19].mxu1 }
 0x11f   : > { %v3744_v58 = vadd.f32 %v3743_v57, %v3742_v52 }
 0x120   : > { %v2589_v59 = vadd.f32 %v3741_v51, %v2525_v55  ;;  %v2528_v60 = vadd.f32 %v3704_v56, %v5214_v2 }
 0x122   : > { %v2592_v61 = vadd.f32 %v3744_v58, %v2528_v60  ;;  %v3705_v62 = vpop.f32.mrb[20].mxu0 }
 0x123   : > { %v3745_v63 = vpop.f32.mrb[20].mxu1  ;;  %v3706_v0 = vpop.f32.mrb[21].mxu0 }
 0x124   : > { %v3707_v1 = vadd.f32 %v3706_v0, %v3705_v62  ;;  %v3746_v3 = vpop.f32.mrb[21].mxu1  ;;  %v3708_v4 = vpop.f32.mrb[22].mxu0 }
 0x125   : > { %v3747_v5 = vadd.f32 %v3746_v3, %v3745_v63  ;;  %v3748_v6 = vpop.f32.mrb[22].mxu1  ;;  %v3709_v7 = vpop.f32.mrb[23].mxu0 }
 0x126   : > { %v2533_v8 = vadd.f32 %v3707_v1, %v5221_v15  ;;  %v3710_v9 = vadd.f32 %v3709_v7, %v3708_v4  ;;  %v3749_v54 = vpop.f32.mrb[23].mxu1 }
 0x127   : > { %v3750_v10 = vadd.f32 %v3749_v54, %v3748_v6 }
 0x128   : > { %v2597_v11 = vadd.f32 %v3747_v5, %v2533_v8  ;;  %v2536_v12 = vadd.f32 %v3710_v9, %v5223_v17 }
 0x12a   : > { %v2600_v13 = vadd.f32 %v3750_v10, %v2536_v12  ;;  %v3711_v2 = vpop.f32.mrb[24].mxu0 }
 0x12b   : > { %v3751_v14 = vpop.f32.mrb[24].mxu1  ;;  %v3712_v16 = vpop.f32.mrb[25].mxu0 }
 0x12c   : > { %v3752_v18 = vpop.f32.mrb[25].mxu1  ;;  %v3713_v19 = vadd.f32 %v3712_v16, %v3711_v2  ;;  %v3714_v21 = vpop.f32.mrb[26].mxu0 }
 0x12d   : > { %v3753_v20 = vadd.f32 %v3752_v18, %v3751_v14  ;;  %v3754_v22 = vpop.f32.mrb[26].mxu1  ;;  %v3715_v23 = vpop.f32.mrb[27].mxu0 }
 0x12e   : > { %v3755_v24 = vpop.f32.mrb[27].mxu1  ;;  %v2541_v25 = vadd.f32 %v3713_v19, %v2477_v31  ;;  %v3716_v26 = vadd.f32 %v3715_v23, %v3714_v21 }
 0x12f   : > { %v3756_v15 = vadd.f32 %v3755_v24, %v3754_v22 }
 0x130   : > { %v2605_v27 = vadd.f32 %v3753_v20, %v2541_v25  ;;  %v2544_v28 = vadd.f32 %v3716_v26, %v2480_v33 }
 0x132   : > { %v2608_v29 = vadd.f32 %v3756_v15, %v2544_v28  ;;  %v3717_v30 = vpop.f32.mrb[28].mxu0 }
 0x133   : > { %v3757_v32 = vpop.f32.mrb[28].mxu1  ;;  %v3718_v17 = vpop.f32.mrb[29].mxu0 }
 0x134   : > { %v3719_v34 = vadd.f32 %v3718_v17, %v3717_v30  ;;  %v3758_v35 = vpop.f32.mrb[29].mxu1  ;;  %v3720_v36 = vpop.f32.mrb[30].mxu0 }
 0x135   : > { %v3759_v37 = vadd.f32 %v3758_v35, %v3757_v32  ;;  %v3760_v38 = vpop.f32.mrb[30].mxu1  ;;  %v3721_v39 = vpop.f32.mrb[31].mxu0 }
 0x136   : > { %v2549_v40 = vadd.f32 %v3719_v34, %v2485_v44  ;;  %v3761_v41 = vpop.f32.mrb[31].mxu1 }
 0x138   : > { %v2613_v42 = vadd.f32 %v3759_v37, %v2549_v40 }
 0x13a   : > { %v3779_v43 = vpop.f32.mrb[32].mxu0 }
 0x13b   : > { %v3819_v45 = vpop.f32.mrb[32].mxu1  ;;  %v3780_v31 = vpop.f32.mrb[33].mxu0 }
 0x13c   : > { %v3781_v46 = vadd.f32 %v3780_v31, %v3779_v43  ;;  %v3820_v47 = vpop.f32.mrb[33].mxu1  ;;  %v3782_v48 = vpop.f32.mrb[34].mxu0 }
 0x13d   : > { %v3821_v33 = vadd.f32 %v3820_v47, %v3819_v45  ;;  %v3822_v49 = vpop.f32.mrb[34].mxu1  ;;  %v3783_v50 = vpop.f32.mrb[35].mxu0 }
 0x13e   : > { %v2653_v51 = vadd.f32 %v3781_v46, %v2589_v59  ;;  %v3784_v52 = vadd.f32 %v3783_v50, %v3782_v48  ;;  %v3823_v53 = vpop.f32.mrb[35].mxu1 }
 0x13f   : > { %v3824_v55 = vadd.f32 %v3823_v53, %v3822_v49 }
 0x140   : > { %v2717_v56 = vadd.f32 %v3821_v33, %v2653_v51  ;;  %v2656_v57 = vadd.f32 %v3784_v52, %v2592_v61 }
 0x142   : > { %v2720_v58 = vadd.f32 %v3824_v55, %v2656_v57  ;;  %v3785_v60 = vpop.f32.mrb[36].mxu0 }
 0x143   : > { %v3825_v44 = vpop.f32.mrb[36].mxu1  ;;  %v3786_v62 = vpop.f32.mrb[37].mxu0 }
 0x144   : > { %v3826_v63 = vpop.f32.mrb[37].mxu1  ;;  %v3787_v0 = vadd.f32 %v3786_v62, %v3785_v60  ;;  %v3788_v3 = vpop.f32.mrb[38].mxu0 }
 0x145   : > { %v3827_v1 = vadd.f32 %v3826_v63, %v3825_v44  ;;  %v3828_v4 = vpop.f32.mrb[38].mxu1  ;;  %v3789_v5 = vpop.f32.mrb[39].mxu0 }
 0x146   : > { %v3829_v6 = vpop.f32.mrb[39].mxu1  ;;  %v2661_v7 = vadd.f32 %v3787_v0, %v2597_v11  ;;  %v3790_v8 = vadd.f32 %v3789_v5, %v3788_v3 }
 0x147   : > { %v3830_v9 = vadd.f32 %v3829_v6, %v3828_v4 }
 0x148   : > { %v2725_v59 = vadd.f32 %v3827_v1, %v2661_v7  ;;  %v2664_v54 = vadd.f32 %v3790_v8, %v2600_v13 }
 0x14a   : > { %v2728_v10 = vadd.f32 %v3830_v9, %v2664_v54  ;;  %v3791_v12 = vpop.f32.mrb[40].mxu0 }
 0x14b   : > { %v3831_v2 = vpop.f32.mrb[40].mxu1  ;;  %v3792_v61 = vpop.f32.mrb[41].mxu0 }
 0x14c   : > { %v3793_v14 = vadd.f32 %v3792_v61, %v3791_v12  ;;  %v3832_v16 = vpop.f32.mrb[41].mxu1  ;;  %v3794_v18 = vpop.f32.mrb[42].mxu0 }
 0x14d   : > { %v3833_v19 = vadd.f32 %v3832_v16, %v3831_v2  ;;  %v3834_v20 = vpop.f32.mrb[42].mxu1  ;;  %v3795_v21 = vpop.f32.mrb[43].mxu0 }
 0x14e   : > { %v2669_v22 = vadd.f32 %v3793_v14, %v2605_v27  ;;  %v3796_v23 = vadd.f32 %v3795_v21, %v3794_v18  ;;  %v3835_v24 = vpop.f32.mrb[43].mxu1 }
 0x14f   : > { %v3836_v25 = vadd.f32 %v3835_v24, %v3834_v20 }
 0x150   : > { %v2733_v26 = vadd.f32 %v3833_v19, %v2669_v22  ;;  %v2672_v11 = vadd.f32 %v3796_v23, %v2608_v29 }
 0x152   : > { %v2736_v15 = vadd.f32 %v3836_v25, %v2672_v11  ;;  %v3797_v28 = vpop.f32.mrb[44].mxu0 }
 0x153   : > { %v3837_v30 = vpop.f32.mrb[44].mxu1  ;;  %v3798_v13 = vpop.f32.mrb[45].mxu0 }
 0x154   : > { %v3838_v32 = vpop.f32.mrb[45].mxu1  ;;  %v3799_v17 = vadd.f32 %v3798_v13, %v3797_v28  ;;  %v3800_v35 = vpop.f32.mrb[46].mxu0 }
 0x155   : > { %v3839_v34 = vadd.f32 %v3838_v32, %v3837_v30  ;;  %v3840_v36 = vpop.f32.mrb[46].mxu1  ;;  %v3801_v37 = vpop.f32.mrb[47].mxu0 }
 0x156   : > { %v3841_v38 = vpop.f32.mrb[47].mxu1  ;;  %v2677_v39 = vadd.f32 %v3799_v17, %v2613_v42 }
 0x158   : > { %v2741_v40 = vadd.f32 %v3839_v34, %v2677_v39 }
 0x15a   : > { %v3859_v41 = vpop.f32.mrb[48].mxu0 }
 0x15b   : > { %v3899_v27 = vpop.f32.mrb[48].mxu1  ;;  %v3860_v43 = vpop.f32.mrb[49].mxu0 }
 0x15c   : > { %v3861_v45 = vadd.f32 %v3860_v43, %v3859_v41  ;;  %v3900_v31 = vpop.f32.mrb[49].mxu1  ;;  %v3862_v46 = vpop.f32.mrb[50].mxu0 }
 0x15d   : > { %v3901_v29 = vadd.f32 %v3900_v31, %v3899_v27  ;;  %v3902_v47 = vpop.f32.mrb[50].mxu1  ;;  %v3863_v48 = vpop.f32.mrb[51].mxu0 }
 0x15e   : > { %v2781_v33 = vadd.f32 %v3861_v45, %v2717_v56  ;;  %v3864_v49 = vadd.f32 %v3863_v48, %v3862_v46  ;;  %v3903_v50 = vpop.f32.mrb[51].mxu1 }
 0x15f   : > { %v3904_v51 = vadd.f32 %v3903_v50, %v3902_v47 }
 0x160   : > { %v2845_v52 = vadd.f32 %v3901_v29, %v2781_v33  ;;  %v2784_v53 = vadd.f32 %v3864_v49, %v2720_v58 }
 0x162   : > { %v2848_v55 = vadd.f32 %v3904_v51, %v2784_v53  ;;  %v3865_v57 = vpop.f32.mrb[52].mxu0 }
 0x163   : > { %v3905_v60 = vpop.f32.mrb[52].mxu1  ;;  %v3866_v42 = vpop.f32.mrb[53].mxu0 }
 0x164   : > { %v3867_v44 = vadd.f32 %v3866_v42, %v3865_v57  ;;  %v3906_v62 = vpop.f32.mrb[53].mxu1  ;;  %v3868_v63 = vpop.f32.mrb[54].mxu0 }
 0x165   : > { %v3907_v0 = vadd.f32 %v3906_v62, %v3905_v60  ;;  %v3908_v1 = vpop.f32.mrb[54].mxu1  ;;  %v3869_v3 = vpop.f32.mrb[55].mxu0 }
 0x166   : > { %v2789_v4 = vadd.f32 %v3867_v44, %v2725_v59  ;;  %v3870_v5 = vadd.f32 %v3869_v3, %v3868_v63  ;;  %v3909_v6 = vpop.f32.mrb[55].mxu1 }
 0x167   : > { %v3910_v7 = vadd.f32 %v3909_v6, %v3908_v1 }
 0x168   : > { %v2853_v56 = vadd.f32 %v3907_v0, %v2789_v4  ;;  %v2792_v8 = vadd.f32 %v3870_v5, %v2728_v10 }
 0x16a   : > { %v2856_v9 = vadd.f32 %v3910_v7, %v2792_v8  ;;  %v3871_v54 = vpop.f32.mrb[56].mxu0 }
 0x16b   : > { %v3911_v12 = vpop.f32.mrb[56].mxu1  ;;  %v3872_v58 = vpop.f32.mrb[57].mxu0 }
 0x16c   : > { %v3873_v2 = vadd.f32 %v3872_v58, %v3871_v54  ;;  %v3912_v61 = vpop.f32.mrb[57].mxu1  ;;  %v3874_v14 = vpop.f32.mrb[58].mxu0 }
 0x16d   : > { %v3913_v16 = vadd.f32 %v3912_v61, %v3911_v12  ;;  %v3914_v18 = vpop.f32.mrb[58].mxu1  ;;  %v3875_v19 = vpop.f32.mrb[59].mxu0 }
 0x16e   : > { %v2797_v20 = vadd.f32 %v3873_v2, %v2733_v26  ;;  %v3876_v21 = vadd.f32 %v3875_v19, %v3874_v14  ;;  %v3915_v22 = vpop.f32.mrb[59].mxu1 }
 0x16f   : > { %v3916_v23 = vadd.f32 %v3915_v22, %v3914_v18 }
 0x170   : > { %v2861_v59 = vadd.f32 %v3913_v16, %v2797_v20  ;;  %v2800_v24 = vadd.f32 %v3876_v21, %v2736_v15 }
 0x172   : > { %v2864_v25 = vadd.f32 %v3916_v23, %v2800_v24  ;;  %v3877_v11 = vpop.f32.mrb[60].mxu0 }
 0x173   : > { %v3917_v28 = vpop.f32.mrb[60].mxu1  ;;  %v3878_v10 = vpop.f32.mrb[61].mxu0 }
 0x174   : > { %v3918_v30 = vpop.f32.mrb[61].mxu1  ;;  %v3879_v13 = vadd.f32 %v3878_v10, %v3877_v11  ;;  %v3880_v17 = vpop.f32.mrb[62].mxu0 }
 0x175   : > { %v3919_v32 = vadd.f32 %v3918_v30, %v3917_v28  ;;  %v3920_v34 = vpop.f32.mrb[62].mxu1  ;;  %v3881_v35 = vpop.f32.mrb[63].mxu0 }
 0x176   : > { %v3921_v36 = vpop.f32.mrb[63].mxu1  ;;  %v2805_v37 = vadd.f32 %v3879_v13, %v2741_v40 }
 0x178   : > { %v2869_v38 = vadd.f32 %v3919_v32, %v2805_v37 }
 0x17a   : > { %v3939_v39 = vpop.f32.mrb[64].mxu0 }
 0x17b   : > { %v3979_v26 = vpop.f32.mrb[64].mxu1  ;;  %v3940_v41 = vpop.f32.mrb[65].mxu0 }
 0x17c   : > { %v3941_v27 = vadd.f32 %v3940_v41, %v3939_v39  ;;  %v3980_v43 = vpop.f32.mrb[65].mxu1  ;;  %v3942_v45 = vpop.f32.mrb[66].mxu0 }
 0x17d   : > { %v3981_v15 = vadd.f32 %v3980_v43, %v3979_v26  ;;  %v3982_v31 = vpop.f32.mrb[66].mxu1  ;;  %v3943_v46 = vpop.f32.mrb[67].mxu0 }
 0x17e   : > { %v2909_v29 = vadd.f32 %v3941_v27, %v2845_v52  ;;  %v3944_v47 = vadd.f32 %v3943_v46, %v3942_v45  ;;  %v3983_v48 = vpop.f32.mrb[67].mxu1 }
 0x17f   : > { %v3984_v33 = vadd.f32 %v3983_v48, %v3982_v31 }
 0x180   : > { %v2973_v49 = vadd.f32 %v3981_v15, %v2909_v29  ;;  %v2912_v50 = vadd.f32 %v3944_v47, %v2848_v55 }
 0x182   : > { %v2976_v51 = vadd.f32 %v3984_v33, %v2912_v50  ;;  %v3945_v53 = vpop.f32.mrb[68].mxu0 }
 0x183   : > { %v3985_v57 = vpop.f32.mrb[68].mxu1  ;;  %v3946_v40 = vpop.f32.mrb[69].mxu0 }
 0x184   : > { %v3947_v60 = vadd.f32 %v3946_v40, %v3945_v53  ;;  %v3986_v42 = vpop.f32.mrb[69].mxu1  ;;  %v3948_v44 = vpop.f32.mrb[70].mxu0 }
 0x185   : > { %v3987_v62 = vadd.f32 %v3986_v42, %v3985_v57  ;;  %v3988_v63 = vpop.f32.mrb[70].mxu1  ;;  %v3949_v0 = vpop.f32.mrb[71].mxu0 }
 0x186   : > { %v2917_v1 = vadd.f32 %v3947_v60, %v2853_v56  ;;  %v3950_v3 = vadd.f32 %v3949_v0, %v3948_v44  ;;  %v3989_v4 = vpop.f32.mrb[71].mxu1 }
 0x187   : > { %v3990_v5 = vadd.f32 %v3989_v4, %v3988_v63 }
 0x188   : > { %v2981_v52 = vadd.f32 %v3987_v62, %v2917_v1  ;;  %v2920_v6 = vadd.f32 %v3950_v3, %v2856_v9 }
 0x18a   : > { %v2984_v7 = vadd.f32 %v3990_v5, %v2920_v6  ;;  %v3951_v8 = vpop.f32.mrb[72].mxu0 }
 0x18b   : > { %v3991_v54 = vpop.f32.mrb[72].mxu1  ;;  %v3952_v55 = vpop.f32.mrb[73].mxu0 }
 0x18c   : > { %v3992_v12 = vpop.f32.mrb[73].mxu1  ;;  %v3953_v58 = vadd.f32 %v3952_v55, %v3951_v8  ;;  %v3954_v61 = vpop.f32.mrb[74].mxu0 }
 0x18d   : > { %v3993_v2 = vadd.f32 %v3992_v12, %v3991_v54  ;;  %v3994_v14 = vpop.f32.mrb[74].mxu1  ;;  %v3955_v16 = vpop.f32.mrb[75].mxu0 }
 0x18e   : > { %v3995_v18 = vpop.f32.mrb[75].mxu1  ;;  %v2925_v19 = vadd.f32 %v3953_v58, %v2861_v59  ;;  %v3956_v20 = vadd.f32 %v3955_v16, %v3954_v61 }
 0x18f   : > { %v3996_v21 = vadd.f32 %v3995_v18, %v3994_v14 }
 0x190   : > { %v2989_v56 = vadd.f32 %v3993_v2, %v2925_v19  ;;  %v2928_v22 = vadd.f32 %v3956_v20, %v2864_v25 }
 0x192   : > { %v2992_v23 = vadd.f32 %v3996_v21, %v2928_v22  ;;  %v3957_v24 = vpop.f32.mrb[76].mxu0 }
 0x193   : > { %v3997_v11 = vpop.f32.mrb[76].mxu1  ;;  %v3958_v9 = vpop.f32.mrb[77].mxu0 }
 0x194   : > { %v3959_v28 = vadd.f32 %v3958_v9, %v3957_v24  ;;  %v3998_v10 = vpop.f32.mrb[77].mxu1  ;;  %v3960_v30 = vpop.f32.mrb[78].mxu0 }
 0x195   : > { %v3999_v13 = vadd.f32 %v3998_v10, %v3997_v11  ;;  %v4000_v32 = vpop.f32.mrb[78].mxu1  ;;  %v3961_v17 = vpop.f32.mrb[79].mxu0 }
 0x196   : > { %v2933_v34 = vadd.f32 %v3959_v28, %v2869_v38  ;;  %v4001_v35 = vpop.f32.mrb[79].mxu1 }
 0x198   : > { %v2997_v36 = vadd.f32 %v3999_v13, %v2933_v34 }
 0x19a   : > { %v4019_v37 = vpop.f32.mrb[80].mxu0 }
 0x19b   : > { %v4059_v39 = vpop.f32.mrb[80].mxu1  ;;  %v4020_v59 = vpop.f32.mrb[81].mxu0 }
 0x19c   : > { %v4021_v26 = vadd.f32 %v4020_v59, %v4019_v37  ;;  %v4060_v41 = vpop.f32.mrb[81].mxu1  ;;  %v4022_v27 = vpop.f32.mrb[82].mxu0  ;;  %v3600_v59 = vld [vmem:[%s5247_s3] ss:$0 sm:$0xff] }
 0x19d   : > { %v4061_v25 = vadd.f32 %v4060_v41, %v4059_v39  ;;  %v4062_v43 = vpop.f32.mrb[82].mxu1  ;;  %v4023_v45 = vpop.f32.mrb[83].mxu0 }
 0x19e   : > { %v3037_v15 = vadd.f32 %v4021_v26, %v2973_v49  ;;  %v4024_v31 = vadd.f32 %v4023_v45, %v4022_v27  ;;  %v4063_v46 = vpop.f32.mrb[83].mxu1 }
 0x19f   : > { %v4064_v29 = vadd.f32 %v4063_v46, %v4062_v43 }
 0x1a0   : > { %v3040_v47 = vadd.f32 %v4024_v31, %v2976_v51  ;;  %v3101_v48 = vadd.f32 %v4061_v25, %v3037_v15 }
 0x1a2   : > { %v4025_v33 = vpop.f32.mrb[84].mxu0  ;;  %v3104_v50 = vadd.f32 %v4064_v29, %v3040_v47 }
 0x1a3   : > { %v4065_v38 = vpop.f32.mrb[84].mxu1  ;;  %v4026_v53 = vpop.f32.mrb[85].mxu0 }
 0x1a4   : > { %v4027_v57 = vadd.f32 %v4026_v53, %v4025_v33  ;;  %v4066_v40 = vpop.f32.mrb[85].mxu1  ;;  %v4028_v60 = vpop.f32.mrb[86].mxu0 }
 0x1a5   : > { %v4067_v42 = vadd.f32 %v4066_v40, %v4065_v38  ;;  %v4068_v44 = vpop.f32.mrb[86].mxu1  ;;  %v4029_v62 = vpop.f32.mrb[87].mxu0 }
 0x1a6   : > { %v3045_v63 = vadd.f32 %v4027_v57, %v2981_v52  ;;  %v4030_v0 = vadd.f32 %v4029_v62, %v4028_v60  ;;  %v4069_v1 = vpop.f32.mrb[87].mxu1 }
 0x1a7   : > { %v4070_v3 = vadd.f32 %v4069_v1, %v4068_v44 }
 0x1a8   : > { %v3048_v49 = vadd.f32 %v4030_v0, %v2984_v7  ;;  %v3109_v4 = vadd.f32 %v4067_v42, %v3045_v63 }
 0x1aa   : > { %v4031_v5 = vpop.f32.mrb[88].mxu0  ;;  %v3112_v6 = vadd.f32 %v4070_v3, %v3048_v49 }
 0x1ab   : > { %v4071_v51 = vpop.f32.mrb[88].mxu1  ;;  %v4032_v8 = vpop.f32.mrb[89].mxu0 }
 0x1ac   : > { %v4033_v54 = vadd.f32 %v4032_v8, %v4031_v5  ;;  %v4072_v55 = vpop.f32.mrb[89].mxu1  ;;  %v4034_v12 = vpop.f32.mrb[90].mxu0 }
 0x1ad   : > { %v4073_v58 = vadd.f32 %v4072_v55, %v4071_v51  ;;  %v4074_v2 = vpop.f32.mrb[90].mxu1  ;;  %v4035_v61 = vpop.f32.mrb[91].mxu0 }
 0x1ae   : > { %v3053_v14 = vadd.f32 %v4033_v54, %v2989_v56  ;;  %v4036_v16 = vadd.f32 %v4035_v61, %v4034_v12  ;;  %v4075_v18 = vpop.f32.mrb[91].mxu1 }
 0x1af   : > { %v4076_v19 = vadd.f32 %v4075_v18, %v4074_v2 }
 0x1b0   : > { %v3056_v52 = vadd.f32 %v4036_v16, %v2992_v23  ;;  %v3117_v20 = vadd.f32 %v4073_v58, %v3053_v14  ;;  %v3599_v23 = vld [vmem:[%s5246_s2] ss:$0 sm:$0xff] }
 0x1b2   : > { %v4037_v21 = vpop.f32.mrb[92].mxu0  ;;  %v3120_v22 = vadd.f32 %v4076_v19, %v3056_v52 }
 0x1b3   : > { %v4077_v7 = vpop.f32.mrb[92].mxu1  ;;  %v4038_v24 = vpop.f32.mrb[93].mxu0 }
 0x1b4   : > { %v4039_v11 = vadd.f32 %v4038_v24, %v4037_v21  ;;  %v4078_v9 = vpop.f32.mrb[93].mxu1  ;;  %v4040_v28 = vpop.f32.mrb[94].mxu0 }
 0x1b5   : > { %v4079_v10 = vadd.f32 %v4078_v9, %v4077_v7  ;;  %v4080_v30 = vpop.f32.mrb[94].mxu1  ;;  %v4041_v13 = vpop.f32.mrb[95].mxu0 }
 0x1b6   : > { %v3061_v32 = vadd.f32 %v4039_v11, %v2997_v36  ;;  %v4081_v17 = vpop.f32.mrb[95].mxu1 }
 0x1b8   : > { %v3125_v34 = vadd.f32 %v4079_v10, %v3061_v32 }
 0x1bb   : > { %v4113_v56 = vpop.f32.mrb[96].mxu0 }
 0x1bc   : > { %v3173_v35 = vadd.f32 %v4113_v56, %v3109_v4  ;;  %v4117_v37 = vpop.f32.mrb[96].mxu1  ;;  %v3164_v39 = vpop.f32.mrb[97].mxu0 }
 0x1bd   : > { %v3189_v26 = vadd.f32 %v4117_v37, %v3125_v34  ;;  %v3165_v41 = vadd.f32 %v3164_v39, %v3101_v48  ;;  %v3180_v27 = vpop.f32.mrb[97].mxu1  ;;  %v4114_v25 = vpop.f32.mrb[98].mxu0 }
 0x1be   : > { %v3203_v36 = vmul.f32 %v3599_v23, %v3173_v35  ;;  %v3181_v43 = vadd.f32 %v3180_v27, %v3117_v20  ;;  %v3176_v45 = vadd.f32 %v4114_v25, %v3112_v6  ;;  %v4118_v15 = vpop.f32.mrb[98].mxu1  ;;  %v3167_v31 = vpop.f32.mrb[99].mxu0 }
 0x1bf   : > { %v3207_v46 = vmul.f32 %v3599_v23, %v3189_v26  ;;  %v3201_v29 = vmul.f32 %v3599_v23, %v3165_v41  ;;  %v3168_v47 = vadd.f32 %v3167_v31, %v3104_v50  ;;  %v3183_v33 = vpop.f32.mrb[99].mxu1 }
 0x1c0   : > { %v3217_v38 = vadd.f32 %v3600_v59, %v3203_v36  ;;  %v3205_v53 = vmul.f32 %v3599_v23, %v3181_v43  ;;  %v3204_v57 = vmul.f32 %v3599_v23, %v3176_v45  ;;  %v3184_v40 = vadd.f32 %v3183_v33, %v3120_v22 }
 0x1c1   : > { %v3221_v48 = vadd.f32 %v3600_v59, %v3207_v46  ;;  %v3215_v60 = vadd.f32 %v3600_v59, %v3201_v29  ;;  %v3202_v42 = vmul.f32 %v3599_v23, %v3168_v47 }
 0x1c2   : > { %v3224_v44 = vmax.f32 %v3217_v38, 0.0  ;;  %v3219_v62 = vadd.f32 %v3600_v59, %v3205_v53  ;;  %v3218_v63 = vadd.f32 %v3600_v59, %v3204_v57  ;;  %v3206_v0 = vmul.f32 %v3599_v23, %v3184_v40 }
 0x1c3   : > { %v3228_v1 = vmax.f32 %v3221_v48, 0.0  ;;  %v3222_v3 = vmax.f32 %v3215_v60, 0.0  ;;  %v3216_v49 = vadd.f32 %v3600_v59, %v3202_v42 }
 0x1c4   : > { %3231 = vst [vmem:[%s202_s8 + $0x10] sm:$0xff] %v3224_v44  ;;  %v3226_v50 = vmax.f32 %v3219_v62, 0.0  ;;  %v3225_v4 = vmax.f32 %v3218_v63, 0.0  ;;  %v3220_v5 = vadd.f32 %v3600_v59, %v3206_v0 }
 0x1c5   : > { %3235 = vst [vmem:[%s202_s8 + $0x30] sm:$0xff] %v3228_v1  ;;  %3229 = vst [vmem:[%s202_s8] sm:$0xff] %v3222_v3  ;;  %v3223_v6 = vmax.f32 %v3216_v49, 0.0 }
 0x1c6   : > { %3233 = vst [vmem:[%s202_s8 + $0x20] sm:$0xff] %v3226_v50  ;;  %3232 = vst [vmem:[%s202_s8 + $0x18] sm:$0xff] %v3225_v4  ;;  %v3227_v51 = vmax.f32 %v3220_v5, 0.0 }
 0x1c7   : > { %3230 = vst [vmem:[%s202_s8 + $0x8] sm:$0xff] %v3223_v6 }
 0x1c8   : > { %3234 = vst [vmem:[%s202_s8 + $0x28] sm:$0xff] %v3227_v51 }
 0x1c9 PF: > { %s14_s15 = sadd.s32 1, %s4486_s15  }
 0x1ca   : > { %p11_p4 = scmp.ge.s32.totalorder %s14_s15, 4  }
 0x1cc   :  { %13 = sbr.rel (!%p11_p4) target bundleno = 1 (0x1), region = 66 }

// kernel: lnn_forward.8
= control target key start
LH: loop header
LB: loop body
LE: loop exit
PB: predicated region body
PF: predicated region fallthrough
CT: control target
= control target key end

     0   :  { %vm6292_vm0 = vmmov 0   ;;  %s9402_s1 = inlined_call_operand.vmem [shape: bf16[3200,128], index: 1, kind: input, shape index: {}]   ;;  %s9403_s0 = inlined_call_operand.vmem [shape: bf16[4,8,3200], index: 0, kind: input, shape index: {}]   ;;  %s9404_s2 = inlined_call_operand.vmem [shape: f32[1,128], index: 2, kind: input, shape index: {}]   ;;  %s9405_s3 = inlined_call_operand.vmem [shape: f32[1,128], index: 3, kind: input, shape index: {}]   ;;  %s9406_s4 = inlined_call_operand.vmem [shape: f32[8,128], index: 4, kind: output, shape index: {}]  }
   0x1   :  { %v5654_v0 = vld [vmem:[%s9402_s1 + $0x40] sm:$0xff]   ;;  %v5658_v4 = vld [vmem:[%s9402_s1 + $0x48] sm:$0xff]   ;;  %v5662_v8 = vld [vmem:[%s9402_s1 + $0x50] sm:$0xff]  }
   0x2   :  { %v5655_v1 = vld [vmem:[%s9402_s1 + $0xc0] sm:$0xff]   ;;  %4480 = vmatprep.subr.bf16.mxu0 %v5654_v0  ;;  %v5659_v5 = vld [vmem:[%s9402_s1 + $0xc8] sm:$0xff]   ;;  %v5663_v9 = vld [vmem:[%s9402_s1 + $0xd0] sm:$0xff]  }
   0x3   :  { %v5656_v2 = vld [vmem:[%s9402_s1] sm:$0xff]   ;;  %4502 = vmatprep.subr.bf16.mxu1 %v5655_v1  ;;  %v5660_v6 = vld [vmem:[%s9402_s1 + $0x8] sm:$0xff]   ;;  %v5664_v10 = vld [vmem:[%s9402_s1 + $0x10] sm:$0xff]  }
   0x4   :  { %v5657_v3 = vld [vmem:[%s9402_s1 + $0x80] sm:$0xff]   ;;  %4481 = vmatpush3.bf16.msra.mxu0 %v5656_v2  ;;  %v5661_v7 = vld [vmem:[%s9402_s1 + $0x88] sm:$0xff]   ;;  %v5665_v11 = vld [vmem:[%s9402_s1 + $0x90] sm:$0xff]  }
   0x5   :  { %4503 = vmatpush3.bf16.msra.mxu1 %v5657_v3  ;;  %4482 = vmatprep.subr.bf16.mxu0 %v5658_v4  ;;  %v5666_v12 = vld [vmem:[%s9402_s1 + $0x58] sm:$0xff]   ;;  %v5670_v16 = vld [vmem:[%s9402_s1 + $0x60] sm:$0xff]   ;;  %v5674_v20 = vld [vmem:[%s9402_s1 + $0x68] sm:$0xff]  }
   0x6   :  { %4504 = vmatprep.subr.bf16.mxu1 %v5659_v5  ;;  %v5667_v13 = vld [vmem:[%s9402_s1 + $0xd8] sm:$0xff]   ;;  %v5671_v17 = vld [vmem:[%s9402_s1 + $0xe0] sm:$0xff]   ;;  %v5675_v21 = vld [vmem:[%s9402_s1 + $0xe8] sm:$0xff]  }
   0x7   :  { %v5668_v14 = vld [vmem:[%s9402_s1 + $0x18] sm:$0xff]   ;;  %v5672_v18 = vld [vmem:[%s9402_s1 + $0x20] sm:$0xff]   ;;  %v5676_v22 = vld [vmem:[%s9402_s1 + $0x28] sm:$0xff]  }
   0x8   :  { %4483 = vmatpush3.bf16.msra.mxu0 %v5660_v6  ;;  %v5669_v15 = vld [vmem:[%s9402_s1 + $0x98] sm:$0xff]   ;;  %v5673_v19 = vld [vmem:[%s9402_s1 + $0xa0] sm:$0xff]   ;;  %v5677_v23 = vld [vmem:[%s9402_s1 + $0xa8] sm:$0xff]  }
   0x9   :  { %4505 = vmatpush3.bf16.msra.mxu1 %v5661_v7  ;;  %4484 = vmatprep.subr.bf16.mxu0 %v5662_v8  ;;  %v5678_v24 = vld [vmem:[%s9402_s1 + $0x70] sm:$0xff]   ;;  %v5682_v28 = vld [vmem:[%s9402_s1 + $0x78] sm:$0xff]   ;;  %v420_v32 = vld [vmem:[%s9403_s0] sm:$0xff] }
   0xa   :  { %4506 = vmatprep.subr.bf16.mxu1 %v5663_v9  ;;  %v5679_v25 = vld [vmem:[%s9402_s1 + $0xf0] sm:$0xff]   ;;  %v5683_v29 = vld [vmem:[%s9402_s1 + $0xf8] sm:$0xff]   ;;  %v421_v33 = vld [vmem:[%s9403_s0 + $0x8] sm:$0xff]  ;;  %v4139_v34 = vcombine.low %v420_v32, %v420_v32  ;;  %v4140_v35 = vcombine.high %v420_v32, %v420_v32 }
   0xb   :  { %v5680_v26 = vld [vmem:[%s9402_s1 + $0x30] sm:$0xff]   ;;  %v5684_v30 = vld [vmem:[%s9402_s1 + $0x38] sm:$0xff]   ;;  %v4141_v36 = vcombine.low %v421_v33, %v421_v33  ;;  %v4142_v37 = vcombine.high %v421_v33, %v421_v33  ;;  %v5690_v38 = vld [vmem:[%s9402_s1 + $0x140] sm:$0xff]  }
   0xc   :  { %4485 = vmatpush3.bf16.msra.mxu0 %v5664_v10  ;;  %v5681_v27 = vld [vmem:[%s9402_s1 + $0xb0] sm:$0xff]   ;;  %v5685_v31 = vld [vmem:[%s9402_s1 + $0xb8] sm:$0xff]   ;;  %v5691_v39 = vld [vmem:[%s9402_s1 + $0x1c0] sm:$0xff]   ;;  %1753 = vmatprep.mubr.bf16.mxu0 %v4140_v35 }
   0xd   :  { %4507 = vmatpush3.bf16.msra.mxu1 %v5665_v11  ;;  %4486 = vmatprep.subr.bf16.mxu0 %v5666_v12  ;;  %v5692_v40 = vld [vmem:[%s9402_s1 + $0x100] sm:$0xff]   ;;  %v5694_v42 = vld [vmem:[%s9402_s1 + $0x148] sm:$0xff]   ;;  %v5698_v46 = vld [vmem:[%s9402_s1 + $0x150] sm:$0xff]  }
   0xe   :  { %4508 = vmatprep.subr.bf16.mxu1 %v5667_v13  ;;  %1793 = vmatprep.mubr.bf16.mxu1 %v4142_v37  ;;  %v5693_v41 = vld [vmem:[%s9402_s1 + $0x180] sm:$0xff]   ;;  %v5695_v43 = vld [vmem:[%s9402_s1 + $0x1c8] sm:$0xff]   ;;  %v5699_v47 = vld [vmem:[%s9402_s1 + $0x1d0] sm:$0xff]  }
   0xf   :  { %v5696_v44 = vld [vmem:[%s9402_s1 + $0x108] sm:$0xff]   ;;  %v5700_v48 = vld [vmem:[%s9402_s1 + $0x110] sm:$0xff]   ;;  %v5702_v50 = vld [vmem:[%s9402_s1 + $0x158] sm:$0xff]  }
  0x10   :  { %4487 = vmatpush3.bf16.msra.mxu0 %v5668_v14  ;;  %v5697_v45 = vld [vmem:[%s9402_s1 + $0x188] sm:$0xff]   ;;  %v5701_v49 = vld [vmem:[%s9402_s1 + $0x190] sm:$0xff]   ;;  %v5703_v51 = vld [vmem:[%s9402_s1 + $0x1d8] sm:$0xff]  }
  0x11   :  { %4509 = vmatpush3.bf16.msra.mxu1 %v5669_v15  ;;  %4488 = vmatprep.subr.bf16.mxu0 %v5670_v16  ;;  %v5704_v52 = vld [vmem:[%s9402_s1 + $0x118] sm:$0xff]   ;;  %v5706_v54 = vld [vmem:[%s9402_s1 + $0x160] sm:$0xff]   ;;  %v5710_v58 = vld [vmem:[%s9402_s1 + $0x168] sm:$0xff]  }
  0x12   :  { %4510 = vmatprep.subr.bf16.mxu1 %v5671_v17  ;;  %v5705_v53 = vld [vmem:[%s9402_s1 + $0x198] sm:$0xff]   ;;  %v5707_v55 = vld [vmem:[%s9402_s1 + $0x1e0] sm:$0xff]   ;;  %v5711_v59 = vld [vmem:[%s9402_s1 + $0x1e8] sm:$0xff]  }
  0x13   :  { %v5708_v56 = vld [vmem:[%s9402_s1 + $0x120] sm:$0xff]   ;;  %v5712_v60 = vld [vmem:[%s9402_s1 + $0x128] sm:$0xff]   ;;  %v5714_v62 = vld [vmem:[%s9402_s1 + $0x170] sm:$0xff]  }
  0x14   :  { %4489 = vmatpush3.bf16.msra.mxu0 %v5672_v18  ;;  %v5709_v57 = vld [vmem:[%s9402_s1 + $0x1a0] sm:$0xff]   ;;  %v5713_v61 = vld [vmem:[%s9402_s1 + $0x1a8] sm:$0xff]   ;;  %v5715_v63 = vld [vmem:[%s9402_s1 + $0x1f0] sm:$0xff]  }
  0x15   :  { %4511 = vmatpush3.bf16.msra.mxu1 %v5673_v19  ;;  %4490 = vmatprep.subr.bf16.mxu0 %v5674_v20  ;;  %v5716_v0 = vld [vmem:[%s9402_s1 + $0x130] sm:$0xff]   ;;  %v5718_v2 = vld [vmem:[%s9402_s1 + $0x178] sm:$0xff]   ;;  %v5726_v12 = vld [vmem:[%s9402_s1 + $0x240] sm:$0xff]  }
  0x16   :  { %4512 = vmatprep.subr.bf16.mxu1 %v5675_v21  ;;  %v5717_v1 = vld [vmem:[%s9402_s1 + $0x1b0] sm:$0xff]   ;;  %v5719_v3 = vld [vmem:[%s9402_s1 + $0x1f8] sm:$0xff]   ;;  %v5727_v13 = vld [vmem:[%s9402_s1 + $0x2c0] sm:$0xff]  }
  0x17   :  { %v5720_v4 = vld [vmem:[%s9402_s1 + $0x138] sm:$0xff]   ;;  %v422_v6 = vld [vmem:[%s9403_s0 + $0x10] sm:$0xff]  ;;  %v5728_v14 = vld [vmem:[%s9402_s1 + $0x200] sm:$0xff]  }
  0x18   :  { %4491 = vmatpush3.bf16.msra.mxu0 %v5676_v22  ;;  %v5721_v5 = vld [vmem:[%s9402_s1 + $0x1b8] sm:$0xff]   ;;  %v4143_v7 = vcombine.low %v422_v6, %v422_v6  ;;  %v4144_v8 = vcombine.high %v422_v6, %v422_v6  ;;  %v5729_v15 = vld [vmem:[%s9402_s1 + $0x280] sm:$0xff]   ;;  %v5730_v16 = vld [vmem:[%s9402_s1 + $0x248] sm:$0xff]  }
  0x19   :  { %4513 = vmatpush3.bf16.msra.mxu1 %v5677_v23  ;;  %4492 = vmatprep.subr.bf16.mxu0 %v5678_v24  ;;  %v423_v9 = vld [vmem:[%s9403_s0 + $0x18] sm:$0xff]  ;;  %v5731_v17 = vld [vmem:[%s9402_s1 + $0x2c8] sm:$0xff]   ;;  %v5734_v20 = vld [vmem:[%s9402_s1 + $0x250] sm:$0xff]  }
  0x1a   :  { %4514 = vmatprep.subr.bf16.mxu1 %v5679_v25  ;;  %v4145_v10 = vcombine.low %v423_v9, %v423_v9  ;;  %v4146_v11 = vcombine.high %v423_v9, %v423_v9  ;;  %v5732_v18 = vld [vmem:[%s9402_s1 + $0x208] sm:$0xff]   ;;  %v5735_v21 = vld [vmem:[%s9402_s1 + $0x2d0] sm:$0xff]   ;;  %v5738_v24 = vld [vmem:[%s9402_s1 + $0x258] sm:$0xff]  }
  0x1b   :  { %v5733_v19 = vld [vmem:[%s9402_s1 + $0x288] sm:$0xff]   ;;  %v5736_v22 = vld [vmem:[%s9402_s1 + $0x210] sm:$0xff]   ;;  %v5739_v25 = vld [vmem:[%s9402_s1 + $0x2d8] sm:$0xff]  }
  0x1c   :  { %4493 = vmatpush3.bf16.msra.mxu0 %v5680_v26  ;;  %v5737_v23 = vld [vmem:[%s9402_s1 + $0x290] sm:$0xff]   ;;  %v5740_v26 = vld [vmem:[%s9402_s1 + $0x218] sm:$0xff]   ;;  %v5746_v32 = vld [vmem:[%s9402_s1 + $0x268] sm:$0xff]  }
  0x1d   :  { %4515 = vmatpush3.bf16.msra.mxu1 %v5681_v27  ;;  %4494 = vmatprep.subr.bf16.mxu0 %v5682_v28  ;;  %v5741_v27 = vld [vmem:[%s9402_s1 + $0x298] sm:$0xff]   ;;  %v5742_v28 = vld [vmem:[%s9402_s1 + $0x260] sm:$0xff]   ;;  %v5747_v33 = vld [vmem:[%s9402_s1 + $0x2e8] sm:$0xff]  }
  0x1e   :  { %4516 = vmatprep.subr.bf16.mxu1 %v5683_v29  ;;  %v5743_v29 = vld [vmem:[%s9402_s1 + $0x2e0] sm:$0xff]   ;;  %v5749_v35 = vld [vmem:[%s9402_s1 + $0x2a8] sm:$0xff]   ;;  %v5751_v37 = vld [vmem:[%s9402_s1 + $0x2f0] sm:$0xff]  }
  0x1f   :  { %v5782_v6 = vld [vmem:[%s9402_s1 + $0x368] sm:$0xff]  }
  0x20   :  { %4495 = vmatpush3.bf16.msra.mxu0 %v5684_v30  ;;  %v5744_v30 = vld [vmem:[%s9402_s1 + $0x220] sm:$0xff]   ;;  %v5785_v9 = vld [vmem:[%s9402_s1 + $0x3a8] sm:$0xff]  }
  0x21   :  { %4517 = vmatpush3.bf16.msra.mxu1 %v5685_v31  ;;  %4524 = vmatprep.subr.bf16.mxu0 %v5690_v38  ;;  %v5745_v31 = vld [vmem:[%s9402_s1 + $0x2a0] sm:$0xff]   ;;  %v5752_v38 = vld [vmem:[%s9402_s1 + $0x230] sm:$0xff]  }
  0x22   :  { %4546 = vmatprep.subr.bf16.mxu1 %v5691_v39  ;;  %v5753_v39 = vld [vmem:[%s9402_s1 + $0x2b0] sm:$0xff]  }
  0x23   :  { %1754 = vmatmul.mubr.bf16.vlgmr.msra.gmra.mrb[0].mxu0 %v4139_v34  ;;  %v5748_v34 = vld [vmem:[%s9402_s1 + $0x228] sm:$0xff]  }
  0x24   :  { %1794 = vmatmul.mubr.bf16.vlgmr.msra.gmra.mrb[0].mxu1 %v4141_v36  ;;  %4525 = vmatpush3.bf16.msra.mxu0 %v5692_v40  ;;  %v5750_v36 = vld [vmem:[%s9402_s1 + $0x270] sm:$0xff]   ;;  %v5754_v40 = vld [vmem:[%s9402_s1 + $0x278] sm:$0xff]  }
  0x25   :  { %4547 = vmatpush3.bf16.msra.mxu1 %v5693_v41  ;;  %4526 = vmatprep.subr.bf16.mxu0 %v5694_v42  ;;  %v5755_v41 = vld [vmem:[%s9402_s1 + $0x2f8] sm:$0xff]  }
  0x26   :  { %4548 = vmatprep.subr.bf16.mxu1 %v5695_v43  ;;  %1833 = vmatprep.mubr.bf16.mxu0 %v4144_v8  ;;  %v5756_v42 = vld [vmem:[%s9402_s1 + $0x238] sm:$0xff]   ;;  %v5784_v8 = vld [vmem:[%s9402_s1 + $0x328] sm:$0xff]  }
  0x27   :  { %1873 = vmatprep.mubr.bf16.mxu1 %v4146_v11  ;;  %v5757_v43 = vld [vmem:[%s9402_s1 + $0x2b8] sm:$0xff]   ;;  %v5787_v11 = vld [vmem:[%s9402_s1 + $0x3f0] sm:$0xff]  }
  0x28   :  { %4527 = vmatpush3.bf16.msra.mxu0 %v5696_v44  ;;  %v424_v44 = vld [vmem:[%s9403_s0 + $0x20] sm:$0xff] }
  0x29   :  { %4549 = vmatpush3.bf16.msra.mxu1 %v5697_v45  ;;  %4528 = vmatprep.subr.bf16.mxu0 %v5698_v46  ;;  %v425_v45 = vld [vmem:[%s9403_s0 + $0x28] sm:$0xff]  ;;  %v4147_v46 = vcombine.low %v424_v44, %v424_v44 }
  0x2a   :  { %4550 = vmatprep.subr.bf16.mxu1 %v5699_v47  ;;  %v4148_v47 = vcombine.high %v424_v44, %v424_v44  ;;  %v6820_v44 = vld [vmem:[%s9402_s1 + $0x468] sm:$0xff]  }
  0x2c   :  { %4529 = vmatpush3.bf16.msra.mxu0 %v5700_v48  ;;  %v4149_v48 = vcombine.low %v425_v45, %v425_v45 }
  0x2d   :  { %4551 = vmatpush3.bf16.msra.mxu1 %v5701_v49  ;;  %4530 = vmatprep.subr.bf16.mxu0 %v5702_v50  ;;  %v4150_v49 = vcombine.high %v425_v45, %v425_v45  ;;  %v5762_v50 = vld [vmem:[%s9402_s1 + $0x340] sm:$0xff]   ;;  %v6827_v45 = vld [vmem:[%s9402_s1 + $0x4e8] sm:$0xff]  }
  0x2e   :  { %4552 = vmatprep.subr.bf16.mxu1 %v5703_v51  ;;  %v5763_v51 = vld [vmem:[%s9402_s1 + $0x3c0] sm:$0xff]  }
  0x30   :  { %4531 = vmatpush3.bf16.msra.mxu0 %v5704_v52  ;;  %v5764_v52 = vld [vmem:[%s9402_s1 + $0x300] sm:$0xff]  }
  0x31   :  { %4553 = vmatpush3.bf16.msra.mxu1 %v5705_v53  ;;  %4532 = vmatprep.subr.bf16.mxu0 %v5706_v54  ;;  %v5765_v53 = vld [vmem:[%s9402_s1 + $0x380] sm:$0xff]   ;;  %v5766_v54 = vld [vmem:[%s9402_s1 + $0x348] sm:$0xff]  }
  0x32   :  { %4554 = vmatprep.subr.bf16.mxu1 %v5707_v55  ;;  %v5767_v55 = vld [vmem:[%s9402_s1 + $0x3c8] sm:$0xff]  }
  0x34   :  { %4533 = vmatpush3.bf16.msra.mxu0 %v5708_v56  ;;  %v5768_v56 = vld [vmem:[%s9402_s1 + $0x308] sm:$0xff]  }
  0x35   :  { %4555 = vmatpush3.bf16.msra.mxu1 %v5709_v57  ;;  %4534 = vmatprep.subr.bf16.mxu0 %v5710_v58  ;;  %v5769_v57 = vld [vmem:[%s9402_s1 + $0x388] sm:$0xff]   ;;  %v5770_v58 = vld [vmem:[%s9402_s1 + $0x350] sm:$0xff]  }
  0x36   :  { %4556 = vmatprep.subr.bf16.mxu1 %v5711_v59  ;;  %v5771_v59 = vld [vmem:[%s9402_s1 + $0x3d0] sm:$0xff]  }
  0x38   :  { %4535 = vmatpush3.bf16.msra.mxu0 %v5712_v60  ;;  %v5772_v60 = vld [vmem:[%s9402_s1 + $0x310] sm:$0xff]  }
  0x39   :  { %4557 = vmatpush3.bf16.msra.mxu1 %v5713_v61  ;;  %4536 = vmatprep.subr.bf16.mxu0 %v5714_v62  ;;  %v5773_v61 = vld [vmem:[%s9402_s1 + $0x390] sm:$0xff]   ;;  %v5774_v62 = vld [vmem:[%s9402_s1 + $0x358] sm:$0xff]  }
  0x3a   :  { %4558 = vmatprep.subr.bf16.mxu1 %v5715_v63  ;;  %v5775_v63 = vld [vmem:[%s9402_s1 + $0x3d8] sm:$0xff]  }
  0x3c   :  { %4537 = vmatpush3.bf16.msra.mxu0 %v5716_v0  ;;  %v5776_v0 = vld [vmem:[%s9402_s1 + $0x318] sm:$0xff]  }
  0x3d   :  { %4559 = vmatpush3.bf16.msra.mxu1 %v5717_v1  ;;  %4538 = vmatprep.subr.bf16.mxu0 %v5718_v2  ;;  %v5777_v1 = vld [vmem:[%s9402_s1 + $0x398] sm:$0xff]   ;;  %v5778_v2 = vld [vmem:[%s9402_s1 + $0x360] sm:$0xff]  }
  0x3e   :  { %4560 = vmatprep.subr.bf16.mxu1 %v5719_v3  ;;  %v5779_v3 = vld [vmem:[%s9402_s1 + $0x3e0] sm:$0xff]  }
  0x40   :  { %4539 = vmatpush3.bf16.msra.mxu0 %v5720_v4  ;;  %v5780_v4 = vld [vmem:[%s9402_s1 + $0x320] sm:$0xff]  }
  0x41   :  { %4561 = vmatpush3.bf16.msra.mxu1 %v5721_v5  ;;  %4568 = vmatprep.subr.bf16.mxu0 %v5726_v12  ;;  %v5781_v5 = vld [vmem:[%s9402_s1 + $0x3a0] sm:$0xff]   ;;  %v5788_v12 = vld [vmem:[%s9402_s1 + $0x330] sm:$0xff]  }
  0x42   :  { %4590 = vmatprep.subr.bf16.mxu1 %v5727_v13  ;;  %v5789_v13 = vld [vmem:[%s9402_s1 + $0x3b0] sm:$0xff]  }
  0x43   :  { %1834 = vmatmul.mubr.bf16.vlgmr.msra.gmra.mrb[4].mxu0 %v4143_v7  ;;  %v5783_v7 = vld [vmem:[%s9402_s1 + $0x3e8] sm:$0xff]  }
  0x44   :  { %1874 = vmatmul.mubr.bf16.vlgmr.msra.gmra.mrb[4].mxu1 %v4145_v10  ;;  %4569 = vmatpush3.bf16.msra.mxu0 %v5728_v14  ;;  %v5786_v10 = vld [vmem:[%s9402_s1 + $0x370] sm:$0xff]   ;;  %v5790_v14 = vld [vmem:[%s9402_s1 + $0x378] sm:$0xff]  }
  0x45   :  { %4591 = vmatpush3.bf16.msra.mxu1 %v5729_v15  ;;  %4570 = vmatprep.subr.bf16.mxu0 %v5730_v16  ;;  %v5791_v15 = vld [vmem:[%s9402_s1 + $0x3f8] sm:$0xff]  }
  0x46   :  { %4592 = vmatprep.subr.bf16.mxu1 %v5731_v17  ;;  %1913 = vmatprep.mubr.bf16.mxu0 %v4148_v47  ;;  %v5792_v16 = vld [vmem:[%s9402_s1 + $0x338] sm:$0xff]   ;;  %v6839_v47 = vld [vmem:[%s9402_s1 + $0x4a8] sm:$0xff]  }
  0x47   :  { %1953 = vmatprep.mubr.bf16.mxu1 %v4150_v49  ;;  %v5793_v17 = vld [vmem:[%s9402_s1 + $0x3b8] sm:$0xff]   ;;  %v6851_v49 = vld [vmem:[%s9402_s1 + $0x4f0] sm:$0xff]  }
  0x48   :  { %4571 = vmatpush3.bf16.msra.mxu0 %v5732_v18  ;;  %v426_v18 = vld [vmem:[%s9403_s0 + $0x30] sm:$0xff] }
  0x49   :  { %4593 = vmatpush3.bf16.msra.mxu1 %v5733_v19  ;;  %4572 = vmatprep.subr.bf16.mxu0 %v5734_v20  ;;  %v427_v19 = vld [vmem:[%s9403_s0 + $0x38] sm:$0xff]  ;;  %v4151_v20 = vcombine.low %v426_v18, %v426_v18 }
  0x4a   :  { %4594 = vmatprep.subr.bf16.mxu1 %v5735_v21  ;;  %v4152_v21 = vcombine.high %v426_v18, %v426_v18  ;;  %v7019_v18 = vld [vmem:[%s9402_s1 + $0x568] sm:$0xff]  }
  0x4c   :  { %4573 = vmatpush3.bf16.msra.mxu0 %v5736_v22  ;;  %v4153_v22 = vcombine.low %v427_v19, %v427_v19 }
  0x4d   :  { %4595 = vmatpush3.bf16.msra.mxu1 %v5737_v23  ;;  %4574 = vmatprep.subr.bf16.mxu0 %v5738_v24  ;;  %v6729_v23 = vld [vmem:[%s9402_s1 + $0x440] sm:$0xff]   ;;  %v4154_v24 = vcombine.high %v427_v19, %v427_v19  ;;  %v7025_v19 = vld [vmem:[%s9402_s1 + $0x5e8] sm:$0xff]  }
  0x4e   :  { %4596 = vmatprep.subr.bf16.mxu1 %v5739_v25  ;;  %v5799_v25 = vld [vmem:[%s9402_s1 + $0x4c0] sm:$0xff]   ;;  %9559 = vst [vmem:[#allocation6_spill] sm:$0xff] %v7025_v19 }
  0x50   :  { %4575 = vmatpush3.bf16.msra.mxu0 %v5740_v26  ;;  %v6738_v26 = vld [vmem:[%s9402_s1 + $0x400] sm:$0xff]  }
  0x51   :  { %4597 = vmatpush3.bf16.msra.mxu1 %v5741_v27  ;;  %4576 = vmatprep.subr.bf16.mxu0 %v5742_v28  ;;  %v5801_v27 = vld [vmem:[%s9402_s1 + $0x480] sm:$0xff]   ;;  %v6746_v28 = vld [vmem:[%s9402_s1 + $0x448] sm:$0xff]  }
  0x52   :  { %4598 = vmatprep.subr.bf16.mxu1 %v5743_v29  ;;  %v5803_v29 = vld [vmem:[%s9402_s1 + $0x4c8] sm:$0xff]  }
  0x54   :  { %4577 = vmatpush3.bf16.msra.mxu0 %v5744_v30  ;;  %v6756_v30 = vld [vmem:[%s9402_s1 + $0x408] sm:$0xff]  }
  0x55   :  { %4599 = vmatpush3.bf16.msra.mxu1 %v5745_v31  ;;  %4578 = vmatprep.subr.bf16.mxu0 %v5746_v32  ;;  %v5805_v31 = vld [vmem:[%s9402_s1 + $0x488] sm:$0xff]   ;;  %v6764_v32 = vld [vmem:[%s9402_s1 + $0x450] sm:$0xff]  }
  0x56   :  { %4600 = vmatprep.subr.bf16.mxu1 %v5747_v33  ;;  %v5807_v33 = vld [vmem:[%s9402_s1 + $0x4d0] sm:$0xff]  }
  0x58   :  { %4579 = vmatpush3.bf16.msra.mxu0 %v5748_v34  ;;  %v6774_v34 = vld [vmem:[%s9402_s1 + $0x410] sm:$0xff]  }
  0x59   :  { %4601 = vmatpush3.bf16.msra.mxu1 %v5749_v35  ;;  %4580 = vmatprep.subr.bf16.mxu0 %v5750_v36  ;;  %v5809_v35 = vld [vmem:[%s9402_s1 + $0x490] sm:$0xff]   ;;  %v6782_v36 = vld [vmem:[%s9402_s1 + $0x458] sm:$0xff]  }
  0x5a   :  { %4602 = vmatprep.subr.bf16.mxu1 %v5751_v37  ;;  %v5811_v37 = vld [vmem:[%s9402_s1 + $0x4d8] sm:$0xff]  }
  0x5c   :  { %4581 = vmatpush3.bf16.msra.mxu0 %v5752_v38  ;;  %v6792_v38 = vld [vmem:[%s9402_s1 + $0x418] sm:$0xff]  }
  0x5d   :  { %4603 = vmatpush3.bf16.msra.mxu1 %v5753_v39  ;;  %4582 = vmatprep.subr.bf16.mxu0 %v5754_v40  ;;  %v5813_v39 = vld [vmem:[%s9402_s1 + $0x498] sm:$0xff]   ;;  %v6800_v40 = vld [vmem:[%s9402_s1 + $0x460] sm:$0xff]  }
  0x5e   :  { %4604 = vmatprep.subr.bf16.mxu1 %v5755_v41  ;;  %v5815_v41 = vld [vmem:[%s9402_s1 + $0x4e0] sm:$0xff]  }
  0x60   :  { %4583 = vmatpush3.bf16.msra.mxu0 %v5756_v42  ;;  %v6810_v42 = vld [vmem:[%s9402_s1 + $0x420] sm:$0xff]  }
  0x61   :  { %4605 = vmatpush3.bf16.msra.mxu1 %v5757_v43  ;;  %4612 = vmatprep.subr.bf16.mxu0 %v5762_v50  ;;  %v6815_v43 = vld [vmem:[%s9402_s1 + $0x4a0] sm:$0xff]   ;;  %v6857_v50 = vld [vmem:[%s9402_s1 + $0x430] sm:$0xff]  }
  0x62   :  { %4634 = vmatprep.subr.bf16.mxu1 %v5763_v51  ;;  %v6863_v51 = vld [vmem:[%s9402_s1 + $0x4b0] sm:$0xff]  }
  0x63   :  { %1914 = vmatmul.mubr.bf16.vlgmr.msra.gmra.mrb[8].mxu0 %v4147_v46  ;;  %v6833_v46 = vld [vmem:[%s9402_s1 + $0x428] sm:$0xff]  }
  0x64   :  { %1954 = vmatmul.mubr.bf16.vlgmr.msra.gmra.mrb[8].mxu1 %v4149_v48  ;;  %4613 = vmatpush3.bf16.msra.mxu0 %v5764_v52  ;;  %v6844_v48 = vld [vmem:[%s9402_s1 + $0x470] sm:$0xff]   ;;  %v6868_v52 = vld [vmem:[%s9402_s1 + $0x478] sm:$0xff]  }
  0x65   :  { %4635 = vmatpush3.bf16.msra.mxu1 %v5765_v53  ;;  %4614 = vmatprep.subr.bf16.mxu0 %v5766_v54  ;;  %v6875_v53 = vld [vmem:[%s9402_s1 + $0x4f8] sm:$0xff]  }
  0x66   :  { %4636 = vmatprep.subr.bf16.mxu1 %v5767_v55  ;;  %1993 = vmatprep.mubr.bf16.mxu0 %v4152_v21  ;;  %v6881_v54 = vld [vmem:[%s9402_s1 + $0x438] sm:$0xff]   ;;  %v7037_v21 = vld [vmem:[%s9402_s1 + $0x5a8] sm:$0xff]  }
  0x67   :  { %2033 = vmatprep.mubr.bf16.mxu1 %v4154_v24  ;;  %v6887_v55 = vld [vmem:[%s9402_s1 + $0x4b8] sm:$0xff]   ;;  %9560 = vst [vmem:[#allocation7_spill] sm:$0xff] %v7037_v21  ;;  %v7049_v24 = vld [vmem:[%s9402_s1 + $0x5f0] sm:$0xff]  }
  0x68   :  { %4615 = vmatpush3.bf16.msra.mxu0 %v5768_v56  ;;  %v428_v56 = vld [vmem:[%s9403_s0 + $0x40] sm:$0xff]  ;;  %9561 = vst [vmem:[#allocation8_spill] sm:$0xff] %v7049_v24 }
  0x69   :  { %4637 = vmatpush3.bf16.msra.mxu1 %v5769_v57  ;;  %4616 = vmatprep.subr.bf16.mxu0 %v5770_v58  ;;  %v4155_v57 = vcombine.low %v428_v56, %v428_v56  ;;  %v4156_v58 = vcombine.high %v428_v56, %v428_v56 }
  0x6a   :  { %4638 = vmatprep.subr.bf16.mxu1 %v5771_v59  ;;  %v429_v59 = vld [vmem:[%s9403_s0 + $0x48] sm:$0xff] }
  0x6c   :  { %4617 = vmatpush3.bf16.msra.mxu0 %v5772_v60  ;;  %v4157_v60 = vcombine.low %v429_v59, %v429_v59 }
  0x6d   :  { %4639 = vmatpush3.bf16.msra.mxu1 %v5773_v61  ;;  %4618 = vmatprep.subr.bf16.mxu0 %v5774_v62  ;;  %v4158_v61 = vcombine.high %v429_v59, %v429_v59  ;;  %v6900_v62 = vld [vmem:[%s9402_s1 + $0x540] sm:$0xff]  }
  0x6e   :  { %4640 = vmatprep.subr.bf16.mxu1 %v5775_v63  ;;  %v6905_v63 = vld [vmem:[%s9402_s1 + $0x5c0] sm:$0xff]  }
  0x6f   :  { %v7097_v59 = vld [vmem:[%s9402_s1 + $0x600] sm:$0xff]  }
  0x70   :  { %4619 = vmatpush3.bf16.msra.mxu0 %v5776_v0  ;;  %v6911_v0 = vld [vmem:[%s9402_s1 + $0x500] sm:$0xff]  }
  0x71   :  { %4641 = vmatpush3.bf16.msra.mxu1 %v5777_v1  ;;  %4620 = vmatprep.subr.bf16.mxu0 %v5778_v2  ;;  %v6917_v1 = vld [vmem:[%s9402_s1 + $0x580] sm:$0xff]   ;;  %v6923_v2 = vld [vmem:[%s9402_s1 + $0x548] sm:$0xff]  }
  0x72   :  { %4642 = vmatprep.subr.bf16.mxu1 %v5779_v3  ;;  %v6929_v3 = vld [vmem:[%s9402_s1 + $0x5c8] sm:$0xff]  }
  0x74   :  { %4621 = vmatpush3.bf16.msra.mxu0 %v5780_v4  ;;  %v6935_v4 = vld [vmem:[%s9402_s1 + $0x508] sm:$0xff]  }
  0x75   :  { %4643 = vmatpush3.bf16.msra.mxu1 %v5781_v5  ;;  %4622 = vmatprep.subr.bf16.mxu0 %v5782_v6  ;;  %v6941_v5 = vld [vmem:[%s9402_s1 + $0x588] sm:$0xff]   ;;  %v6947_v6 = vld [vmem:[%s9402_s1 + $0x550] sm:$0xff]  }
  0x76   :  { %4644 = vmatprep.subr.bf16.mxu1 %v5783_v7  ;;  %v6953_v7 = vld [vmem:[%s9402_s1 + $0x5d0] sm:$0xff]  }
  0x78   :  { %4623 = vmatpush3.bf16.msra.mxu0 %v5784_v8  ;;  %v6959_v8 = vld [vmem:[%s9402_s1 + $0x510] sm:$0xff]  }
  0x79   :  { %4645 = vmatpush3.bf16.msra.mxu1 %v5785_v9  ;;  %4624 = vmatprep.subr.bf16.mxu0 %v5786_v10  ;;  %v6965_v9 = vld [vmem:[%s9402_s1 + $0x590] sm:$0xff]   ;;  %v6971_v10 = vld [vmem:[%s9402_s1 + $0x558] sm:$0xff]  }
  0x7a   :  { %4646 = vmatprep.subr.bf16.mxu1 %v5787_v11  ;;  %v6977_v11 = vld [vmem:[%s9402_s1 + $0x5d8] sm:$0xff]  }
  0x7b   :  { %9555 = vst [vmem:[#allocation2_spill] sm:$0xff] %v6977_v11 }
  0x7c   :  { %4625 = vmatpush3.bf16.msra.mxu0 %v5788_v12  ;;  %v6983_v12 = vld [vmem:[%s9402_s1 + $0x518] sm:$0xff]  }
  0x7d   :  { %4647 = vmatpush3.bf16.msra.mxu1 %v5789_v13  ;;  %4626 = vmatprep.subr.bf16.mxu0 %v5790_v14  ;;  %v6989_v13 = vld [vmem:[%s9402_s1 + $0x598] sm:$0xff]   ;;  %v6995_v14 = vld [vmem:[%s9402_s1 + $0x560] sm:$0xff]  }
  0x7e   :  { %4648 = vmatprep.subr.bf16.mxu1 %v5791_v15  ;;  %9556 = vst [vmem:[#allocation3_spill] sm:$0xff] %v6989_v13  ;;  %v7001_v15 = vld [vmem:[%s9402_s1 + $0x5e0] sm:$0xff]  }
  0x7f   :  { %9557 = vst [vmem:[#allocation4_spill] sm:$0xff] %v7001_v15 }
  0x80   :  { %4627 = vmatpush3.bf16.msra.mxu0 %v5792_v16  ;;  %v7007_v16 = vld [vmem:[%s9402_s1 + $0x520] sm:$0xff]  }
  0x81   :  { %4649 = vmatpush3.bf16.msra.mxu1 %v5793_v17  ;;  %4656 = vmatprep.subr.bf16.mxu0 %v6729_v23  ;;  %v7013_v17 = vld [vmem:[%s9402_s1 + $0x5a0] sm:$0xff]  }
  0x82   :  { %4678 = vmatprep.subr.bf16.mxu1 %v5799_v25  ;;  %9558 = vst [vmem:[#allocation5_spill] sm:$0xff] %v7013_v17  ;;  %v7055_v25 = vld [vmem:[%s9402_s1 + $0x530] sm:$0xff]  }
  0x83   :  { %1994 = vmatmul.mubr.bf16.vlgmr.msra.gmra.mrb[12].mxu0 %v4151_v20  ;;  %v7031_v20 = vld [vmem:[%s9402_s1 + $0x528] sm:$0xff]  }
  0x84   :  { %2034 = vmatmul.mubr.bf16.vlgmr.msra.gmra.mrb[12].mxu1 %v4153_v22  ;;  %4657 = vmatpush3.bf16.msra.mxu0 %v6738_v26  ;;  %v7043_v22 = vld [vmem:[%s9402_s1 + $0x570] sm:$0xff]  }
  0x85   :  { %4679 = vmatpush3.bf16.msra.mxu1 %v5801_v27  ;;  %4658 = vmatprep.subr.bf16.mxu0 %v6746_v28  ;;  %v7061_v27 = vld [vmem:[%s9402_s1 + $0x5b0] sm:$0xff]  }
  0x86   :  { %4680 = vmatprep.subr.bf16.mxu1 %v5803_v29  ;;  %2073 = vmatprep.mubr.bf16.mxu0 %v4156_v58  ;;  %9562 = vst [vmem:[#allocation9_spill] sm:$0xff] %v7061_v27  ;;  %v7067_v29 = vld [vmem:[%s9402_s1 + $0x578] sm:$0xff]  }
  0x87   :  { %2113 = vmatprep.mubr.bf16.mxu1 %v4158_v61  ;;  %v7104_v61 = vld [vmem:[%s9402_s1 + $0x40] sm:$0xff]  }
  0x88   :  { %4659 = vmatpush3.bf16.msra.mxu0 %v6756_v30  ;;  %9565 = vst [vmem:[#allocation12_spill] sm:$0xff] %v7104_v61 }
  0x89   :  { %4681 = vmatpush3.bf16.msra.mxu1 %v5805_v31  ;;  %4660 = vmatprep.subr.bf16.mxu0 %v6764_v32  ;;  %v7073_v31 = vld [vmem:[%s9402_s1 + $0x5f8] sm:$0xff]  }
  0x8a   :  { %4682 = vmatprep.subr.bf16.mxu1 %v5807_v33  ;;  %9563 = vst [vmem:[#allocation10_spill] sm:$0xff] %v7073_v31  ;;  %v7079_v33 = vld [vmem:[%s9402_s1 + $0x538] sm:$0xff]  }
  0x8c   :  { %4661 = vmatpush3.bf16.msra.mxu0 %v6774_v34 }
  0x8d   :  { %4683 = vmatpush3.bf16.msra.mxu1 %v5809_v35  ;;  %4662 = vmatprep.subr.bf16.mxu0 %v6782_v36  ;;  %v7085_v35 = vld [vmem:[%s9402_s1 + $0x5b8] sm:$0xff]  }
  0x8e   :  { %4684 = vmatprep.subr.bf16.mxu1 %v5811_v37  ;;  %9564 = vst [vmem:[#allocation11_spill] sm:$0xff] %v7085_v35  ;;  %v430_v37 = vld [vmem:[%s9403_s0 + $0x50] sm:$0xff] }
  0x8f   :  { %v4160_v56 = vcombine.high %v430_v37, %v430_v37 }
  0x90   :  { %4663 = vmatpush3.bf16.msra.mxu0 %v6792_v38 }
  0x91   :  { %4685 = vmatpush3.bf16.msra.mxu1 %v5813_v39  ;;  %4664 = vmatprep.subr.bf16.mxu0 %v6800_v40  ;;  %v431_v39 = vld [vmem:[%s9403_s0 + $0x58] sm:$0xff] }
  0x92   :  { %4686 = vmatprep.subr.bf16.mxu1 %v5815_v41  ;;  %v4159_v41 = vcombine.low %v430_v37, %v430_v37  ;;  %v4162_v58 = vcombine.high %v431_v39, %v431_v39  ;;  %v7111_v37 = vld [vmem:[%s9402_s1 + $0x608] sm:$0xff]  }
  0x94   :  { %4665 = vmatpush3.bf16.msra.mxu0 %v6810_v42 }
  0x95   :  { %4687 = vmatpush3.bf16.msra.mxu1 %v6815_v43  ;;  %4666 = vmatprep.subr.bf16.mxu0 %v6820_v44 }
  0x96   :  { %4688 = vmatprep.subr.bf16.mxu1 %v6827_v45 }
  0x98   :  { %4667 = vmatpush3.bf16.msra.mxu0 %v6833_v46 }
  0x99   :  { %4689 = vmatpush3.bf16.msra.mxu1 %v6839_v47  ;;  %4668 = vmatprep.subr.bf16.mxu0 %v6844_v48 }
  0x9a   :  { %4690 = vmatprep.subr.bf16.mxu1 %v6851_v49 }
  0x9c   :  { %4669 = vmatpush3.bf16.msra.mxu0 %v6857_v50 }
  0x9d   :  { %4691 = vmatpush3.bf16.msra.mxu1 %v6863_v51  ;;  %4670 = vmatprep.subr.bf16.mxu0 %v6868_v52 }
  0x9e   :  { %4692 = vmatprep.subr.bf16.mxu1 %v6875_v53 }
  0xa0   :  { %4671 = vmatpush3.bf16.msra.mxu0 %v6881_v54 }
  0xa1   :  { %4693 = vmatpush3.bf16.msra.mxu1 %v6887_v55  ;;  %4700 = vmatprep.subr.bf16.mxu0 %v6900_v62 }
  0xa2   :  { %4722 = vmatprep.subr.bf16.mxu1 %v6905_v63 }
  0xa3   :  { %2074 = vmatmul.mubr.bf16.vlgmr.msra.gmra.mrb[16].mxu0 %v4155_v57  ;;  %v4161_v57 = vcombine.low %v431_v39, %v431_v39  ;;  %v7116_v39 = vld [vmem:[%s9402_s1] sm:$0xff]  }
  0xa4   :  { %2114 = vmatmul.mubr.bf16.vlgmr.msra.gmra.mrb[16].mxu1 %v4157_v60  ;;  %4701 = vmatpush3.bf16.msra.mxu0 %v6911_v0  ;;  %v9410_v60 = vmov 0.0   ;;  %9566 = vst [vmem:[#allocation13_spill] sm:$0xff] %v7116_v39 }
  0xa5   :  { %4723 = vmatpush3.bf16.msra.mxu1 %v6917_v1  ;;  %4702 = vmatprep.subr.bf16.mxu0 %v6923_v2 }
  0xa6   :  { %4724 = vmatprep.subr.bf16.mxu1 %v6929_v3  ;;  %2153 = vmatprep.mubr.bf16.mxu0 %v4160_v56  ;;  %v7132_v56 = vld [vmem:[%s9402_s1 + $0x610] sm:$0xff]  }
  0xa7   :  { %2193 = vmatprep.mubr.bf16.mxu1 %v4162_v58  ;;  %v7140_v58 = vld [vmem:[%s9402_s1 + $0x8] sm:$0xff]  }
  0xa8   :  { %4703 = vmatpush3.bf16.msra.mxu0 %v6935_v4  ;;  %9568 = vst [vmem:[#allocation15_spill] sm:$0xff] %v7140_v58 }
  0xa9   :  { %4725 = vmatpush3.bf16.msra.mxu1 %v6941_v5  ;;  %4704 = vmatprep.subr.bf16.mxu0 %v6947_v6 }
  0xaa   :  { %4726 = vmatprep.subr.bf16.mxu1 %v6953_v7 }
  0xac   :  { %4705 = vmatpush3.bf16.msra.mxu0 %v6959_v8 }
  0xad   :  { %4727 = vmatpush3.bf16.msra.mxu1 %v6965_v9  ;;  %4706 = vmatprep.subr.bf16.mxu0 %v6971_v10 }
  0xae   :  { %4728 = vmatprep.subr.bf16.mxu1 %v6977_v11 }
  0xb0   :  { %4707 = vmatpush3.bf16.msra.mxu0 %v6983_v12 }
  0xb1   :  { %4729 = vmatpush3.bf16.msra.mxu1 %v6989_v13  ;;  %4708 = vmatprep.subr.bf16.mxu0 %v6995_v14 }
  0xb2   :  { %4730 = vmatprep.subr.bf16.mxu1 %v7001_v15 }
  0xb4   :  { %4709 = vmatpush3.bf16.msra.mxu0 %v7007_v16 }
  0xb5   :  { %4731 = vmatpush3.bf16.msra.mxu1 %v7013_v17  ;;  %4710 = vmatprep.subr.bf16.mxu0 %v7019_v18  ;;  %v7392_v17 = vld [vmem:[%s9402_s1 + $0xe8] sm:$0xff]  }
  0xb6   :  { %4732 = vmatprep.subr.bf16.mxu1 %v7025_v19  ;;  %v7284_v19 = vld [vmem:[%s9402_s1 + $0x80] sm:$0xff]   ;;  %9607 = vst [vmem:[#allocation53_spill] sm:$0xff] %v7392_v17 }
  0xb7   :  { %9589 = vst [vmem:[#allocation35_spill] sm:$0xff] %v7284_v19 }
  0xb8   :  { %4711 = vmatpush3.bf16.msra.mxu0 %v7031_v20 }
  0xb9   :  { %4733 = vmatpush3.bf16.msra.mxu1 %v7037_v21  ;;  %4712 = vmatprep.subr.bf16.mxu0 %v7043_v22  ;;  %v7268_v21 = vld [vmem:[%s9402_s1 + $0xc0] sm:$0xff]  }
  0xba   :  { %4734 = vmatprep.subr.bf16.mxu1 %v7049_v24  ;;  %v7251_v24 = vld [vmem:[%s9403_s0 + $0x6c] sm:$0xff]  ;;  %9587 = vst [vmem:[#allocation33_spill] sm:$0xff] %v7268_v21 }
  0xbc   :  { %4713 = vmatpush3.bf16.msra.mxu0 %v7055_v25 }
  0xbd   :  { %4735 = vmatpush3.bf16.msra.mxu1 %v7061_v27  ;;  %4714 = vmatprep.subr.bf16.mxu0 %v7067_v29  ;;  %v7230_v27 = vld [vmem:[%s9402_s1 + $0x638] sm:$0xff]  }
  0xbe   :  { %4736 = vmatprep.subr.bf16.mxu1 %v7073_v31  ;;  %v7211_v31 = vld [vmem:[%s9402_s1 + $0x630] sm:$0xff]   ;;  %9583 = vst [vmem:[#allocation29_spill] sm:$0xff] %v7230_v27 }
  0xbf   :  { %9580 = vst [vmem:[#allocation26_spill] sm:$0xff] %v7211_v31 }
  0xc0   :  { %4715 = vmatpush3.bf16.msra.mxu0 %v7079_v33 }
  0xc1   :  { %4737 = vmatpush3.bf16.msra.mxu1 %v7085_v35  ;;  %5572 = vmatprep.subr.bf16.mxu0 %v9410_v60  ;;  %v7192_v35 = vld [vmem:[%s9402_s1 + $0x628] sm:$0xff]  }
  0xc2   :  { %4753 = vmatprep.subr.bf16.mxu1 %v7104_v61  ;;  %v7154_v61 = vld [vmem:[%s9402_s1 + $0x618] sm:$0xff]   ;;  %9577 = vst [vmem:[#allocation23_spill] sm:$0xff] %v7192_v35 }
  0xc3   :  { %2154 = vmatmul.mubr.bf16.vlgmr.msra.gmra.mrb[20].mxu0 %v4159_v41  ;;  %v7123_v41 = vld [vmem:[%s9402_s1 + $0x48] sm:$0xff]   ;;  %9570 = vst [vmem:[#allocation17_spill] sm:$0xff] %v7154_v61 }
  0xc4   :  { %2194 = vmatmul.mubr.bf16.vlgmr.msra.gmra.mrb[20].mxu1 %v4161_v57  ;;  %5573 = vmatpush3.bf16.msra.mxu0 %v7097_v59  ;;  %9567 = vst [vmem:[#allocation14_spill] sm:$0xff] %v7123_v41  ;;  %v4366_v57 = vld [vmem:[%s9403_s0 + $0x64] sm:$0xff] }
  0xc5   :  { %4754 = vmatpush3.bf16.msra.mxu1 %v7116_v39  ;;  %5574 = vmatprep.subr.bf16.mxu0 %v9410_v60  ;;  %v7147_v39 = vld [vmem:[%s9402_s1 + $0x50] sm:$0xff]  }
  0xc6   :  { %4755 = vmatprep.subr.bf16.mxu1 %v7123_v41  ;;  %5588 = vmatprep.mubr.msk.bf16.mxu0 %vm6292_vm0, %v9410_v60  ;;  %v4380_v41 = vcombine.high %v4366_v57, %v4366_v57  ;;  %9569 = vst [vmem:[#allocation16_spill] sm:$0xff] %v7147_v39 }
  0xc8   :  { %5575 = vmatpush3.bf16.msra.mxu0 %v7111_v37  ;;  %2390 = vmatprep.mubr.bf16.mxu1 %v4380_v41  ;;  %v7166_v41 = vld [vmem:[%s9402_s1 + $0x58] sm:$0xff]  }
  0xc9   :  { %4756 = vmatpush3.bf16.msra.mxu1 %v7140_v58  ;;  %5576 = vmatprep.subr.bf16.mxu0 %v9410_v60  ;;  %v7159_v60 = vld [vmem:[%s9402_s1 + $0x10] sm:$0xff]   ;;  %v9572_v58 = vmov 0.0   ;;  %9573 = vst [vmem:[#allocation19_spill] sm:$0xff] %v7166_v41 }
  0xca   :  { %4757 = vmatprep.subr.bf16.mxu1 %v7147_v39  ;;  %9571 = vst [vmem:[#allocation18_spill] sm:$0xff] %v7159_v60  ;;  %v7173_v39 = vld [vmem:[%s9402_s1 + $0x620] sm:$0xff]  }
  0xcb   :  { %9574 = vst [vmem:[#allocation20_spill] sm:$0xff] %v7173_v39 }
  0xcc   :  { %5577 = vmatpush3.bf16.msra.mxu0 %v7132_v56 }
  0xcd   :  { %4758 = vmatpush3.bf16.msra.mxu1 %v7159_v60  ;;  %5578 = vmatprep.subr.bf16.mxu0 %v9572_v58  ;;  %v7178_v60 = vld [vmem:[%s9402_s1 + $0x18] sm:$0xff]  }
  0xce   :  { %4759 = vmatprep.subr.bf16.mxu1 %v7166_v41  ;;  %9575 = vst [vmem:[#allocation21_spill] sm:$0xff] %v7178_v60  ;;  %v7185_v41 = vld [vmem:[%s9402_s1 + $0x60] sm:$0xff]  }
  0xcf   :  { %9576 = vst [vmem:[#allocation22_spill] sm:$0xff] %v7185_v41 }
  0xd0   :  { %5579 = vmatpush3.bf16.msra.mxu0 %v7154_v61  ;;  %v7398_v61 = vld [vmem:[%s9402_s1 + $0x168] sm:$0xff]  }
  0xd1   :  { %4760 = vmatpush3.bf16.msra.mxu1 %v7178_v60  ;;  %5580 = vmatprep.subr.bf16.mxu0 %v9572_v58  ;;  %v7197_v60 = vld [vmem:[%s9402_s1 + $0x20] sm:$0xff]   ;;  %9608 = vst [vmem:[#allocation54_spill] sm:$0xff] %v7398_v61 }
  0xd2   :  { %4761 = vmatprep.subr.bf16.mxu1 %v7185_v41  ;;  %9578 = vst [vmem:[#allocation24_spill] sm:$0xff] %v7197_v60  ;;  %v7204_v41 = vld [vmem:[%s9402_s1 + $0x68] sm:$0xff]  }
  0xd3   :  { %9579 = vst [vmem:[#allocation25_spill] sm:$0xff] %v7204_v41 }
  0xd4   :  { %5581 = vmatpush3.bf16.msra.mxu0 %v7173_v39 }
  0xd5   :  { %4762 = vmatpush3.bf16.msra.mxu1 %v7197_v60  ;;  %5582 = vmatprep.subr.bf16.mxu0 %v9572_v58  ;;  %v7216_v60 = vld [vmem:[%s9402_s1 + $0x28] sm:$0xff]  }
  0xd6   :  { %4763 = vmatprep.subr.bf16.mxu1 %v7204_v41  ;;  %9581 = vst [vmem:[#allocation27_spill] sm:$0xff] %v7216_v60  ;;  %v7223_v41 = vld [vmem:[%s9402_s1 + $0x70] sm:$0xff]  }
  0xd7   :  { %9582 = vst [vmem:[#allocation28_spill] sm:$0xff] %v7223_v41 }
  0xd8   :  { %5583 = vmatpush3.bf16.msra.mxu0 %v7192_v35  ;;  %v7257_v35 = vld [vmem:[%s9403_s0 + $0x74] sm:$0xff] }
  0xd9   :  { %4764 = vmatpush3.bf16.msra.mxu1 %v7216_v60  ;;  %5584 = vmatprep.subr.bf16.mxu0 %v9572_v58  ;;  %v7235_v60 = vld [vmem:[%s9402_s1 + $0x30] sm:$0xff]  }
  0xda   :  { %4765 = vmatprep.subr.bf16.mxu1 %v7223_v41  ;;  %9584 = vst [vmem:[#allocation30_spill] sm:$0xff] %v7235_v60  ;;  %v7242_v41 = vld [vmem:[%s9402_s1 + $0x78] sm:$0xff]  }
  0xdb   :  { %9585 = vst [vmem:[#allocation31_spill] sm:$0xff] %v7242_v41 }
  0xdc   :  { %5585 = vmatpush3.bf16.msra.mxu0 %v7211_v31  ;;  %v5878_v31 = vld [vmem:[%s9403_s0 + $0x60] ss:$0 sps:$4 sm:$0xff]  }
  0xdd   :  { %4766 = vmatpush3.bf16.msra.mxu1 %v7235_v60  ;;  %5586 = vmatprep.subr.bf16.mxu0 %v9572_v58  ;;  %v4379_v60 = vcombine.low %v4366_v57, %v4366_v57  ;;  %v7274_v57 = vld [vmem:[%s9402_s1 + $0x140] sm:$0xff]  }
  0xde   :  { %4767 = vmatprep.subr.bf16.mxu1 %v7242_v41  ;;  %v7262_v41 = vld [vmem:[%s9402_s1 + $0x38] sm:$0xff]   ;;  %9588 = vst [vmem:[#allocation34_spill] sm:$0xff] %v7274_v57 }
  0xdf   :  { %9586 = vst [vmem:[#allocation32_spill] sm:$0xff] %v7262_v41 }
  0xe0   :  { %5587 = vmatpush3.bf16.msra.mxu0 %v7230_v27  ;;  %v4382_v27 = vcombine.high %v7251_v24, %v7251_v24 }
  0xe1   :  { %4768 = vmatpush3.bf16.msra.mxu1 %v7262_v41  ;;  %4775 = vmatprep.subr.bf16.mxu0 %v7268_v21  ;;  %v4384_v41 = vcombine.high %v7257_v35, %v7257_v35  ;;  %v7290_v21 = vld [vmem:[%s9402_s1 + $0x100] sm:$0xff]  }
  0xe2   :  { %4797 = vmatprep.subr.bf16.mxu1 %v7274_v57  ;;  %9590 = vst [vmem:[#allocation36_spill] sm:$0xff] %v7290_v21  ;;  %v7314_v57 = vld [vmem:[%s9402_s1 + $0x108] sm:$0xff]  }
  0xe3   :  { %5589 = vmatmul.mubr.bf16.vlgmr.msra.gmra.mrb[24].mxu0 %v5878_v31  ;;  %v7296_v31 = vld [vmem:[%s9402_s1 + $0xc8] sm:$0xff]   ;;  %9594 = vst [vmem:[#allocation40_spill] sm:$0xff] %v7314_v57 }
  0xe4   :  { %2391 = vmatmul.mubr.bf16.vlgmr.msra.gmra.mrb[24].mxu1 %v4379_v60  ;;  %4776 = vmatpush3.bf16.msra.mxu0 %v7284_v19  ;;  %9591 = vst [vmem:[#allocation37_spill] sm:$0xff] %v7296_v31  ;;  %v7302_v60 = vld [vmem:[%s9402_s1 + $0x148] sm:$0xff]  }
  0xe5   :  { %4798 = vmatpush3.bf16.msra.mxu1 %v7290_v21  ;;  %4777 = vmatprep.subr.bf16.mxu0 %v7296_v31  ;;  %9592 = vst [vmem:[#allocation38_spill] sm:$0xff] %v7302_v60  ;;  %v7308_v21 = vld [vmem:[%s9402_s1 + $0x88] sm:$0xff]  }
  0xe6   :  { %4799 = vmatprep.subr.bf16.mxu1 %v7302_v60  ;;  %2430 = vmatprep.mubr.bf16.mxu0 %v4382_v27  ;;  %9593 = vst [vmem:[#allocation39_spill] sm:$0xff] %v7308_v21  ;;  %v7320_v60 = vld [vmem:[%s9402_s1 + $0xd0] sm:$0xff]  }
  0xe7   :  { %2470 = vmatprep.mubr.bf16.mxu1 %v4384_v41  ;;  %9595 = vst [vmem:[#allocation41_spill] sm:$0xff] %v7320_v60  ;;  %v7326_v27 = vld [vmem:[%s9402_s1 + $0x150] sm:$0xff]  }
  0xe8   :  { %4778 = vmatpush3.bf16.msra.mxu0 %v7308_v21  ;;  %9596 = vst [vmem:[#allocation42_spill] sm:$0xff] %v7326_v27  ;;  %v7332_v41 = vld [vmem:[%s9402_s1 + $0x90] sm:$0xff]  }
  0xe9   :  { %4800 = vmatpush3.bf16.msra.mxu1 %v7314_v57  ;;  %4779 = vmatprep.subr.bf16.mxu0 %v7320_v60  ;;  %9597 = vst [vmem:[#allocation43_spill] sm:$0xff] %v7332_v41  ;;  %v7338_v57 = vld [vmem:[%s9402_s1 + $0x110] sm:$0xff]   ;;  %v7344_v60 = vld [vmem:[%s9402_s1 + $0xd8] sm:$0xff]  }
  0xea   :  { %4801 = vmatprep.subr.bf16.mxu1 %v7326_v27  ;;  %9598 = vst [vmem:[#allocation44_spill] sm:$0xff] %v7338_v57  ;;  %9599 = vst [vmem:[#allocation45_spill] sm:$0xff] %v7344_v60  ;;  %v7350_v27 = vld [vmem:[%s9402_s1 + $0x158] sm:$0xff]  }
  0xeb   :  { %9600 = vst [vmem:[#allocation46_spill] sm:$0xff] %v7350_v27 }
  0xec   :  { %4780 = vmatpush3.bf16.msra.mxu0 %v7332_v41  ;;  %v7356_v41 = vld [vmem:[%s9402_s1 + $0x98] sm:$0xff]  }
  0xed   :  { %4802 = vmatpush3.bf16.msra.mxu1 %v7338_v57  ;;  %4781 = vmatprep.subr.bf16.mxu0 %v7344_v60  ;;  %9601 = vst [vmem:[#allocation47_spill] sm:$0xff] %v7356_v41  ;;  %v7362_v57 = vld [vmem:[%s9402_s1 + $0x118] sm:$0xff]   ;;  %v7368_v60 = vld [vmem:[%s9402_s1 + $0xe0] sm:$0xff]  }
  0xee   :  { %4803 = vmatprep.subr.bf16.mxu1 %v7350_v27  ;;  %9602 = vst [vmem:[#allocation48_spill] sm:$0xff] %v7362_v57  ;;  %9603 = vst [vmem:[#allocation49_spill] sm:$0xff] %v7368_v60  ;;  %v7374_v27 = vld [vmem:[%s9402_s1 + $0x160] sm:$0xff]  }
  0xef   :  { %9604 = vst [vmem:[#allocation50_spill] sm:$0xff] %v7374_v27 }
  0xf0   :  { %4782 = vmatpush3.bf16.msra.mxu0 %v7356_v41 }
  0xf1   :  { %4804 = vmatpush3.bf16.msra.mxu1 %v7362_v57  ;;  %4783 = vmatprep.subr.bf16.mxu0 %v7368_v60  ;;  %v7380_v57 = vld [vmem:[%s9402_s1 + $0xa0] sm:$0xff]  }
  0xf2   :  { %4805 = vmatprep.subr.bf16.mxu1 %v7374_v27  ;;  %9605 = vst [vmem:[#allocation51_spill] sm:$0xff] %v7380_v57  ;;  %v7386_v60 = vld [vmem:[%s9402_s1 + $0x120] sm:$0xff]  }
  0xf3   :  { %9606 = vst [vmem:[#allocation52_spill] sm:$0xff] %v7386_v60 }
  0xf4   :  { %4784 = vmatpush3.bf16.msra.mxu0 %v7380_v57 }
  0xf5   :  { %4806 = vmatpush3.bf16.msra.mxu1 %v7386_v60  ;;  %4785 = vmatprep.subr.bf16.mxu0 %v7392_v17 }
  0xf6   :  { %v4496_v41 = vpop.f32.mrb[0].mxu0  ;;  %4807 = vmatprep.subr.bf16.mxu1 %v7398_v61  ;;  %v7480_v61 = vld [vmem:[%s9402_s1 + $0x1c0] sm:$0xff]  }
  0xf7   :  { %v4518_v21 = vpop.f32.mrb[0].mxu1  ;;  %v4497_v31 = vpop.f32.mrb[1].mxu0  ;;  %9619 = vst [vmem:[#allocation65_spill] sm:$0xff] %v7480_v61 }
  0xf8   :  { %v4519_v19 = vpop.f32.mrb[1].mxu1  ;;  %v4498_v39 = vadd.f32 %v4497_v31, %v4496_v41  ;;  %v4499_v15 = vpop.f32.mrb[2].mxu0  ;;  %v4381_v41 = vcombine.low %v7251_v24, %v7251_v24  ;;  %v7474_v24 = vld [vmem:[%s9402_s1 + $0x138] sm:$0xff]  }
  0xf9   :  { %v4520_v27 = vadd.f32 %v4519_v19, %v4518_v21  ;;  %v4521_v57 = vpop.f32.mrb[2].mxu1  ;;  %v4500_v13 = vpop.f32.mrb[3].mxu0  ;;  %v7406_v19 = vld [vmem:[%s9402_s1 + $0xa8] sm:$0xff]   ;;  %v7424_v21 = vld [vmem:[%s9402_s1 + $0x170] sm:$0xff]   ;;  %9618 = vst [vmem:[#allocation64_spill] sm:$0xff] %v7474_v24 }
  0xfa   :  { %v4522_v60 = vpop.f32.mrb[3].mxu1  ;;  %9609 = vst [vmem:[#allocation55_spill] sm:$0xff] %v7406_v19  ;;  %4786 = vmatpush3.bf16.msra.mxu0 %v7406_v19  ;;  %v7412_v15 = vld [vmem:[%s9402_s1 + $0x128] sm:$0xff]   ;;  %v7418_v13 = vld [vmem:[%s9402_s1 + $0xf0] sm:$0xff]   ;;  %9612 = vst [vmem:[#allocation58_spill] sm:$0xff] %v7424_v21 }
  0xfb   :  { %v7401_v31 = vadd.f32 %v4520_v27, %v4498_v39  ;;  %9610 = vst [vmem:[#allocation56_spill] sm:$0xff] %v7412_v15  ;;  %4808 = vmatpush3.bf16.msra.mxu1 %v7412_v15  ;;  %9611 = vst [vmem:[#allocation57_spill] sm:$0xff] %v7418_v13  ;;  %4787 = vmatprep.subr.bf16.mxu0 %v7418_v13  ;;  %v7430_v39 = vld [vmem:[%s9402_s1 + $0xb0] sm:$0xff]   ;;  %v7442_v60 = vld [vmem:[%s9402_s1 + $0xf8] sm:$0xff]   ;;  %v4383_v15 = vcombine.low %v7257_v35, %v7257_v35 }
  0xfc   :  { %4809 = vmatprep.subr.bf16.mxu1 %v7424_v21  ;;  %9613 = vst [vmem:[#allocation59_spill] sm:$0xff] %v7430_v39  ;;  %v7436_v57 = vld [vmem:[%s9402_s1 + $0x130] sm:$0xff]   ;;  %9615 = vst [vmem:[#allocation61_spill] sm:$0xff] %v7442_v60  ;;  %v7448_v27 = vld [vmem:[%s9402_s1 + $0x178] sm:$0xff]  }
  0xfd   :  { %9614 = vst [vmem:[#allocation60_spill] sm:$0xff] %v7436_v57  ;;  %9616 = vst [vmem:[#allocation62_spill] sm:$0xff] %v7448_v27  ;;  %v7461_v21 = vld [vmem:[%s9402_s1 + $0xb8] sm:$0xff]   ;;  %v7486_v35 = vld [vmem:[%s9402_s1 + $0x240] sm:$0xff]  }
  0xfe   :  { %4788 = vmatpush3.bf16.msra.mxu0 %v7430_v39  ;;  %9617 = vst [vmem:[#allocation63_spill] sm:$0xff] %v7461_v21  ;;  %9620 = vst [vmem:[#allocation66_spill] sm:$0xff] %v7486_v35 }
  0xff   :  { %4810 = vmatpush3.bf16.msra.mxu1 %v7436_v57  ;;  %4789 = vmatprep.subr.bf16.mxu0 %v7442_v60  ;;  %v7456_v57 = vld [vmem:[%s9403_s0 + $0x7c] sm:$0xff] }
 0x100   :  { %4811 = vmatprep.subr.bf16.mxu1 %v7448_v27  ;;  %v7469_v27 = vld [vmem:[%s9403_s0 + $0x84] sm:$0xff] }
 0x101   :  { %v7496_v60 = vld [vmem:[%s9402_s1 + $0x180] sm:$0xff]  }
 0x102   :  { %4790 = vmatpush3.bf16.msra.mxu0 %v7461_v21  ;;  %v4386_v21 = vcombine.high %v7456_v57, %v7456_v57  ;;  %9621 = vst [vmem:[#allocation67_spill] sm:$0xff] %v7496_v60 }
 0x103   :  { %4812 = vmatpush3.bf16.msra.mxu1 %v7474_v24  ;;  %4819 = vmatprep.subr.bf16.mxu0 %v7480_v61  ;;  %v4388_v24 = vcombine.high %v7469_v27, %v7469_v27  ;;  %v7502_v61 = vld [vmem:[%s9402_s1 + $0x200] sm:$0xff]  }
 0x104   :  { %4841 = vmatprep.subr.bf16.mxu1 %v7486_v35  ;;  %9622 = vst [vmem:[#allocation68_spill] sm:$0xff] %v7502_v61  ;;  %v7526_v35 = vld [vmem:[%s9402_s1 + $0x208] sm:$0xff]  }
 0x105   :  { %2431 = vmatmul.mubr.bf16.vlgmr.msra.gmra.mrb[28].mxu0 %v4381_v41  ;;  %v7508_v41 = vld [vmem:[%s9402_s1 + $0x1c8] sm:$0xff]   ;;  %9626 = vst [vmem:[#allocation72_spill] sm:$0xff] %v7526_v35 }
 0x106   :  { %2471 = vmatmul.mubr.bf16.vlgmr.msra.gmra.mrb[28].mxu1 %v4383_v15  ;;  %4820 = vmatpush3.bf16.msra.mxu0 %v7496_v60  ;;  %9623 = vst [vmem:[#allocation69_spill] sm:$0xff] %v7508_v41  ;;  %v7514_v15 = vld [vmem:[%s9402_s1 + $0x248] sm:$0xff]  }
 0x107   :  { %4842 = vmatpush3.bf16.msra.mxu1 %v7502_v61  ;;  %4821 = vmatprep.subr.bf16.mxu0 %v7508_v41  ;;  %9624 = vst [vmem:[#allocation70_spill] sm:$0xff] %v7514_v15  ;;  %v7520_v61 = vld [vmem:[%s9402_s1 + $0x188] sm:$0xff]  }
 0x108   :  { %4843 = vmatprep.subr.bf16.mxu1 %v7514_v15  ;;  %2510 = vmatprep.mubr.bf16.mxu0 %v4386_v21  ;;  %9625 = vst [vmem:[#allocation71_spill] sm:$0xff] %v7520_v61  ;;  %v7532_v15 = vld [vmem:[%s9402_s1 + $0x1d0] sm:$0xff]  }
 0x109   :  { %2550 = vmatprep.mubr.bf16.mxu1 %v4388_v24  ;;  %9627 = vst [vmem:[#allocation73_spill] sm:$0xff] %v7532_v15  ;;  %v7538_v21 = vld [vmem:[%s9402_s1 + $0x250] sm:$0xff]  }
 0x10a   :  { %4822 = vmatpush3.bf16.msra.mxu0 %v7520_v61  ;;  %9628 = vst [vmem:[#allocation74_spill] sm:$0xff] %v7538_v21  ;;  %v7544_v24 = vld [vmem:[%s9402_s1 + $0x190] sm:$0xff]   ;;  %v7598_v61 = vld [vmem:[%s9402_s1 + $0x220] sm:$0xff]  }
 0x10b   :  { %4844 = vmatpush3.bf16.msra.mxu1 %v7526_v35  ;;  %4823 = vmatprep.subr.bf16.mxu0 %v7532_v15  ;;  %9629 = vst [vmem:[#allocation75_spill] sm:$0xff] %v7544_v24  ;;  %v7550_v35 = vld [vmem:[%s9402_s1 + $0x210] sm:$0xff]   ;;  %v7556_v15 = vld [vmem:[%s9402_s1 + $0x1d8] sm:$0xff]   ;;  %9638 = vst [vmem:[#allocation84_spill] sm:$0xff] %v7598_v61 }
 0x10c   :  { %4845 = vmatprep.subr.bf16.mxu1 %v7538_v21  ;;  %9630 = vst [vmem:[#allocation76_spill] sm:$0xff] %v7550_v35  ;;  %9631 = vst [vmem:[#allocation77_spill] sm:$0xff] %v7556_v15  ;;  %v7562_v21 = vld [vmem:[%s9402_s1 + $0x258] sm:$0xff]  }
 0x10d   :  { %9632 = vst [vmem:[#allocation78_spill] sm:$0xff] %v7562_v21 }
 0x10e   :  { %4824 = vmatpush3.bf16.msra.mxu0 %v7544_v24  ;;  %v7568_v24 = vld [vmem:[%s9402_s1 + $0x198] sm:$0xff]  }
 0x10f   :  { %4846 = vmatpush3.bf16.msra.mxu1 %v7550_v35  ;;  %4825 = vmatprep.subr.bf16.mxu0 %v7556_v15  ;;  %9633 = vst [vmem:[#allocation79_spill] sm:$0xff] %v7568_v24  ;;  %v7574_v35 = vld [vmem:[%s9402_s1 + $0x218] sm:$0xff]   ;;  %v7580_v15 = vld [vmem:[%s9402_s1 + $0x1e0] sm:$0xff]  }
 0x110   :  { %4847 = vmatprep.subr.bf16.mxu1 %v7562_v21  ;;  %9634 = vst [vmem:[#allocation80_spill] sm:$0xff] %v7574_v35  ;;  %9635 = vst [vmem:[#allocation81_spill] sm:$0xff] %v7580_v15  ;;  %v7586_v21 = vld [vmem:[%s9402_s1 + $0x260] sm:$0xff]  }
 0x111   :  { %9636 = vst [vmem:[#allocation82_spill] sm:$0xff] %v7586_v21 }
 0x112   :  { %4826 = vmatpush3.bf16.msra.mxu0 %v7568_v24  ;;  %v7592_v24 = vld [vmem:[%s9402_s1 + $0x1a0] sm:$0xff]  }
 0x113   :  { %4848 = vmatpush3.bf16.msra.mxu1 %v7574_v35  ;;  %4827 = vmatprep.subr.bf16.mxu0 %v7580_v15  ;;  %9637 = vst [vmem:[#allocation83_spill] sm:$0xff] %v7592_v24 }
 0x114   :  { %4849 = vmatprep.subr.bf16.mxu1 %v7586_v21  ;;  %v7604_v21 = vld [vmem:[%s9402_s1 + $0x1e8] sm:$0xff]  }
 0x115   :  { %9639 = vst [vmem:[#allocation85_spill] sm:$0xff] %v7604_v21 }
 0x116   :  { %4828 = vmatpush3.bf16.msra.mxu0 %v7592_v24  ;;  %v4540_v35 = vpop.f32.mrb[4].mxu0  ;;  %v7610_v24 = vld [vmem:[%s9402_s1 + $0x268] sm:$0xff]  }
 0x117   :  { %4850 = vmatpush3.bf16.msra.mxu1 %v7598_v61  ;;  %v4541_v15 = vpop.f32.mrb[5].mxu0  ;;  %4829 = vmatprep.subr.bf16.mxu0 %v7604_v21  ;;  %v4562_v41 = vpop.f32.mrb[4].mxu1  ;;  %9640 = vst [vmem:[#allocation86_spill] sm:$0xff] %v7610_v24  ;;  %v7617_v21 = vld [vmem:[%s9402_s1 + $0x1a8] sm:$0xff]  }
 0x118   :  { %v4542_v60 = vadd.f32 %v4541_v15, %v4540_v35  ;;  %4851 = vmatprep.subr.bf16.mxu1 %v7610_v24  ;;  %v4543_v39 = vpop.f32.mrb[6].mxu0  ;;  %v4563_v13 = vpop.f32.mrb[5].mxu1  ;;  %9641 = vst [vmem:[#allocation87_spill] sm:$0xff] %v7617_v21  ;;  %v7623_v15 = vld [vmem:[%s9402_s1 + $0x228] sm:$0xff]   ;;  %v7709_v24 = vld [vmem:[%s9402_s1 + $0x280] sm:$0xff]  }
 0x119   :  { %v4544_v61 = vpop.f32.mrb[7].mxu0  ;;  %v4564_v19 = vadd.f32 %v4563_v13, %v4562_v41  ;;  %v4565_v17 = vpop.f32.mrb[6].mxu1  ;;  %9642 = vst [vmem:[#allocation88_spill] sm:$0xff] %v7623_v15  ;;  %v7643_v13 = vld [vmem:[%s9402_s1 + $0x1b0] sm:$0xff]   ;;  %9653 = vst [vmem:[#allocation99_spill] sm:$0xff] %v7709_v24 }
 0x11a   :  { %v1836_v11 = vadd.f32 %v4542_v60, %v7401_v31  ;;  %4830 = vmatpush3.bf16.msra.mxu0 %v7617_v21  ;;  %v4566_v35 = vpop.f32.mrb[7].mxu1  ;;  %v7629_v17 = vld [vmem:[%s9402_s1 + $0x1f0] sm:$0xff]   ;;  %9645 = vst [vmem:[#allocation91_spill] sm:$0xff] %v7643_v13  ;;  %v4385_v60 = vcombine.low %v7456_v57, %v7456_v57  ;;  %v7687_v57 = vld [vmem:[%s9402_s1 + $0x238] sm:$0xff]  }
 0x11b   :  { %4852 = vmatpush3.bf16.msra.mxu1 %v7623_v15  ;;  %9643 = vst [vmem:[#allocation89_spill] sm:$0xff] %v7629_v17  ;;  %4831 = vmatprep.subr.bf16.mxu0 %v7629_v17  ;;  %v7637_v31 = vld [vmem:[%s9402_s1 + $0x270] sm:$0xff]   ;;  %v7674_v35 = vld [vmem:[%s9402_s1 + $0x1b8] sm:$0xff]   ;;  %9650 = vst [vmem:[#allocation96_spill] sm:$0xff] %v7687_v57 }
 0x11c   :  { %v7632_v61 = vadd.f32 %v4564_v19, %v1836_v11  ;;  %9644 = vst [vmem:[#allocation90_spill] sm:$0xff] %v7637_v31  ;;  %4853 = vmatprep.subr.bf16.mxu1 %v7637_v31  ;;  %v7649_v39 = vld [vmem:[%s9402_s1 + $0x230] sm:$0xff]   ;;  %v7655_v11 = vld [vmem:[%s9402_s1 + $0x1f8] sm:$0xff]   ;;  %9649 = vst [vmem:[#allocation95_spill] sm:$0xff] %v7674_v35 }
 0x11d   :  { %9646 = vst [vmem:[#allocation92_spill] sm:$0xff] %v7649_v39  ;;  %9647 = vst [vmem:[#allocation93_spill] sm:$0xff] %v7655_v11  ;;  %v7661_v19 = vld [vmem:[%s9402_s1 + $0x278] sm:$0xff]   ;;  %v7669_v41 = vld [vmem:[%s9403_s0 + $0x8c] sm:$0xff] }
 0x11e   :  { %4832 = vmatpush3.bf16.msra.mxu0 %v7643_v13  ;;  %9648 = vst [vmem:[#allocation94_spill] sm:$0xff] %v7661_v19  ;;  %v7693_v31 = vld [vmem:[%s9402_s1 + $0x2c0] sm:$0xff]   ;;  %v4390_v15 = vcombine.high %v7669_v41, %v7669_v41 }
 0x11f   :  { %4854 = vmatpush3.bf16.msra.mxu1 %v7649_v39  ;;  %4833 = vmatprep.subr.bf16.mxu0 %v7655_v11  ;;  %v4387_v39 = vcombine.low %v7469_v27, %v7469_v27  ;;  %9651 = vst [vmem:[#allocation97_spill] sm:$0xff] %v7693_v31  ;;  %v7699_v27 = vld [vmem:[%s9402_s1 + $0x340] sm:$0xff]  }
 0x120   :  { %4855 = vmatprep.subr.bf16.mxu1 %v7661_v19  ;;  %v7682_v19 = vld [vmem:[%s9403_s0 + $0x94] sm:$0xff]  ;;  %9652 = vst [vmem:[#allocation98_spill] sm:$0xff] %v7699_v27 }
 0x122   :  { %4834 = vmatpush3.bf16.msra.mxu0 %v7674_v35 }
 0x123   :  { %4856 = vmatpush3.bf16.msra.mxu1 %v7687_v57  ;;  %4863 = vmatprep.subr.bf16.mxu0 %v7693_v31  ;;  %v4392_v57 = vcombine.high %v7682_v19, %v7682_v19  ;;  %v7715_v31 = vld [vmem:[%s9402_s1 + $0x300] sm:$0xff]  }
 0x124   :  { %4885 = vmatprep.subr.bf16.mxu1 %v7699_v27  ;;  %9654 = vst [vmem:[#allocation100_spill] sm:$0xff] %v7715_v31  ;;  %v7739_v27 = vld [vmem:[%s9402_s1 + $0x308] sm:$0xff]  }
 0x125   :  { %2511 = vmatmul.mubr.bf16.vlgmr.msra.gmra.mrb[32].mxu0 %v4385_v60  ;;  %v7721_v60 = vld [vmem:[%s9402_s1 + $0x2c8] sm:$0xff]   ;;  %9658 = vst [vmem:[#allocation104_spill] sm:$0xff] %v7739_v27 }
 0x126   :  { %2551 = vmatmul.mubr.bf16.vlgmr.msra.gmra.mrb[32].mxu1 %v4387_v39  ;;  %4864 = vmatpush3.bf16.msra.mxu0 %v7709_v24  ;;  %9655 = vst [vmem:[#allocation101_spill] sm:$0xff] %v7721_v60  ;;  %v7727_v39 = vld [vmem:[%s9402_s1 + $0x348] sm:$0xff]  }
 0x127   :  { %4886 = vmatpush3.bf16.msra.mxu1 %v7715_v31  ;;  %4865 = vmatprep.subr.bf16.mxu0 %v7721_v60  ;;  %9656 = vst [vmem:[#allocation102_spill] sm:$0xff] %v7727_v39  ;;  %v7733_v31 = vld [vmem:[%s9402_s1 + $0x288] sm:$0xff]  }
 0x128   :  { %4887 = vmatprep.subr.bf16.mxu1 %v7727_v39  ;;  %2590 = vmatprep.mubr.bf16.mxu0 %v4390_v15  ;;  %9657 = vst [vmem:[#allocation103_spill] sm:$0xff] %v7733_v31  ;;  %v7745_v39 = vld [vmem:[%s9402_s1 + $0x2d0] sm:$0xff]  }
 0x129   :  { %2630 = vmatprep.mubr.bf16.mxu1 %v4392_v57  ;;  %9659 = vst [vmem:[#allocation105_spill] sm:$0xff] %v7745_v39  ;;  %v7751_v15 = vld [vmem:[%s9402_s1 + $0x350] sm:$0xff]  }
 0x12a   :  { %4866 = vmatpush3.bf16.msra.mxu0 %v7733_v31  ;;  %9660 = vst [vmem:[#allocation106_spill] sm:$0xff] %v7751_v15  ;;  %v7757_v57 = vld [vmem:[%s9402_s1 + $0x290] sm:$0xff]   ;;  %v7811_v31 = vld [vmem:[%s9402_s1 + $0x320] sm:$0xff]  }
 0x12b   :  { %4888 = vmatpush3.bf16.msra.mxu1 %v7739_v27  ;;  %4867 = vmatprep.subr.bf16.mxu0 %v7745_v39  ;;  %9661 = vst [vmem:[#allocation107_spill] sm:$0xff] %v7757_v57  ;;  %v7763_v27 = vld [vmem:[%s9402_s1 + $0x310] sm:$0xff]   ;;  %v7769_v39 = vld [vmem:[%s9402_s1 + $0x2d8] sm:$0xff]   ;;  %9670 = vst [vmem:[#allocation116_spill] sm:$0xff] %v7811_v31 }
 0x12c   :  { %4889 = vmatprep.subr.bf16.mxu1 %v7751_v15  ;;  %9662 = vst [vmem:[#allocation108_spill] sm:$0xff] %v7763_v27  ;;  %9663 = vst [vmem:[#allocation109_spill] sm:$0xff] %v7769_v39  ;;  %v7775_v15 = vld [vmem:[%s9402_s1 + $0x358] sm:$0xff]  }
 0x12d   :  { %9664 = vst [vmem:[#allocation110_spill] sm:$0xff] %v7775_v15 }
 0x12e   :  { %4868 = vmatpush3.bf16.msra.mxu0 %v7757_v57  ;;  %v7781_v57 = vld [vmem:[%s9402_s1 + $0x298] sm:$0xff]  }
 0x12f   :  { %4890 = vmatpush3.bf16.msra.mxu1 %v7763_v27  ;;  %4869 = vmatprep.subr.bf16.mxu0 %v7769_v39  ;;  %9665 = vst [vmem:[#allocation111_spill] sm:$0xff] %v7781_v57  ;;  %v7787_v27 = vld [vmem:[%s9402_s1 + $0x318] sm:$0xff]   ;;  %v7793_v39 = vld [vmem:[%s9402_s1 + $0x2e0] sm:$0xff]  }
 0x130   :  { %4891 = vmatprep.subr.bf16.mxu1 %v7775_v15  ;;  %9666 = vst [vmem:[#allocation112_spill] sm:$0xff] %v7787_v27  ;;  %9667 = vst [vmem:[#allocation113_spill] sm:$0xff] %v7793_v39  ;;  %v7799_v15 = vld [vmem:[%s9402_s1 + $0x360] sm:$0xff]  }
 0x131   :  { %9668 = vst [vmem:[#allocation114_spill] sm:$0xff] %v7799_v15 }
 0x132   :  { %4870 = vmatpush3.bf16.msra.mxu0 %v7781_v57  ;;  %v7805_v57 = vld [vmem:[%s9402_s1 + $0x2a0] sm:$0xff]  }
 0x133   :  { %4892 = vmatpush3.bf16.msra.mxu1 %v7787_v27  ;;  %4871 = vmatprep.subr.bf16.mxu0 %v7793_v39  ;;  %9669 = vst [vmem:[#allocation115_spill] sm:$0xff] %v7805_v57 }
 0x134   :  { %4893 = vmatprep.subr.bf16.mxu1 %v7799_v15  ;;  %v7817_v15 = vld [vmem:[%s9402_s1 + $0x2e8] sm:$0xff]  }
 0x135   :  { %9671 = vst [vmem:[#allocation117_spill] sm:$0xff] %v7817_v15 }
 0x136   :  { %4872 = vmatpush3.bf16.msra.mxu0 %v7805_v57  ;;  %v4584_v27 = vpop.f32.mrb[8].mxu0  ;;  %v7823_v57 = vld [vmem:[%s9402_s1 + $0x368] sm:$0xff]  }
 0x137   :  { %4894 = vmatpush3.bf16.msra.mxu1 %v7811_v31  ;;  %v4585_v39 = vpop.f32.mrb[9].mxu0  ;;  %4873 = vmatprep.subr.bf16.mxu0 %v7817_v15  ;;  %v4606_v60 = vpop.f32.mrb[8].mxu1  ;;  %9672 = vst [vmem:[#allocation118_spill] sm:$0xff] %v7823_v57  ;;  %v7830_v15 = vld [vmem:[%s9402_s1 + $0x2a8] sm:$0xff]  }
 0x138   :  { %v4586_v24 = vadd.f32 %v4585_v39, %v4584_v27  ;;  %4895 = vmatprep.subr.bf16.mxu1 %v7823_v57  ;;  %v4587_v35 = vpop.f32.mrb[10].mxu0  ;;  %v4607_v11 = vpop.f32.mrb[9].mxu1  ;;  %v7836_v39 = vld [vmem:[%s9402_s1 + $0x328] sm:$0xff]  }
 0x139   :  { %v4588_v31 = vpop.f32.mrb[11].mxu0  ;;  %v4608_v13 = vadd.f32 %v4607_v11, %v4606_v60  ;;  %v4609_v17 = vpop.f32.mrb[10].mxu1  ;;  %9673 = vst [vmem:[#allocation119_spill] sm:$0xff] %v7836_v39  ;;  %v7862_v11 = vld [vmem:[%s9402_s1 + $0x330] sm:$0xff]   ;;  %v4389_v35 = vcombine.low %v7669_v41, %v7669_v41  ;;  %v7882_v60 = vld [vmem:[%s9403_s0 + $0x9c] sm:$0xff] }
 0x13a   :  { %v1916_v21 = vadd.f32 %v4586_v24, %v7632_v61  ;;  %4874 = vmatpush3.bf16.msra.mxu0 %v7830_v15  ;;  %v4610_v27 = vpop.f32.mrb[11].mxu1  ;;  %v7842_v17 = vld [vmem:[%s9402_s1 + $0x2f0] sm:$0xff]   ;;  %9675 = vst [vmem:[#allocation121_spill] sm:$0xff] %v7862_v11  ;;  %v7900_v41 = vld [vmem:[%s9402_s1 + $0x338] sm:$0xff]  }
 0x13b   :  { %4896 = vmatpush3.bf16.msra.mxu1 %v7836_v39  ;;  %4875 = vmatprep.subr.bf16.mxu0 %v7842_v17  ;;  %v7850_v61 = vld [vmem:[%s9402_s1 + $0x370] sm:$0xff]   ;;  %v7887_v27 = vld [vmem:[%s9402_s1 + $0x2b8] sm:$0xff]   ;;  %9677 = vst [vmem:[#allocation123_spill] sm:$0xff] %v7900_v41 }
 0x13c   :  { %v7845_v24 = vadd.f32 %v4608_v13, %v1916_v21  ;;  %9674 = vst [vmem:[#allocation120_spill] sm:$0xff] %v7850_v61  ;;  %4897 = vmatprep.subr.bf16.mxu1 %v7850_v61  ;;  %v7856_v31 = vld [vmem:[%s9402_s1 + $0x2b0] sm:$0xff]   ;;  %v7868_v21 = vld [vmem:[%s9402_s1 + $0x2f8] sm:$0xff]   ;;  %v7906_v61 = vld [vmem:[%s9402_s1 + $0x3c0] sm:$0xff]  }
 0x13d   :  { %v7874_v13 = vld [vmem:[%s9402_s1 + $0x378] sm:$0xff]  }
 0x13e   :  { %4876 = vmatpush3.bf16.msra.mxu0 %v7856_v31  ;;  %9676 = vst [vmem:[#allocation122_spill] sm:$0xff] %v7874_v13 }
 0x13f   :  { %4898 = vmatpush3.bf16.msra.mxu1 %v7862_v11  ;;  %4877 = vmatprep.subr.bf16.mxu0 %v7868_v21  ;;  %v4391_v11 = vcombine.low %v7682_v19, %v7682_v19  ;;  %v4394_v19 = vcombine.high %v7882_v60, %v7882_v60 }
 0x140   :  { %4899 = vmatprep.subr.bf16.mxu1 %v7874_v13  ;;  %v7895_v13 = vld [vmem:[%s9403_s0 + $0xa4] sm:$0xff] }
 0x141   :  { %v4396_v39 = vcombine.high %v7895_v13, %v7895_v13 }
 0x142   :  { %4878 = vmatpush3.bf16.msra.mxu0 %v7887_v27 }
 0x143   :  { %4900 = vmatpush3.bf16.msra.mxu1 %v7900_v41  ;;  %4907 = vmatprep.subr.bf16.mxu0 %v7906_v61  ;;  %v7917_v41 = vld [vmem:[%s9402_s1 + $0x380] sm:$0xff]  }
 0x144   :  { %4929 = vmatprep.subr.bf16.mxu1 %v6729_v23  ;;  %v7924_v23 = vld [vmem:[%s9402_s1 + $0x3c8] sm:$0xff]  }
 0x145   :  { %2591 = vmatmul.mubr.bf16.vlgmr.msra.gmra.mrb[36].mxu0 %v4389_v35 }
 0x146   :  { %2631 = vmatmul.mubr.bf16.vlgmr.msra.gmra.mrb[36].mxu1 %v4391_v11  ;;  %4908 = vmatpush3.bf16.msra.mxu0 %v7917_v41  ;;  %v7931_v11 = vld [vmem:[%s9402_s1 + $0x388] sm:$0xff]  }
 0x147   :  { %4930 = vmatpush3.bf16.msra.mxu1 %v6738_v26  ;;  %4909 = vmatprep.subr.bf16.mxu0 %v7924_v23  ;;  %v7938_v26 = vld [vmem:[%s9402_s1 + $0x3d0] sm:$0xff]  }
 0x148   :  { %4931 = vmatprep.subr.bf16.mxu1 %v6746_v28  ;;  %2670 = vmatprep.mubr.bf16.mxu0 %v4394_v19  ;;  %v7945_v28 = vld [vmem:[%s9402_s1 + $0x390] sm:$0xff]  }
 0x149   :  { %2710 = vmatprep.mubr.bf16.mxu1 %v4396_v39  ;;  %9678 = vst [vmem:[#allocation124_spill] sm:$0xff] %v7945_v28 }
 0x14a   :  { %4910 = vmatpush3.bf16.msra.mxu0 %v7931_v11 }
 0x14b   :  { %4932 = vmatpush3.bf16.msra.mxu1 %v6756_v30  ;;  %4911 = vmatprep.subr.bf16.mxu0 %v7938_v26  ;;  %v7952_v30 = vld [vmem:[%s9402_s1 + $0x3d8] sm:$0xff]  }
 0x14c   :  { %4933 = vmatprep.subr.bf16.mxu1 %v6764_v32  ;;  %9679 = vst [vmem:[#allocation125_spill] sm:$0xff] %v7952_v30  ;;  %v7959_v32 = vld [vmem:[%s9402_s1 + $0x398] sm:$0xff]  }
 0x14d   :  { %9680 = vst [vmem:[#allocation126_spill] sm:$0xff] %v7959_v32 }
 0x14e   :  { %4912 = vmatpush3.bf16.msra.mxu0 %v7945_v28 }
 0x14f   :  { %4934 = vmatpush3.bf16.msra.mxu1 %v6774_v34  ;;  %4913 = vmatprep.subr.bf16.mxu0 %v7952_v30  ;;  %v7966_v34 = vld [vmem:[%s9402_s1 + $0x3e0] sm:$0xff]  }
 0x150   :  { %4935 = vmatprep.subr.bf16.mxu1 %v6782_v36  ;;  %9681 = vst [vmem:[#allocation127_spill] sm:$0xff] %v7966_v34  ;;  %v7973_v36 = vld [vmem:[%s9402_s1 + $0x3a0] sm:$0xff]  }
 0x151   :  { %9682 = vst [vmem:[#allocation128_spill] sm:$0xff] %v7973_v36 }
 0x152   :  { %4914 = vmatpush3.bf16.msra.mxu0 %v7959_v32 }
 0x153   :  { %4936 = vmatpush3.bf16.msra.mxu1 %v6792_v38  ;;  %4915 = vmatprep.subr.bf16.mxu0 %v7966_v34  ;;  %v7980_v38 = vld [vmem:[%s9402_s1 + $0x3e8] sm:$0xff]  }
 0x154   :  { %4937 = vmatprep.subr.bf16.mxu1 %v6800_v40 }
 0x156   :  { %4916 = vmatpush3.bf16.msra.mxu0 %v7973_v36  ;;  %v4628_v39 = vpop.f32.mrb[12].mxu0  ;;  %v7987_v36 = vld [vmem:[%s9402_s1 + $0x3a8] sm:$0xff]  }
 0x157   :  { %4938 = vmatpush3.bf16.msra.mxu1 %v6810_v42  ;;  %4917 = vmatprep.subr.bf16.mxu0 %v7980_v38  ;;  %v4629_v35 = vpop.f32.mrb[13].mxu0  ;;  %v4650_v40 = vpop.f32.mrb[12].mxu1 }
 0x158   :  { %4939 = vmatprep.subr.bf16.mxu1 %v6820_v44  ;;  %v4630_v19 = vadd.f32 %v4629_v35, %v4628_v39  ;;  %v4631_v57 = vpop.f32.mrb[14].mxu0  ;;  %v4651_v34 = vpop.f32.mrb[13].mxu1  ;;  %v7995_v44 = vld [vmem:[%s9402_s1 + $0x3f0] sm:$0xff]  }
 0x159   :  { %v4632_v42 = vpop.f32.mrb[15].mxu0  ;;  %v4652_v32 = vadd.f32 %v4651_v34, %v4650_v40  ;;  %v4653_v30 = vpop.f32.mrb[14].mxu1  ;;  %v8064_v34 = vld [vmem:[%s9402_s1 + $0x488] sm:$0xff]  }
 0x15a   :  { %4918 = vmatpush3.bf16.msra.mxu0 %v7987_v36  ;;  %v1996_v28 = vadd.f32 %v4630_v19, %v7845_v24  ;;  %v4654_v57 = vpop.f32.mrb[15].mxu1  ;;  %v8004_v30 = vld [vmem:[%s9402_s1 + $0x3b0] sm:$0xff]  }
 0x15b   :  { %4940 = vmatpush3.bf16.msra.mxu1 %v6833_v46  ;;  %4919 = vmatprep.subr.bf16.mxu0 %v7995_v44  ;;  %v8011_v46 = vld [vmem:[%s9402_s1 + $0x3f8] sm:$0xff]   ;;  %v8020_v24 = vld [vmem:[%s9403_s0 + $0xac] sm:$0xff] }
 0x15c   :  { %4941 = vmatprep.subr.bf16.mxu1 %v6844_v48  ;;  %v7999_v39 = vadd.f32 %v4652_v32, %v1996_v28  ;;  %v4393_v48 = vcombine.low %v7882_v60, %v7882_v60  ;;  %v4395_v28 = vcombine.low %v7895_v13, %v7895_v13  ;;  %v8039_v60 = vld [vmem:[%s9402_s1 + $0x4c0] sm:$0xff]   ;;  %v4398_v32 = vcombine.high %v8020_v24, %v8020_v24 }
 0x15e   :  { %4920 = vmatpush3.bf16.msra.mxu0 %v8004_v30 }
 0x15f   :  { %4942 = vmatpush3.bf16.msra.mxu1 %v6857_v50  ;;  %4921 = vmatprep.subr.bf16.mxu0 %v8011_v46  ;;  %v8025_v50 = vld [vmem:[%s9402_s1 + $0x3b8] sm:$0xff]  }
 0x160   :  { %4943 = vmatprep.subr.bf16.mxu1 %v6868_v52  ;;  %v8033_v52 = vld [vmem:[%s9403_s0 + $0xb4] sm:$0xff] }
 0x161   :  { %v4400_v13 = vcombine.high %v8033_v52, %v8033_v52 }
 0x162   :  { %4922 = vmatpush3.bf16.msra.mxu0 %v8025_v50 }
 0x163   :  { %4944 = vmatpush3.bf16.msra.mxu1 %v6881_v54  ;;  %4951 = vmatprep.subr.bf16.mxu0 %v8039_v60  ;;  %v8050_v54 = vld [vmem:[%s9402_s1 + $0x480] sm:$0xff]  }
 0x164   :  { %4973 = vmatprep.subr.bf16.mxu1 %v6900_v62  ;;  %v8057_v62 = vld [vmem:[%s9402_s1 + $0x4c8] sm:$0xff]  }
 0x165   :  { %2671 = vmatmul.mubr.bf16.vlgmr.msra.gmra.mrb[40].mxu0 %v4393_v48 }
 0x166   :  { %2711 = vmatmul.mubr.bf16.vlgmr.msra.gmra.mrb[40].mxu1 %v4395_v28  ;;  %4952 = vmatpush3.bf16.msra.mxu0 %v8050_v54  ;;  %v9692_v28 = vld [vmem:[#allocation8_spill] sm:$0xff] }
 0x167   :  { %4974 = vmatpush3.bf16.msra.mxu1 %v6911_v0  ;;  %4953 = vmatprep.subr.bf16.mxu0 %v8057_v62  ;;  %v8071_v0 = vld [vmem:[%s9402_s1 + $0x4d0] sm:$0xff]  }
 0x168   :  { %4975 = vmatprep.subr.bf16.mxu1 %v6923_v2  ;;  %2750 = vmatprep.mubr.bf16.mxu0 %v4398_v32  ;;  %v8078_v2 = vld [vmem:[%s9402_s1 + $0x490] sm:$0xff]  }
 0x169   :  { %2790 = vmatprep.mubr.bf16.mxu1 %v4400_v13  ;;  %v9693_v13 = vld [vmem:[#allocation9_spill] sm:$0xff] }
 0x16a   :  { %4954 = vmatpush3.bf16.msra.mxu0 %v8064_v34 }
 0x16b   :  { %4976 = vmatpush3.bf16.msra.mxu1 %v6935_v4  ;;  %4955 = vmatprep.subr.bf16.mxu0 %v8071_v0  ;;  %v8085_v4 = vld [vmem:[%s9402_s1 + $0x4d8] sm:$0xff]  }
 0x16c   :  { %4977 = vmatprep.subr.bf16.mxu1 %v6947_v6  ;;  %v8092_v6 = vld [vmem:[%s9402_s1 + $0x498] sm:$0xff]  }
 0x16e   :  { %4956 = vmatpush3.bf16.msra.mxu0 %v8078_v2 }
 0x16f   :  { %4978 = vmatpush3.bf16.msra.mxu1 %v6959_v8  ;;  %4957 = vmatprep.subr.bf16.mxu0 %v8085_v4  ;;  %v8099_v8 = vld [vmem:[%s9402_s1 + $0x4e0] sm:$0xff]  }
 0x170   :  { %4979 = vmatprep.subr.bf16.mxu1 %v6971_v10 }
 0x172   :  { %4958 = vmatpush3.bf16.msra.mxu0 %v8092_v6 }
 0x173   :  { %4980 = vmatpush3.bf16.msra.mxu1 %v6983_v12  ;;  %4959 = vmatprep.subr.bf16.mxu0 %v8099_v8 }
 0x174   :  { %4981 = vmatprep.subr.bf16.mxu1 %v6995_v14 }
 0x176   :  { %4960 = vmatpush3.bf16.msra.mxu0 %v6815_v43  ;;  %v4672_v10 = vpop.f32.mrb[16].mxu0 }
 0x177   :  { %4982 = vmatpush3.bf16.msra.mxu1 %v7007_v16  ;;  %4961 = vmatprep.subr.bf16.mxu0 %v6827_v45  ;;  %v4673_v35 = vpop.f32.mrb[17].mxu0  ;;  %v4694_v12 = vpop.f32.mrb[16].mxu1 }
 0x178   :  { %4983 = vmatprep.subr.bf16.mxu1 %v7019_v18  ;;  %v4674_v40 = vadd.f32 %v4673_v35, %v4672_v10  ;;  %v4675_v19 = vpop.f32.mrb[18].mxu0  ;;  %v4695_v42 = vpop.f32.mrb[17].mxu1  ;;  %v4399_v18 = vcombine.low %v8033_v52, %v8033_v52  ;;  %v9694_v35 = vld [vmem:[#allocation26_spill] sm:$0xff] }
 0x179   :  { %v4676_v57 = vpop.f32.mrb[19].mxu0  ;;  %v4696_v14 = vadd.f32 %v4695_v42, %v4694_v12  ;;  %v4697_v48 = vpop.f32.mrb[18].mxu1  ;;  %v9695_v12 = vld [vmem:[#allocation10_spill] sm:$0xff]  ;;  %v4404_v19 = vld [vmem:[%s9403_s0 + $0xc8] sm:$0xff] }
 0x17a   :  { %4962 = vmatpush3.bf16.msra.mxu0 %v6839_v47  ;;  %v2076_v43 = vadd.f32 %v4674_v40, %v7999_v39  ;;  %v4698_v45 = vpop.f32.mrb[19].mxu1  ;;  %v4397_v47 = vcombine.low %v8020_v24, %v8020_v24  ;;  %v9696_v42 = vld [vmem:[#allocation11_spill] sm:$0xff]  ;;  %v5903_v57 = vld [vmem:[%s9403_s0 + $0xc4] ss:$0 sps:$4 sm:$0xff]   ;;  %v9697_v48 = vld [vmem:[#allocation29_spill] sm:$0xff] }
 0x17b   :  { %4984 = vmatpush3.bf16.msra.mxu1 %v7031_v20  ;;  %4963 = vmatprep.subr.bf16.mxu0 %v6851_v49  ;;  %v4377_v49 = vld [vmem:[%s9403_s0 + $0xbc] sm:$0xff] }
 0x17c   :  { %4985 = vmatprep.subr.bf16.mxu1 %v7043_v22  ;;  %v2116_v16 = vadd.f32 %v4696_v14, %v2076_v43  ;;  %v4401_v40 = vcombine.low %v4377_v49, %v4377_v49  ;;  %v4405_v14 = vld [vmem:[%s9403_s0 + $0xd0] sm:$0xff]  ;;  %v9699_v45 = vld [vmem:[#allocation33_spill] sm:$0xff] }
 0x17d   :  { %v9698_v43 = vld [vmem:[#allocation12_spill] sm:$0xff] }
 0x17e   :  { %4964 = vmatpush3.bf16.msra.mxu0 %v6863_v51  ;;  %v4402_v51 = vcombine.high %v4377_v49, %v4377_v49  ;;  %v9700_v49 = vld [vmem:[#allocation13_spill] sm:$0xff] }
 0x17f   :  { %4986 = vmatpush3.bf16.msra.mxu1 %v7055_v25  ;;  %4965 = vmatprep.subr.bf16.mxu0 %v6875_v53  ;;  %v9683_v53 = vld [vmem:[#allocation2_spill] sm:$0xff] }
 0x180   :  { %4987 = vmatprep.subr.bf16.mxu1 %v7067_v29 }
 0x182   :  { %4966 = vmatpush3.bf16.msra.mxu0 %v6887_v55  ;;  %v9684_v55 = vld [vmem:[#allocation3_spill] sm:$0xff] }
 0x183   :  { %4988 = vmatpush3.bf16.msra.mxu1 %v7079_v33  ;;  %4995 = vmatprep.subr.bf16.mxu0 %v6905_v63  ;;  %v9685_v63 = vld [vmem:[#allocation17_spill] sm:$0xff]  ;;  %v9690_v33 = vld [vmem:[#allocation7_spill] sm:$0xff] }
 0x184   :  { %5592 = vmatprep.subr.bf16.mxu1 %v9572_v58 }
 0x185   :  { %2751 = vmatmul.mubr.bf16.vlgmr.msra.gmra.mrb[44].mxu0 %v4397_v47  ;;  %v4420_v47 = vcombine.high %v4405_v14, %v4405_v14 }
 0x186   :  { %2791 = vmatmul.mubr.bf16.vlgmr.msra.gmra.mrb[44].mxu1 %v4399_v18  ;;  %4996 = vmatpush3.bf16.msra.mxu0 %v6917_v1  ;;  %v9686_v1 = vld [vmem:[#allocation4_spill] sm:$0xff]  ;;  %v9701_v18 = vld [vmem:[#allocation35_spill] sm:$0xff] }
 0x187   :  { %5593 = vmatpush3.bf16.msra.mxu1 %v7097_v59  ;;  %4997 = vmatprep.subr.bf16.mxu0 %v6929_v3  ;;  %v9687_v3 = vld [vmem:[#allocation5_spill] sm:$0xff] }
 0x188   :  { %5594 = vmatprep.subr.bf16.mxu1 %v9572_v58  ;;  %2830 = vmatprep.mubr.bf16.mxu0 %v4402_v51  ;;  %v9702_v51 = vld [vmem:[#allocation14_spill] sm:$0xff] }
 0x189   :  { %5608 = vmatprep.mubr.msk.bf16.mxu1 %vm6292_vm0, %v9572_v58 }
 0x18a   :  { %4998 = vmatpush3.bf16.msra.mxu0 %v6941_v5  ;;  %v9688_v5 = vld [vmem:[#allocation20_spill] sm:$0xff] }
 0x18b   :  { %5595 = vmatpush3.bf16.msra.mxu1 %v7111_v37  ;;  %4999 = vmatprep.subr.bf16.mxu0 %v6953_v7  ;;  %v9689_v7 = vld [vmem:[#allocation6_spill] sm:$0xff]  ;;  %v9691_v37 = vld [vmem:[#allocation23_spill] sm:$0xff] }
 0x18c   :  { %5596 = vmatprep.subr.bf16.mxu1 %v9572_v58 }
 0x18e   :  { %5000 = vmatpush3.bf16.msra.mxu0 %v6965_v9 }
 0x18f   :  { %5597 = vmatpush3.bf16.msra.mxu1 %v7132_v56  ;;  %5001 = vmatprep.subr.bf16.mxu0 %v9683_v53  ;;  %v9703_v53 = vld [vmem:[#allocation37_spill] sm:$0xff] }
 0x190   :  { %5598 = vmatprep.subr.bf16.mxu1 %v9572_v58 }
 0x192   :  { %5002 = vmatpush3.bf16.msra.mxu0 %v9684_v55  ;;  %v9704_v55 = vld [vmem:[#allocation15_spill] sm:$0xff] }
 0x193   :  { %5599 = vmatpush3.bf16.msra.mxu1 %v9685_v63  ;;  %5003 = vmatprep.subr.bf16.mxu0 %v9686_v1  ;;  %v9705_v63 = vld [vmem:[#allocation39_spill] sm:$0xff]  ;;  %v9706_v1 = vld [vmem:[#allocation16_spill] sm:$0xff] }
 0x194   :  { %5600 = vmatprep.subr.bf16.mxu1 %v9572_v58 }
 0x196   :  { %5004 = vmatpush3.bf16.msra.mxu0 %v9687_v3  ;;  %v4716_v9 = vpop.f32.mrb[20].mxu0  ;;  %v9707_v3 = vld [vmem:[#allocation41_spill] sm:$0xff] }
 0x197   :  { %5601 = vmatpush3.bf16.msra.mxu1 %v9688_v5  ;;  %5005 = vmatprep.subr.bf16.mxu0 %v9689_v7  ;;  %v4717_v20 = vpop.f32.mrb[21].mxu0  ;;  %v4738_v22 = vpop.f32.mrb[20].mxu1  ;;  %v9708_v5 = vld [vmem:[#allocation18_spill] sm:$0xff]  ;;  %v9709_v7 = vld [vmem:[#allocation43_spill] sm:$0xff] }
 0x198   :  { %5602 = vmatprep.subr.bf16.mxu1 %v9572_v58  ;;  %v4718_v25 = vadd.f32 %v4717_v20, %v4716_v9  ;;  %v4719_v29 = vpop.f32.mrb[22].mxu0  ;;  %v4739_v59 = vpop.f32.mrb[21].mxu1  ;;  %v9710_v9 = vld [vmem:[#allocation19_spill] sm:$0xff]  ;;  %v9711_v20 = vld [vmem:[#allocation45_spill] sm:$0xff] }
 0x199   :  { %v4720_v56 = vpop.f32.mrb[23].mxu0  ;;  %v4740_v39 = vadd.f32 %v4739_v59, %v4738_v22  ;;  %v4741_v24 = vpop.f32.mrb[22].mxu1  ;;  %v9712_v22 = vld [vmem:[#allocation21_spill] sm:$0xff]  ;;  %v9714_v29 = vld [vmem:[#allocation22_spill] sm:$0xff]  ;;  %v9716_v59 = vld [vmem:[#allocation24_spill] sm:$0xff] }
 0x19a   :  { %5006 = vmatpush3.bf16.msra.mxu0 %v9690_v33  ;;  %v2156_v52 = vadd.f32 %v4718_v25, %v2116_v16  ;;  %v4742_v32 = vpop.f32.mrb[23].mxu1  ;;  %v4418_v16 = vcombine.high %v4404_v19, %v4404_v19  ;;  %v9713_v25 = vld [vmem:[#allocation47_spill] sm:$0xff]  ;;  %v9715_v33 = vld [vmem:[#allocation49_spill] sm:$0xff] }
 0x19b   :  { %5603 = vmatpush3.bf16.msra.mxu1 %v9691_v37  ;;  %5007 = vmatprep.subr.bf16.mxu0 %v9692_v28  ;;  %v9717_v37 = vld [vmem:[#allocation51_spill] sm:$0xff]  ;;  %v9718_v56 = vld [vmem:[#allocation25_spill] sm:$0xff] }
 0x19c   :  { %5604 = vmatprep.subr.bf16.mxu1 %v9572_v58  ;;  %v2196_v10 = vadd.f32 %v4740_v39, %v2156_v52  ;;  %v9719_v24 = vld [vmem:[#allocation53_spill] sm:$0xff] }
 0x19e   :  { %5008 = vmatpush3.bf16.msra.mxu0 %v9693_v13 }
 0x19f   :  { %5605 = vmatpush3.bf16.msra.mxu1 %v9694_v35  ;;  %5009 = vmatprep.subr.bf16.mxu0 %v9695_v12  ;;  %v9720_v35 = vld [vmem:[#allocation27_spill] sm:$0xff] }
 0x1a0   :  { %5606 = vmatprep.subr.bf16.mxu1 %v9572_v58 }
 0x1a2   :  { %5010 = vmatpush3.bf16.msra.mxu0 %v9696_v42 }
 0x1a3   :  { %5607 = vmatpush3.bf16.msra.mxu1 %v9697_v48  ;;  %5026 = vmatprep.subr.bf16.mxu0 %v9698_v43  ;;  %v9722_v43 = vld [vmem:[#allocation28_spill] sm:$0xff] }
 0x1a4   :  { %5048 = vmatprep.subr.bf16.mxu1 %v9699_v45  ;;  %v9723_v45 = vld [vmem:[#allocation57_spill] sm:$0xff] }
 0x1a5   :  { %2831 = vmatmul.mubr.bf16.vlgmr.msra.gmra.mrb[48].mxu0 %v4401_v40  ;;  %v9721_v40 = vld [vmem:[#allocation55_spill] sm:$0xff] }
 0x1a6   :  { %5609 = vmatmul.mubr.bf16.vlgmr.msra.gmra.mrb[48].mxu1 %v5903_v57  ;;  %5027 = vmatpush3.bf16.msra.mxu0 %v9700_v49  ;;  %v9726_v49 = vld [vmem:[#allocation31_spill] sm:$0xff] }
 0x1a7   :  { %5049 = vmatpush3.bf16.msra.mxu1 %v9701_v18  ;;  %5028 = vmatprep.subr.bf16.mxu0 %v9702_v51  ;;  %v9727_v18 = vld [vmem:[#allocation61_spill] sm:$0xff]  ;;  %v4417_v51 = vcombine.low %v4404_v19, %v4404_v19 }
 0x1a8   :  { %5050 = vmatprep.subr.bf16.mxu1 %v9703_v53  ;;  %3016 = vmatprep.mubr.bf16.mxu0 %v4418_v16  ;;  %v4406_v53 = vld [vmem:[%s9403_s0 + $0xd8] sm:$0xff] }
 0x1a9   :  { %3056 = vmatprep.mubr.bf16.mxu1 %v4420_v47  ;;  %v9724_v47 = vld [vmem:[#allocation30_spill] sm:$0xff] }
 0x1aa   :  { %5029 = vmatpush3.bf16.msra.mxu0 %v9704_v55  ;;  %v9728_v55 = vld [vmem:[#allocation32_spill] sm:$0xff] }
 0x1ab   :  { %5051 = vmatpush3.bf16.msra.mxu1 %v9705_v63  ;;  %5030 = vmatprep.subr.bf16.mxu0 %v9706_v1  ;;  %v4419_v63 = vcombine.low %v4405_v14, %v4405_v14  ;;  %v4407_v1 = vld [vmem:[%s9403_s0 + $0xe0] sm:$0xff]  ;;  %v9735_v14 = vld [vmem:[#allocation69_spill] sm:$0xff] }
 0x1ac   :  { %5052 = vmatprep.subr.bf16.mxu1 %v9707_v3  ;;  %v9729_v3 = vld [vmem:[#allocation63_spill] sm:$0xff]  ;;  %v4424_v19 = vcombine.high %v4407_v1, %v4407_v1 }
 0x1ae   :  { %5031 = vmatpush3.bf16.msra.mxu0 %v9708_v5  ;;  %v9730_v5 = vld [vmem:[#allocation34_spill] sm:$0xff] }
 0x1af   :  { %5053 = vmatpush3.bf16.msra.mxu1 %v9709_v7  ;;  %5032 = vmatprep.subr.bf16.mxu0 %v9710_v9  ;;  %v9731_v7 = vld [vmem:[#allocation65_spill] sm:$0xff]  ;;  %v4422_v9 = vcombine.high %v4406_v53, %v4406_v53 }
 0x1b0   :  { %5054 = vmatprep.subr.bf16.mxu1 %v9711_v20  ;;  %v9732_v20 = vld [vmem:[#allocation36_spill] sm:$0xff] }
 0x1b2   :  { %5033 = vmatpush3.bf16.msra.mxu0 %v9712_v22  ;;  %v9733_v22 = vld [vmem:[#allocation67_spill] sm:$0xff] }
 0x1b3   :  { %5055 = vmatpush3.bf16.msra.mxu1 %v9713_v25  ;;  %5034 = vmatprep.subr.bf16.mxu0 %v9714_v29  ;;  %v9734_v25 = vld [vmem:[#allocation38_spill] sm:$0xff]  ;;  %v9736_v29 = vld [vmem:[#allocation40_spill] sm:$0xff] }
 0x1b4   :  { %5056 = vmatprep.subr.bf16.mxu1 %v9715_v33  ;;  %v9737_v33 = vld [vmem:[#allocation71_spill] sm:$0xff] }
 0x1b6   :  { %5035 = vmatpush3.bf16.msra.mxu0 %v9716_v59  ;;  %v2235_v39 = vpop.f32.mrb[24].mxu0  ;;  %v9738_v59 = vld [vmem:[#allocation42_spill] sm:$0xff] }
 0x1b7   :  { %5057 = vmatpush3.bf16.msra.mxu1 %v9717_v37  ;;  %5036 = vmatprep.subr.bf16.mxu0 %v9718_v56  ;;  %v8190_v28 = vadd.f32 %v2235_v39, %v2196_v10  ;;  %v5590_v52 = vpop.f32.mrb[25].mxu0  ;;  %v4769_v32 = vpop.f32.mrb[24].mxu1  ;;  %v9725_v10 = vld [vmem:[#allocation59_spill] sm:$0xff]  ;;  %v9739_v37 = vld [vmem:[#allocation73_spill] sm:$0xff]  ;;  %v9740_v56 = vld [vmem:[#allocation44_spill] sm:$0xff] }
 0x1b8   :  { %5058 = vmatprep.subr.bf16.mxu1 %v9719_v24  ;;  %v2238_v13 = vpop.f32.mrb[26].mxu0  ;;  %v4770_v12 = vpop.f32.mrb[25].mxu1  ;;  %v9741_v39 = vld [vmem:[#allocation75_spill] sm:$0xff]  ;;  %v9742_v24 = vld [vmem:[#allocation46_spill] sm:$0xff]  ;;  %v9743_v52 = vld [vmem:[#allocation77_spill] sm:$0xff] }
 0x1b9   :  { %v5591_v42 = vpop.f32.mrb[27].mxu0  ;;  %v4771_v57 = vadd.f32 %v4770_v12, %v4769_v32  ;;  %v4772_v48 = vpop.f32.mrb[26].mxu1  ;;  %v9744_v32 = vld [vmem:[#allocation48_spill] sm:$0xff]  ;;  %v9745_v13 = vld [vmem:[#allocation79_spill] sm:$0xff]  ;;  %v9747_v12 = vld [vmem:[#allocation81_spill] sm:$0xff] }
 0x1ba   :  { %5037 = vmatpush3.bf16.msra.mxu0 %v9720_v35  ;;  %v4773_v16 = vpop.f32.mrb[27].mxu1  ;;  %v9746_v35 = vld [vmem:[#allocation50_spill] sm:$0xff]  ;;  %v9749_v42 = vld [vmem:[#allocation83_spill] sm:$0xff] }
 0x1bb   :  { %5059 = vmatpush3.bf16.msra.mxu1 %v9721_v40  ;;  %5038 = vmatprep.subr.bf16.mxu0 %v9722_v43  ;;  %v9748_v40 = vld [vmem:[#allocation52_spill] sm:$0xff]  ;;  %v9750_v48 = vld [vmem:[#allocation54_spill] sm:$0xff] }
 0x1bc   :  { %5060 = vmatprep.subr.bf16.mxu1 %v9723_v45  ;;  %v9751_v45 = vld [vmem:[#allocation85_spill] sm:$0xff] }
 0x1be   :  { %5039 = vmatpush3.bf16.msra.mxu0 %v9724_v47 }
 0x1bf   :  { %5061 = vmatpush3.bf16.msra.mxu1 %v9725_v10  ;;  %5040 = vmatprep.subr.bf16.mxu0 %v9726_v49 }
 0x1c0   :  { %5062 = vmatprep.subr.bf16.mxu1 %v9727_v18  ;;  %v9752_v18 = vld [vmem:[#allocation56_spill] sm:$0xff] }
 0x1c2   :  { %5041 = vmatpush3.bf16.msra.mxu0 %v9728_v55 }
 0x1c3   :  { %5063 = vmatpush3.bf16.msra.mxu1 %v9729_v3  ;;  %5070 = vmatprep.subr.bf16.mxu0 %v9730_v5  ;;  %v9753_v3 = vld [vmem:[#allocation87_spill] sm:$0xff] }
 0x1c4   :  { %5092 = vmatprep.subr.bf16.mxu1 %v9731_v7  ;;  %v9754_v7 = vld [vmem:[#allocation58_spill] sm:$0xff] }
 0x1c5   :  { %3017 = vmatmul.mubr.bf16.vlgmr.msra.gmra.mrb[52].mxu0 %v4417_v51 }
 0x1c6   :  { %3057 = vmatmul.mubr.bf16.vlgmr.msra.gmra.mrb[52].mxu1 %v4419_v63  ;;  %5071 = vmatpush3.bf16.msra.mxu0 %v9732_v20  ;;  %v9755_v20 = vld [vmem:[#allocation89_spill] sm:$0xff] }
 0x1c7   :  { %5093 = vmatpush3.bf16.msra.mxu1 %v9733_v22  ;;  %5072 = vmatprep.subr.bf16.mxu0 %v9734_v25  ;;  %v9756_v25 = vld [vmem:[#allocation60_spill] sm:$0xff] }
 0x1c8   :  { %5094 = vmatprep.subr.bf16.mxu1 %v9735_v14  ;;  %3096 = vmatprep.mubr.bf16.mxu0 %v4422_v9  ;;  %v9757_v14 = vld [vmem:[#allocation91_spill] sm:$0xff] }
 0x1c9   :  { %3136 = vmatprep.mubr.bf16.mxu1 %v4424_v19 }
 0x1ca   :  { %5073 = vmatpush3.bf16.msra.mxu0 %v9736_v29  ;;  %v9758_v29 = vld [vmem:[#allocation62_spill] sm:$0xff] }
 0x1cb   :  { %5095 = vmatpush3.bf16.msra.mxu1 %v9737_v33  ;;  %5074 = vmatprep.subr.bf16.mxu0 %v9738_v59  ;;  %v9759_v33 = vld [vmem:[#allocation93_spill] sm:$0xff]  ;;  %v4421_v59 = vcombine.low %v4406_v53, %v4406_v53 }
 0x1cc   :  { %5096 = vmatprep.subr.bf16.mxu1 %v9739_v37  ;;  %v4408_v37 = vld [vmem:[%s9403_s0 + $0xe8] sm:$0xff] }
 0x1ce   :  { %5075 = vmatpush3.bf16.msra.mxu0 %v9740_v56  ;;  %v9760_v56 = vld [vmem:[#allocation64_spill] sm:$0xff] }
 0x1cf   :  { %5097 = vmatpush3.bf16.msra.mxu1 %v9741_v39  ;;  %5076 = vmatprep.subr.bf16.mxu0 %v9742_v24  ;;  %v4409_v39 = vld [vmem:[%s9403_s0 + $0xf0] sm:$0xff]  ;;  %v9761_v24 = vld [vmem:[#allocation95_spill] sm:$0xff] }
 0x1d0   :  { %5098 = vmatprep.subr.bf16.mxu1 %v9743_v52  ;;  %v9762_v52 = vld [vmem:[#allocation66_spill] sm:$0xff]  ;;  %v4428_v53 = vcombine.high %v4409_v39, %v4409_v39 }
 0x1d2   :  { %5077 = vmatpush3.bf16.msra.mxu0 %v9744_v32  ;;  %v9763_v32 = vld [vmem:[#allocation97_spill] sm:$0xff] }
 0x1d3   :  { %5099 = vmatpush3.bf16.msra.mxu1 %v9745_v13  ;;  %5078 = vmatprep.subr.bf16.mxu0 %v9746_v35  ;;  %v4426_v13 = vcombine.high %v4408_v37, %v4408_v37  ;;  %v9764_v35 = vld [vmem:[#allocation68_spill] sm:$0xff] }
 0x1d4   :  { %5100 = vmatprep.subr.bf16.mxu1 %v9747_v12  ;;  %v9765_v12 = vld [vmem:[#allocation99_spill] sm:$0xff] }
 0x1d6   :  { %5079 = vmatpush3.bf16.msra.mxu0 %v9748_v40  ;;  %v9766_v40 = vld [vmem:[#allocation70_spill] sm:$0xff] }
 0x1d7   :  { %5101 = vmatpush3.bf16.msra.mxu1 %v9749_v42  ;;  %5080 = vmatprep.subr.bf16.mxu0 %v9750_v48  ;;  %v9768_v42 = vld [vmem:[#allocation72_spill] sm:$0xff]  ;;  %v9769_v48 = vld [vmem:[#allocation103_spill] sm:$0xff] }
 0x1d8   :  { %v4791_v43 = vpop.f32.mrb[28].mxu0  ;;  %5102 = vmatprep.subr.bf16.mxu1 %v9751_v45  ;;  %v9771_v45 = vld [vmem:[#allocation105_spill] sm:$0xff] }
 0x1d9   :  { %v4792_v16 = vpop.f32.mrb[29].mxu0  ;;  %v4813_v47 = vpop.f32.mrb[28].mxu1 }
 0x1da   :  { %v4793_v10 = vadd.f32 %v4792_v16, %v4791_v43  ;;  %v4794_v49 = vpop.f32.mrb[30].mxu0  ;;  %5081 = vmatpush3.bf16.msra.mxu0 %v9752_v18  ;;  %v4814_v51 = vpop.f32.mrb[29].mxu1  ;;  %v9770_v43 = vld [vmem:[#allocation74_spill] sm:$0xff]  ;;  %v9772_v16 = vld [vmem:[#allocation76_spill] sm:$0xff] }
 0x1db   :  { %v4795_v55 = vpop.f32.mrb[31].mxu0  ;;  %v4815_v63 = vadd.f32 %v4814_v51, %v4813_v47  ;;  %5103 = vmatpush3.bf16.msra.mxu1 %v9753_v3  ;;  %v4816_v5 = vpop.f32.mrb[30].mxu1  ;;  %5082 = vmatprep.subr.bf16.mxu0 %v9754_v7  ;;  %v9773_v47 = vld [vmem:[#allocation107_spill] sm:$0xff]  ;;  %v9775_v49 = vld [vmem:[#allocation109_spill] sm:$0xff]  ;;  %v9776_v18 = vld [vmem:[#allocation80_spill] sm:$0xff] }
 0x1dc   :  { %v2433_v9 = vadd.f32 %v4793_v10, %v4771_v57  ;;  %v4817_v19 = vpop.f32.mrb[31].mxu1  ;;  %5104 = vmatprep.subr.bf16.mxu1 %v9755_v20  ;;  %v4423_v57 = vcombine.low %v4407_v1, %v4407_v1  ;;  %v9767_v1 = vld [vmem:[#allocation101_spill] sm:$0xff]  ;;  %v9774_v10 = vld [vmem:[#allocation78_spill] sm:$0xff]  ;;  %v9777_v51 = vld [vmem:[#allocation111_spill] sm:$0xff] }
 0x1dd   :  { %v9778_v55 = vld [vmem:[#allocation82_spill] sm:$0xff]  ;;  %v9780_v3 = vld [vmem:[#allocation84_spill] sm:$0xff]  ;;  %v9781_v5 = vld [vmem:[#allocation115_spill] sm:$0xff] }
 0x1de   :  { %v2473_v22 = vadd.f32 %v4815_v63, %v2433_v9  ;;  %5083 = vmatpush3.bf16.msra.mxu0 %v9756_v25  ;;  %v9779_v63 = vld [vmem:[#allocation113_spill] sm:$0xff]  ;;  %v9782_v7 = vld [vmem:[#allocation86_spill] sm:$0xff] }
 0x1df   :  { %5105 = vmatpush3.bf16.msra.mxu1 %v9757_v14  ;;  %5084 = vmatprep.subr.bf16.mxu0 %v9758_v29  ;;  %v9783_v19 = vld [vmem:[#allocation117_spill] sm:$0xff] }
 0x1e0   :  { %5106 = vmatprep.subr.bf16.mxu1 %v9759_v33  ;;  %v9784_v33 = vld [vmem:[#allocation88_spill] sm:$0xff] }
 0x1e2   :  { %5085 = vmatpush3.bf16.msra.mxu0 %v9760_v56 }
 0x1e3   :  { %5107 = vmatpush3.bf16.msra.mxu1 %v9761_v24  ;;  %5114 = vmatprep.subr.bf16.mxu0 %v9762_v52  ;;  %v9785_v52 = vld [vmem:[#allocation90_spill] sm:$0xff] }
 0x1e4   :  { %5136 = vmatprep.subr.bf16.mxu1 %v9763_v32 }
 0x1e5   :  { %3097 = vmatmul.mubr.bf16.vlgmr.msra.gmra.mrb[56].mxu0 %v4421_v59 }
 0x1e6   :  { %5115 = vmatpush3.bf16.msra.mxu0 %v9764_v35  ;;  %3137 = vmatmul.mubr.bf16.vlgmr.msra.gmra.mrb[56].mxu1 %v4423_v57  ;;  %v9786_v35 = vld [vmem:[#allocation92_spill] sm:$0xff] }
 0x1e7   :  { %5137 = vmatpush3.bf16.msra.mxu1 %v9765_v12  ;;  %5116 = vmatprep.subr.bf16.mxu0 %v9766_v40  ;;  %v9787_v12 = vld [vmem:[#allocation94_spill] sm:$0xff]  ;;  %v4425_v40 = vcombine.low %v4408_v37, %v4408_v37 }
 0x1e8   :  { %5138 = vmatprep.subr.bf16.mxu1 %v9767_v1  ;;  %3176 = vmatprep.mubr.bf16.mxu0 %v4426_v13  ;;  %v9788_v1 = vld [vmem:[#allocation96_spill] sm:$0xff] }
 0x1e9   :  { %3216 = vmatprep.mubr.bf16.mxu1 %v4428_v53 }
 0x1ea   :  { %5117 = vmatpush3.bf16.msra.mxu0 %v9768_v42  ;;  %v9790_v42 = vld [vmem:[#allocation100_spill] sm:$0xff] }
 0x1eb   :  { %5139 = vmatpush3.bf16.msra.mxu1 %v9769_v48  ;;  %5118 = vmatprep.subr.bf16.mxu0 %v9770_v43  ;;  %v9794_v48 = vld [vmem:[#allocation108_spill] sm:$0xff] }
 0x1ec   :  { %5140 = vmatprep.subr.bf16.mxu1 %v9771_v45  ;;  %v9795_v43 = vld [vmem:[#allocation124_spill] sm:$0xff]  ;;  %v9796_v45 = vld [vmem:[#allocation110_spill] sm:$0xff] }
 0x1ee   :  { %5119 = vmatpush3.bf16.msra.mxu0 %v9772_v16  ;;  %v9798_v16 = vld [vmem:[#allocation112_spill] sm:$0xff] }
 0x1ef   :  { %5141 = vmatpush3.bf16.msra.mxu1 %v9773_v47  ;;  %5120 = vmatprep.subr.bf16.mxu0 %v9774_v10  ;;  %v9800_v47 = vld [vmem:[#allocation114_spill] sm:$0xff]  ;;  %v9801_v10 = vld [vmem:[#allocation127_spill] sm:$0xff] }
 0x1f0   :  { %5142 = vmatprep.subr.bf16.mxu1 %v9775_v49  ;;  %v9803_v49 = vld [vmem:[#allocation128_spill] sm:$0xff] }
 0x1f2   :  { %5121 = vmatpush3.bf16.msra.mxu0 %v9776_v18 }
 0x1f3   :  { %5143 = vmatpush3.bf16.msra.mxu1 %v9777_v51  ;;  %5122 = vmatprep.subr.bf16.mxu0 %v9778_v55 }
 0x1f4   :  { %5144 = vmatprep.subr.bf16.mxu1 %v9779_v63 }
 0x1f6   :  { %5123 = vmatpush3.bf16.msra.mxu0 %v9780_v3 }
 0x1f7   :  { %5145 = vmatpush3.bf16.msra.mxu1 %v9781_v5  ;;  %5124 = vmatprep.subr.bf16.mxu0 %v9782_v7  ;;  %v9805_v5 = vld [vmem:[#allocation119_spill] sm:$0xff] }
 0x1f8   :  { %v4835_v9 = vpop.f32.mrb[32].mxu0  ;;  %5146 = vmatprep.subr.bf16.mxu1 %v9783_v19 }
 0x1f9   :  { %v4836_v20 = vpop.f32.mrb[33].mxu0  ;;  %v4857_v25 = vpop.f32.mrb[32].mxu1 }
 0x1fa   :  { %v4837_v14 = vadd.f32 %v4836_v20, %v4835_v9  ;;  %v4838_v29 = vpop.f32.mrb[34].mxu0  ;;  %5125 = vmatpush3.bf16.msra.mxu0 %v9784_v33  ;;  %v4858_v59 = vpop.f32.mrb[33].mxu1 }
 0x1fb   :  { %v4839_v56 = vpop.f32.mrb[35].mxu0  ;;  %v4859_v57 = vadd.f32 %v4858_v59, %v4857_v25  ;;  %5147 = vmatpush3.bf16.msra.mxu1 %v7830_v15  ;;  %v4860_v24 = vpop.f32.mrb[34].mxu1  ;;  %5126 = vmatprep.subr.bf16.mxu0 %v9785_v52  ;;  %v8279_v15 = vld [vmem:[%s9403_s0 + $0xf8] sm:$0xff]  ;;  %v9806_v25 = vld [vmem:[#allocation120_spill] sm:$0xff]  ;;  %v9808_v59 = vld [vmem:[#allocation122_spill] sm:$0xff] }
 0x1fc   :  { %v2513_v32 = vadd.f32 %v4837_v14, %v2473_v22  ;;  %v4861_v13 = vpop.f32.mrb[35].mxu1  ;;  %5148 = vmatprep.subr.bf16.mxu1 %v7842_v17  ;;  %v4427_v22 = vcombine.low %v4409_v39, %v4409_v39  ;;  %v8285_v17 = vld [vmem:[%s9403_s0 + $0x100] sm:$0xff]  ;;  %v8329_v56 = vld [vmem:[%s9403_s0 + $0x108] sm:$0xff] }
 0x1fd   :  { %v4432_v37 = vcombine.high %v8285_v17, %v8285_v17  ;;  %v9791_v39 = vld [vmem:[#allocation102_spill] sm:$0xff]  ;;  %v4434_v24 = vcombine.high %v8329_v56, %v8329_v56  ;;  %v8422_v13 = vld [vmem:[%s9402_s1 + $0x468] sm:$0xff]  }
 0x1fe   :  { %v2553_v53 = vadd.f32 %v4859_v57, %v2513_v32  ;;  %5127 = vmatpush3.bf16.msra.mxu0 %v9786_v35  ;;  %v9809_v57 = vld [vmem:[#allocation123_spill] sm:$0xff] }
 0x1ff   :  { %5149 = vmatpush3.bf16.msra.mxu1 %v7856_v31  ;;  %5128 = vmatprep.subr.bf16.mxu0 %v9787_v12  ;;  %v9789_v31 = vld [vmem:[#allocation98_spill] sm:$0xff]  ;;  %v8368_v32 = vld [vmem:[%s9402_s1 + $0x408] sm:$0xff]  }
 0x200   :  { %5150 = vmatprep.subr.bf16.mxu1 %v7868_v21  ;;  %v4430_v21 = vcombine.high %v8279_v15, %v8279_v15 }
 0x202   :  { %5129 = vmatpush3.bf16.msra.mxu0 %v9788_v1  ;;  %v8434_v1 = vld [vmem:[%s9402_s1 + $0x428] sm:$0xff]  }
 0x203   :  { %5151 = vmatpush3.bf16.msra.mxu1 %v7887_v27  ;;  %5158 = vmatprep.subr.bf16.mxu0 %v9789_v31  ;;  %v9792_v27 = vld [vmem:[#allocation104_spill] sm:$0xff] }
 0x204   :  { %5180 = vmatprep.subr.bf16.mxu1 %v7906_v61  ;;  %v9793_v61 = vld [vmem:[#allocation106_spill] sm:$0xff] }
 0x205   :  { %3177 = vmatmul.mubr.bf16.vlgmr.msra.gmra.mrb[60].mxu0 %v4425_v40 }
 0x206   :  { %5159 = vmatpush3.bf16.msra.mxu0 %v9790_v42  ;;  %3217 = vmatmul.mubr.bf16.vlgmr.msra.gmra.mrb[60].mxu1 %v4427_v22  ;;  %v8446_v42 = vld [vmem:[%s9402_s1 + $0x470] sm:$0xff]  }
 0x207   :  { %5181 = vmatpush3.bf16.msra.mxu1 %v7917_v41  ;;  %5160 = vmatprep.subr.bf16.mxu0 %v9791_v39  ;;  %v9797_v41 = vld [vmem:[#allocation125_spill] sm:$0xff] }
 0x208   :  { %5182 = vmatprep.subr.bf16.mxu1 %v7924_v23  ;;  %3256 = vmatprep.mubr.bf16.mxu0 %v4430_v21  ;;  %v9799_v23 = vld [vmem:[#allocation126_spill] sm:$0xff]  ;;  %v8440_v21 = vld [vmem:[%s9402_s1 + $0x4a8] sm:$0xff]  }
 0x209   :  { %3296 = vmatprep.mubr.bf16.mxu1 %v4432_v37 }
 0x20a   :  { %5161 = vmatpush3.bf16.msra.mxu0 %v9792_v27 }
 0x20b   :  { %5183 = vmatpush3.bf16.msra.mxu1 %v7931_v11  ;;  %5162 = vmatprep.subr.bf16.mxu0 %v9793_v61  ;;  %v9802_v11 = vld [vmem:[#allocation116_spill] sm:$0xff] }
 0x20c   :  { %5184 = vmatprep.subr.bf16.mxu1 %v7938_v26  ;;  %v9804_v26 = vld [vmem:[#allocation118_spill] sm:$0xff]  ;;  %v8453_v61 = vld [vmem:[%s9402_s1 + $0x4f0] sm:$0xff]  }
 0x20e   :  { %5163 = vmatpush3.bf16.msra.mxu0 %v9794_v48 }
 0x20f   :  { %5185 = vmatpush3.bf16.msra.mxu1 %v9795_v43  ;;  %5164 = vmatprep.subr.bf16.mxu0 %v9796_v45  ;;  %v8461_v43 = vld [vmem:[%s9402_s1 + $0x430] sm:$0xff]  }
 0x210   :  { %5186 = vmatprep.subr.bf16.mxu1 %v9797_v41  ;;  %v8467_v45 = vld [vmem:[%s9402_s1 + $0x4b0] sm:$0xff]   ;;  %v8473_v41 = vld [vmem:[%s9402_s1 + $0x478] sm:$0xff]  }
 0x212   :  { %5165 = vmatpush3.bf16.msra.mxu0 %v9798_v16  ;;  %v8479_v16 = vld [vmem:[%s9402_s1 + $0x4f8] sm:$0xff]  }
 0x213   :  { %5187 = vmatpush3.bf16.msra.mxu1 %v9799_v23  ;;  %5166 = vmatprep.subr.bf16.mxu0 %v9800_v47  ;;  %v4433_v23 = vcombine.low %v8329_v56, %v8329_v56  ;;  %v8487_v47 = vld [vmem:[%s9403_s0 + $0x118] sm:$0xff] }
 0x214   :  { %5188 = vmatprep.subr.bf16.mxu1 %v9801_v10  ;;  %v8492_v10 = vld [vmem:[%s9402_s1 + $0x438] sm:$0xff]  }
 0x215   :  { %v8605_v56 = vld [vmem:[%s9402_s1 + $0x598] sm:$0xff]  }
 0x216   :  { %5167 = vmatpush3.bf16.msra.mxu0 %v9802_v11  ;;  %9811 = vst [vmem:[#allocation3_spill] sm:$0xff] %v8605_v56 }
 0x217   :  { %5189 = vmatpush3.bf16.msra.mxu1 %v9803_v49  ;;  %5168 = vmatprep.subr.bf16.mxu0 %v9804_v26  ;;  %v8500_v49 = vld [vmem:[%s9403_s0 + $0x120] sm:$0xff]  ;;  %v8505_v26 = vld [vmem:[%s9402_s1 + $0x4b8] sm:$0xff]  }
 0x218   :  { %v4879_v18 = vpop.f32.mrb[36].mxu0  ;;  %5190 = vmatprep.subr.bf16.mxu1 %v7980_v38  ;;  %v9807_v38 = vld [vmem:[#allocation121_spill] sm:$0xff] }
 0x219   :  { %v4880_v51 = vpop.f32.mrb[37].mxu0  ;;  %v4901_v55 = vpop.f32.mrb[36].mxu1 }
 0x21a   :  { %v4881_v63 = vadd.f32 %v4880_v51, %v4879_v18  ;;  %v4882_v3 = vpop.f32.mrb[38].mxu0  ;;  %5169 = vmatpush3.bf16.msra.mxu0 %v9805_v5  ;;  %v4902_v7 = vpop.f32.mrb[37].mxu1  ;;  %v8511_v18 = vld [vmem:[%s9402_s1 + $0x540] sm:$0xff]  }
 0x21b   :  { %v4883_v9 = vpop.f32.mrb[39].mxu0  ;;  %v4903_v19 = vadd.f32 %v4902_v7, %v4901_v55  ;;  %5191 = vmatpush3.bf16.msra.mxu1 %v7987_v36  ;;  %v4904_v20 = vpop.f32.mrb[38].mxu1  ;;  %5170 = vmatprep.subr.bf16.mxu0 %v9806_v25  ;;  %v4429_v36 = vcombine.low %v8279_v15, %v8279_v15  ;;  %v8517_v51 = vld [vmem:[%s9402_s1 + $0x5c0] sm:$0xff]   ;;  %v4438_v55 = vcombine.high %v8487_v47, %v8487_v47  ;;  %v8539_v7 = vld [vmem:[%s9402_s1 + $0x548] sm:$0xff]   ;;  %v8563_v25 = vld [vmem:[%s9402_s1 + $0x550] sm:$0xff]  }
 0x21c   :  { %v2593_v14 = vadd.f32 %v4881_v63, %v2553_v53  ;;  %v4905_v29 = vpop.f32.mrb[39].mxu1  ;;  %5192 = vmatprep.subr.bf16.mxu1 %v7995_v44  ;;  %v4431_v44 = vcombine.low %v8285_v17, %v8285_v17  ;;  %v8428_v53 = vld [vmem:[%s9402_s1 + $0x4e8] sm:$0xff]   ;;  %v4440_v63 = vcombine.high %v8500_v49, %v8500_v49  ;;  %v8527_v3 = vld [vmem:[%s9402_s1 + $0x500] sm:$0xff]  }
 0x21d   :  { %v8533_v5 = vld [vmem:[%s9402_s1 + $0x580] sm:$0xff]   ;;  %v8545_v9 = vld [vmem:[%s9402_s1 + $0x5c8] sm:$0xff]   ;;  %v8575_v29 = vld [vmem:[%s9402_s1 + $0x510] sm:$0xff]  }
 0x21e   :  { %v8318_v33 = vadd.f32 %v4903_v19, %v2593_v14  ;;  %5171 = vmatpush3.bf16.msra.mxu0 %v9807_v38  ;;  %v8551_v19 = vld [vmem:[%s9402_s1 + $0x508] sm:$0xff]   ;;  %v8569_v14 = vld [vmem:[%s9402_s1 + $0x5d0] sm:$0xff]   ;;  %v8587_v38 = vld [vmem:[%s9402_s1 + $0x558] sm:$0xff]  }
 0x21f   :  { %5193 = vmatpush3.bf16.msra.mxu1 %v8004_v30  ;;  %5172 = vmatprep.subr.bf16.mxu0 %v9808_v59  ;;  %v8337_v30 = vld [vmem:[%s9403_s0 + $0x110] sm:$0xff]  ;;  %v8557_v20 = vld [vmem:[%s9402_s1 + $0x588] sm:$0xff]   ;;  %v8593_v59 = vld [vmem:[%s9402_s1 + $0x5d8] sm:$0xff]  }
 0x220   :  { %5194 = vmatprep.subr.bf16.mxu1 %v8011_v46  ;;  %v8343_v46 = vld [vmem:[%s9402_s1 + $0x440] sm:$0xff]   ;;  %v4436_v52 = vcombine.high %v8337_v30, %v8337_v30  ;;  %v4435_v11 = vcombine.low %v8337_v30, %v8337_v30  ;;  %9810 = vst [vmem:[#allocation2_spill] sm:$0xff] %v8593_v59 }
 0x221   :  { %v8623_v30 = vld [vmem:[%s9402_s1 + $0x520] sm:$0xff]  }
 0x222   :  { %5173 = vmatpush3.bf16.msra.mxu0 %v9809_v57  ;;  %v8611_v57 = vld [vmem:[%s9402_s1 + $0x560] sm:$0xff]  }
 0x223   :  { %5195 = vmatpush3.bf16.msra.mxu1 %v8025_v50  ;;  %5202 = vmatprep.subr.bf16.mxu0 %v8343_v46  ;;  %v8354_v50 = vld [vmem:[%s9402_s1 + $0x400] sm:$0xff]  }
 0x224   :  { %5224 = vmatprep.subr.bf16.mxu1 %v8039_v60  ;;  %v8361_v60 = vld [vmem:[%s9402_s1 + $0x448] sm:$0xff]  }
 0x225   :  { %3257 = vmatmul.mubr.bf16.vlgmr.msra.gmra.mrb[64].mxu0 %v4429_v36  ;;  %v8599_v36 = vld [vmem:[%s9402_s1 + $0x518] sm:$0xff]  }
 0x226   :  { %5203 = vmatpush3.bf16.msra.mxu0 %v8354_v50  ;;  %3297 = vmatmul.mubr.bf16.vlgmr.msra.gmra.mrb[64].mxu1 %v4431_v44  ;;  %v8617_v44 = vld [vmem:[%s9402_s1 + $0x5e0] sm:$0xff]  }
 0x227   :  { %5225 = vmatpush3.bf16.msra.mxu1 %v8050_v54  ;;  %5204 = vmatprep.subr.bf16.mxu0 %v8361_v60  ;;  %v8375_v54 = vld [vmem:[%s9402_s1 + $0x450] sm:$0xff]   ;;  %9812 = vst [vmem:[#allocation17_spill] sm:$0xff] %v8617_v44 }
 0x228   :  { %5226 = vmatprep.subr.bf16.mxu1 %v8057_v62  ;;  %3336 = vmatprep.mubr.bf16.mxu0 %v4434_v24  ;;  %v8382_v62 = vld [vmem:[%s9402_s1 + $0x410] sm:$0xff]   ;;  %v8629_v24 = vld [vmem:[%s9402_s1 + $0x5a0] sm:$0xff]  }
 0x229   :  { %3376 = vmatprep.mubr.bf16.mxu1 %v4436_v52  ;;  %9813 = vst [vmem:[#allocation4_spill] sm:$0xff] %v8629_v24  ;;  %v8635_v52 = vld [vmem:[%s9402_s1 + $0x568] sm:$0xff]  }
 0x22a   :  { %5205 = vmatpush3.bf16.msra.mxu0 %v8368_v32 }
 0x22b   :  { %5227 = vmatpush3.bf16.msra.mxu1 %v8064_v34  ;;  %5206 = vmatprep.subr.bf16.mxu0 %v8375_v54  ;;  %v8389_v34 = vld [vmem:[%s9402_s1 + $0x458] sm:$0xff]  }
 0x22c   :  { %5228 = vmatprep.subr.bf16.mxu1 %v8071_v0  ;;  %v8396_v0 = vld [vmem:[%s9402_s1 + $0x418] sm:$0xff]  }
 0x22e   :  { %5207 = vmatpush3.bf16.msra.mxu0 %v8382_v62 }
 0x22f   :  { %5229 = vmatpush3.bf16.msra.mxu1 %v8078_v2  ;;  %5208 = vmatprep.subr.bf16.mxu0 %v8389_v34  ;;  %v8403_v2 = vld [vmem:[%s9402_s1 + $0x460] sm:$0xff]  }
 0x230   :  { %5230 = vmatprep.subr.bf16.mxu1 %v8085_v4  ;;  %v8410_v4 = vld [vmem:[%s9402_s1 + $0x420] sm:$0xff]  }
 0x232   :  { %5209 = vmatpush3.bf16.msra.mxu0 %v8396_v0 }
 0x233   :  { %5231 = vmatpush3.bf16.msra.mxu1 %v8092_v6  ;;  %5210 = vmatprep.subr.bf16.mxu0 %v8403_v2  ;;  %v8416_v6 = vld [vmem:[%s9402_s1 + $0x4a0] sm:$0xff]  }
 0x234   :  { %5232 = vmatprep.subr.bf16.mxu1 %v8099_v8 }
 0x236   :  { %5211 = vmatpush3.bf16.msra.mxu0 %v8410_v4 }
 0x237   :  { %5233 = vmatpush3.bf16.msra.mxu1 %v8416_v6  ;;  %5212 = vmatprep.subr.bf16.mxu0 %v8422_v13 }
 0x238   :  { %v4923_v8 = vpop.f32.mrb[40].mxu0  ;;  %5234 = vmatprep.subr.bf16.mxu1 %v8428_v53 }
 0x239   :  { %v4924_v35 = vpop.f32.mrb[41].mxu0  ;;  %v4945_v12 = vpop.f32.mrb[40].mxu1 }
 0x23a   :  { %v4925_v40 = vadd.f32 %v4924_v35, %v4923_v8  ;;  %v4926_v15 = vpop.f32.mrb[42].mxu0  ;;  %5213 = vmatpush3.bf16.msra.mxu0 %v8434_v1  ;;  %v4946_v22 = vpop.f32.mrb[41].mxu1  ;;  %v8641_v35 = vld [vmem:[%s9402_s1 + $0x5e8] sm:$0xff]  }
 0x23b   :  { %v4927_v17 = vpop.f32.mrb[43].mxu0  ;;  %v4947_v31 = vadd.f32 %v4946_v22, %v4945_v12  ;;  %5235 = vmatpush3.bf16.msra.mxu1 %v8440_v21  ;;  %v4948_v37 = vpop.f32.mrb[42].mxu1  ;;  %5214 = vmatprep.subr.bf16.mxu0 %v8446_v42  ;;  %9814 = vst [vmem:[#allocation5_spill] sm:$0xff] %v8641_v35 }
 0x23c   :  { %v2673_v39 = vadd.f32 %v4925_v40, %v8318_v33  ;;  %v4949_v27 = vpop.f32.mrb[43].mxu1  ;;  %5236 = vmatprep.subr.bf16.mxu1 %v8453_v61  ;;  %v8581_v33 = vld [vmem:[%s9402_s1 + $0x590] sm:$0xff]   ;;  %v8647_v17 = vld [vmem:[%s9402_s1 + $0x528] sm:$0xff]  }
 0x23d   :  { %v8653_v27 = vld [vmem:[%s9402_s1 + $0x5a8] sm:$0xff]  }
 0x23e   :  { %v8456_v48 = vadd.f32 %v4947_v31, %v2673_v39  ;;  %5215 = vmatpush3.bf16.msra.mxu0 %v8461_v43  ;;  %9815 = vst [vmem:[#allocation20_spill] sm:$0xff] %v8653_v27 }
 0x23f   :  { %5237 = vmatpush3.bf16.msra.mxu1 %v8467_v45  ;;  %5216 = vmatprep.subr.bf16.mxu0 %v8473_v41 }
 0x240   :  { %5238 = vmatprep.subr.bf16.mxu1 %v8479_v16 }
 0x242   :  { %5217 = vmatpush3.bf16.msra.mxu0 %v8492_v10 }
 0x243   :  { %5239 = vmatpush3.bf16.msra.mxu1 %v8505_v26  ;;  %5246 = vmatprep.subr.bf16.mxu0 %v8511_v18 }
 0x244   :  { %5268 = vmatprep.subr.bf16.mxu1 %v8517_v51 }
 0x245   :  { %3337 = vmatmul.mubr.bf16.vlgmr.msra.gmra.mrb[68].mxu0 %v4433_v23 }
 0x246   :  { %5247 = vmatpush3.bf16.msra.mxu0 %v8527_v3  ;;  %3377 = vmatmul.mubr.bf16.vlgmr.msra.gmra.mrb[68].mxu1 %v4435_v11  ;;  %v8659_v11 = vld [vmem:[%s9402_s1 + $0x570] sm:$0xff]  }
 0x247   :  { %5269 = vmatpush3.bf16.msra.mxu1 %v8533_v5  ;;  %5248 = vmatprep.subr.bf16.mxu0 %v8539_v7 }
 0x248   :  { %5270 = vmatprep.subr.bf16.mxu1 %v8545_v9  ;;  %3416 = vmatprep.mubr.bf16.mxu0 %v4438_v55 }
 0x249   :  { %3456 = vmatprep.mubr.bf16.mxu1 %v4440_v63 }
 0x24a   :  { %5249 = vmatpush3.bf16.msra.mxu0 %v8551_v19 }
 0x24b   :  { %5271 = vmatpush3.bf16.msra.mxu1 %v8557_v20  ;;  %5250 = vmatprep.subr.bf16.mxu0 %v8563_v25 }
 0x24c   :  { %5272 = vmatprep.subr.bf16.mxu1 %v8569_v14 }
 0x24e   :  { %5251 = vmatpush3.bf16.msra.mxu0 %v8575_v29 }
 0x24f   :  { %5273 = vmatpush3.bf16.msra.mxu1 %v8581_v33  ;;  %5252 = vmatprep.subr.bf16.mxu0 %v8587_v38 }
 0x250   :  { %5274 = vmatprep.subr.bf16.mxu1 %v8593_v59 }
 0x252   :  { %5253 = vmatpush3.bf16.msra.mxu0 %v8599_v36 }
 0x253   :  { %5275 = vmatpush3.bf16.msra.mxu1 %v8605_v56  ;;  %5254 = vmatprep.subr.bf16.mxu0 %v8611_v57 }
 0x254   :  { %5276 = vmatprep.subr.bf16.mxu1 %v8617_v44 }
 0x256   :  { %5255 = vmatpush3.bf16.msra.mxu0 %v8623_v30 }
 0x257   :  { %5277 = vmatpush3.bf16.msra.mxu1 %v8629_v24  ;;  %5256 = vmatprep.subr.bf16.mxu0 %v8635_v52 }
 0x258   :  { %v4967_v8 = vpop.f32.mrb[44].mxu0  ;;  %5278 = vmatprep.subr.bf16.mxu1 %v8641_v35 }
 0x259   :  { %v4968_v12 = vpop.f32.mrb[45].mxu0  ;;  %v4989_v40 = vpop.f32.mrb[44].mxu1 }
 0x25a   :  { %v4969_v15 = vadd.f32 %v4968_v12, %v4967_v8  ;;  %v4970_v22 = vpop.f32.mrb[46].mxu0  ;;  %5257 = vmatpush3.bf16.msra.mxu0 %v8647_v17  ;;  %v4990_v31 = vpop.f32.mrb[45].mxu1  ;;  %v8666_v8 = vld [vmem:[%s9402_s1 + $0x5f0] sm:$0xff]  }
 0x25b   :  { %v4971_v37 = vpop.f32.mrb[47].mxu0  ;;  %v4991_v39 = vadd.f32 %v4990_v31, %v4989_v40  ;;  %5279 = vmatpush3.bf16.msra.mxu1 %v8653_v27  ;;  %v4992_v23 = vpop.f32.mrb[46].mxu1  ;;  %5258 = vmatprep.subr.bf16.mxu0 %v8659_v11  ;;  %9816 = vst [vmem:[#allocation6_spill] sm:$0xff] %v8666_v8  ;;  %v8674_v40 = vld [vmem:[%s9402_s1 + $0x530] sm:$0xff]   ;;  %v8692_v22 = vld [vmem:[%s9402_s1 + $0x5f8] sm:$0xff]   ;;  %v4437_v31 = vcombine.low %v8487_v47, %v8487_v47  ;;  %v6146_v47 = vld [vmem:[%s9402_s1 + $0x40] sm:$0xff]  }
 0x25c   :  { %v2753_v55 = vadd.f32 %v4969_v15, %v8456_v48  ;;  %v4993_v63 = vpop.f32.mrb[47].mxu1  ;;  %5280 = vmatprep.subr.bf16.mxu1 %v8666_v8  ;;  %v8680_v48 = vld [vmem:[%s9402_s1 + $0x5b0] sm:$0xff]   ;;  %v8686_v15 = vld [vmem:[%s9402_s1 + $0x578] sm:$0xff]   ;;  %9818 = vst [vmem:[#allocation23_spill] sm:$0xff] %v8692_v22  ;;  %v6161_v8 = vld [vmem:[%s9402_s1 + $0x68] sm:$0xff]  }
 0x25d   :  { %9817 = vst [vmem:[#allocation7_spill] sm:$0xff] %v8680_v48  ;;  %v8700_v37 = vld [vmem:[%s9402_s1 + $0x538] sm:$0xff]   ;;  %v8708_v23 = vld [vmem:[%s9403_s0 + $0x12c] sm:$0xff]  ;;  %v8725_v63 = vld [vmem:[%s9402_s1 + $0x600] sm:$0xff]  }
 0x25e   :  { %v8669_v12 = vadd.f32 %v4991_v39, %v2753_v55  ;;  %5259 = vmatpush3.bf16.msra.mxu0 %v8674_v40  ;;  %v4439_v39 = vcombine.low %v8500_v49, %v8500_v49  ;;  %v8713_v55 = vld [vmem:[%s9402_s1 + $0x5b8] sm:$0xff]   ;;  %v4456_v49 = vcombine.high %v8708_v23, %v8708_v23 }
 0x25f   :  { %5281 = vmatpush3.bf16.msra.mxu1 %v8680_v48  ;;  %5260 = vmatprep.subr.bf16.mxu0 %v8686_v15  ;;  %9819 = vst [vmem:[#allocation8_spill] sm:$0xff] %v8713_v55  ;;  %v6160_v48 = vld [vmem:[%s9402_s1 + $0x20] sm:$0xff]  }
 0x260   :  { %5282 = vmatprep.subr.bf16.mxu1 %v8692_v22  ;;  %v6157_v22 = vld [vmem:[%s9402_s1 + $0x18] sm:$0xff]  }
 0x262   :  { %5261 = vmatpush3.bf16.msra.mxu0 %v8700_v37 }
 0x263   :  { %5283 = vmatpush3.bf16.msra.mxu1 %v8713_v55  ;;  %5612 = vmatprep.subr.bf16.mxu0 %v9572_v58  ;;  %v6148_v55 = vld [vmem:[%s9402_s1] sm:$0xff]  }
 0x264   :  { %5299 = vmatprep.subr.bf16.mxu1 %v6146_v47  ;;  %v6152_v47 = vld [vmem:[%s9402_s1 + $0x50] sm:$0xff]  }
 0x265   :  { %3417 = vmatmul.mubr.bf16.vlgmr.msra.gmra.mrb[72].mxu0 %v4437_v31  ;;  %v6149_v31 = vld [vmem:[%s9402_s1 + $0x48] sm:$0xff]  }
 0x266   :  { %5613 = vmatpush3.bf16.msra.mxu0 %v8725_v63  ;;  %3457 = vmatmul.mubr.bf16.vlgmr.msra.gmra.mrb[72].mxu1 %v4439_v39  ;;  %v8740_v39 = vld [vmem:[%s9402_s1 + $0x608] sm:$0xff]  }
 0x267   :  { %5300 = vmatpush3.bf16.msra.mxu1 %v6148_v55  ;;  %5614 = vmatprep.subr.bf16.mxu0 %v9572_v58  ;;  %v6151_v55 = vld [vmem:[%s9402_s1 + $0x8] sm:$0xff]  }
 0x268   :  { %5301 = vmatprep.subr.bf16.mxu1 %v6149_v31  ;;  %5628 = vmatprep.mubr.msk.bf16.mxu0 %vm6292_vm0, %v9572_v58  ;;  %v6154_v31 = vld [vmem:[%s9402_s1 + $0x10] sm:$0xff]  }
 0x269   :  { %3641 = vmatprep.mubr.bf16.mxu1 %v4456_v49  ;;  %v8753_v49 = vld [vmem:[%s9402_s1 + $0x610] sm:$0xff]  }
 0x26a   :  { %5615 = vmatpush3.bf16.msra.mxu0 %v8740_v39 }
 0x26b   :  { %5302 = vmatpush3.bf16.msra.mxu1 %v6151_v55  ;;  %5616 = vmatprep.subr.bf16.mxu0 %v9572_v58  ;;  %v6155_v55 = vld [vmem:[%s9402_s1 + $0x58] sm:$0xff]  }
 0x26c   :  { %5303 = vmatprep.subr.bf16.mxu1 %v6152_v47  ;;  %v8766_v47 = vld [vmem:[%s9402_s1 + $0x618] sm:$0xff]  }
 0x26d   :  { %9820 = vst [vmem:[#allocation9_spill] sm:$0xff] %v8766_v47 }
 0x26e   :  { %5617 = vmatpush3.bf16.msra.mxu0 %v8753_v49 }
 0x26f   :  { %5304 = vmatpush3.bf16.msra.mxu1 %v6154_v31  ;;  %5618 = vmatprep.subr.bf16.mxu0 %v9572_v58  ;;  %v6158_v31 = vld [vmem:[%s9402_s1 + $0x60] sm:$0xff]  }
 0x270   :  { %5305 = vmatprep.subr.bf16.mxu1 %v6155_v55  ;;  %v8779_v55 = vld [vmem:[%s9402_s1 + $0x620] sm:$0xff]  }
 0x271   :  { %9821 = vst [vmem:[#allocation26_spill] sm:$0xff] %v8779_v55 }
 0x272   :  { %5619 = vmatpush3.bf16.msra.mxu0 %v8766_v47 }
 0x273   :  { %5306 = vmatpush3.bf16.msra.mxu1 %v6157_v22  ;;  %5620 = vmatprep.subr.bf16.mxu0 %v9572_v58 }
 0x274   :  { %5307 = vmatprep.subr.bf16.mxu1 %v6158_v31  ;;  %v8792_v31 = vld [vmem:[%s9404_s2] ss:$0 sm:$0xff] }
 0x275   :  { %9822 = vst [vmem:[#allocation10_spill] sm:$0xff] %v8792_v31 }
 0x276   :  { %5621 = vmatpush3.bf16.msra.mxu0 %v8779_v55 }
 0x277   :  { %5308 = vmatpush3.bf16.msra.mxu1 %v6160_v48  ;;  %5622 = vmatprep.subr.bf16.mxu0 %v9572_v58  ;;  %v8797_v48 = vld [vmem:[%s9402_s1 + $0x628] sm:$0xff]  }
 0x278   :  { %v5011_v22 = vpop.f32.mrb[48].mxu0  ;;  %5309 = vmatprep.subr.bf16.mxu1 %v6161_v8  ;;  %9823 = vst [vmem:[#allocation11_spill] sm:$0xff] %v8797_v48  ;;  %v6163_v8 = vld [vmem:[%s9402_s1 + $0x28] sm:$0xff]  }
 0x279   :  { %v5012_v27 = vpop.f32.mrb[49].mxu0  ;;  %v2872_v35 = vpop.f32.mrb[48].mxu1 }
 0x27a   :  { %v5013_v55 = vadd.f32 %v5012_v27, %v5011_v22  ;;  %v5014_v24 = vpop.f32.mrb[50].mxu0  ;;  %5623 = vmatpush3.bf16.msra.mxu0 %v8797_v48  ;;  %v5610_v44 = vpop.f32.mrb[49].mxu1  ;;  %v6164_v48 = vld [vmem:[%s9402_s1 + $0x70] sm:$0xff]  }
 0x27b   :  { %v5015_v47 = vpop.f32.mrb[51].mxu0  ;;  %5310 = vmatpush3.bf16.msra.mxu1 %v6163_v8  ;;  %v2875_v56 = vpop.f32.mrb[50].mxu1  ;;  %5624 = vmatprep.subr.bf16.mxu0 %v9572_v58  ;;  %v2247_v24 = vmul.f32 %v8792_v31, %v8190_v28  ;;  %v8813_v44 = vld [vmem:[%s9405_s3] ss:$0 sm:$0xff]  ;;  %v6166_v28 = vld [vmem:[%s9402_s1 + $0x30] sm:$0xff]  }
 0x27c   :  { %v2833_v27 = vadd.f32 %v5013_v55, %v8669_v12  ;;  %v5611_v22 = vpop.f32.mrb[51].mxu1  ;;  %5311 = vmatprep.subr.bf16.mxu1 %v6164_v48  ;;  %9824 = vst [vmem:[#allocation29_spill] sm:$0xff] %v8813_v44  ;;  %v8818_v56 = vld [vmem:[%s9402_s1 + $0x630] sm:$0xff]   ;;  %v5928_v48 = vld [vmem:[%s9403_s0 + $0x128] ss:$0 sps:$4 sm:$0xff]  }
 0x27d   :  { %9825 = vst [vmem:[#allocation12_spill] sm:$0xff] %v8818_v56  ;;  %v2254_v12 = vadd.f32 %v8813_v44, %v2247_v24  ;;  %v8836_v8 = vld [vmem:[%s9403_s0 + $0x134] sm:$0xff]  ;;  %v4455_v22 = vcombine.low %v8708_v23, %v8708_v23  ;;  %v6171_v23 = vld [vmem:[%s9402_s1 + $0x140] sm:$0xff]  }
 0x27e   :  { %v2873_v47 = vadd.f32 %v2872_v35, %v2833_v27  ;;  %5625 = vmatpush3.bf16.msra.mxu0 %v8818_v56  ;;  %v6167_v35 = vld [vmem:[%s9402_s1 + $0x78] sm:$0xff]  }
 0x27f   :  { %5312 = vmatpush3.bf16.msra.mxu1 %v6166_v28  ;;  %5626 = vmatprep.subr.bf16.mxu0 %v9572_v58  ;;  %v8842_v24 = vld [vmem:[%s9402_s1 + $0x638] sm:$0xff]  }
 0x280   :  { %v2878_v55 = vmul.f32 %v8792_v31, %v2873_v47  ;;  %5313 = vmatprep.subr.bf16.mxu1 %v6167_v35  ;;  %9826 = vst [vmem:[#allocation33_spill] sm:$0xff] %v8842_v24  ;;  %v8850_v47 = vld [vmem:[%s9403_s0 + $0x13c] sm:$0xff]  ;;  %v2255_v35 = vmax.f32 %v2254_v12, 0.0  ;;  %v4458_v31 = vcombine.high %v8836_v8, %v8836_v8 }
 0x281   :  { %v6169_v28 = vld [vmem:[%s9402_s1 + $0x38] sm:$0xff]   ;;  %v6173_v12 = vld [vmem:[%s9402_s1 + $0x100] sm:$0xff]  }
 0x282   :  { %v2879_v27 = vadd.f32 %v8813_v44, %v2878_v55  ;;  %5627 = vmatpush3.bf16.msra.mxu0 %v8842_v24  ;;  %v6170_v55 = vld [vmem:[%s9402_s1 + $0xc0] sm:$0xff]   ;;  %v4460_v24 = vcombine.high %v8850_v47, %v8850_v47 }
 0x283   :  { %5314 = vmatpush3.bf16.msra.mxu1 %v6169_v28  ;;  %5321 = vmatprep.subr.bf16.mxu0 %v6170_v55  ;;  %v6172_v55 = vld [vmem:[%s9402_s1 + $0x80] sm:$0xff]  }
 0x284   :  { %v2880_v44 = vmax.f32 %v2879_v27, 0.0  ;;  %5343 = vmatprep.subr.bf16.mxu1 %v6171_v23  ;;  %v6176_v27 = vld [vmem:[%s9402_s1 + $0x88] sm:$0xff]   ;;  %v6181_v23 = vld [vmem:[%s9402_s1 + $0x110] sm:$0xff]  }
 0x285   :  { %5629 = vmatmul.mubr.bf16.vlgmr.msra.gmra.mrb[76].mxu0 %v5928_v48  ;;  %v6174_v48 = vld [vmem:[%s9402_s1 + $0xc8] sm:$0xff]  }
 0x286   :  { %v8865_v28 = vmax.f32 %v2255_v35, %v2880_v44  ;;  %5322 = vmatpush3.bf16.msra.mxu0 %v6172_v55  ;;  %3642 = vmatmul.mubr.bf16.vlgmr.msra.gmra.mrb[76].mxu1 %v4455_v22  ;;  %v6175_v44 = vld [vmem:[%s9402_s1 + $0x148] sm:$0xff]   ;;  %v6178_v35 = vld [vmem:[%s9402_s1 + $0xd0] sm:$0xff]   ;;  %v6182_v55 = vld [vmem:[%s9402_s1 + $0xd8] sm:$0xff]  }
 0x287   :  { %5344 = vmatpush3.bf16.msra.mxu1 %v6173_v12  ;;  %5323 = vmatprep.subr.bf16.mxu0 %v6174_v48  ;;  %v6177_v22 = vld [vmem:[%s9402_s1 + $0x108] sm:$0xff]   ;;  %v6183_v12 = vld [vmem:[%s9402_s1 + $0x158] sm:$0xff]  }
 0x288   :  { %9827 = vst [vmem:[#allocation13_spill] sm:$0xff] %v8865_v28  ;;  %5345 = vmatprep.subr.bf16.mxu1 %v6175_v44  ;;  %3681 = vmatprep.mubr.bf16.mxu0 %v4458_v31  ;;  %v6179_v31 = vld [vmem:[%s9402_s1 + $0x150] sm:$0xff]   ;;  %v6184_v48 = vld [vmem:[%s9402_s1 + $0x98] sm:$0xff]  }
 0x289   :  { %3721 = vmatprep.mubr.bf16.mxu1 %v4460_v24  ;;  %v6180_v24 = vld [vmem:[%s9402_s1 + $0x90] sm:$0xff]   ;;  %v6185_v44 = vld [vmem:[%s9402_s1 + $0x118] sm:$0xff]  }
 0x28a   :  { %5324 = vmatpush3.bf16.msra.mxu0 %v6176_v27  ;;  %v6186_v27 = vld [vmem:[%s9402_s1 + $0xe0] sm:$0xff]  }
 0x28b   :  { %5346 = vmatpush3.bf16.msra.mxu1 %v6177_v22  ;;  %5325 = vmatprep.subr.bf16.mxu0 %v6178_v35  ;;  %v6187_v22 = vld [vmem:[%s9402_s1 + $0x160] sm:$0xff]  }
 0x28c   :  { %5347 = vmatprep.subr.bf16.mxu1 %v6179_v31  ;;  %v6188_v35 = vld [vmem:[%s9402_s1 + $0xa0] sm:$0xff]  }
 0x28d   :  { %v6189_v31 = vld [vmem:[%s9402_s1 + $0x120] sm:$0xff]  }
 0x28e   :  { %5326 = vmatpush3.bf16.msra.mxu0 %v6180_v24  ;;  %v6190_v24 = vld [vmem:[%s9402_s1 + $0xe8] sm:$0xff]  }
 0x28f   :  { %5348 = vmatpush3.bf16.msra.mxu1 %v6181_v23  ;;  %5327 = vmatprep.subr.bf16.mxu0 %v6182_v55  ;;  %v6191_v55 = vld [vmem:[%s9402_s1 + $0x168] sm:$0xff]  }
 0x290   :  { %5349 = vmatprep.subr.bf16.mxu1 %v6183_v12 }
 0x292   :  { %5328 = vmatpush3.bf16.msra.mxu0 %v6184_v48 }
 0x293   :  { %5350 = vmatpush3.bf16.msra.mxu1 %v6185_v44  ;;  %5329 = vmatprep.subr.bf16.mxu0 %v6186_v27 }
 0x294   :  { %5351 = vmatprep.subr.bf16.mxu1 %v6187_v22 }
 0x296   :  { %5330 = vmatpush3.bf16.msra.mxu0 %v6188_v35  ;;  %v6192_v35 = vld [vmem:[%s9402_s1 + $0xa8] sm:$0xff]  }
 0x297   :  { %5352 = vmatpush3.bf16.msra.mxu1 %v6189_v31  ;;  %5331 = vmatprep.subr.bf16.mxu0 %v6190_v24  ;;  %v6193_v24 = vld [vmem:[%s9402_s1 + $0x128] sm:$0xff]  }
 0x298   :  { %v5042_v23 = vpop.f32.mrb[52].mxu0  ;;  %5353 = vmatprep.subr.bf16.mxu1 %v6191_v55  ;;  %v6194_v55 = vld [vmem:[%s9402_s1 + $0xf0] sm:$0xff]  }
 0x299   :  { %v5064_v12 = vpop.f32.mrb[52].mxu1  ;;  %v5043_v48 = vpop.f32.mrb[53].mxu0 }
 0x29a   :  { %v5044_v44 = vadd.f32 %v5043_v48, %v5042_v23  ;;  %v5065_v27 = vpop.f32.mrb[53].mxu1  ;;  %v5045_v22 = vpop.f32.mrb[54].mxu0  ;;  %5332 = vmatpush3.bf16.msra.mxu0 %v6192_v35  ;;  %v6195_v48 = vld [vmem:[%s9402_s1 + $0x170] sm:$0xff]   ;;  %v8958_v35 = vld [vmem:[%s9403_s0 + $0x144] sm:$0xff] }
 0x29b   :  { %v5066_v31 = vadd.f32 %v5065_v27, %v5064_v12  ;;  %v5046_v28 = vpop.f32.mrb[55].mxu0  ;;  %5354 = vmatpush3.bf16.msra.mxu1 %v6193_v24  ;;  %v5067_v56 = vpop.f32.mrb[54].mxu1  ;;  %5333 = vmatprep.subr.bf16.mxu0 %v6194_v55  ;;  %v6198_v12 = vld [vmem:[%s9402_s1 + $0xf8] sm:$0xff]   ;;  %v4457_v27 = vcombine.low %v8836_v8, %v8836_v8  ;;  %v4459_v24 = vcombine.low %v8850_v47, %v8850_v47  ;;  %v8968_v55 = vld [vmem:[%s9403_s0 + $0x14c] sm:$0xff] }
 0x29c   :  { %v5068_v23 = vpop.f32.mrb[55].mxu1  ;;  %5355 = vmatprep.subr.bf16.mxu1 %v6195_v48  ;;  %v6196_v28 = vld [vmem:[%s9402_s1 + $0xb0] sm:$0xff]   ;;  %v6201_v8 = vld [vmem:[%s9402_s1 + $0x138] sm:$0xff]   ;;  %v6203_v48 = vld [vmem:[%s9402_s1 + $0x240] sm:$0xff]   ;;  %v4462_v47 = vcombine.high %v8958_v35, %v8958_v35 }
 0x29d   :  { %v8939_v22 = vadd.f32 %v5066_v31, %v5044_v44  ;;  %v6197_v56 = vld [vmem:[%s9402_s1 + $0x130] sm:$0xff]   ;;  %v6199_v44 = vld [vmem:[%s9402_s1 + $0x178] sm:$0xff]   ;;  %v6202_v23 = vld [vmem:[%s9402_s1 + $0x1c0] sm:$0xff]  }
 0x29e   :  { %5334 = vmatpush3.bf16.msra.mxu0 %v6196_v28  ;;  %v6200_v31 = vld [vmem:[%s9402_s1 + $0xb8] sm:$0xff]   ;;  %v4464_v28 = vcombine.high %v8968_v55, %v8968_v55 }
 0x29f   :  { %5356 = vmatpush3.bf16.msra.mxu1 %v6197_v56  ;;  %5335 = vmatprep.subr.bf16.mxu0 %v6198_v12  ;;  %v6204_v56 = vld [vmem:[%s9402_s1 + $0x180] sm:$0xff]  }
 0x2a0   :  { %5357 = vmatprep.subr.bf16.mxu1 %v6199_v44  ;;  %v6205_v12 = vld [vmem:[%s9402_s1 + $0x200] sm:$0xff]   ;;  %v6206_v44 = vld [vmem:[%s9402_s1 + $0x1c8] sm:$0xff]  }
 0x2a2   :  { %5336 = vmatpush3.bf16.msra.mxu0 %v6200_v31  ;;  %v6208_v31 = vld [vmem:[%s9402_s1 + $0x188] sm:$0xff]  }
 0x2a3   :  { %5358 = vmatpush3.bf16.msra.mxu1 %v6201_v8  ;;  %5365 = vmatprep.subr.bf16.mxu0 %v6202_v23  ;;  %v6210_v8 = vld [vmem:[%s9402_s1 + $0x1d0] sm:$0xff]  }
 0x2a4   :  { %5387 = vmatprep.subr.bf16.mxu1 %v6203_v48  ;;  %v6211_v23 = vld [vmem:[%s9402_s1 + $0x250] sm:$0xff]  }
 0x2a5   :  { %3682 = vmatmul.mubr.bf16.vlgmr.msra.gmra.mrb[80].mxu0 %v4457_v27  ;;  %v6207_v27 = vld [vmem:[%s9402_s1 + $0x248] sm:$0xff]   ;;  %v6212_v48 = vld [vmem:[%s9402_s1 + $0x190] sm:$0xff]  }
 0x2a6   :  { %5366 = vmatpush3.bf16.msra.mxu0 %v6204_v56  ;;  %3722 = vmatmul.mubr.bf16.vlgmr.msra.gmra.mrb[80].mxu1 %v4459_v24  ;;  %v6209_v24 = vld [vmem:[%s9402_s1 + $0x208] sm:$0xff]   ;;  %v6215_v56 = vld [vmem:[%s9402_s1 + $0x258] sm:$0xff]  }
 0x2a7   :  { %5388 = vmatpush3.bf16.msra.mxu1 %v6205_v12  ;;  %5367 = vmatprep.subr.bf16.mxu0 %v6206_v44  ;;  %v6216_v12 = vld [vmem:[%s9402_s1 + $0x198] sm:$0xff]  }
 0x2a8   :  { %5389 = vmatprep.subr.bf16.mxu1 %v6207_v27  ;;  %3761 = vmatprep.mubr.bf16.mxu0 %v4462_v47  ;;  %v6213_v47 = vld [vmem:[%s9402_s1 + $0x210] sm:$0xff]   ;;  %v6217_v44 = vld [vmem:[%s9402_s1 + $0x218] sm:$0xff]   ;;  %v6218_v27 = vld [vmem:[%s9402_s1 + $0x1e0] sm:$0xff]  }
 0x2a9   :  { %3801 = vmatprep.mubr.bf16.mxu1 %v4464_v28  ;;  %v6214_v28 = vld [vmem:[%s9402_s1 + $0x1d8] sm:$0xff]  }
 0x2aa   :  { %5368 = vmatpush3.bf16.msra.mxu0 %v6208_v31  ;;  %v6219_v31 = vld [vmem:[%s9402_s1 + $0x260] sm:$0xff]  }
 0x2ab   :  { %5390 = vmatpush3.bf16.msra.mxu1 %v6209_v24  ;;  %5369 = vmatprep.subr.bf16.mxu0 %v6210_v8  ;;  %v6220_v24 = vld [vmem:[%s9402_s1 + $0x1a0] sm:$0xff]  }
 0x2ac   :  { %5391 = vmatprep.subr.bf16.mxu1 %v6211_v23  ;;  %v6221_v8 = vld [vmem:[%s9402_s1 + $0x220] sm:$0xff]   ;;  %v6222_v23 = vld [vmem:[%s9402_s1 + $0x1e8] sm:$0xff]  }
 0x2ae   :  { %5370 = vmatpush3.bf16.msra.mxu0 %v6212_v48 }
 0x2af   :  { %5392 = vmatpush3.bf16.msra.mxu1 %v6213_v47  ;;  %5371 = vmatprep.subr.bf16.mxu0 %v6214_v28  ;;  %v6223_v47 = vld [vmem:[%s9402_s1 + $0x268] sm:$0xff]  }
 0x2b0   :  { %5393 = vmatprep.subr.bf16.mxu1 %v6215_v56 }
 0x2b2   :  { %5372 = vmatpush3.bf16.msra.mxu0 %v6216_v12 }
 0x2b3   :  { %5394 = vmatpush3.bf16.msra.mxu1 %v6217_v44  ;;  %5373 = vmatprep.subr.bf16.mxu0 %v6218_v27  ;;  %v6224_v27 = vld [vmem:[%s9402_s1 + $0x1a8] sm:$0xff]  }
 0x2b4   :  { %5395 = vmatprep.subr.bf16.mxu1 %v6219_v31 }
 0x2b6   :  { %5374 = vmatpush3.bf16.msra.mxu0 %v6220_v24 }
 0x2b7   :  { %5396 = vmatpush3.bf16.msra.mxu1 %v6221_v8  ;;  %5375 = vmatprep.subr.bf16.mxu0 %v6222_v23  ;;  %v6225_v23 = vld [vmem:[%s9402_s1 + $0x228] sm:$0xff]  }
 0x2b8   :  { %v5086_v48 = vpop.f32.mrb[56].mxu0  ;;  %5397 = vmatprep.subr.bf16.mxu1 %v6223_v47  ;;  %v6226_v47 = vld [vmem:[%s9402_s1 + $0x1f0] sm:$0xff]  }
 0x2b9   :  { %v5087_v28 = vpop.f32.mrb[57].mxu0  ;;  %v5108_v56 = vpop.f32.mrb[56].mxu1 }
 0x2ba   :  { %v5088_v12 = vadd.f32 %v5087_v28, %v5086_v48  ;;  %v5089_v44 = vpop.f32.mrb[58].mxu0  ;;  %5376 = vmatpush3.bf16.msra.mxu0 %v6224_v27  ;;  %v5109_v31 = vpop.f32.mrb[57].mxu1  ;;  %v6228_v27 = vld [vmem:[%s9402_s1 + $0x1b0] sm:$0xff]  }
 0x2bb   :  { %v5090_v24 = vpop.f32.mrb[59].mxu0  ;;  %v5110_v8 = vadd.f32 %v5109_v31, %v5108_v56  ;;  %5398 = vmatpush3.bf16.msra.mxu1 %v6225_v23  ;;  %v5111_v59 = vpop.f32.mrb[58].mxu1  ;;  %5377 = vmatprep.subr.bf16.mxu0 %v6226_v47  ;;  %v6227_v44 = vld [vmem:[%s9402_s1 + $0x270] sm:$0xff]   ;;  %v4461_v31 = vcombine.low %v8958_v35, %v8958_v35  ;;  %v4463_v23 = vcombine.low %v8968_v55, %v8968_v55  ;;  %v9085_v47 = vld [vmem:[%s9403_s0 + $0x15c] sm:$0xff] }
 0x2bc   :  { %v3099_v48 = vadd.f32 %v5088_v12, %v8939_v22  ;;  %v5112_v28 = vpop.f32.mrb[59].mxu1  ;;  %5399 = vmatprep.subr.bf16.mxu1 %v6227_v44  ;;  %v6229_v59 = vld [vmem:[%s9402_s1 + $0x230] sm:$0xff]   ;;  %v6230_v22 = vld [vmem:[%s9402_s1 + $0x1f8] sm:$0xff]   ;;  %v4468_v44 = vcombine.high %v9085_v47, %v9085_v47 }
 0x2bd   :  { %v6231_v12 = vld [vmem:[%s9402_s1 + $0x278] sm:$0xff]   ;;  %v6235_v28 = vld [vmem:[%s9402_s1 + $0x340] sm:$0xff]  }
 0x2be   :  { %v9056_v56 = vadd.f32 %v5110_v8, %v3099_v48  ;;  %5378 = vmatpush3.bf16.msra.mxu0 %v6228_v27  ;;  %v9075_v24 = vld [vmem:[%s9403_s0 + $0x154] sm:$0xff]  ;;  %v6234_v48 = vld [vmem:[%s9402_s1 + $0x2c0] sm:$0xff]  }
 0x2bf   :  { %5400 = vmatpush3.bf16.msra.mxu1 %v6229_v59  ;;  %5379 = vmatprep.subr.bf16.mxu0 %v6230_v22  ;;  %v6232_v8 = vld [vmem:[%s9402_s1 + $0x1b8] sm:$0xff]   ;;  %v4466_v55 = vcombine.high %v9075_v24, %v9075_v24  ;;  %v6236_v27 = vld [vmem:[%s9402_s1 + $0x280] sm:$0xff]   ;;  %v6238_v22 = vld [vmem:[%s9402_s1 + $0x2c8] sm:$0xff]  }
 0x2c0   :  { %5401 = vmatprep.subr.bf16.mxu1 %v6231_v12  ;;  %v6233_v35 = vld [vmem:[%s9402_s1 + $0x238] sm:$0xff]   ;;  %v6237_v59 = vld [vmem:[%s9402_s1 + $0x300] sm:$0xff]   ;;  %v6239_v12 = vld [vmem:[%s9402_s1 + $0x348] sm:$0xff]  }
 0x2c2   :  { %5380 = vmatpush3.bf16.msra.mxu0 %v6232_v8  ;;  %v6241_v8 = vld [vmem:[%s9402_s1 + $0x308] sm:$0xff]  }
 0x2c3   :  { %5402 = vmatpush3.bf16.msra.mxu1 %v6233_v35  ;;  %5409 = vmatprep.subr.bf16.mxu0 %v6234_v48  ;;  %v6243_v35 = vld [vmem:[%s9402_s1 + $0x350] sm:$0xff]  }
 0x2c4   :  { %5431 = vmatprep.subr.bf16.mxu1 %v6235_v28  ;;  %v6244_v48 = vld [vmem:[%s9402_s1 + $0x290] sm:$0xff]  }
 0x2c5   :  { %3762 = vmatmul.mubr.bf16.vlgmr.msra.gmra.mrb[84].mxu0 %v4461_v31  ;;  %v6240_v31 = vld [vmem:[%s9402_s1 + $0x288] sm:$0xff]   ;;  %v6245_v28 = vld [vmem:[%s9402_s1 + $0x310] sm:$0xff]  }
 0x2c6   :  { %5410 = vmatpush3.bf16.msra.mxu0 %v6236_v27  ;;  %3802 = vmatmul.mubr.bf16.vlgmr.msra.gmra.mrb[84].mxu1 %v4463_v23  ;;  %v6242_v23 = vld [vmem:[%s9402_s1 + $0x2d0] sm:$0xff]   ;;  %v6248_v27 = vld [vmem:[%s9402_s1 + $0x298] sm:$0xff]  }
 0x2c7   :  { %5432 = vmatpush3.bf16.msra.mxu1 %v6237_v59  ;;  %5411 = vmatprep.subr.bf16.mxu0 %v6238_v22  ;;  %v6249_v59 = vld [vmem:[%s9402_s1 + $0x318] sm:$0xff]   ;;  %v6250_v22 = vld [vmem:[%s9402_s1 + $0x2e0] sm:$0xff]  }
 0x2c8   :  { %5433 = vmatprep.subr.bf16.mxu1 %v6239_v12  ;;  %3841 = vmatprep.mubr.bf16.mxu0 %v4466_v55  ;;  %v6246_v55 = vld [vmem:[%s9402_s1 + $0x2d8] sm:$0xff]   ;;  %v6251_v12 = vld [vmem:[%s9402_s1 + $0x360] sm:$0xff]  }
 0x2c9   :  { %3881 = vmatprep.mubr.bf16.mxu1 %v4468_v44  ;;  %v6247_v44 = vld [vmem:[%s9402_s1 + $0x358] sm:$0xff]  }
 0x2ca   :  { %5412 = vmatpush3.bf16.msra.mxu0 %v6240_v31  ;;  %v6252_v31 = vld [vmem:[%s9402_s1 + $0x2a0] sm:$0xff]  }
 0x2cb   :  { %5434 = vmatpush3.bf16.msra.mxu1 %v6241_v8  ;;  %5413 = vmatprep.subr.bf16.mxu0 %v6242_v23  ;;  %v6253_v8 = vld [vmem:[%s9402_s1 + $0x320] sm:$0xff]   ;;  %v6254_v23 = vld [vmem:[%s9402_s1 + $0x2e8] sm:$0xff]  }
 0x2cc   :  { %5435 = vmatprep.subr.bf16.mxu1 %v6243_v35 }
 0x2ce   :  { %5414 = vmatpush3.bf16.msra.mxu0 %v6244_v48  ;;  %v6255_v48 = vld [vmem:[%s9402_s1 + $0x368] sm:$0xff]  }
 0x2cf   :  { %5436 = vmatpush3.bf16.msra.mxu1 %v6245_v28  ;;  %5415 = vmatprep.subr.bf16.mxu0 %v6246_v55 }
 0x2d0   :  { %5437 = vmatprep.subr.bf16.mxu1 %v6247_v44 }
 0x2d2   :  { %5416 = vmatpush3.bf16.msra.mxu0 %v6248_v27 }
 0x2d3   :  { %5438 = vmatpush3.bf16.msra.mxu1 %v6249_v59  ;;  %5417 = vmatprep.subr.bf16.mxu0 %v6250_v22  ;;  %v6256_v59 = vld [vmem:[%s9402_s1 + $0x2a8] sm:$0xff]  }
 0x2d4   :  { %5439 = vmatprep.subr.bf16.mxu1 %v6251_v12 }
 0x2d6   :  { %5418 = vmatpush3.bf16.msra.mxu0 %v6252_v31 }
 0x2d7   :  { %5440 = vmatpush3.bf16.msra.mxu1 %v6253_v8  ;;  %5419 = vmatprep.subr.bf16.mxu0 %v6254_v23  ;;  %v6257_v8 = vld [vmem:[%s9402_s1 + $0x328] sm:$0xff]  }
 0x2d8   :  { %v5130_v35 = vpop.f32.mrb[60].mxu0  ;;  %5441 = vmatprep.subr.bf16.mxu1 %v6255_v48  ;;  %v6258_v48 = vld [vmem:[%s9402_s1 + $0x2f0] sm:$0xff]  }
 0x2d9   :  { %v5131_v28 = vpop.f32.mrb[61].mxu0  ;;  %v5152_v55 = vpop.f32.mrb[60].mxu1 }
 0x2da   :  { %v5132_v44 = vadd.f32 %v5131_v28, %v5130_v35  ;;  %v5133_v27 = vpop.f32.mrb[62].mxu0  ;;  %5420 = vmatpush3.bf16.msra.mxu0 %v6256_v59  ;;  %v5153_v22 = vpop.f32.mrb[61].mxu1  ;;  %v6260_v59 = vld [vmem:[%s9402_s1 + $0x2b0] sm:$0xff]  }
 0x2db   :  { %v5134_v12 = vpop.f32.mrb[63].mxu0  ;;  %v5154_v31 = vadd.f32 %v5153_v22, %v5152_v55  ;;  %5442 = vmatpush3.bf16.msra.mxu1 %v6257_v8  ;;  %v5155_v23 = vpop.f32.mrb[62].mxu1  ;;  %5421 = vmatprep.subr.bf16.mxu0 %v6258_v48  ;;  %v6259_v27 = vld [vmem:[%s9402_s1 + $0x370] sm:$0xff]   ;;  %v6264_v8 = vld [vmem:[%s9402_s1 + $0x2b8] sm:$0xff]  }
 0x2dc   :  { %v3179_v35 = vadd.f32 %v5132_v44, %v9056_v56  ;;  %v5156_v28 = vpop.f32.mrb[63].mxu1  ;;  %5443 = vmatprep.subr.bf16.mxu1 %v6259_v27  ;;  %v6261_v22 = vld [vmem:[%s9402_s1 + $0x330] sm:$0xff]   ;;  %v6262_v56 = vld [vmem:[%s9402_s1 + $0x2f8] sm:$0xff]   ;;  %v4465_v12 = vcombine.low %v9075_v24, %v9075_v24  ;;  %v4467_v23 = vcombine.low %v9085_v47, %v9085_v47  ;;  %v6267_v27 = vld [vmem:[%s9402_s1 + $0x380] sm:$0xff]  }
 0x2dd   :  { %v6263_v44 = vld [vmem:[%s9402_s1 + $0x378] sm:$0xff]   ;;  %v9202_v48 = vld [vmem:[%s9403_s0 + $0x16c] sm:$0xff] }
 0x2de   :  { %v9173_v55 = vadd.f32 %v5154_v31, %v3179_v35  ;;  %5422 = vmatpush3.bf16.msra.mxu0 %v6260_v59  ;;  %v9192_v31 = vld [vmem:[%s9403_s0 + $0x164] sm:$0xff]  ;;  %v6265_v24 = vld [vmem:[%s9402_s1 + $0x338] sm:$0xff]   ;;  %v4472_v28 = vcombine.high %v9202_v48, %v9202_v48 }
 0x2df   :  { %5444 = vmatpush3.bf16.msra.mxu1 %v6261_v22  ;;  %5423 = vmatprep.subr.bf16.mxu0 %v6262_v56  ;;  %v6266_v35 = vld [vmem:[%s9402_s1 + $0x3c0] sm:$0xff]   ;;  %v4470_v47 = vcombine.high %v9192_v31, %v9192_v31  ;;  %v6268_v59 = vld [vmem:[%s9402_s1 + $0x3c8] sm:$0xff]   ;;  %v6272_v22 = vld [vmem:[%s9402_s1 + $0x3d8] sm:$0xff]  }
 0x2e0   :  { %5445 = vmatprep.subr.bf16.mxu1 %v6263_v44 }
 0x2e2   :  { %5424 = vmatpush3.bf16.msra.mxu0 %v6264_v8 }
 0x2e3   :  { %5446 = vmatpush3.bf16.msra.mxu1 %v6265_v24  ;;  %5453 = vmatprep.subr.bf16.mxu0 %v6266_v35 }
 0x2e4   :  { %5475 = vmatprep.subr.bf16.mxu1 %v8343_v46  ;;  %v6269_v46 = vld [vmem:[%s9402_s1 + $0x388] sm:$0xff]  }
 0x2e5   :  { %3842 = vmatmul.mubr.bf16.vlgmr.msra.gmra.mrb[88].mxu0 %v4465_v12 }
 0x2e6   :  { %5454 = vmatpush3.bf16.msra.mxu0 %v6267_v27  ;;  %3882 = vmatmul.mubr.bf16.vlgmr.msra.gmra.mrb[88].mxu1 %v4467_v23 }
 0x2e7   :  { %5476 = vmatpush3.bf16.msra.mxu1 %v8354_v50  ;;  %5455 = vmatprep.subr.bf16.mxu0 %v6268_v59  ;;  %v6270_v50 = vld [vmem:[%s9402_s1 + $0x3d0] sm:$0xff]  }
 0x2e8   :  { %5477 = vmatprep.subr.bf16.mxu1 %v8361_v60  ;;  %3921 = vmatprep.mubr.bf16.mxu0 %v4470_v47  ;;  %v6271_v60 = vld [vmem:[%s9402_s1 + $0x390] sm:$0xff]  }
 0x2e9   :  { %3961 = vmatprep.mubr.bf16.mxu1 %v4472_v28  ;;  %v6278_v47 = vld [vmem:[%s9402_s1 + $0x3f0] sm:$0xff]  }
 0x2ea   :  { %5456 = vmatpush3.bf16.msra.mxu0 %v6269_v46  ;;  %v6279_v59 = vld [vmem:[%s9402_s1 + $0x3b0] sm:$0xff]   ;;  %v6281_v46 = vld [vmem:[%s9402_s1 + $0x3b8] sm:$0xff]  }
 0x2eb   :  { %5478 = vmatpush3.bf16.msra.mxu1 %v8368_v32  ;;  %5457 = vmatprep.subr.bf16.mxu0 %v6270_v50  ;;  %v6273_v32 = vld [vmem:[%s9402_s1 + $0x398] sm:$0xff]  }
 0x2ec   :  { %5479 = vmatprep.subr.bf16.mxu1 %v8375_v54  ;;  %v6274_v54 = vld [vmem:[%s9402_s1 + $0x3e0] sm:$0xff]  }
 0x2ee   :  { %5458 = vmatpush3.bf16.msra.mxu0 %v6271_v60  ;;  %v6283_v60 = vld [vmem:[%s9402_s1 + $0x480] sm:$0xff]  }
 0x2ef   :  { %5480 = vmatpush3.bf16.msra.mxu1 %v8382_v62  ;;  %5459 = vmatprep.subr.bf16.mxu0 %v6272_v22  ;;  %v6275_v62 = vld [vmem:[%s9402_s1 + $0x3a0] sm:$0xff]   ;;  %v6288_v22 = vld [vmem:[%s9402_s1 + $0x4d8] sm:$0xff]  }
 0x2f0   :  { %5481 = vmatprep.subr.bf16.mxu1 %v8389_v34  ;;  %v6276_v34 = vld [vmem:[%s9402_s1 + $0x3e8] sm:$0xff]  }
 0x2f2   :  { %5460 = vmatpush3.bf16.msra.mxu0 %v6273_v32 }
 0x2f3   :  { %5482 = vmatpush3.bf16.msra.mxu1 %v8396_v0  ;;  %5461 = vmatprep.subr.bf16.mxu0 %v6274_v54 }
 0x2f4   :  { %5483 = vmatprep.subr.bf16.mxu1 %v8403_v2  ;;  %v6277_v2 = vld [vmem:[%s9402_s1 + $0x3a8] sm:$0xff]  }
 0x2f6   :  { %5462 = vmatpush3.bf16.msra.mxu0 %v6275_v62 }
 0x2f7   :  { %5484 = vmatpush3.bf16.msra.mxu1 %v8410_v4  ;;  %5463 = vmatprep.subr.bf16.mxu0 %v6276_v34 }
 0x2f8   :  { %v5174_v0 = vpop.f32.mrb[64].mxu0  ;;  %5485 = vmatprep.subr.bf16.mxu1 %v8422_v13 }
 0x2f9   :  { %v5175_v56 = vpop.f32.mrb[65].mxu0  ;;  %v5196_v44 = vpop.f32.mrb[64].mxu1 }
 0x2fa   :  { %v5176_v12 = vadd.f32 %v5175_v56, %v5174_v0  ;;  %v5177_v8 = vpop.f32.mrb[66].mxu0  ;;  %5464 = vmatpush3.bf16.msra.mxu0 %v6277_v2  ;;  %v5197_v23 = vpop.f32.mrb[65].mxu1  ;;  %v9836_v56 = vld [vmem:[#allocation11_spill] sm:$0xff] }
 0x2fb   :  { %v5178_v24 = vpop.f32.mrb[67].mxu0  ;;  %v5198_v4 = vadd.f32 %v5197_v23, %v5196_v44  ;;  %5486 = vmatpush3.bf16.msra.mxu1 %v8434_v1  ;;  %v5199_v35 = vpop.f32.mrb[66].mxu1  ;;  %5465 = vmatprep.subr.bf16.mxu0 %v6278_v47  ;;  %v6280_v1 = vld [vmem:[%s9402_s1 + $0x3f8] sm:$0xff]   ;;  %v9838_v23 = vld [vmem:[#allocation7_spill] sm:$0xff] }
 0x2fc   :  { %v3259_v13 = vadd.f32 %v5176_v12, %v9173_v55  ;;  %v5200_v28 = vpop.f32.mrb[67].mxu1  ;;  %5487 = vmatprep.subr.bf16.mxu1 %v8446_v42  ;;  %v4469_v55 = vcombine.low %v9192_v31, %v9192_v31  ;;  %v9279_v42 = vld [vmem:[%s9403_s0 + $0x174] sm:$0xff]  ;;  %v6282_v31 = vld [vmem:[%s9402_s1 + $0x4c0] sm:$0xff]   ;;  %v9840_v35 = vld [vmem:[#allocation23_spill] sm:$0xff] }
 0x2fd   :  { %v4474_v50 = vcombine.high %v9279_v42, %v9279_v42  ;;  %v9837_v12 = vld [vmem:[#allocation6_spill] sm:$0xff]  ;;  %v5953_v28 = vld [vmem:[%s9403_s0 + $0x18c] ss:$0 sps:$4 sm:$0xff]  }
 0x2fe   :  { %v9264_v27 = vadd.f32 %v5198_v4, %v3259_v13  ;;  %5466 = vmatpush3.bf16.msra.mxu0 %v6279_v59  ;;  %v9839_v4 = vld [vmem:[#allocation12_spill] sm:$0xff] }
 0x2ff   :  { %5488 = vmatpush3.bf16.msra.mxu1 %v8461_v43  ;;  %5467 = vmatprep.subr.bf16.mxu0 %v6280_v1  ;;  %v4471_v43 = vcombine.low %v9202_v48, %v9202_v48  ;;  %v9841_v13 = vld [vmem:[#allocation8_spill] sm:$0xff] }
 0x300   :  { %5489 = vmatprep.subr.bf16.mxu1 %v8473_v41  ;;  %v9289_v41 = vld [vmem:[%s9403_s0 + $0x17c] sm:$0xff] }
 0x301   :  { %v4476_v48 = vcombine.high %v9289_v41, %v9289_v41 }
 0x302   :  { %5468 = vmatpush3.bf16.msra.mxu0 %v6281_v46 }
 0x303   :  { %5490 = vmatpush3.bf16.msra.mxu1 %v8492_v10  ;;  %5497 = vmatprep.subr.bf16.mxu0 %v6282_v31  ;;  %v6284_v10 = vld [vmem:[%s9402_s1 + $0x4c8] sm:$0xff]  }
 0x304   :  { %5519 = vmatprep.subr.bf16.mxu1 %v8511_v18  ;;  %v6285_v18 = vld [vmem:[%s9402_s1 + $0x488] sm:$0xff]  }
 0x305   :  { %3922 = vmatmul.mubr.bf16.vlgmr.msra.gmra.mrb[92].mxu0 %v4469_v55 }
 0x306   :  { %5498 = vmatpush3.bf16.msra.mxu0 %v6283_v60  ;;  %3962 = vmatmul.mubr.bf16.vlgmr.msra.gmra.mrb[92].mxu1 %v4471_v43 }
 0x307   :  { %5520 = vmatpush3.bf16.msra.mxu1 %v8527_v3  ;;  %5499 = vmatprep.subr.bf16.mxu0 %v6284_v10  ;;  %v6286_v3 = vld [vmem:[%s9402_s1 + $0x4d0] sm:$0xff]  }
 0x308   :  { %5521 = vmatprep.subr.bf16.mxu1 %v8539_v7  ;;  %4001 = vmatprep.mubr.bf16.mxu0 %v4474_v50  ;;  %v6287_v7 = vld [vmem:[%s9402_s1 + $0x490] sm:$0xff]  }
 0x309   :  { %4041 = vmatprep.mubr.bf16.mxu1 %v4476_v48 }
 0x30a   :  { %5500 = vmatpush3.bf16.msra.mxu0 %v6285_v18 }
 0x30b   :  { %5522 = vmatpush3.bf16.msra.mxu1 %v8551_v19  ;;  %5501 = vmatprep.subr.bf16.mxu0 %v6286_v3  ;;  %v6289_v19 = vld [vmem:[%s9402_s1 + $0x498] sm:$0xff]  }
 0x30c   :  { %5523 = vmatprep.subr.bf16.mxu1 %v8563_v25  ;;  %v6290_v25 = vld [vmem:[%s9402_s1 + $0x4e0] sm:$0xff]  }
 0x30e   :  { %5502 = vmatpush3.bf16.msra.mxu0 %v6287_v7 }
 0x30f   :  { %5524 = vmatpush3.bf16.msra.mxu1 %v8575_v29  ;;  %5503 = vmatprep.subr.bf16.mxu0 %v6288_v22 }
 0x310   :  { %5525 = vmatprep.subr.bf16.mxu1 %v8587_v38 }
 0x312   :  { %5504 = vmatpush3.bf16.msra.mxu0 %v6289_v19 }
 0x313   :  { %5526 = vmatpush3.bf16.msra.mxu1 %v8599_v36  ;;  %5505 = vmatprep.subr.bf16.mxu0 %v6290_v25 }
 0x314   :  { %5527 = vmatprep.subr.bf16.mxu1 %v8611_v57 }
 0x316   :  { %5506 = vmatpush3.bf16.msra.mxu0 %v8416_v6 }
 0x317   :  { %5528 = vmatpush3.bf16.msra.mxu1 %v8623_v30  ;;  %5507 = vmatprep.subr.bf16.mxu0 %v8428_v53 }
 0x318   :  { %v5218_v29 = vpop.f32.mrb[68].mxu0  ;;  %5529 = vmatprep.subr.bf16.mxu1 %v8635_v52  ;;  %v4475_v52 = vcombine.low %v9289_v41, %v9289_v41 }
 0x319   :  { %v5219_v38 = vpop.f32.mrb[69].mxu0  ;;  %v5240_v32 = vpop.f32.mrb[68].mxu1 }
 0x31a   :  { %v5220_v54 = vadd.f32 %v5219_v38, %v5218_v29  ;;  %v5221_v36 = vpop.f32.mrb[70].mxu0  ;;  %5508 = vmatpush3.bf16.msra.mxu0 %v8440_v21  ;;  %v5241_v62 = vpop.f32.mrb[69].mxu1  ;;  %v4473_v21 = vcombine.low %v9279_v42, %v9279_v42 }
 0x31b   :  { %v5222_v34 = vpop.f32.mrb[71].mxu0  ;;  %v5242_v0 = vadd.f32 %v5241_v62, %v5240_v32  ;;  %5530 = vmatpush3.bf16.msra.mxu1 %v8647_v17  ;;  %v5243_v57 = vpop.f32.mrb[70].mxu1  ;;  %5509 = vmatprep.subr.bf16.mxu0 %v8453_v61  ;;  %v4453_v61 = vld [vmem:[%s9403_s0 + $0x184] sm:$0xff] }
 0x31c   :  { %v3339_v6 = vadd.f32 %v5220_v54, %v9264_v27  ;;  %v5244_v53 = vpop.f32.mrb[71].mxu1  ;;  %5531 = vmatprep.subr.bf16.mxu1 %v8659_v11  ;;  %v4477_v47 = vcombine.low %v4453_v61, %v4453_v61  ;;  %v9842_v27 = vld [vmem:[#allocation33_spill] sm:$0xff] }
 0x31e   :  { %v3379_v30 = vadd.f32 %v5242_v0, %v3339_v6  ;;  %5510 = vmatpush3.bf16.msra.mxu0 %v8467_v45  ;;  %v4478_v45 = vcombine.high %v4453_v61, %v4453_v61 }
 0x31f   :  { %5532 = vmatpush3.bf16.msra.mxu1 %v8674_v40  ;;  %5511 = vmatprep.subr.bf16.mxu0 %v8479_v16  ;;  %v9828_v16 = vld [vmem:[#allocation2_spill] sm:$0xff] }
 0x320   :  { %5533 = vmatprep.subr.bf16.mxu1 %v8686_v15 }
 0x322   :  { %5512 = vmatpush3.bf16.msra.mxu0 %v8505_v26  ;;  %v9829_v26 = vld [vmem:[#allocation3_spill] sm:$0xff] }
 0x323   :  { %5534 = vmatpush3.bf16.msra.mxu1 %v8700_v37  ;;  %5541 = vmatprep.subr.bf16.mxu0 %v8517_v51  ;;  %v9830_v51 = vld [vmem:[#allocation9_spill] sm:$0xff]  ;;  %v9835_v37 = vld [vmem:[#allocation20_spill] sm:$0xff] }
 0x324   :  { %5632 = vmatprep.subr.bf16.mxu1 %v9572_v58 }
 0x325   :  { %4002 = vmatmul.mubr.bf16.vlgmr.msra.gmra.mrb[96].mxu0 %v4473_v21 }
 0x326   :  { %5542 = vmatpush3.bf16.msra.mxu0 %v8533_v5  ;;  %4042 = vmatmul.mubr.bf16.vlgmr.msra.gmra.mrb[96].mxu1 %v4475_v52  ;;  %v9831_v5 = vld [vmem:[#allocation17_spill] sm:$0xff] }
 0x327   :  { %5633 = vmatpush3.bf16.msra.mxu1 %v8725_v63  ;;  %5543 = vmatprep.subr.bf16.mxu0 %v8545_v9  ;;  %v9832_v9 = vld [vmem:[#allocation4_spill] sm:$0xff] }
 0x328   :  { %5634 = vmatprep.subr.bf16.mxu1 %v9572_v58  ;;  %4081 = vmatprep.mubr.bf16.mxu0 %v4478_v45 }
 0x329   :  { %5648 = vmatprep.mubr.msk.bf16.mxu1 %vm6292_vm0, %v9572_v58 }
 0x32a   :  { %5544 = vmatpush3.bf16.msra.mxu0 %v8557_v20  ;;  %v9833_v20 = vld [vmem:[#allocation26_spill] sm:$0xff] }
 0x32b   :  { %5635 = vmatpush3.bf16.msra.mxu1 %v8740_v39  ;;  %5545 = vmatprep.subr.bf16.mxu0 %v8569_v14  ;;  %v9834_v14 = vld [vmem:[#allocation5_spill] sm:$0xff] }
 0x32c   :  { %5636 = vmatprep.subr.bf16.mxu1 %v9572_v58 }
 0x32e   :  { %5546 = vmatpush3.bf16.msra.mxu0 %v8581_v33 }
 0x32f   :  { %5637 = vmatpush3.bf16.msra.mxu1 %v8753_v49  ;;  %5547 = vmatprep.subr.bf16.mxu0 %v9828_v16 }
 0x330   :  { %5638 = vmatprep.subr.bf16.mxu1 %v9572_v58 }
 0x332   :  { %5548 = vmatpush3.bf16.msra.mxu0 %v9829_v26 }
 0x333   :  { %5639 = vmatpush3.bf16.msra.mxu1 %v9830_v51  ;;  %5549 = vmatprep.subr.bf16.mxu0 %v9831_v5 }
 0x334   :  { %5640 = vmatprep.subr.bf16.mxu1 %v9572_v58 }
 0x336   :  { %5550 = vmatpush3.bf16.msra.mxu0 %v9832_v9 }
 0x337   :  { %5641 = vmatpush3.bf16.msra.mxu1 %v9833_v20  ;;  %5551 = vmatprep.subr.bf16.mxu0 %v9834_v14 }
 0x338   :  { %v5262_v33 = vpop.f32.mrb[72].mxu0  ;;  %5642 = vmatprep.subr.bf16.mxu1 %v9572_v58 }
 0x339   :  { %v5263_v17 = vpop.f32.mrb[73].mxu0  ;;  %v5284_v11 = vpop.f32.mrb[72].mxu1 }
 0x33a   :  { %v5264_v40 = vadd.f32 %v5263_v17, %v5262_v33  ;;  %v5265_v15 = vpop.f32.mrb[74].mxu0  ;;  %5552 = vmatpush3.bf16.msra.mxu0 %v9835_v37  ;;  %v5285_v63 = vpop.f32.mrb[73].mxu1 }
 0x33b   :  { %v5266_v39 = vpop.f32.mrb[75].mxu0  ;;  %v5286_v49 = vadd.f32 %v5285_v63, %v5284_v11  ;;  %5643 = vmatpush3.bf16.msra.mxu1 %v9836_v56  ;;  %v5287_v44 = vpop.f32.mrb[74].mxu1  ;;  %5553 = vmatprep.subr.bf16.mxu0 %v9837_v12 }
 0x33c   :  { %v3419_v8 = vadd.f32 %v5264_v40, %v3379_v30  ;;  %v5288_v2 = vpop.f32.mrb[75].mxu1  ;;  %5644 = vmatprep.subr.bf16.mxu1 %v9572_v58 }
 0x33e   :  { %5554 = vmatpush3.bf16.msra.mxu0 %v9838_v23  ;;  %v3459_v24 = vadd.f32 %v5286_v49, %v3419_v8 }
 0x33f   :  { %5645 = vmatpush3.bf16.msra.mxu1 %v9839_v4  ;;  %5555 = vmatprep.subr.bf16.mxu0 %v9840_v35 }
 0x340   :  { %5646 = vmatprep.subr.bf16.mxu1 %v9572_v58 }
 0x342   :  { %5556 = vmatpush3.bf16.msra.mxu0 %v9841_v13 }
 0x343   :  { %5647 = vmatpush3.bf16.msra.mxu1 %v9842_v27 }
 0x345   :  { %4082 = vmatmul.mubr.bf16.vlgmr.msra.gmra.mrb[100].mxu0 %v4477_v47 }
 0x346   :  { %5649 = vmatmul.mubr.bf16.vlgmr.msra.gmra.mrb[100].mxu1 %v5953_v28 }
 0x358   :  { %v3498_v59 = vpop.f32.mrb[76].mxu0 }
 0x359   :  { %v9391_v1 = vadd.f32 %v3498_v59, %v3459_v24  ;;  %v5630_v55 = vpop.f32.mrb[77].mxu0  ;;  %v5315_v42 = vpop.f32.mrb[76].mxu1 }
 0x35a   :  { %v3501_v46 = vpop.f32.mrb[78].mxu0  ;;  %v5316_v43 = vpop.f32.mrb[77].mxu1 }
 0x35b   :  { %v5631_v41 = vpop.f32.mrb[79].mxu0  ;;  %v5317_v58 = vadd.f32 %v5316_v43, %v5315_v42  ;;  %v5318_v31 = vpop.f32.mrb[78].mxu1 }
 0x35c   :  { %v5319_v50 = vpop.f32.mrb[79].mxu1 }
 0x378   :  { %v5337_v48 = vpop.f32.mrb[80].mxu0 }
 0x379   :  { %v5338_v60 = vpop.f32.mrb[81].mxu0  ;;  %v5359_v10 = vpop.f32.mrb[80].mxu1 }
 0x37a   :  { %v5339_v18 = vadd.f32 %v5338_v60, %v5337_v48  ;;  %v5340_v3 = vpop.f32.mrb[82].mxu0  ;;  %v5360_v7 = vpop.f32.mrb[81].mxu1 }
 0x37b   :  { %v5341_v22 = vpop.f32.mrb[83].mxu0  ;;  %v5361_v19 = vadd.f32 %v5360_v7, %v5359_v10  ;;  %v5362_v25 = vpop.f32.mrb[82].mxu1  ;;  %v9843_v7 = vld [vmem:[#allocation10_spill] sm:$0xff] }
 0x37c   :  { %v3684_v29 = vadd.f32 %v5339_v18, %v5317_v58  ;;  %v5363_v38 = vpop.f32.mrb[83].mxu1  ;;  %v3504_v22 = vmul.f32 %v9843_v7, %v9391_v1 }
 0x37d   :  { %v9844_v38 = vld [vmem:[#allocation29_spill] sm:$0xff] }
 0x37e   :  { %v3724_v32 = vadd.f32 %v5361_v19, %v3684_v29 }
 0x398   :  { %v5381_v54 = vpop.f32.mrb[84].mxu0 }
 0x399   :  { %v5382_v36 = vpop.f32.mrb[85].mxu0  ;;  %v5403_v62 = vpop.f32.mrb[84].mxu1 }
 0x39a   :  { %v5383_v34 = vadd.f32 %v5382_v36, %v5381_v54  ;;  %v5384_v0 = vpop.f32.mrb[86].mxu0  ;;  %v5404_v57 = vpop.f32.mrb[85].mxu1 }
 0x39b   :  { %v5385_v6 = vpop.f32.mrb[87].mxu0  ;;  %v5405_v53 = vadd.f32 %v5404_v57, %v5403_v62  ;;  %v5406_v30 = vpop.f32.mrb[86].mxu1  ;;  %v9845_v57 = vld [vmem:[#allocation13_spill] sm:$0xff] }
 0x39c   :  { %v3764_v21 = vadd.f32 %v5383_v34, %v3724_v32  ;;  %v5407_v61 = vpop.f32.mrb[87].mxu1  ;;  %v3505_v32 = vadd.f32 %v9844_v38, %v3504_v22 }
 0x39e   :  { %v3804_v52 = vadd.f32 %v5405_v53, %v3764_v21  ;;  %v3506_v62 = vmax.f32 %v3505_v32, 0.0 }
 0x3b8   :  { %v5425_v45 = vpop.f32.mrb[88].mxu0 }
 0x3b9   :  { %v5426_v16 = vpop.f32.mrb[89].mxu0  ;;  %v5447_v26 = vpop.f32.mrb[88].mxu1 }
 0x3ba   :  { %v5427_v51 = vadd.f32 %v5426_v16, %v5425_v45  ;;  %v5428_v5 = vpop.f32.mrb[90].mxu0  ;;  %v5448_v9 = vpop.f32.mrb[89].mxu1 }
 0x3bb   :  { %v5429_v20 = vpop.f32.mrb[91].mxu0  ;;  %v5449_v14 = vadd.f32 %v5448_v9, %v5447_v26  ;;  %v5450_v33 = vpop.f32.mrb[90].mxu1 }
 0x3bc   :  { %v3844_v17 = vadd.f32 %v5427_v51, %v3804_v52  ;;  %v5451_v11 = vpop.f32.mrb[91].mxu1 }
 0x3be   :  { %v3884_v40 = vadd.f32 %v5449_v14, %v3844_v17 }
 0x3d8   :  { %v5469_v15 = vpop.f32.mrb[92].mxu0 }
 0x3d9   :  { %v5470_v37 = vpop.f32.mrb[93].mxu0  ;;  %v5491_v63 = vpop.f32.mrb[92].mxu1 }
 0x3da   :  { %v5471_v39 = vadd.f32 %v5470_v37, %v5469_v15  ;;  %v5472_v49 = vpop.f32.mrb[94].mxu0  ;;  %v5492_v56 = vpop.f32.mrb[93].mxu1 }
 0x3db   :  { %v5473_v44 = vpop.f32.mrb[95].mxu0  ;;  %v5493_v12 = vadd.f32 %v5492_v56, %v5491_v63  ;;  %v5494_v8 = vpop.f32.mrb[94].mxu1 }
 0x3dc   :  { %v3924_v2 = vadd.f32 %v5471_v39, %v3884_v40  ;;  %v5495_v23 = vpop.f32.mrb[95].mxu1 }
 0x3de   :  { %v3964_v24 = vadd.f32 %v5493_v12, %v3924_v2 }
 0x3f8   :  { %v5513_v4 = vpop.f32.mrb[96].mxu0 }
 0x3f9   :  { %v5514_v35 = vpop.f32.mrb[97].mxu0  ;;  %v5535_v47 = vpop.f32.mrb[96].mxu1 }
 0x3fa   :  { %v5515_v13 = vadd.f32 %v5514_v35, %v5513_v4  ;;  %v5516_v28 = vpop.f32.mrb[98].mxu0  ;;  %v5536_v27 = vpop.f32.mrb[97].mxu1 }
 0x3fb   :  { %v5517_v59 = vpop.f32.mrb[99].mxu0  ;;  %v5537_v55 = vadd.f32 %v5536_v27, %v5535_v47  ;;  %v5538_v42 = vpop.f32.mrb[98].mxu1 }
 0x3fc   :  { %v4004_v46 = vadd.f32 %v5515_v13, %v3964_v24  ;;  %v5539_v43 = vpop.f32.mrb[99].mxu1 }
 0x3fe   :  { %v4044_v41 = vadd.f32 %v5537_v55, %v4004_v46 }
 0x418   :  { %v5557_v58 = vpop.f32.mrb[100].mxu0 }
 0x419   :  { %v5558_v31 = vpop.f32.mrb[101].mxu0  ;;  %v4123_v50 = vpop.f32.mrb[100].mxu1 }
 0x41a   :  { %v5559_v48 = vadd.f32 %v5558_v31, %v5557_v58  ;;  %v5560_v60 = vpop.f32.mrb[102].mxu0  ;;  %v5650_v10 = vpop.f32.mrb[101].mxu1 }
 0x41b   :  { %v5561_v18 = vpop.f32.mrb[103].mxu0  ;;  %v4126_v3 = vpop.f32.mrb[102].mxu1 }
 0x41c   :  { %v4084_v19 = vadd.f32 %v5559_v48, %v4044_v41  ;;  %v5651_v25 = vpop.f32.mrb[103].mxu1 }
 0x41e   :  { %v4124_v29 = vadd.f32 %v4123_v50, %v4084_v19 }
 0x420   :  { %v4129_v54 = vmul.f32 %v9843_v7, %v4124_v29 }
 0x422   :  { %v4130_v36 = vadd.f32 %v9844_v38, %v4129_v54 }
 0x424   :  { %v4131_v34 = vmax.f32 %v4130_v36, 0.0 }
 0x426   :  { %v4132_v0 = vmax.f32 %v3506_v62, %v4131_v34 }
 0x428   :  { %v4133_v6 = vmax.f32 %v9845_v57, %v4132_v0 }
 0x42a   :  { %4134 = vst [vmem:[%s9406_s4] sm:$0xff] %v4133_v6 }

// kernel: lnn_forward.9
= control target key start
LH: loop header
LB: loop body
LE: loop exit
PB: predicated region body
PF: predicated region fallthrough
CT: control target
= control target key end

     0   :  { %v1877_v1 = vmov 0   ;;  %vm175_vm0 = vcmask 523264   ;;  %v70_v58 = vlaneseq  ;;  %vm562_vm1 = vcmask 1041409   ;;  %s2646_s1 = inlined_call_operand.vmem [shape: bf16[64,512], index: 1, kind: input, shape index: {}]   ;;  %s2647_s0 = inlined_call_operand.vmem [shape: bf16[16,64], index: 0, kind: input, shape index: {}]   ;;  %s2648_s2 = inlined_call_operand.vmem [shape: bf16[128,512], index: 2, kind: input, shape index: {}]   ;;  %s2649_s3 = inlined_call_operand.vmem [shape: f32[1,512], index: 3, kind: input, shape index: {}]   ;;  %s2650_s4 = inlined_call_operand.vmem [shape: f32[2,128], index: 4, kind: output, shape index: {}]  }
   0x1   :  { %v1644_v0 = vld [vmem:[%s2646_s1 + $0x4] ss:$16 sps:$4 sm:$0xff]   ;;  %254 = vmatprep.mubr.bf16.mxu1 %v1877_v1  ;;  %211 = vmatprep.mubr.bf16.mxu0 %v1877_v1  ;;  %v1646_v2 = vld [vmem:[%s2646_s1 + $0xc] ss:$16 sps:$4 sm:$0xff]   ;;  %v1648_v3 = vld [vmem:[%s2646_s1] ss:$16 sps:$4 sm:$0xff]  }
   0x2   :  { %179 = vmatprep.subr.bf16.mxu0 %v1644_v0  ;;  %v1649_v4 = vld [vmem:[%s2646_s1 + $0x8] ss:$16 sps:$4 sm:$0xff]   ;;  %222 = vmatprep.subr.bf16.mxu1 %v1646_v2  ;;  %v1650_v5 = vld [vmem:[%s2646_s1 + $0x24] ss:$16 sps:$4 sm:$0xff]   ;;  %v1652_v6 = vld [vmem:[%s2646_s1 + $0x2c] ss:$16 sps:$4 sm:$0xff]  }
   0x3   :  { %180 = vmatpush1.bf16.msra.mxu0 %v1648_v3  ;;  %223 = vmatpush1.bf16.msra.mxu1 %v1649_v4  ;;  %v1654_v7 = vld [vmem:[%s2646_s1 + $0x20] ss:$16 sps:$4 sm:$0xff]   ;;  %v1655_v8 = vld [vmem:[%s2646_s1 + $0x28] ss:$16 sps:$4 sm:$0xff]   ;;  %v1656_v9 = vld [vmem:[%s2646_s1 + $0x44] ss:$16 sps:$4 sm:$0xff]  }
   0x4   :  { %181 = vmatprep.subr.bf16.mxu0 %v1650_v5  ;;  %224 = vmatprep.subr.bf16.mxu1 %v1652_v6  ;;  %v1658_v10 = vld [vmem:[%s2646_s1 + $0x4c] ss:$16 sps:$4 sm:$0xff]   ;;  %v1660_v11 = vld [vmem:[%s2646_s1 + $0x40] ss:$16 sps:$4 sm:$0xff]   ;;  %v1661_v12 = vld [vmem:[%s2646_s1 + $0x48] ss:$16 sps:$4 sm:$0xff]  }
   0x5   :  { %v1662_v13 = vld [vmem:[%s2646_s1 + $0x64] ss:$16 sps:$4 sm:$0xff]   ;;  %v1664_v14 = vld [vmem:[%s2646_s1 + $0x6c] ss:$16 sps:$4 sm:$0xff]   ;;  %v1666_v15 = vld [vmem:[%s2646_s1 + $0x60] ss:$16 sps:$4 sm:$0xff]  }
   0x6   :  { %v1667_v16 = vld [vmem:[%s2646_s1 + $0x68] ss:$16 sps:$4 sm:$0xff]   ;;  %v1956_v17 = vld [vmem:[%s2648_s2 + $0x4] ss:$16 sps:$4 sm:$0xff]   ;;  %v1961_v18 = vld [vmem:[%s2648_s2 + $0xc] ss:$16 sps:$4 sm:$0xff]  }
   0x7   :  { %182 = vmatpush1.bf16.msra.mxu0 %v1654_v7  ;;  %225 = vmatpush1.bf16.msra.mxu1 %v1655_v8  ;;  %v1668_v19 = vld [vmem:[%s2647_s0] sm:$0xff]   ;;  %v1974_v21 = vld [vmem:[%s2648_s2 + $0x8] ss:$16 sps:$4 sm:$0xff]   ;;  %v1986_v23 = vld [vmem:[%s2648_s2 + $0x2c] ss:$16 sps:$4 sm:$0xff]   ;;  %v71_v59 = vshrl.u32 %v70_v58, 7 }
   0x8   :  { %183 = vmatprep.subr.bf16.mxu0 %v1656_v9  ;;  %226 = vmatprep.subr.bf16.mxu1 %v1658_v10  ;;  %v1969_v20 = vld [vmem:[%s2648_s2] ss:$16 sps:$4 sm:$0xff]   ;;  %v1979_v22 = vld [vmem:[%s2648_s2 + $0x24] ss:$16 sps:$4 sm:$0xff]   ;;  %v1998_v25 = vld [vmem:[%s2648_s2 + $0x28] ss:$16 sps:$4 sm:$0xff]  }
   0x9   :  { %v1991_v24 = vld [vmem:[%s2648_s2 + $0x20] ss:$16 sps:$4 sm:$0xff]   ;;  %v2005_v26 = vld [vmem:[%s2648_s2 + $0x44] ss:$16 sps:$4 sm:$0xff]   ;;  %v2010_v27 = vld [vmem:[%s2648_s2 + $0x4c] ss:$16 sps:$4 sm:$0xff]  }
   0xa   :  { %v2019_v28 = vld [vmem:[%s2648_s2 + $0x40] ss:$16 sps:$4 sm:$0xff]   ;;  %v2024_v29 = vld [vmem:[%s2648_s2 + $0x48] ss:$16 sps:$4 sm:$0xff]   ;;  %v2029_v30 = vld [vmem:[%s2648_s2 + $0x64] ss:$16 sps:$4 sm:$0xff]  }
   0xb   :  { %184 = vmatpush1.bf16.msra.mxu0 %v1660_v11  ;;  %227 = vmatpush1.bf16.msra.mxu1 %v1661_v12  ;;  %v2036_v31 = vld [vmem:[%s2648_s2 + $0x6c] ss:$16 sps:$4 sm:$0xff]   ;;  %v2041_v32 = vld [vmem:[%s2648_s2 + $0x60] ss:$16 sps:$4 sm:$0xff]   ;;  %v2048_v33 = vld [vmem:[%s2648_s2 + $0x68] ss:$16 sps:$4 sm:$0xff]  }
   0xc   :  { %185 = vmatprep.subr.bf16.mxu0 %v1662_v13  ;;  %228 = vmatprep.subr.bf16.mxu1 %v1664_v14  ;;  %v2055_v34 = vld [vmem:[%s2648_s2 + $0x84] ss:$16 sps:$4 sm:$0xff]   ;;  %v2060_v35 = vld [vmem:[%s2648_s2 + $0x8c] ss:$16 sps:$4 sm:$0xff]   ;;  %v2067_v36 = vld [vmem:[%s2648_s2 + $0x80] ss:$16 sps:$4 sm:$0xff]  }
   0xd   :  { %v2072_v37 = vld [vmem:[%s2648_s2 + $0x88] ss:$16 sps:$4 sm:$0xff]   ;;  %v2079_v38 = vld [vmem:[%s2648_s2 + $0xa4] ss:$16 sps:$4 sm:$0xff]   ;;  %v2084_v39 = vld [vmem:[%s2648_s2 + $0xac] ss:$16 sps:$4 sm:$0xff]  }
   0xe   :  { %v2091_v40 = vld [vmem:[%s2648_s2 + $0xa0] ss:$16 sps:$4 sm:$0xff]   ;;  %v2096_v41 = vld [vmem:[%s2648_s2 + $0xa8] ss:$16 sps:$4 sm:$0xff]   ;;  %v2103_v42 = vld [vmem:[%s2648_s2 + $0xc4] ss:$16 sps:$4 sm:$0xff]  }
   0xf   :  { %186 = vmatpush1.bf16.msra.mxu0 %v1666_v15  ;;  %229 = vmatpush1.bf16.msra.mxu1 %v1667_v16  ;;  %v2108_v43 = vld [vmem:[%s2648_s2 + $0xcc] ss:$16 sps:$4 sm:$0xff]   ;;  %v2115_v44 = vld [vmem:[%s2648_s2 + $0xc0] ss:$16 sps:$4 sm:$0xff]   ;;  %v2120_v45 = vld [vmem:[%s2648_s2 + $0xc8] ss:$16 sps:$4 sm:$0xff]  }
  0x10   :  { %425 = vmatprep.subr.bf16.mxu0 %v1956_v17  ;;  %466 = vmatprep.subr.bf16.mxu1 %v1961_v18  ;;  %v2127_v46 = vld [vmem:[%s2648_s2 + $0xe4] ss:$16 sps:$4 sm:$0xff]   ;;  %v2132_v47 = vld [vmem:[%s2648_s2 + $0xec] ss:$16 sps:$4 sm:$0xff]   ;;  %v2139_v48 = vld [vmem:[%s2648_s2 + $0xe0] ss:$16 sps:$4 sm:$0xff]  }
  0x11   :  { %v2144_v49 = vld [vmem:[%s2648_s2 + $0xe8] ss:$16 sps:$4 sm:$0xff]   ;;  %v80_v60 = vsub.s32 2, %v71_v59  ;;  %v84_v61 = vsub.s32 3, %v71_v59  ;;  %v72_v62 = vsub.s32 0, %v71_v59  ;;  %v76_v63 = vsub.s32 1, %v71_v59 }
  0x12   :  { %1594 = vmatmul.mubr.msk.bf16.vlgmr.msra.gmra.mrb[0].mxu1 %vm175_vm0, %v1668_v19  ;;  %1593 = vmatmul.mubr.msk.bf16.vlgmr.msra.gmra.mrb[0].mxu0 %vm175_vm0, %v1668_v19  ;;  %v68_v0 = vld [vmem:[%s2649_s3] sm:$0xf] }
  0x13   :  { %426 = vmatpush1.bf16.msra.mxu0 %v1969_v20  ;;  %467 = vmatpush1.bf16.msra.mxu1 %v1974_v21  ;;  %v81_v2 = vrot.slane %v68_v0, %v80_v60  ;;  %v85_v3 = vrot.slane %v68_v0, %v84_v61  ;;  %v73_v4 = vrot.slane %v68_v0, %v72_v62 }
  0x14   :  { %427 = vmatprep.subr.bf16.mxu0 %v1979_v22  ;;  %468 = vmatprep.subr.bf16.mxu1 %v1986_v23  ;;  %v77_v5 = vrot.slane %v68_v0, %v76_v63 }
  0x15   :  { %457 = vmatprep.mubr.bf16.mxu0 %v1877_v1  ;;  %498 = vmatprep.mubr.bf16.mxu1 %v1877_v1 }
  0x17   :  { %428 = vmatpush1.bf16.msra.mxu0 %v1991_v24  ;;  %469 = vmatpush1.bf16.msra.mxu1 %v1998_v25 }
  0x18   :  { %429 = vmatprep.subr.bf16.mxu0 %v2005_v26  ;;  %470 = vmatprep.subr.bf16.mxu1 %v2010_v27 }
  0x1b   :  { %430 = vmatpush1.bf16.msra.mxu0 %v2019_v28  ;;  %471 = vmatpush1.bf16.msra.mxu1 %v2024_v29 }
  0x1c   :  { %431 = vmatprep.subr.bf16.mxu0 %v2029_v30  ;;  %472 = vmatprep.subr.bf16.mxu1 %v2036_v31 }
  0x1f   :  { %432 = vmatpush1.bf16.msra.mxu0 %v2041_v32  ;;  %473 = vmatpush1.bf16.msra.mxu1 %v2048_v33 }
  0x20   :  { %433 = vmatprep.subr.bf16.mxu0 %v2055_v34  ;;  %474 = vmatprep.subr.bf16.mxu1 %v2060_v35 }
  0x23   :  { %434 = vmatpush1.bf16.msra.mxu0 %v2067_v36  ;;  %475 = vmatpush1.bf16.msra.mxu1 %v2072_v37 }
  0x24   :  { %435 = vmatprep.subr.bf16.mxu0 %v2079_v38  ;;  %476 = vmatprep.subr.bf16.mxu1 %v2084_v39 }
  0x27   :  { %436 = vmatpush1.bf16.msra.mxu0 %v2091_v40  ;;  %477 = vmatpush1.bf16.msra.mxu1 %v2096_v41 }
  0x28   :  { %437 = vmatprep.subr.bf16.mxu0 %v2103_v42  ;;  %478 = vmatprep.subr.bf16.mxu1 %v2108_v43 }
  0x2b   :  { %438 = vmatpush1.bf16.msra.mxu0 %v2115_v44  ;;  %479 = vmatpush1.bf16.msra.mxu1 %v2120_v45 }
  0x2c   :  { %439 = vmatprep.subr.bf16.mxu0 %v2127_v46  ;;  %480 = vmatprep.subr.bf16.mxu1 %v2132_v47 }
  0x2f   :  { %440 = vmatpush1.bf16.msra.mxu0 %v2139_v48  ;;  %481 = vmatpush1.bf16.msra.mxu1 %v2144_v49 }
  0x30   :  { %566 = vmatprep.subr.bf16.mxu0 %v1956_v17  ;;  %607 = vmatprep.subr.bf16.mxu1 %v1961_v18 }
  0x32   :  { %458 = vmatmul.mubr.bf16.vlgmr.msra.gmra.mrb[4].mxu0 %v1877_v1  ;;  %499 = vmatmul.mubr.bf16.vlgmr.msra.gmra.mrb[4].mxu1 %v1877_v1 }
  0x33   :  { %567 = vmatpush1.bf16.msra.mxu0 %v1969_v20  ;;  %608 = vmatpush1.bf16.msra.mxu1 %v1974_v21 }
  0x34   :  { %568 = vmatprep.subr.bf16.mxu0 %v1979_v22  ;;  %609 = vmatprep.subr.bf16.mxu1 %v1986_v23 }
  0x35   :  { %598 = vmatprep.mubr.bf16.mxu0 %v1877_v1  ;;  %639 = vmatprep.mubr.bf16.mxu1 %v1877_v1 }
  0x37   :  { %569 = vmatpush1.bf16.msra.mxu0 %v1991_v24  ;;  %610 = vmatpush1.bf16.msra.mxu1 %v1998_v25 }
  0x38   :  { %570 = vmatprep.subr.bf16.mxu0 %v2005_v26  ;;  %611 = vmatprep.subr.bf16.mxu1 %v2010_v27 }
  0x3b   :  { %571 = vmatpush1.bf16.msra.mxu0 %v2019_v28  ;;  %612 = vmatpush1.bf16.msra.mxu1 %v2024_v29 }
  0x3c   :  { %572 = vmatprep.subr.bf16.mxu0 %v2029_v30  ;;  %613 = vmatprep.subr.bf16.mxu1 %v2036_v31 }
  0x3f   :  { %573 = vmatpush1.bf16.msra.mxu0 %v2041_v32  ;;  %614 = vmatpush1.bf16.msra.mxu1 %v2048_v33 }
  0x40   :  { %574 = vmatprep.subr.bf16.mxu0 %v2055_v34  ;;  %615 = vmatprep.subr.bf16.mxu1 %v2060_v35 }
  0x43   :  { %575 = vmatpush1.bf16.msra.mxu0 %v2067_v36  ;;  %616 = vmatpush1.bf16.msra.mxu1 %v2072_v37 }
  0x44   :  { %576 = vmatprep.subr.bf16.mxu0 %v2079_v38  ;;  %617 = vmatprep.subr.bf16.mxu1 %v2084_v39 }
  0x47   :  { %577 = vmatpush1.bf16.msra.mxu0 %v2091_v40  ;;  %618 = vmatpush1.bf16.msra.mxu1 %v2096_v41 }
  0x48   :  { %578 = vmatprep.subr.bf16.mxu0 %v2103_v42  ;;  %619 = vmatprep.subr.bf16.mxu1 %v2108_v43 }
  0x4b   :  { %579 = vmatpush1.bf16.msra.mxu0 %v2115_v44  ;;  %620 = vmatpush1.bf16.msra.mxu1 %v2120_v45 }
  0x4c   :  { %580 = vmatprep.subr.bf16.mxu0 %v2127_v46  ;;  %621 = vmatprep.subr.bf16.mxu1 %v2132_v47 }
  0x4f   :  { %581 = vmatpush1.bf16.msra.mxu0 %v2139_v48  ;;  %622 = vmatpush1.bf16.msra.mxu1 %v2144_v49 }
  0x50   :  { %706 = vmatprep.subr.bf16.mxu0 %v1956_v17  ;;  %747 = vmatprep.subr.bf16.mxu1 %v1961_v18 }
  0xe5   :  { %v256_v50 = vpop.f32.mrb[0].mxu1  ;;  %v213_v51 = vpop.f32.mrb[0].mxu0 }
  0xe6   :  { %v258_v52 = vpop.f32.mrb[1].mxu1  ;;  %v215_v53 = vpop.f32.mrb[1].mxu0  ;;  %v2191_v6 = vadd.f32 %v256_v50, %v81_v2  ;;  %v2195_v8 = vadd.f32 %v213_v51, %v73_v4 }
  0xe7   :  { %v260_v54 = vpop.f32.mrb[2].mxu1  ;;  %v217_v55 = vpop.f32.mrb[2].mxu0  ;;  %v2193_v7 = vadd.f32 %v258_v52, %v85_v3  ;;  %v2197_v9 = vadd.f32 %v215_v53, %v77_v5 }
  0xe8   :  { %v262_v56 = vpop.f32.mrb[3].mxu1  ;;  %v219_v57 = vpop.f32.mrb[3].mxu0  ;;  %v2199_v10 = vadd.f32 %v260_v54, %v81_v2  ;;  %v2203_v12 = vadd.f32 %v217_v55, %v73_v4 }
  0xe9   :  { %v2201_v11 = vadd.f32 %v262_v56, %v85_v3  ;;  %v2205_v13 = vadd.f32 %v219_v57, %v77_v5 }
 0x105   :  { %v459_v14 = vpop.f32.mrb[4].mxu0  ;;  %v500_v15 = vpop.f32.mrb[4].mxu1 }
 0x106   :  { %v511_v16 = vrot.slane %v459_v14, 1  ;;  %v523_v19 = vadd.f32 %v459_v14, %v2195_v8  ;;  %v513_v50 = vrot.slane %v500_v15, 1  ;;  %v525_v52 = vadd.f32 %v500_v15, %v2191_v6  ;;  %v461_v51 = vpop.f32.mrb[5].mxu0  ;;  %v502_v58 = vpop.f32.mrb[5].mxu1 }
 0x107   :  { %v512_v53 = vrot.slane %v461_v51, 1  ;;  %v524_v54 = vadd.f32 %v461_v51, %v2197_v9  ;;  %v514_v59 = vrot.slane %v502_v58, 1  ;;  %v526_v56 = vadd.f32 %v502_v58, %v2193_v7  ;;  %v504_v55 = vpop.f32.mrb[6].mxu1  ;;  %v463_v60 = vpop.f32.mrb[6].mxu0 }
 0x108   :  { %v527_v57 = vadd.f32 %v511_v16, %v2203_v12  ;;  %1717 = vtanh.f32 %v523_v19  ;;  %v529_v61 = vadd.f32 %v513_v50, %v2199_v10  ;;  %v505_v62 = vpop.f32.mrb[7].mxu1  ;;  %v464_v63 = vpop.f32.mrb[7].mxu0 }
 0x109   :  { %v528_v0 = vadd.f32 %v512_v53, %v2205_v13  ;;  %1719 = vtanh.f32 %v524_v54  ;;  %v530_v2 = vadd.f32 %v514_v59, %v2201_v11  ;;  %v535_v3 = vadd.f32 %v526_v56, %v525_v52 }
 0x10a   :  { %1721 = vtanh.f32 %v527_v57 }
 0x10b   :  { %1723 = vtanh.f32 %v528_v0  ;;  %v536_v4 = vadd.f32 %v530_v2, %v529_v61  ;;  %v1627_v5 = vmul.f32 -1.442695, %v535_v3 }
 0x10d   :  { %1725 = vpow2.f32 %v1627_v5  ;;  %v1628_v14 = vmul.f32 -1.442695, %v536_v4 }
 0x10f   :  { %1727 = vpow2.f32 %v1628_v14 }
 0x112   :  { %v1718_v15 = vpop.eup %1717 }
 0x113   :  { %v1720_v16 = vpop.eup %1719 }
 0x114   :  { %v1722_v19 = vpop.eup %1721  ;;  %v549_v51 = vsub.f32 %v1720_v16, %v1718_v15 }
 0x115   :  { %v1724_v50 = vpop.eup %1723 }
 0x116   :  { %v550_v58 = vsub.f32 %v1724_v50, %v1722_v19 }
 0x117   :  { %v1726_v55 = vpop.eup %1725 }
 0x118   :  { %v543_v60 = vadd.f32 1.0, %v1726_v55 }
 0x119   :  { %v1728_v53 = vpop.eup %1727 }
 0x11a   :  { %v544_v54 = vadd.f32 1.0, %v1728_v53  ;;  %1729 = vrcp.f32 %v543_v60 }
 0x11c   :  { %1731 = vrcp.f32 %v544_v54 }
 0x124   :  { %v1730_v52 = vpop.eup %1729 }
 0x125   :  { %v551_v59 = vmul.f32 %v1730_v52, %v549_v51 }
 0x126   :  { %v1732_v56 = vpop.eup %1731 }
 0x127   :  { %v552_v57 = vmul.f32 %v1732_v56, %v550_v58  ;;  %v553_v61 = vadd.f32 %v1718_v15, %v551_v59 }
 0x129   :  { %v554_v62 = vadd.f32 %v1722_v19, %v552_v57  ;;  %v555_v63 = vpack.c.bf16 %v553_v61, %v553_v61 }
 0x12b   :  { %v556_v0 = vpack.c.bf16 %v554_v62, %v554_v62  ;;  %v559_v3 = vunpack.c.l.b16 %v555_v63 }
 0x12d   :  { %v560_v2 = vunpack.c.l.b16 %v556_v0 }
 0x12f   :  { %v561_v4 = vrot.slane %v560_v2, 7 }
 0x131   :  { %v563_v5 = vsel %vm562_vm1, %v561_v4, %v559_v3 }
 0x132   :  { %v564_v14 = vpack.c.b16 %v563_v5, %v563_v5 }
 0x134   :  { %599 = vmatmul.mubr.bf16.vlgmr.msra.gmra.mrb[8].mxu0 %v564_v14  ;;  %640 = vmatmul.mubr.bf16.vlgmr.msra.gmra.mrb[8].mxu1 %v564_v14 }
 0x135   :  { %707 = vmatpush1.bf16.msra.mxu0 %v1969_v20  ;;  %748 = vmatpush1.bf16.msra.mxu1 %v1974_v21 }
 0x136   :  { %708 = vmatprep.subr.bf16.mxu0 %v1979_v22  ;;  %749 = vmatprep.subr.bf16.mxu1 %v1986_v23 }
 0x137   :  { %738 = vmatprep.mubr.bf16.mxu0 %v1877_v1  ;;  %779 = vmatprep.mubr.bf16.mxu1 %v1877_v1 }
 0x139   :  { %709 = vmatpush1.bf16.msra.mxu0 %v1991_v24  ;;  %750 = vmatpush1.bf16.msra.mxu1 %v1998_v25 }
 0x13a   :  { %710 = vmatprep.subr.bf16.mxu0 %v2005_v26  ;;  %751 = vmatprep.subr.bf16.mxu1 %v2010_v27 }
 0x13d   :  { %711 = vmatpush1.bf16.msra.mxu0 %v2019_v28  ;;  %752 = vmatpush1.bf16.msra.mxu1 %v2024_v29 }
 0x13e   :  { %712 = vmatprep.subr.bf16.mxu0 %v2029_v30  ;;  %753 = vmatprep.subr.bf16.mxu1 %v2036_v31 }
 0x141   :  { %713 = vmatpush1.bf16.msra.mxu0 %v2041_v32  ;;  %754 = vmatpush1.bf16.msra.mxu1 %v2048_v33 }
 0x142   :  { %714 = vmatprep.subr.bf16.mxu0 %v2055_v34  ;;  %755 = vmatprep.subr.bf16.mxu1 %v2060_v35 }
 0x145   :  { %715 = vmatpush1.bf16.msra.mxu0 %v2067_v36  ;;  %756 = vmatpush1.bf16.msra.mxu1 %v2072_v37 }
 0x146   :  { %716 = vmatprep.subr.bf16.mxu0 %v2079_v38  ;;  %757 = vmatprep.subr.bf16.mxu1 %v2084_v39 }
 0x149   :  { %717 = vmatpush1.bf16.msra.mxu0 %v2091_v40  ;;  %758 = vmatpush1.bf16.msra.mxu1 %v2096_v41 }
 0x14a   :  { %718 = vmatprep.subr.bf16.mxu0 %v2103_v42  ;;  %759 = vmatprep.subr.bf16.mxu1 %v2108_v43 }
 0x14d   :  { %719 = vmatpush1.bf16.msra.mxu0 %v2115_v44  ;;  %760 = vmatpush1.bf16.msra.mxu1 %v2120_v45 }
 0x14e   :  { %720 = vmatprep.subr.bf16.mxu0 %v2127_v46  ;;  %761 = vmatprep.subr.bf16.mxu1 %v2132_v47 }
 0x151   :  { %721 = vmatpush1.bf16.msra.mxu0 %v2139_v48  ;;  %762 = vmatpush1.bf16.msra.mxu1 %v2144_v49 }
 0x152   :  { %851 = vmatprep.subr.bf16.mxu0 %v1956_v17  ;;  %892 = vmatprep.subr.bf16.mxu1 %v1961_v18 }
 0x207   :  { %v600_v15 = vpop.f32.mrb[8].mxu0  ;;  %v641_v16 = vpop.f32.mrb[8].mxu1 }
 0x208   :  { %v652_v19 = vrot.slane %v600_v15, 7  ;;  %v668_v51 = vadd.f32 %v600_v15, %v2203_v12  ;;  %v654_v50 = vrot.slane %v641_v16, 7  ;;  %v670_v58 = vadd.f32 %v641_v16, %v2199_v10  ;;  %v602_v55 = vpop.f32.mrb[9].mxu0  ;;  %v643_v60 = vpop.f32.mrb[9].mxu1 }
 0x209   :  { %v653_v53 = vrot.slane %v602_v55, 7  ;;  %v669_v54 = vadd.f32 %v602_v55, %v2205_v13  ;;  %v655_v52 = vrot.slane %v643_v60, 7  ;;  %v671_v59 = vadd.f32 %v643_v60, %v2201_v11  ;;  %v604_v56 = vpop.f32.mrb[10].mxu0  ;;  %v645_v57 = vpop.f32.mrb[10].mxu1 }
 0x20a   :  { %v664_v61 = vadd.f32 %v652_v19, %v2195_v8  ;;  %1733 = vtanh.f32 %v668_v51  ;;  %v666_v62 = vadd.f32 %v654_v50, %v2191_v6  ;;  %v605_v63 = vpop.f32.mrb[11].mxu0  ;;  %v646_v0 = vpop.f32.mrb[11].mxu1 }
 0x20b   :  { %v665_v2 = vadd.f32 %v653_v53, %v2197_v9  ;;  %1735 = vtanh.f32 %v669_v54  ;;  %v667_v3 = vadd.f32 %v655_v52, %v2193_v7  ;;  %v677_v4 = vadd.f32 %v671_v59, %v670_v58 }
 0x20c   :  { %1737 = vtanh.f32 %v664_v61 }
 0x20d   :  { %1739 = vtanh.f32 %v665_v2  ;;  %v676_v5 = vadd.f32 %v667_v3, %v666_v62  ;;  %v1630_v14 = vmul.f32 -1.442695, %v677_v4 }
 0x20f   :  { %v1629_v15 = vmul.f32 -1.442695, %v676_v5  ;;  %1741 = vpow2.f32 %v1630_v14 }
 0x211   :  { %1743 = vpow2.f32 %v1629_v15 }
 0x214   :  { %v1734_v16 = vpop.eup %1733 }
 0x215   :  { %v1736_v19 = vpop.eup %1735 }
 0x216   :  { %v1738_v51 = vpop.eup %1737  ;;  %v691_v55 = vsub.f32 %v1736_v19, %v1734_v16 }
 0x217   :  { %v1740_v50 = vpop.eup %1739 }
 0x218   :  { %v690_v60 = vsub.f32 %v1740_v50, %v1738_v51 }
 0x219   :  { %v1742_v56 = vpop.eup %1741 }
 0x21a   :  { %v685_v57 = vadd.f32 1.0, %v1742_v56 }
 0x21b   :  { %v1744_v53 = vpop.eup %1743 }
 0x21c   :  { %v684_v54 = vadd.f32 1.0, %v1744_v53  ;;  %1745 = vrcp.f32 %v685_v57 }
 0x21e   :  { %1747 = vrcp.f32 %v684_v54 }
 0x226   :  { %v1746_v58 = vpop.eup %1745 }
 0x227   :  { %v693_v52 = vmul.f32 %v1746_v58, %v691_v55 }
 0x228   :  { %v1748_v59 = vpop.eup %1747 }
 0x229   :  { %v692_v61 = vmul.f32 %v1748_v59, %v690_v60  ;;  %v695_v62 = vadd.f32 %v1734_v16, %v693_v52 }
 0x22b   :  { %v694_v63 = vadd.f32 %v1738_v51, %v692_v61  ;;  %v697_v2 = vpack.c.bf16 %v695_v62, %v695_v62 }
 0x22d   :  { %v696_v0 = vpack.c.bf16 %v694_v63, %v694_v63  ;;  %v701_v4 = vunpack.c.l.b16 %v697_v2 }
 0x22f   :  { %v700_v3 = vunpack.c.l.b16 %v696_v0 }
 0x231   :  { %v702_v5 = vrot.slane %v700_v3, 1 }
 0x233   :  { %v703_v14 = vsel %vm562_vm1, %v701_v4, %v702_v5 }
 0x234   :  { %v704_v15 = vpack.c.b16 %v703_v14, %v703_v14 }
 0x236   :  { %739 = vmatmul.mubr.bf16.vlgmr.msra.gmra.mrb[12].mxu0 %v704_v15  ;;  %780 = vmatmul.mubr.bf16.vlgmr.msra.gmra.mrb[12].mxu1 %v704_v15 }
 0x237   :  { %852 = vmatpush1.bf16.msra.mxu0 %v1969_v20  ;;  %893 = vmatpush1.bf16.msra.mxu1 %v1974_v21 }
 0x238   :  { %853 = vmatprep.subr.bf16.mxu0 %v1979_v22  ;;  %894 = vmatprep.subr.bf16.mxu1 %v1986_v23 }
 0x239   :  { %883 = vmatprep.mubr.bf16.mxu0 %v1877_v1  ;;  %924 = vmatprep.mubr.bf16.mxu1 %v1877_v1 }
 0x23b   :  { %854 = vmatpush1.bf16.msra.mxu0 %v1991_v24  ;;  %895 = vmatpush1.bf16.msra.mxu1 %v1998_v25 }
 0x23c   :  { %855 = vmatprep.subr.bf16.mxu0 %v2005_v26  ;;  %896 = vmatprep.subr.bf16.mxu1 %v2010_v27 }
 0x23f   :  { %856 = vmatpush1.bf16.msra.mxu0 %v2019_v28  ;;  %897 = vmatpush1.bf16.msra.mxu1 %v2024_v29 }
 0x240   :  { %857 = vmatprep.subr.bf16.mxu0 %v2029_v30  ;;  %898 = vmatprep.subr.bf16.mxu1 %v2036_v31 }
 0x243   :  { %858 = vmatpush1.bf16.msra.mxu0 %v2041_v32  ;;  %899 = vmatpush1.bf16.msra.mxu1 %v2048_v33 }
 0x244   :  { %859 = vmatprep.subr.bf16.mxu0 %v2055_v34  ;;  %900 = vmatprep.subr.bf16.mxu1 %v2060_v35 }
 0x247   :  { %860 = vmatpush1.bf16.msra.mxu0 %v2067_v36  ;;  %901 = vmatpush1.bf16.msra.mxu1 %v2072_v37 }
 0x248   :  { %861 = vmatprep.subr.bf16.mxu0 %v2079_v38  ;;  %902 = vmatprep.subr.bf16.mxu1 %v2084_v39 }
 0x24b   :  { %862 = vmatpush1.bf16.msra.mxu0 %v2091_v40  ;;  %903 = vmatpush1.bf16.msra.mxu1 %v2096_v41 }
 0x24c   :  { %863 = vmatprep.subr.bf16.mxu0 %v2103_v42  ;;  %904 = vmatprep.subr.bf16.mxu1 %v2108_v43 }
 0x24f   :  { %864 = vmatpush1.bf16.msra.mxu0 %v2115_v44  ;;  %905 = vmatpush1.bf16.msra.mxu1 %v2120_v45 }
 0x250   :  { %865 = vmatprep.subr.bf16.mxu0 %v2127_v46  ;;  %906 = vmatprep.subr.bf16.mxu1 %v2132_v47 }
 0x253   :  { %866 = vmatpush1.bf16.msra.mxu0 %v2139_v48  ;;  %907 = vmatpush1.bf16.msra.mxu1 %v2144_v49 }
 0x254   :  { %996 = vmatprep.subr.bf16.mxu0 %v1956_v17  ;;  %1037 = vmatprep.subr.bf16.mxu1 %v1961_v18 }
 0x309   :  { %v740_v16 = vpop.f32.mrb[12].mxu0  ;;  %v781_v19 = vpop.f32.mrb[12].mxu1 }
 0x30a   :  { %v792_v51 = vrot.slane %v740_v16, 6  ;;  %v796_v55 = vrot.slane %v740_v16, 7  ;;  %v794_v50 = vrot.slane %v781_v19, 6  ;;  %v798_v60 = vrot.slane %v781_v19, 7  ;;  %v742_v56 = vpop.f32.mrb[13].mxu0  ;;  %v783_v57 = vpop.f32.mrb[13].mxu1 }
 0x30b   :  { %v793_v53 = vrot.slane %v742_v56, 6  ;;  %v797_v54 = vrot.slane %v742_v56, 7  ;;  %v795_v58 = vrot.slane %v783_v57, 6  ;;  %v799_v52 = vrot.slane %v783_v57, 7  ;;  %v744_v59 = vpop.f32.mrb[14].mxu0  ;;  %v785_v61 = vpop.f32.mrb[14].mxu1 }
 0x30c   :  { %v808_v62 = vadd.f32 %v792_v51, %v2195_v8  ;;  %v812_v63 = vadd.f32 %v796_v55, %v2203_v12  ;;  %v810_v0 = vadd.f32 %v794_v50, %v2191_v6  ;;  %v814_v2 = vadd.f32 %v798_v60, %v2199_v10  ;;  %v745_v3 = vpop.f32.mrb[15].mxu0  ;;  %v786_v4 = vpop.f32.mrb[15].mxu1 }
 0x30d   :  { %v809_v5 = vadd.f32 %v793_v53, %v2197_v9  ;;  %v813_v14 = vadd.f32 %v797_v54, %v2205_v13  ;;  %v811_v15 = vadd.f32 %v795_v58, %v2193_v7  ;;  %v815_v16 = vadd.f32 %v799_v52, %v2201_v11 }
 0x30e   :  { %1749 = vtanh.f32 %v808_v62 }
 0x30f   :  { %1751 = vtanh.f32 %v812_v63  ;;  %v820_v19 = vadd.f32 %v811_v15, %v810_v0  ;;  %v821_v51 = vadd.f32 %v815_v16, %v814_v2 }
 0x310   :  { %1753 = vtanh.f32 %v809_v5 }
 0x311   :  { %1755 = vtanh.f32 %v813_v14  ;;  %v1631_v55 = vmul.f32 -1.442695, %v820_v19  ;;  %v1632_v50 = vmul.f32 -1.442695, %v821_v51 }
 0x313   :  { %1757 = vpow2.f32 %v1631_v55 }
 0x314   :  { %1759 = vpow2.f32 %v1632_v50 }
 0x318   :  { %v1750_v60 = vpop.eup %1749 }
 0x319   :  { %v1752_v56 = vpop.eup %1751 }
 0x31a   :  { %v1754_v57 = vpop.eup %1753 }
 0x31b   :  { %v1756_v53 = vpop.eup %1755  ;;  %v834_v59 = vsub.f32 %v1754_v57, %v1750_v60 }
 0x31c   :  { %v835_v54 = vsub.f32 %v1756_v53, %v1752_v56 }
 0x31d   :  { %v1758_v61 = vpop.eup %1757 }
 0x31e   :  { %v1760_v58 = vpop.eup %1759  ;;  %v828_v3 = vadd.f32 1.0, %v1758_v61 }
 0x31f   :  { %v829_v52 = vadd.f32 1.0, %v1760_v58 }
 0x320   :  { %1761 = vrcp.f32 %v828_v3 }
 0x321   :  { %1763 = vrcp.f32 %v829_v52 }
 0x32a   :  { %v1762_v62 = vpop.eup %1761 }
 0x32b   :  { %v1764_v63 = vpop.eup %1763  ;;  %v836_v0 = vmul.f32 %v1762_v62, %v834_v59 }
 0x32c   :  { %v837_v2 = vmul.f32 %v1764_v63, %v835_v54 }
 0x32d   :  { %v838_v4 = vadd.f32 %v1750_v60, %v836_v0 }
 0x32e   :  { %v839_v5 = vadd.f32 %v1752_v56, %v837_v2 }
 0x32f   :  { %v840_v14 = vpack.c.bf16 %v838_v4, %v838_v4 }
 0x330   :  { %v841_v15 = vpack.c.bf16 %v839_v5, %v839_v5 }
 0x331   :  { %v844_v16 = vunpack.c.l.b16 %v840_v14 }
 0x332   :  { %v845_v19 = vunpack.c.l.b16 %v841_v15 }
 0x333   :  { %v846_v51 = vrot.slane %v844_v16, 2 }
 0x334   :  { %v847_v55 = vrot.slane %v845_v19, 1 }
 0x336   :  { %v848_v50 = vsel %vm562_vm1, %v847_v55, %v846_v51 }
 0x337   :  { %v849_v57 = vpack.c.b16 %v848_v50, %v848_v50 }
 0x339   :  { %884 = vmatmul.mubr.bf16.vlgmr.msra.gmra.mrb[16].mxu0 %v849_v57  ;;  %925 = vmatmul.mubr.bf16.vlgmr.msra.gmra.mrb[16].mxu1 %v849_v57 }
 0x33a   :  { %997 = vmatpush1.bf16.msra.mxu0 %v1969_v20  ;;  %1038 = vmatpush1.bf16.msra.mxu1 %v1974_v21 }
 0x33b   :  { %998 = vmatprep.subr.bf16.mxu0 %v1979_v22  ;;  %1039 = vmatprep.subr.bf16.mxu1 %v1986_v23 }
 0x33c   :  { %1028 = vmatprep.mubr.bf16.mxu0 %v1877_v1  ;;  %1069 = vmatprep.mubr.bf16.mxu1 %v1877_v1 }
 0x33e   :  { %999 = vmatpush1.bf16.msra.mxu0 %v1991_v24  ;;  %1040 = vmatpush1.bf16.msra.mxu1 %v1998_v25 }
 0x33f   :  { %1000 = vmatprep.subr.bf16.mxu0 %v2005_v26  ;;  %1041 = vmatprep.subr.bf16.mxu1 %v2010_v27 }
 0x342   :  { %1001 = vmatpush1.bf16.msra.mxu0 %v2019_v28  ;;  %1042 = vmatpush1.bf16.msra.mxu1 %v2024_v29 }
 0x343   :  { %1002 = vmatprep.subr.bf16.mxu0 %v2029_v30  ;;  %1043 = vmatprep.subr.bf16.mxu1 %v2036_v31 }
 0x346   :  { %1003 = vmatpush1.bf16.msra.mxu0 %v2041_v32  ;;  %1044 = vmatpush1.bf16.msra.mxu1 %v2048_v33 }
 0x347   :  { %1004 = vmatprep.subr.bf16.mxu0 %v2055_v34  ;;  %1045 = vmatprep.subr.bf16.mxu1 %v2060_v35 }
 0x34a   :  { %1005 = vmatpush1.bf16.msra.mxu0 %v2067_v36  ;;  %1046 = vmatpush1.bf16.msra.mxu1 %v2072_v37 }
 0x34b   :  { %1006 = vmatprep.subr.bf16.mxu0 %v2079_v38  ;;  %1047 = vmatprep.subr.bf16.mxu1 %v2084_v39 }
 0x34e   :  { %1007 = vmatpush1.bf16.msra.mxu0 %v2091_v40  ;;  %1048 = vmatpush1.bf16.msra.mxu1 %v2096_v41 }
 0x34f   :  { %1008 = vmatprep.subr.bf16.mxu0 %v2103_v42  ;;  %1049 = vmatprep.subr.bf16.mxu1 %v2108_v43 }
 0x352   :  { %1009 = vmatpush1.bf16.msra.mxu0 %v2115_v44  ;;  %1050 = vmatpush1.bf16.msra.mxu1 %v2120_v45 }
 0x353   :  { %1010 = vmatprep.subr.bf16.mxu0 %v2127_v46  ;;  %1051 = vmatprep.subr.bf16.mxu1 %v2132_v47 }
 0x356   :  { %1011 = vmatpush1.bf16.msra.mxu0 %v2139_v48  ;;  %1052 = vmatpush1.bf16.msra.mxu1 %v2144_v49 }
 0x357   :  { %1141 = vmatprep.subr.bf16.mxu0 %v1956_v17  ;;  %1182 = vmatprep.subr.bf16.mxu1 %v1961_v18 }
 0x40c   :  { %v885_v60 = vpop.f32.mrb[16].mxu0  ;;  %v926_v56 = vpop.f32.mrb[16].mxu1 }
 0x40d   :  { %v937_v53 = vrot.slane %v885_v60, 5  ;;  %v941_v59 = vrot.slane %v885_v60, 6  ;;  %v939_v54 = vrot.slane %v926_v56, 5  ;;  %v943_v61 = vrot.slane %v926_v56, 6  ;;  %v887_v58 = vpop.f32.mrb[17].mxu0  ;;  %v928_v3 = vpop.f32.mrb[17].mxu1 }
 0x40e   :  { %v938_v52 = vrot.slane %v887_v58, 5  ;;  %v942_v62 = vrot.slane %v887_v58, 6  ;;  %v940_v63 = vrot.slane %v928_v3, 5  ;;  %v944_v0 = vrot.slane %v928_v3, 6  ;;  %v889_v2 = vpop.f32.mrb[18].mxu0  ;;  %v930_v4 = vpop.f32.mrb[18].mxu1 }
 0x40f   :  { %v953_v5 = vadd.f32 %v937_v53, %v2195_v8  ;;  %v957_v17 = vadd.f32 %v941_v59, %v2203_v12  ;;  %v955_v18 = vadd.f32 %v939_v54, %v2191_v6  ;;  %v959_v14 = vadd.f32 %v943_v61, %v2199_v10  ;;  %v890_v15 = vpop.f32.mrb[19].mxu0  ;;  %v931_v16 = vpop.f32.mrb[19].mxu1 }
 0x410   :  { %v954_v19 = vadd.f32 %v938_v52, %v2197_v9  ;;  %v958_v51 = vadd.f32 %v942_v62, %v2205_v13  ;;  %v956_v55 = vadd.f32 %v940_v63, %v2193_v7  ;;  %v960_v50 = vadd.f32 %v944_v0, %v2201_v11 }
 0x411   :  { %1765 = vtanh.f32 %v953_v5 }
 0x412   :  { %1767 = vtanh.f32 %v957_v17  ;;  %v965_v57 = vadd.f32 %v956_v55, %v955_v18  ;;  %v966_v60 = vadd.f32 %v960_v50, %v959_v14 }
 0x413   :  { %1769 = vtanh.f32 %v954_v19 }
 0x414   :  { %1771 = vtanh.f32 %v958_v51  ;;  %v1633_v56 = vmul.f32 -1.442695, %v965_v57  ;;  %v1634_v53 = vmul.f32 -1.442695, %v966_v60 }
 0x416   :  { %1773 = vpow2.f32 %v1633_v56 }
 0x417   :  { %1775 = vpow2.f32 %v1634_v53 }
 0x41b   :  { %v1766_v59 = vpop.eup %1765 }
 0x41c   :  { %v1768_v54 = vpop.eup %1767 }
 0x41d   :  { %v1770_v61 = vpop.eup %1769 }
 0x41e   :  { %v1772_v58 = vpop.eup %1771  ;;  %v979_v3 = vsub.f32 %v1770_v61, %v1766_v59 }
 0x41f   :  { %v980_v52 = vsub.f32 %v1772_v58, %v1768_v54 }
 0x420   :  { %v1774_v62 = vpop.eup %1773 }
 0x421   :  { %v1776_v63 = vpop.eup %1775  ;;  %v973_v2 = vadd.f32 1.0, %v1774_v62 }
 0x422   :  { %v974_v0 = vadd.f32 1.0, %v1776_v63 }
 0x423   :  { %1777 = vrcp.f32 %v973_v2 }
 0x424   :  { %1779 = vrcp.f32 %v974_v0 }
 0x42d   :  { %v1778_v4 = vpop.eup %1777 }
 0x42e   :  { %v1780_v5 = vpop.eup %1779  ;;  %v981_v17 = vmul.f32 %v1778_v4, %v979_v3 }
 0x42f   :  { %v982_v18 = vmul.f32 %v1780_v5, %v980_v52 }
 0x430   :  { %v983_v14 = vadd.f32 %v1766_v59, %v981_v17 }
 0x431   :  { %v984_v15 = vadd.f32 %v1768_v54, %v982_v18 }
 0x432   :  { %v985_v16 = vpack.c.bf16 %v983_v14, %v983_v14 }
 0x433   :  { %v986_v19 = vpack.c.bf16 %v984_v15, %v984_v15 }
 0x434   :  { %v989_v51 = vunpack.c.l.b16 %v985_v16 }
 0x435   :  { %v990_v55 = vunpack.c.l.b16 %v986_v19 }
 0x436   :  { %v991_v50 = vrot.slane %v989_v51, 3 }
 0x437   :  { %v992_v57 = vrot.slane %v990_v55, 2 }
 0x439   :  { %v993_v60 = vsel %vm562_vm1, %v992_v57, %v991_v50 }
 0x43a   :  { %v994_v56 = vpack.c.b16 %v993_v60, %v993_v60 }
 0x43c   :  { %1029 = vmatmul.mubr.bf16.vlgmr.msra.gmra.mrb[20].mxu0 %v994_v56  ;;  %1070 = vmatmul.mubr.bf16.vlgmr.msra.gmra.mrb[20].mxu1 %v994_v56  ;;  %v2401_v56 = vld [vmem:[%s2648_s2] ss:$16 sps:$4 sm:$0xff]  }
 0x43d   :  { %1142 = vmatpush1.bf16.msra.mxu0 %v1969_v20  ;;  %1183 = vmatpush1.bf16.msra.mxu1 %v1974_v21  ;;  %v2380_v20 = vld [vmem:[%s2648_s2 + $0x4] ss:$16 sps:$4 sm:$0xff]   ;;  %v2386_v21 = vld [vmem:[%s2648_s2 + $0xc] ss:$16 sps:$4 sm:$0xff]  }
 0x43e   :  { %1143 = vmatprep.subr.bf16.mxu0 %v1979_v22  ;;  %1184 = vmatprep.subr.bf16.mxu1 %v1986_v23 }
 0x43f   :  { %1173 = vmatprep.mubr.bf16.mxu0 %v1877_v1  ;;  %1214 = vmatprep.mubr.bf16.mxu1 %v1877_v1 }
 0x441   :  { %1144 = vmatpush1.bf16.msra.mxu0 %v1991_v24  ;;  %1185 = vmatpush1.bf16.msra.mxu1 %v1998_v25 }
 0x442   :  { %1145 = vmatprep.subr.bf16.mxu0 %v2005_v26  ;;  %1186 = vmatprep.subr.bf16.mxu1 %v2010_v27 }
 0x445   :  { %1146 = vmatpush1.bf16.msra.mxu0 %v2019_v28  ;;  %1187 = vmatpush1.bf16.msra.mxu1 %v2024_v29 }
 0x446   :  { %1147 = vmatprep.subr.bf16.mxu0 %v2029_v30  ;;  %1188 = vmatprep.subr.bf16.mxu1 %v2036_v31 }
 0x449   :  { %1148 = vmatpush1.bf16.msra.mxu0 %v2041_v32  ;;  %1189 = vmatpush1.bf16.msra.mxu1 %v2048_v33 }
 0x44a   :  { %1149 = vmatprep.subr.bf16.mxu0 %v2055_v34  ;;  %1190 = vmatprep.subr.bf16.mxu1 %v2060_v35 }
 0x44d   :  { %1150 = vmatpush1.bf16.msra.mxu0 %v2067_v36  ;;  %1191 = vmatpush1.bf16.msra.mxu1 %v2072_v37 }
 0x44e   :  { %1151 = vmatprep.subr.bf16.mxu0 %v2079_v38  ;;  %1192 = vmatprep.subr.bf16.mxu1 %v2084_v39 }
 0x451   :  { %1152 = vmatpush1.bf16.msra.mxu0 %v2091_v40  ;;  %1193 = vmatpush1.bf16.msra.mxu1 %v2096_v41 }
 0x452   :  { %1153 = vmatprep.subr.bf16.mxu0 %v2103_v42  ;;  %1194 = vmatprep.subr.bf16.mxu1 %v2108_v43 }
 0x455   :  { %1154 = vmatpush1.bf16.msra.mxu0 %v2115_v44  ;;  %1195 = vmatpush1.bf16.msra.mxu1 %v2120_v45 }
 0x456   :  { %1155 = vmatprep.subr.bf16.mxu0 %v2127_v46  ;;  %1196 = vmatprep.subr.bf16.mxu1 %v2132_v47 }
 0x459   :  { %1156 = vmatpush1.bf16.msra.mxu0 %v2139_v48  ;;  %1197 = vmatpush1.bf16.msra.mxu1 %v2144_v49 }
 0x45a   :  { %1286 = vmatprep.subr.bf16.mxu0 %v2380_v20  ;;  %1327 = vmatprep.subr.bf16.mxu1 %v2386_v21 }
 0x50f   :  { %v1030_v22 = vpop.f32.mrb[20].mxu0  ;;  %v1071_v23 = vpop.f32.mrb[20].mxu1 }
 0x510   :  { %v1082_v24 = vrot.slane %v1030_v22, 4  ;;  %v1086_v25 = vrot.slane %v1030_v22, 5  ;;  %v1084_v26 = vrot.slane %v1071_v23, 4  ;;  %v1088_v27 = vrot.slane %v1071_v23, 5  ;;  %v1032_v28 = vpop.f32.mrb[21].mxu0  ;;  %v1073_v29 = vpop.f32.mrb[21].mxu1 }
 0x511   :  { %v1083_v30 = vrot.slane %v1032_v28, 4  ;;  %v1087_v31 = vrot.slane %v1032_v28, 5  ;;  %v1085_v32 = vrot.slane %v1073_v29, 4  ;;  %v1089_v33 = vrot.slane %v1073_v29, 5  ;;  %v1034_v34 = vpop.f32.mrb[22].mxu0  ;;  %v1075_v35 = vpop.f32.mrb[22].mxu1 }
 0x512   :  { %v1098_v36 = vadd.f32 %v1082_v24, %v2195_v8  ;;  %v1102_v37 = vadd.f32 %v1086_v25, %v2203_v12  ;;  %v1100_v38 = vadd.f32 %v1084_v26, %v2191_v6  ;;  %v1104_v39 = vadd.f32 %v1088_v27, %v2199_v10  ;;  %v1035_v40 = vpop.f32.mrb[23].mxu0  ;;  %v1076_v41 = vpop.f32.mrb[23].mxu1  ;;  %v2407_v22 = vld [vmem:[%s2648_s2 + $0x8] ss:$16 sps:$4 sm:$0xff]   ;;  %v2413_v23 = vld [vmem:[%s2648_s2 + $0x24] ss:$16 sps:$4 sm:$0xff]  }
 0x513   :  { %v1099_v42 = vadd.f32 %v1083_v30, %v2197_v9  ;;  %v1103_v43 = vadd.f32 %v1087_v31, %v2205_v13  ;;  %v1101_v44 = vadd.f32 %v1085_v32, %v2193_v7  ;;  %v1105_v45 = vadd.f32 %v1089_v33, %v2201_v11  ;;  %v2419_v24 = vld [vmem:[%s2648_s2 + $0x2c] ss:$16 sps:$4 sm:$0xff]   ;;  %v2427_v25 = vld [vmem:[%s2648_s2 + $0x20] ss:$16 sps:$4 sm:$0xff]   ;;  %v2433_v26 = vld [vmem:[%s2648_s2 + $0x28] ss:$16 sps:$4 sm:$0xff]  }
 0x514   :  { %1781 = vtanh.f32 %v1098_v36  ;;  %v2439_v27 = vld [vmem:[%s2648_s2 + $0x44] ss:$16 sps:$4 sm:$0xff]   ;;  %v2445_v28 = vld [vmem:[%s2648_s2 + $0x4c] ss:$16 sps:$4 sm:$0xff]   ;;  %v2451_v29 = vld [vmem:[%s2648_s2 + $0x40] ss:$16 sps:$4 sm:$0xff]  }
 0x515   :  { %1783 = vtanh.f32 %v1102_v37  ;;  %v1110_v46 = vadd.f32 %v1101_v44, %v1100_v38  ;;  %v1111_v47 = vadd.f32 %v1105_v45, %v1104_v39  ;;  %v2457_v30 = vld [vmem:[%s2648_s2 + $0x48] ss:$16 sps:$4 sm:$0xff]   ;;  %v2463_v31 = vld [vmem:[%s2648_s2 + $0x64] ss:$16 sps:$4 sm:$0xff]   ;;  %v2469_v32 = vld [vmem:[%s2648_s2 + $0x6c] ss:$16 sps:$4 sm:$0xff]  }
 0x516   :  { %1785 = vtanh.f32 %v1099_v42  ;;  %v2475_v33 = vld [vmem:[%s2648_s2 + $0x60] ss:$16 sps:$4 sm:$0xff]   ;;  %v2481_v34 = vld [vmem:[%s2648_s2 + $0x68] ss:$16 sps:$4 sm:$0xff]   ;;  %v2487_v35 = vld [vmem:[%s2648_s2 + $0x84] ss:$16 sps:$4 sm:$0xff]  }
 0x517   :  { %1787 = vtanh.f32 %v1103_v43  ;;  %v1635_v48 = vmul.f32 -1.442695, %v1110_v46  ;;  %v1636_v49 = vmul.f32 -1.442695, %v1111_v47  ;;  %v2493_v36 = vld [vmem:[%s2648_s2 + $0x8c] ss:$16 sps:$4 sm:$0xff]  }
 0x518   :  { %v2499_v37 = vld [vmem:[%s2648_s2 + $0x80] ss:$16 sps:$4 sm:$0xff]   ;;  %v2505_v38 = vld [vmem:[%s2648_s2 + $0x88] ss:$16 sps:$4 sm:$0xff]   ;;  %v2511_v39 = vld [vmem:[%s2648_s2 + $0xa4] ss:$16 sps:$4 sm:$0xff]  }
 0x519   :  { %1789 = vpow2.f32 %v1635_v48  ;;  %v2517_v40 = vld [vmem:[%s2648_s2 + $0xac] ss:$16 sps:$4 sm:$0xff]   ;;  %v2523_v41 = vld [vmem:[%s2648_s2 + $0xa0] ss:$16 sps:$4 sm:$0xff]   ;;  %v2529_v42 = vld [vmem:[%s2648_s2 + $0xa8] ss:$16 sps:$4 sm:$0xff]  }
 0x51a   :  { %1791 = vpow2.f32 %v1636_v49  ;;  %v2535_v43 = vld [vmem:[%s2648_s2 + $0xc4] ss:$16 sps:$4 sm:$0xff]   ;;  %v2541_v44 = vld [vmem:[%s2648_s2 + $0xcc] ss:$16 sps:$4 sm:$0xff]   ;;  %v2547_v45 = vld [vmem:[%s2648_s2 + $0xc0] ss:$16 sps:$4 sm:$0xff]  }
 0x51b   :  { %v2553_v46 = vld [vmem:[%s2648_s2 + $0xc8] ss:$16 sps:$4 sm:$0xff]   ;;  %v2559_v47 = vld [vmem:[%s2648_s2 + $0xe4] ss:$16 sps:$4 sm:$0xff]   ;;  %v2565_v48 = vld [vmem:[%s2648_s2 + $0xec] ss:$16 sps:$4 sm:$0xff]  }
 0x51c   :  { %v2571_v49 = vld [vmem:[%s2648_s2 + $0xe0] ss:$16 sps:$4 sm:$0xff]  }
 0x51e   :  { %v1782_v53 = vpop.eup %1781 }
 0x51f   :  { %v1784_v59 = vpop.eup %1783 }
 0x520   :  { %v1786_v54 = vpop.eup %1785 }
 0x521   :  { %v1788_v61 = vpop.eup %1787  ;;  %v1124_v58 = vsub.f32 %v1786_v54, %v1782_v53 }
 0x522   :  { %v1125_v3 = vsub.f32 %v1788_v61, %v1784_v59 }
 0x523   :  { %v1790_v52 = vpop.eup %1789 }
 0x524   :  { %v1792_v62 = vpop.eup %1791  ;;  %v1118_v63 = vadd.f32 1.0, %v1790_v52 }
 0x525   :  { %v1119_v2 = vadd.f32 1.0, %v1792_v62 }
 0x526   :  { %1793 = vrcp.f32 %v1118_v63 }
 0x527   :  { %1795 = vrcp.f32 %v1119_v2 }
 0x530   :  { %v1794_v0 = vpop.eup %1793 }
 0x531   :  { %v1796_v4 = vpop.eup %1795  ;;  %v1126_v5 = vmul.f32 %v1794_v0, %v1124_v58 }
 0x532   :  { %v1127_v17 = vmul.f32 %v1796_v4, %v1125_v3 }
 0x533   :  { %v1128_v18 = vadd.f32 %v1782_v53, %v1126_v5  ;;  %v2577_v53 = vld [vmem:[%s2648_s2 + $0xe8] ss:$16 sps:$4 sm:$0xff]  }
 0x534   :  { %v1129_v14 = vadd.f32 %v1784_v59, %v1127_v17 }
 0x535   :  { %v1130_v15 = vpack.c.bf16 %v1128_v18, %v1128_v18 }
 0x536   :  { %v1131_v16 = vpack.c.bf16 %v1129_v14, %v1129_v14 }
 0x537   :  { %v1134_v19 = vunpack.c.l.b16 %v1130_v15 }
 0x538   :  { %v1135_v51 = vunpack.c.l.b16 %v1131_v16 }
 0x539   :  { %v1136_v55 = vrot.slane %v1134_v19, 4 }
 0x53a   :  { %v1137_v50 = vrot.slane %v1135_v51, 3 }
 0x53c   :  { %v1138_v57 = vsel %vm562_vm1, %v1137_v50, %v1136_v55 }
 0x53d   :  { %v1139_v60 = vpack.c.b16 %v1138_v57, %v1138_v57 }
 0x53f   :  { %1174 = vmatmul.mubr.bf16.vlgmr.msra.gmra.mrb[24].mxu0 %v1139_v60  ;;  %1215 = vmatmul.mubr.bf16.vlgmr.msra.gmra.mrb[24].mxu1 %v1139_v60 }
 0x540   :  { %1287 = vmatpush1.bf16.msra.mxu0 %v2401_v56  ;;  %1328 = vmatpush1.bf16.msra.mxu1 %v2407_v22 }
 0x541   :  { %1288 = vmatprep.subr.bf16.mxu0 %v2413_v23  ;;  %1329 = vmatprep.subr.bf16.mxu1 %v2419_v24 }
 0x542   :  { %1318 = vmatprep.mubr.bf16.mxu0 %v1877_v1  ;;  %1359 = vmatprep.mubr.bf16.mxu1 %v1877_v1 }
 0x544   :  { %1289 = vmatpush1.bf16.msra.mxu0 %v2427_v25  ;;  %1330 = vmatpush1.bf16.msra.mxu1 %v2433_v26 }
 0x545   :  { %1290 = vmatprep.subr.bf16.mxu0 %v2439_v27  ;;  %1331 = vmatprep.subr.bf16.mxu1 %v2445_v28 }
 0x548   :  { %1291 = vmatpush1.bf16.msra.mxu0 %v2451_v29  ;;  %1332 = vmatpush1.bf16.msra.mxu1 %v2457_v30 }
 0x549   :  { %1292 = vmatprep.subr.bf16.mxu0 %v2463_v31  ;;  %1333 = vmatprep.subr.bf16.mxu1 %v2469_v32 }
 0x54c   :  { %1293 = vmatpush1.bf16.msra.mxu0 %v2475_v33  ;;  %1334 = vmatpush1.bf16.msra.mxu1 %v2481_v34 }
 0x54d   :  { %1294 = vmatprep.subr.bf16.mxu0 %v2487_v35  ;;  %1335 = vmatprep.subr.bf16.mxu1 %v2493_v36 }
 0x550   :  { %1295 = vmatpush1.bf16.msra.mxu0 %v2499_v37  ;;  %1336 = vmatpush1.bf16.msra.mxu1 %v2505_v38 }
 0x551   :  { %1296 = vmatprep.subr.bf16.mxu0 %v2511_v39  ;;  %1337 = vmatprep.subr.bf16.mxu1 %v2517_v40 }
 0x554   :  { %1297 = vmatpush1.bf16.msra.mxu0 %v2523_v41  ;;  %1338 = vmatpush1.bf16.msra.mxu1 %v2529_v42 }
 0x555   :  { %1298 = vmatprep.subr.bf16.mxu0 %v2535_v43  ;;  %1339 = vmatprep.subr.bf16.mxu1 %v2541_v44 }
 0x558   :  { %1299 = vmatpush1.bf16.msra.mxu0 %v2547_v45  ;;  %1340 = vmatpush1.bf16.msra.mxu1 %v2553_v46 }
 0x559   :  { %1300 = vmatprep.subr.bf16.mxu0 %v2559_v47  ;;  %1341 = vmatprep.subr.bf16.mxu1 %v2565_v48 }
 0x55c   :  { %1301 = vmatpush1.bf16.msra.mxu0 %v2571_v49  ;;  %1342 = vmatpush1.bf16.msra.mxu1 %v2577_v53 }
 0x55d   :  { %1431 = vmatprep.subr.bf16.mxu0 %v2380_v20  ;;  %1472 = vmatprep.subr.bf16.mxu1 %v2386_v21 }
 0x612   :  { %v1175_v59 = vpop.f32.mrb[24].mxu0  ;;  %v1216_v54 = vpop.f32.mrb[24].mxu1 }
 0x613   :  { %v1227_v61 = vrot.slane %v1175_v59, 3  ;;  %v1231_v58 = vrot.slane %v1175_v59, 4  ;;  %v1229_v3 = vrot.slane %v1216_v54, 3  ;;  %v1233_v52 = vrot.slane %v1216_v54, 4  ;;  %v1177_v62 = vpop.f32.mrb[25].mxu0  ;;  %v1218_v63 = vpop.f32.mrb[25].mxu1 }
 0x614   :  { %v1228_v2 = vrot.slane %v1177_v62, 3  ;;  %v1232_v0 = vrot.slane %v1177_v62, 4  ;;  %v1230_v4 = vrot.slane %v1218_v63, 3  ;;  %v1234_v5 = vrot.slane %v1218_v63, 4  ;;  %v1179_v17 = vpop.f32.mrb[26].mxu0  ;;  %v1220_v18 = vpop.f32.mrb[26].mxu1 }
 0x615   :  { %v1243_v14 = vadd.f32 %v1227_v61, %v2195_v8  ;;  %v1247_v20 = vadd.f32 %v1231_v58, %v2203_v12  ;;  %v1245_v21 = vadd.f32 %v1229_v3, %v2191_v6  ;;  %v1249_v15 = vadd.f32 %v1233_v52, %v2199_v10  ;;  %v1180_v16 = vpop.f32.mrb[27].mxu0  ;;  %v1221_v19 = vpop.f32.mrb[27].mxu1 }
 0x616   :  { %v1244_v51 = vadd.f32 %v1228_v2, %v2197_v9  ;;  %v1248_v55 = vadd.f32 %v1232_v0, %v2205_v13  ;;  %v1246_v50 = vadd.f32 %v1230_v4, %v2193_v7  ;;  %v1250_v57 = vadd.f32 %v1234_v5, %v2201_v11 }
 0x617   :  { %1797 = vtanh.f32 %v1243_v14 }
 0x618   :  { %1799 = vtanh.f32 %v1247_v20  ;;  %v1255_v60 = vadd.f32 %v1246_v50, %v1245_v21  ;;  %v1256_v59 = vadd.f32 %v1250_v57, %v1249_v15 }
 0x619   :  { %1801 = vtanh.f32 %v1244_v51 }
 0x61a   :  { %1803 = vtanh.f32 %v1248_v55  ;;  %v1637_v54 = vmul.f32 -1.442695, %v1255_v60  ;;  %v1638_v61 = vmul.f32 -1.442695, %v1256_v59 }
 0x61c   :  { %1805 = vpow2.f32 %v1637_v54 }
 0x61d   :  { %1807 = vpow2.f32 %v1638_v61 }
 0x621   :  { %v1798_v58 = vpop.eup %1797 }
 0x622   :  { %v1800_v3 = vpop.eup %1799 }
 0x623   :  { %v1802_v52 = vpop.eup %1801 }
 0x624   :  { %v1804_v62 = vpop.eup %1803  ;;  %v1269_v63 = vsub.f32 %v1802_v52, %v1798_v58 }
 0x625   :  { %v1270_v2 = vsub.f32 %v1804_v62, %v1800_v3 }
 0x626   :  { %v1806_v0 = vpop.eup %1805 }
 0x627   :  { %v1808_v4 = vpop.eup %1807  ;;  %v1263_v17 = vadd.f32 1.0, %v1806_v0 }
 0x628   :  { %v1264_v5 = vadd.f32 1.0, %v1808_v4 }
 0x629   :  { %1809 = vrcp.f32 %v1263_v17 }
 0x62a   :  { %1811 = vrcp.f32 %v1264_v5 }
 0x633   :  { %v1810_v18 = vpop.eup %1809 }
 0x634   :  { %v1812_v14 = vpop.eup %1811  ;;  %v1271_v20 = vmul.f32 %v1810_v18, %v1269_v63 }
 0x635   :  { %v1272_v21 = vmul.f32 %v1812_v14, %v1270_v2 }
 0x636   :  { %v1273_v15 = vadd.f32 %v1798_v58, %v1271_v20 }
 0x637   :  { %v1274_v16 = vadd.f32 %v1800_v3, %v1272_v21 }
 0x638   :  { %v1275_v19 = vpack.c.bf16 %v1273_v15, %v1273_v15 }
 0x639   :  { %v1276_v51 = vpack.c.bf16 %v1274_v16, %v1274_v16 }
 0x63a   :  { %v1279_v55 = vunpack.c.l.b16 %v1275_v19 }
 0x63b   :  { %v1280_v50 = vunpack.c.l.b16 %v1276_v51 }
 0x63c   :  { %v1281_v57 = vrot.slane %v1279_v55, 5 }
 0x63d   :  { %v1282_v60 = vrot.slane %v1280_v50, 4 }
 0x63f   :  { %v1283_v59 = vsel %vm562_vm1, %v1282_v60, %v1281_v57 }
 0x640   :  { %v1284_v54 = vpack.c.b16 %v1283_v59, %v1283_v59 }
 0x642   :  { %1319 = vmatmul.mubr.bf16.vlgmr.msra.gmra.mrb[28].mxu0 %v1284_v54  ;;  %1360 = vmatmul.mubr.bf16.vlgmr.msra.gmra.mrb[28].mxu1 %v1284_v54 }
 0x643   :  { %1432 = vmatpush1.bf16.msra.mxu0 %v2401_v56  ;;  %1473 = vmatpush1.bf16.msra.mxu1 %v2407_v22 }
 0x644   :  { %1433 = vmatprep.subr.bf16.mxu0 %v2413_v23  ;;  %1474 = vmatprep.subr.bf16.mxu1 %v2419_v24 }
 0x645   :  { %1463 = vmatprep.mubr.bf16.mxu0 %v1877_v1  ;;  %1504 = vmatprep.mubr.bf16.mxu1 %v1877_v1 }
 0x647   :  { %1434 = vmatpush1.bf16.msra.mxu0 %v2427_v25  ;;  %1475 = vmatpush1.bf16.msra.mxu1 %v2433_v26 }
 0x648   :  { %1435 = vmatprep.subr.bf16.mxu0 %v2439_v27  ;;  %1476 = vmatprep.subr.bf16.mxu1 %v2445_v28 }
 0x64b   :  { %1436 = vmatpush1.bf16.msra.mxu0 %v2451_v29  ;;  %1477 = vmatpush1.bf16.msra.mxu1 %v2457_v30 }
 0x64c   :  { %1437 = vmatprep.subr.bf16.mxu0 %v2463_v31  ;;  %1478 = vmatprep.subr.bf16.mxu1 %v2469_v32 }
 0x64f   :  { %1438 = vmatpush1.bf16.msra.mxu0 %v2475_v33  ;;  %1479 = vmatpush1.bf16.msra.mxu1 %v2481_v34 }
 0x650   :  { %1439 = vmatprep.subr.bf16.mxu0 %v2487_v35  ;;  %1480 = vmatprep.subr.bf16.mxu1 %v2493_v36 }
 0x653   :  { %1440 = vmatpush1.bf16.msra.mxu0 %v2499_v37  ;;  %1481 = vmatpush1.bf16.msra.mxu1 %v2505_v38 }
 0x654   :  { %1441 = vmatprep.subr.bf16.mxu0 %v2511_v39  ;;  %1482 = vmatprep.subr.bf16.mxu1 %v2517_v40 }
 0x657   :  { %1442 = vmatpush1.bf16.msra.mxu0 %v2523_v41  ;;  %1483 = vmatpush1.bf16.msra.mxu1 %v2529_v42 }
 0x658   :  { %1443 = vmatprep.subr.bf16.mxu0 %v2535_v43  ;;  %1484 = vmatprep.subr.bf16.mxu1 %v2541_v44 }
 0x65b   :  { %1444 = vmatpush1.bf16.msra.mxu0 %v2547_v45  ;;  %1485 = vmatpush1.bf16.msra.mxu1 %v2553_v46 }
 0x65c   :  { %1445 = vmatprep.subr.bf16.mxu0 %v2559_v47  ;;  %1486 = vmatprep.subr.bf16.mxu1 %v2565_v48 }
 0x65f   :  { %1446 = vmatpush1.bf16.msra.mxu0 %v2571_v49  ;;  %1487 = vmatpush1.bf16.msra.mxu1 %v2577_v53 }
 0x715   :  { %v1320_v1 = vpop.f32.mrb[28].mxu0  ;;  %v1361_v56 = vpop.f32.mrb[28].mxu1 }
 0x716   :  { %v1372_v22 = vrot.slane %v1320_v1, 2  ;;  %v1376_v23 = vrot.slane %v1320_v1, 3  ;;  %v1374_v24 = vrot.slane %v1361_v56, 2  ;;  %v1378_v25 = vrot.slane %v1361_v56, 3  ;;  %v1322_v26 = vpop.f32.mrb[29].mxu0  ;;  %v1363_v27 = vpop.f32.mrb[29].mxu1 }
 0x717   :  { %v1373_v28 = vrot.slane %v1322_v26, 2  ;;  %v1377_v29 = vrot.slane %v1322_v26, 3  ;;  %v1375_v30 = vrot.slane %v1363_v27, 2  ;;  %v1379_v31 = vrot.slane %v1363_v27, 3  ;;  %v1324_v32 = vpop.f32.mrb[30].mxu0  ;;  %v1365_v33 = vpop.f32.mrb[30].mxu1 }
 0x718   :  { %v1388_v34 = vadd.f32 %v1372_v22, %v2195_v8  ;;  %v1392_v35 = vadd.f32 %v1376_v23, %v2203_v12  ;;  %v1390_v36 = vadd.f32 %v1374_v24, %v2191_v6  ;;  %v1394_v37 = vadd.f32 %v1378_v25, %v2199_v10  ;;  %v1325_v38 = vpop.f32.mrb[31].mxu0  ;;  %v1366_v39 = vpop.f32.mrb[31].mxu1 }
 0x719   :  { %v1389_v40 = vadd.f32 %v1373_v28, %v2197_v9  ;;  %v1393_v41 = vadd.f32 %v1377_v29, %v2205_v13  ;;  %v1391_v42 = vadd.f32 %v1375_v30, %v2193_v7  ;;  %v1395_v43 = vadd.f32 %v1379_v31, %v2201_v11 }
 0x71a   :  { %1813 = vtanh.f32 %v1388_v34 }
 0x71b   :  { %1815 = vtanh.f32 %v1392_v35  ;;  %v1400_v44 = vadd.f32 %v1391_v42, %v1390_v36  ;;  %v1401_v45 = vadd.f32 %v1395_v43, %v1394_v37 }
 0x71c   :  { %1817 = vtanh.f32 %v1389_v40 }
 0x71d   :  { %1819 = vtanh.f32 %v1393_v41  ;;  %v1639_v46 = vmul.f32 -1.442695, %v1400_v44  ;;  %v1640_v47 = vmul.f32 -1.442695, %v1401_v45 }
 0x71f   :  { %1821 = vpow2.f32 %v1639_v46 }
 0x720   :  { %1823 = vpow2.f32 %v1640_v47 }
 0x724   :  { %v1814_v48 = vpop.eup %1813 }
 0x725   :  { %v1816_v49 = vpop.eup %1815 }
 0x726   :  { %v1818_v53 = vpop.eup %1817 }
 0x727   :  { %v1820_v61 = vpop.eup %1819  ;;  %v1414_v58 = vsub.f32 %v1818_v53, %v1814_v48 }
 0x728   :  { %v1415_v3 = vsub.f32 %v1820_v61, %v1816_v49 }
 0x729   :  { %v1822_v52 = vpop.eup %1821 }
 0x72a   :  { %v1824_v62 = vpop.eup %1823  ;;  %v1408_v63 = vadd.f32 1.0, %v1822_v52 }
 0x72b   :  { %v1409_v2 = vadd.f32 1.0, %v1824_v62 }
 0x72c   :  { %1825 = vrcp.f32 %v1408_v63 }
 0x72d   :  { %1827 = vrcp.f32 %v1409_v2 }
 0x736   :  { %v1826_v0 = vpop.eup %1825 }
 0x737   :  { %v1828_v4 = vpop.eup %1827  ;;  %v1416_v17 = vmul.f32 %v1826_v0, %v1414_v58 }
 0x738   :  { %v1417_v5 = vmul.f32 %v1828_v4, %v1415_v3 }
 0x739   :  { %v1418_v18 = vadd.f32 %v1814_v48, %v1416_v17 }
 0x73a   :  { %v1419_v14 = vadd.f32 %v1816_v49, %v1417_v5 }
 0x73b   :  { %v1420_v20 = vpack.c.bf16 %v1418_v18, %v1418_v18 }
 0x73c   :  { %v1421_v21 = vpack.c.bf16 %v1419_v14, %v1419_v14 }
 0x73d   :  { %v1424_v15 = vunpack.c.l.b16 %v1420_v20 }
 0x73e   :  { %v1425_v16 = vunpack.c.l.b16 %v1421_v21 }
 0x73f   :  { %v1426_v19 = vrot.slane %v1424_v15, 6 }
 0x740   :  { %v1427_v51 = vrot.slane %v1425_v16, 5 }
 0x742   :  { %v1428_v55 = vsel %vm562_vm1, %v1427_v51, %v1426_v19 }
 0x743   :  { %v1429_v50 = vpack.c.b16 %v1428_v55, %v1428_v55 }
 0x745   :  { %1464 = vmatmul.mubr.bf16.vlgmr.msra.gmra.mrb[32].mxu0 %v1429_v50  ;;  %1505 = vmatmul.mubr.bf16.vlgmr.msra.gmra.mrb[32].mxu1 %v1429_v50 }
 0x818   :  { %v1465_v57 = vpop.f32.mrb[32].mxu0  ;;  %v1506_v60 = vpop.f32.mrb[32].mxu1 }
 0x819   :  { %v1517_v59 = vrot.slane %v1465_v57, 1  ;;  %v1521_v54 = vrot.slane %v1465_v57, 2  ;;  %v1519_v1 = vrot.slane %v1506_v60, 1  ;;  %v1523_v56 = vrot.slane %v1506_v60, 2  ;;  %v1467_v22 = vpop.f32.mrb[33].mxu0  ;;  %v1508_v23 = vpop.f32.mrb[33].mxu1 }
 0x81a   :  { %v1518_v24 = vrot.slane %v1467_v22, 1  ;;  %v1522_v25 = vrot.slane %v1467_v22, 2  ;;  %v1520_v26 = vrot.slane %v1508_v23, 1  ;;  %v1524_v27 = vrot.slane %v1508_v23, 2  ;;  %v1469_v28 = vpop.f32.mrb[34].mxu0  ;;  %v1510_v29 = vpop.f32.mrb[34].mxu1 }
 0x81b   :  { %v1533_v30 = vadd.f32 %v1517_v59, %v2195_v8  ;;  %v1537_v31 = vadd.f32 %v1521_v54, %v2203_v12  ;;  %v1535_v32 = vadd.f32 %v1519_v1, %v2191_v6  ;;  %v1539_v33 = vadd.f32 %v1523_v56, %v2199_v10  ;;  %v1470_v34 = vpop.f32.mrb[35].mxu0  ;;  %v1511_v35 = vpop.f32.mrb[35].mxu1 }
 0x81c   :  { %v1534_v36 = vadd.f32 %v1518_v24, %v2197_v9  ;;  %v1538_v37 = vadd.f32 %v1522_v25, %v2205_v13  ;;  %v1536_v38 = vadd.f32 %v1520_v26, %v2193_v7  ;;  %v1540_v39 = vadd.f32 %v1524_v27, %v2201_v11 }
 0x81d   :  { %1829 = vtanh.f32 %v1533_v30 }
 0x81e   :  { %1831 = vtanh.f32 %v1537_v31  ;;  %v1545_v40 = vadd.f32 %v1536_v38, %v1535_v32  ;;  %v1546_v8 = vadd.f32 %v1540_v39, %v1539_v33 }
 0x81f   :  { %1833 = vtanh.f32 %v1534_v36 }
 0x820   :  { %1835 = vtanh.f32 %v1538_v37  ;;  %v1641_v12 = vmul.f32 -1.442695, %v1545_v40  ;;  %v1642_v6 = vmul.f32 -1.442695, %v1546_v8 }
 0x822   :  { %1837 = vpow2.f32 %v1641_v12 }
 0x823   :  { %1839 = vpow2.f32 %v1642_v6 }
 0x827   :  { %v1830_v10 = vpop.eup %1829 }
 0x828   :  { %v1832_v41 = vpop.eup %1831 }
 0x829   :  { %v1834_v42 = vpop.eup %1833 }
 0x82a   :  { %v1836_v9 = vpop.eup %1835  ;;  %v1559_v43 = vsub.f32 %v1834_v42, %v1830_v10 }
 0x82b   :  { %v1560_v13 = vsub.f32 %v1836_v9, %v1832_v41 }
 0x82c   :  { %v1838_v44 = vpop.eup %1837 }
 0x82d   :  { %v1840_v7 = vpop.eup %1839  ;;  %v1553_v45 = vadd.f32 1.0, %v1838_v44 }
 0x82e   :  { %v1554_v11 = vadd.f32 1.0, %v1840_v7 }
 0x82f   :  { %1841 = vrcp.f32 %v1553_v45 }
 0x830   :  { %1843 = vrcp.f32 %v1554_v11 }
 0x839   :  { %v1842_v46 = vpop.eup %1841 }
 0x83a   :  { %v1844_v47 = vpop.eup %1843  ;;  %v1561_v48 = vmul.f32 %v1842_v46, %v1559_v43 }
 0x83b   :  { %v1562_v49 = vmul.f32 %v1844_v47, %v1560_v13 }
 0x83c   :  { %v1563_v53 = vadd.f32 %v1830_v10, %v1561_v48 }
 0x83d   :  { %v1564_v61 = vadd.f32 %v1832_v41, %v1562_v49 }
 0x83e   :  { %1570 = vst [vmem:[%s2650_s4 - $0x7] sm:$0x80] %v1563_v53 }
 0x83f   :  { %v1567_v58 = vrot.slane %v1564_v61, 7 }
 0x841   :  { %1571 = vst [vmem:[%s2650_s4 + $0x1] sm:$0x1] %v1567_v58 }

</bundles_post_ra>
